<compile_context>
chip_gen: v7x
topology: tpu7x:2x2x1
jax: 0.10.0
libtpu: 0.0.40
codegen_flags: <defaults>
</compile_context>

<pallas_src>
import functools

import jax
import jax.numpy as jnp
import numpy as np
from jax import lax
from jax.experimental import pallas as pl
from jax.experimental.pallas import tpu as pltpu

NUM_LAYERS = 3  # Config.num_layers


def _sigmoid(x):
    # Exactly 1/(1+exp(-x)), but a single EUP tanh + cheap VPU ops instead of
    # exp + full-precision divide on the serial gate chain.
    return 0.5 * (jnp.tanh(0.5 * x) + 1.0)


def _lstm_cell(gates, c_prev, H):
    # PyTorch gate order: i, f, g, o  (all math in f32).
    i_g = _sigmoid(gates[:, 0 * H:1 * H])
    f_g = _sigmoid(gates[:, 1 * H:2 * H])
    g_g = jnp.tanh(gates[:, 2 * H:3 * H])
    o_g = _sigmoid(gates[:, 3 * H:4 * H])
    c_new = f_g * c_prev + i_g * g_g
    h_new = o_g * jnp.tanh(c_new)
    return h_new, c_new


def _poetry_kernel(
    # inputs (all resident in VMEM for the whole call)
    x_ref,       # (S*B, E)   bf16 embeds, row = t*B + b
    wih0_ref,    # (E, 4H)    bf16 layer-0 input weight (pre-transposed)
    whh0_ref,    # (H, 4H)    bf16 layer-0 recurrent weight
    b0_ref,      # (1, 4H)    f32  fused b_ih + b_hh
    wih1_ref,    # (H, 4H)    bf16
    whh1_ref,    # (H, 4H)    bf16
    b1_ref,      # (1, 4H)    f32
    wih2_ref,    # (H, 4H)    bf16
    whh2_ref,    # (H, 4H)    bf16
    b2_ref,      # (1, 4H)    f32
    wlin_ref,    # (H, V)     bf16 final linear (pre-transposed)
    blin_ref,    # (1, V)     f32
    # outputs
    logits_ref,  # (S*B, V)   f32
    hn_ref,      # (L, B, H)  f32
    cn_ref,      # (L, B, H)  f32
    # scratch
    a0_sc,       # (S*B, 4H)  f32: hoisted layer-0 input projection
):
    H = hn_ref.shape[-1]
    B = hn_ref.shape[1]
    SB = x_ref.shape[0]
    S = SB // B
    V = logits_ref.shape[-1]
    bf16 = jnp.bfloat16
    f32 = jnp.float32

    def mm(lhs_f32, w_ref):
        # bf16 x bf16 MXU matmul with f32 accumulation.
        return jnp.dot(lhs_f32.astype(bf16), w_ref[...],
                       preferred_element_type=f32)

    # ---- hoisted time-independent work: layer-0 input projection -----------
    # One big (S*B, E) @ (E, 4H) matmul instead of S tiny (B, E) ones.
    a0_sc[...] = (
        jnp.dot(x_ref[...], wih0_ref[...], preferred_element_type=f32)
        + b0_ref[...])

    # ---- biases broadcast once (JAX does not CSE broadcast_in_dim) ---------
    b1b = jnp.broadcast_to(b1_ref[...], (B, 4 * H))
    b2b = jnp.broadcast_to(b2_ref[...], (B, 4 * H))
    blb = jnp.broadcast_to(blin_ref[...], (B, V))

    # ---- wavefront-pipelined recurrence -------------------------------------
    # Iteration k runs layer0(t=k), layer1(t=k-1), layer2(t=k-2).  All three
    # stages read only carries committed at the end of iteration k-1, so they
    # are mutually independent within an iteration and the scheduler can
    # overlap their MXU/EUP chains.  Fully unrolled (S is small and static).
    # TODO(synk): for long sequences switch to lax.fori_loop(..., unroll=4..8)
    # with the same skewed body to bound vreg live ranges.
    z = jnp.zeros((B, H), f32)
    h0, c0, h1, c1, h2, c2 = z, z, z, z, z, z

    for k in range(S + 2):
        do_l0 = k < S            # layer 0 processes timestep k
        do_l1 = 1 <= k <= S      # layer 1 processes timestep k-1
        do_l2 = k >= 2           # layer 2 processes timestep k-2

        if do_l0:
            t0 = k
            g0 = a0_sc[t0 * B:(t0 + 1) * B, :] + mm(h0, whh0_ref)
            h0_n, c0_n = _lstm_cell(g0, c0, H)
        if do_l1:
            # h0 still holds layer-0's output at timestep k-1 (committed at the
            # end of iteration k-1).  Two dots instead of dot(concat(...)).
            g1 = mm(h0, wih1_ref) + mm(h1, whh1_ref) + b1b
            h1_n, c1_n = _lstm_cell(g1, c1, H)
        if do_l2:
            t2 = k - 2
            g2 = mm(h1, wih2_ref) + mm(h2, whh2_ref) + b2b
            h2_n, c2_n = _lstm_cell(g2, c2, H)
            # Interleaved vocab projection: MXU filler, lane-dense store.
            logits_ref[t2 * B:(t2 + 1) * B, :] = mm(h2_n, wlin_ref) + blb

        # Commit carries only after every stage of this iteration has read the
        # previous-iteration values (keeps the three chains independent).
        if do_l0:
            h0, c0 = h0_n, c0_n
        if do_l1:
            h1, c1 = h1_n, c1_n
        if do_l2:
            h2, c2 = h2_n, c2_n

    hn_ref[0, :, :] = h0
    hn_ref[1, :, :] = h1
    hn_ref[2, :, :] = h2
    cn_ref[0, :, :] = c0
    cn_ref[1, :, :] = c1
    cn_ref[2, :, :] = c2


def poetry_forward(tokens, params):
    """Forward pass of PoetryModel.

    tokens: (seq_len, batch) int32
    returns (logits (seq_len*batch, vocab), (h_n, c_n)) matching PyTorch.
    """
    emb_table = params["embedding"]          # (V, E)
    S, B = tokens.shape
    V, E = emb_table.shape
    H = params["w_hh_0"].shape[1]            # w_hh_l is (4H, H)
    L = NUM_LAYERS
    bf16 = jnp.bfloat16

    # Embedding gather in JAX glue (time-major row = t*B + b).
    # TODO(synk): for large V/E move the gather in-kernel via scalar-prefetched
    # token ids + DMA row gather to avoid materializing (S*B, E) in HBM.
    embeds = jnp.take(emb_table, tokens.reshape(-1), axis=0).astype(bf16)

    def wt(name):  # pre-transpose + bf16 cast
        return params[name].T.astype(bf16)

    b0 = (params["b_ih_0"] + params["b_hh_0"]).reshape(1, 4 * H).astype(jnp.float32)
    b1 = (params["b_ih_1"] + params["b_hh_1"]).reshape(1, 4 * H).astype(jnp.float32)
    b2 = (params["b_ih_2"] + params["b_hh_2"]).reshape(1, 4 * H).astype(jnp.float32)
    b_lin = params["b_lin"].reshape(1, V).astype(jnp.float32)

    args = (embeds,
            wt("w_ih_0"), wt("w_hh_0"), b0,
            wt("w_ih_1"), wt("w_hh_1"), b1,
            wt("w_ih_2"), wt("w_hh_2"), b2,
            wt("w_lin"), b_lin)
    vmem_spec = pl.BlockSpec(memory_space=pltpu.MemorySpace.VMEM)

    logits, h_n, c_n = pl.pallas_call(
        _poetry_kernel,
        out_shape=(
            jax.ShapeDtypeStruct((S * B, V), jnp.float32),
            jax.ShapeDtypeStruct((L, B, H), jnp.float32),
            jax.ShapeDtypeStruct((L, B, H), jnp.float32),
        ),
        in_specs=[vmem_spec] * len(args),
        out_specs=(vmem_spec, vmem_spec, vmem_spec),
        scratch_shapes=[
            pltpu.VMEM((S * B, 4 * H), jnp.float32),   # hoisted ih0 projection
        ],
        compiler_params=pltpu.CompilerParams(
            # Explicit scoped-VMEM budget (v5e defaults to only 16 MiB).
            vmem_limit_bytes=32 * 1024 * 1024),
    )(*args)

    return logits, (h_n, c_n)


def _reference_forward(tokens, params):
    """Pure-JAX f32 reference (mirrors PyTorch nn.LSTM semantics)."""
    emb_table = params["embedding"]
    S, B = tokens.shape
    V, E = emb_table.shape
    H = params["w_hh_0"].shape[1]
    L = NUM_LAYERS
    embeds = jnp.take(emb_table, tokens, axis=0).astype(jnp.float32)  # (S, B, E)

    wih_t = [params[f"w_ih_{l}"].T for l in range(L)]
    whh_t = [params[f"w_hh_{l}"].T for l in range(L)]
    bias = [params[f"b_ih_{l}"] + params[f"b_hh_{l}"] for l in range(L)]

    def step(carry, x):
        hs, cs = carry
        new_h, new_c = [], []
        layer_in = x
        for l in range(L):
            gates = layer_in @ wih_t[l] + hs[l] @ whh_t[l] + bias[l]
            i_g, f_g, g_g, o_g = jnp.split(gates, 4, axis=-1)
            i_g = jax.nn.sigmoid(i_g)
            f_g = jax.nn.sigmoid(f_g)
            g_g = jnp.tanh(g_g)
            o_g = jax.nn.sigmoid(o_g)
            c = f_g * cs[l] + i_g * g_g
            h = o_g * jnp.tanh(c)
            new_h.append(h)
            new_c.append(c)
            layer_in = h
        return (jnp.stack(new_h), jnp.stack(new_c)), layer_in

    init = (jnp.zeros((L, B, H), jnp.float32), jnp.zeros((L, B, H), jnp.float32))
    (h_n, c_n), out = lax.scan(step, init, embeds)
    logits = out.reshape(S * B, H) @ params["w_lin"].T + params["b_lin"]
    return logits, (h_n, c_n)


def make_params(key, vocab_size, embedding_dim, hidden_dim):
    ks = jax.random.split(key, 16)
    p = {}
    p["embedding"] = 0.1 * jax.random.normal(
        ks[0], (vocab_size, embedding_dim), jnp.float32)
    k_idx = 1
    for l in range(NUM_LAYERS):
        in_dim = embedding_dim if l == 0 else hidden_dim
        scale = 1.0 / np.sqrt(hidden_dim)
        p[f"w_ih_{l}"] = scale * jax.random.normal(
            ks[k_idx], (4 * hidden_dim, in_dim), jnp.float32)
        p[f"w_hh_{l}"] = scale * jax.random.normal(
            ks[k_idx + 1], (4 * hidden_dim, hidden_dim), jnp.float32)
        p[f"b_ih_{l}"] = scale * jax.random.normal(
            ks[k_idx + 2], (4 * hidden_dim,), jnp.float32)
        p[f"b_hh_{l}"] = scale * jax.random.normal(
            ks[k_idx + 3], (4 * hidden_dim,), jnp.float32)
        k_idx += 4
    p["w_lin"] = 0.05 * jax.random.normal(
        ks[k_idx], (vocab_size, hidden_dim), jnp.float32)
    p["b_lin"] = 0.05 * jax.random.normal(ks[k_idx + 1], (vocab_size,), jnp.float32)
    return p


if __name__ == "__main__":
    # Small, TPU-tile-friendly shapes consistent with the module's forward.
    SEQ_LEN = 8
    BATCH = 8
    VOCAB = 256
    EMBED = 128
    HIDDEN = 128

    key = jax.random.PRNGKey(0)
    pkey, tkey = jax.random.split(key)
    params = make_params(pkey, VOCAB, EMBED, HIDDEN)
    tokens = jax.random.randint(tkey, (SEQ_LEN, BATCH), 0, VOCAB, dtype=jnp.int32)

    logits, (h_n, c_n) = jax.jit(
        functools.partial(poetry_forward, params=params))(tokens)
    jax.block_until_ready((logits, h_n, c_n))

    # Reference is f32; kernel uses bf16 weights/activations on the MXU with
    # f32 accumulation -> loosened tolerance (per review guidance).
    ref_logits, (ref_h, ref_c) = _reference_forward(tokens, params)
    np.testing.assert_allclose(np.asarray(logits), np.asarray(ref_logits),
                               atol=2e-2, rtol=2e-2)
    np.testing.assert_allclose(np.asarray(h_n), np.asarray(ref_h),
                               atol=2e-2, rtol=2e-2)
    np.testing.assert_allclose(np.asarray(c_n), np.asarray(ref_c),
                               atol=2e-2, rtol=2e-2)

    assert logits.shape == (SEQ_LEN * BATCH, VOCAB)
    assert h_n.shape == (NUM_LAYERS, BATCH, HIDDEN)
    assert c_n.shape == (NUM_LAYERS, BATCH, HIDDEN)
    print("KERNEL_OK")
</pallas_src>

<mosaic_0001>
module attributes {stable_mosaic.version = 11 : i64} {
  func.func @_poetry_kernel(%arg0: memref<64x128xbf16, #tpu.memory_space<vmem>>, %arg1: memref<128x512xbf16, #tpu.memory_space<vmem>>, %arg2: memref<128x512xbf16, #tpu.memory_space<vmem>>, %arg3: memref<1x512xf32, #tpu.memory_space<vmem>>, %arg4: memref<128x512xbf16, #tpu.memory_space<vmem>>, %arg5: memref<128x512xbf16, #tpu.memory_space<vmem>>, %arg6: memref<1x512xf32, #tpu.memory_space<vmem>>, %arg7: memref<128x512xbf16, #tpu.memory_space<vmem>>, %arg8: memref<128x512xbf16, #tpu.memory_space<vmem>>, %arg9: memref<1x512xf32, #tpu.memory_space<vmem>>, %arg10: memref<128x256xbf16, #tpu.memory_space<vmem>>, %arg11: memref<1x256xf32, #tpu.memory_space<vmem>>, %arg12: memref<64x256xf32, #tpu.memory_space<vmem>>, %arg13: memref<3x8x128xf32, #tpu.memory_space<vmem>>, %arg14: memref<3x8x128xf32, #tpu.memory_space<vmem>>, %arg15: memref<64x512xf32, #tpu.memory_space<vmem>>) attributes {dimension_semantics = [], scalar_prefetch = 0 : i64, scratch_operands = 1 : i64, tpu.core_type = #tpu.core_type<tc>} {
    %c0 = arith.constant 0 : index
    %c0_0 = arith.constant 0 : index
    %0 = vector.load %arg0[%c0, %c0_0] : memref<64x128xbf16, #tpu.memory_space<vmem>>, vector<64x128xbf16>
    %c0_1 = arith.constant 0 : index
    %c0_2 = arith.constant 0 : index
    %1 = vector.load %arg1[%c0_1, %c0_2] : memref<128x512xbf16, #tpu.memory_space<vmem>>, vector<128x512xbf16>
    %cst = arith.constant dense<0.000000e+00> : vector<64x512xf32>
    %2 = tpu.matmul %0, %1, %cst {dimension_numbers = #tpu.dot_dimension_numbers<[1], [0], [0], [1], [0, 0, 1, 1], [], []>} : vector<64x128xbf16>, vector<128x512xbf16>, vector<64x512xf32> -> vector<64x512xf32>
    %c0_3 = arith.constant 0 : index
    %c0_4 = arith.constant 0 : index
    %3 = vector.load %arg3[%c0_3, %c0_4] : memref<1x512xf32, #tpu.memory_space<vmem>>, vector<1x512xf32>
    %4 = vector.broadcast %3 : vector<1x512xf32> to vector<64x512xf32>
    %5 = arith.addf %2, %4 : vector<64x512xf32>
    %c0_5 = arith.constant 0 : index
    %c0_6 = arith.constant 0 : index
    %6 = vector.load %arg15[%c0_5, %c0_6] : memref<64x512xf32, #tpu.memory_space<vmem>>, vector<64x512xf32>
    tpu.vector_store %arg15[%c0_5, %c0_6], %5 {strides = array<i32>} : memref<64x512xf32, #tpu.memory_space<vmem>>, vector<64x512xf32>,
    %c0_7 = arith.constant 0 : index
    %c0_8 = arith.constant 0 : index
    %7 = vector.load %arg6[%c0_7, %c0_8] : memref<1x512xf32, #tpu.memory_space<vmem>>, vector<1x512xf32>
    %8 = vector.shape_cast %7 : vector<1x512xf32> to vector<1x512xf32>
    %9 = vector.broadcast %8 : vector<1x512xf32> to vector<8x512xf32>
    %c0_9 = arith.constant 0 : index
    %c0_10 = arith.constant 0 : index
    %10 = vector.load %arg9[%c0_9, %c0_10] : memref<1x512xf32, #tpu.memory_space<vmem>>, vector<1x512xf32>
    %11 = vector.shape_cast %10 : vector<1x512xf32> to vector<1x512xf32>
    %12 = vector.broadcast %11 : vector<1x512xf32> to vector<8x512xf32>
    %c0_11 = arith.constant 0 : index
    %c0_12 = arith.constant 0 : index
    %13 = vector.load %arg11[%c0_11, %c0_12] : memref<1x256xf32, #tpu.memory_space<vmem>>, vector<1x256xf32>
    %14 = vector.shape_cast %13 : vector<1x256xf32> to vector<1x256xf32>
    %15 = vector.broadcast %14 : vector<1x256xf32> to vector<8x256xf32>
    %cst_13 = arith.constant 0.000000e+00 : f32
    %16 = vector.broadcast %cst_13 : f32 to vector<8x128xf32>
    %c0_14 = arith.constant 0 : index
    %c0_15 = arith.constant 0 : index
    %17 = vector.load %arg15[%c0_14, %c0_15] : memref<64x512xf32, #tpu.memory_space<vmem>>, vector<8x512xf32>
    %18 = arith.truncf %16 : vector<8x128xf32> to vector<8x128xbf16>
    %c0_16 = arith.constant 0 : index
    %c0_17 = arith.constant 0 : index
    %19 = vector.load %arg2[%c0_16, %c0_17] : memref<128x512xbf16, #tpu.memory_space<vmem>>, vector<128x512xbf16>
    %cst_18 = arith.constant dense<0.000000e+00> : vector<8x512xf32>
    %20 = tpu.matmul %18, %19, %cst_18 {dimension_numbers = #tpu.dot_dimension_numbers<[1], [0], [0], [1], [0, 0, 1, 1], [], []>} : vector<8x128xbf16>, vector<128x512xbf16>, vector<8x512xf32> -> vector<8x512xf32>
    %21 = arith.addf %17, %20 : vector<8x512xf32>
    %22 = vector.extract_strided_slice %21 {offsets = [0, 0], sizes = [8, 128], strides = [1, 1]} : vector<8x512xf32> to vector<8x128xf32>
    %cst_19 = arith.constant 5.000000e-01 : f32
    %23 = vector.broadcast %cst_19 : f32 to vector<8x128xf32>
    %24 = arith.mulf %23, %22 : vector<8x128xf32>
    %25 = math.tanh %24 : vector<8x128xf32>
    %cst_20 = arith.constant 1.000000e+00 : f32
    %26 = vector.broadcast %cst_20 : f32 to vector<8x128xf32>
    %27 = arith.addf %25, %26 : vector<8x128xf32>
    %cst_21 = arith.constant 5.000000e-01 : f32
    %28 = vector.broadcast %cst_21 : f32 to vector<8x128xf32>
    %29 = arith.mulf %28, %27 : vector<8x128xf32>
    %30 = vector.extract_strided_slice %21 {offsets = [0, 128], sizes = [8, 128], strides = [1, 1]} : vector<8x512xf32> to vector<8x128xf32>
    %cst_22 = arith.constant 5.000000e-01 : f32
    %31 = vector.broadcast %cst_22 : f32 to vector<8x128xf32>
    %32 = arith.mulf %31, %30 : vector<8x128xf32>
    %33 = math.tanh %32 : vector<8x128xf32>
    %cst_23 = arith.constant 1.000000e+00 : f32
    %34 = vector.broadcast %cst_23 : f32 to vector<8x128xf32>
    %35 = arith.addf %33, %34 : vector<8x128xf32>
    %cst_24 = arith.constant 5.000000e-01 : f32
    %36 = vector.broadcast %cst_24 : f32 to vector<8x128xf32>
    %37 = arith.mulf %36, %35 : vector<8x128xf32>
    %38 = vector.extract_strided_slice %21 {offsets = [0, 256], sizes = [8, 128], strides = [1, 1]} : vector<8x512xf32> to vector<8x128xf32>
    %39 = math.tanh %38 : vector<8x128xf32>
    %40 = vector.extract_strided_slice %21 {offsets = [0, 384], sizes = [8, 128], strides = [1, 1]} : vector<8x512xf32> to vector<8x128xf32>
    %cst_25 = arith.constant 5.000000e-01 : f32
    %41 = vector.broadcast %cst_25 : f32 to vector<8x128xf32>
    %42 = arith.mulf %41, %40 : vector<8x128xf32>
    %43 = math.tanh %42 : vector<8x128xf32>
    %cst_26 = arith.constant 1.000000e+00 : f32
    %44 = vector.broadcast %cst_26 : f32 to vector<8x128xf32>
    %45 = arith.addf %43, %44 : vector<8x128xf32>
    %cst_27 = arith.constant 5.000000e-01 : f32
    %46 = vector.broadcast %cst_27 : f32 to vector<8x128xf32>
    %47 = arith.mulf %46, %45 : vector<8x128xf32>
    %48 = arith.mulf %37, %16 : vector<8x128xf32>
    %49 = arith.mulf %29, %39 : vector<8x128xf32>
    %50 = arith.addf %48, %49 : vector<8x128xf32>
    %51 = math.tanh %50 : vector<8x128xf32>
    %52 = arith.mulf %47, %51 : vector<8x128xf32>
    %c8 = arith.constant 8 : index
    %c0_28 = arith.constant 0 : index
    %53 = vector.load %arg15[%c8, %c0_28] : memref<64x512xf32, #tpu.memory_space<vmem>>, vector<8x512xf32>
    %54 = arith.truncf %52 : vector<8x128xf32> to vector<8x128xbf16>
    %c0_29 = arith.constant 0 : index
    %c0_30 = arith.constant 0 : index
    %55 = vector.load %arg2[%c0_29, %c0_30] : memref<128x512xbf16, #tpu.memory_space<vmem>>, vector<128x512xbf16>
    %cst_31 = arith.constant dense<0.000000e+00> : vector<8x512xf32>
    %56 = tpu.matmul %54, %55, %cst_31 {dimension_numbers = #tpu.dot_dimension_numbers<[1], [0], [0], [1], [0, 0, 1, 1], [], []>} : vector<8x128xbf16>, vector<128x512xbf16>, vector<8x512xf32> -> vector<8x512xf32>
    %57 = arith.addf %53, %56 : vector<8x512xf32>
    %58 = vector.extract_strided_slice %57 {offsets = [0, 0], sizes = [8, 128], strides = [1, 1]} : vector<8x512xf32> to vector<8x128xf32>
    %cst_32 = arith.constant 5.000000e-01 : f32
    %59 = vector.broadcast %cst_32 : f32 to vector<8x128xf32>
    %60 = arith.mulf %59, %58 : vector<8x128xf32>
    %61 = math.tanh %60 : vector<8x128xf32>
    %cst_33 = arith.constant 1.000000e+00 : f32
    %62 = vector.broadcast %cst_33 : f32 to vector<8x128xf32>
    %63 = arith.addf %61, %62 : vector<8x128xf32>
    %cst_34 = arith.constant 5.000000e-01 : f32
    %64 = vector.broadcast %cst_34 : f32 to vector<8x128xf32>
    %65 = arith.mulf %64, %63 : vector<8x128xf32>
    %66 = vector.extract_strided_slice %57 {offsets = [0, 128], sizes = [8, 128], strides = [1, 1]} : vector<8x512xf32> to vector<8x128xf32>
    %cst_35 = arith.constant 5.000000e-01 : f32
    %67 = vector.broadcast %cst_35 : f32 to vector<8x128xf32>
    %68 = arith.mulf %67, %66 : vector<8x128xf32>
    %69 = math.tanh %68 : vector<8x128xf32>
    %cst_36 = arith.constant 1.000000e+00 : f32
    %70 = vector.broadcast %cst_36 : f32 to vector<8x128xf32>
    %71 = arith.addf %69, %70 : vector<8x128xf32>
    %cst_37 = arith.constant 5.000000e-01 : f32
    %72 = vector.broadcast %cst_37 : f32 to vector<8x128xf32>
    %73 = arith.mulf %72, %71 : vector<8x128xf32>
    %74 = vector.extract_strided_slice %57 {offsets = [0, 256], sizes = [8, 128], strides = [1, 1]} : vector<8x512xf32> to vector<8x128xf32>
    %75 = math.tanh %74 : vector<8x128xf32>
    %76 = vector.extract_strided_slice %57 {offsets = [0, 384], sizes = [8, 128], strides = [1, 1]} : vector<8x512xf32> to vector<8x128xf32>
    %cst_38 = arith.constant 5.000000e-01 : f32
    %77 = vector.broadcast %cst_38 : f32 to vector<8x128xf32>
    %78 = arith.mulf %77, %76 : vector<8x128xf32>
    %79 = math.tanh %78 : vector<8x128xf32>
    %cst_39 = arith.constant 1.000000e+00 : f32
    %80 = vector.broadcast %cst_39 : f32 to vector<8x128xf32>
    %81 = arith.addf %79, %80 : vector<8x128xf32>
    %cst_40 = arith.constant 5.000000e-01 : f32
    %82 = vector.broadcast %cst_40 : f32 to vector<8x128xf32>
    %83 = arith.mulf %82, %81 : vector<8x128xf32>
    %84 = arith.mulf %73, %50 : vector<8x128xf32>
    %85 = arith.mulf %65, %75 : vector<8x128xf32>
    %86 = arith.addf %84, %85 : vector<8x128xf32>
    %87 = math.tanh %86 : vector<8x128xf32>
    %88 = arith.mulf %83, %87 : vector<8x128xf32>
    %89 = arith.truncf %52 : vector<8x128xf32> to vector<8x128xbf16>
    %c0_41 = arith.constant 0 : index
    %c0_42 = arith.constant 0 : index
    %90 = vector.load %arg4[%c0_41, %c0_42] : memref<128x512xbf16, #tpu.memory_space<vmem>>, vector<128x512xbf16>
    %cst_43 = arith.constant dense<0.000000e+00> : vector<8x512xf32>
    %91 = tpu.matmul %89, %90, %cst_43 {dimension_numbers = #tpu.dot_dimension_numbers<[1], [0], [0], [1], [0, 0, 1, 1], [], []>} : vector<8x128xbf16>, vector<128x512xbf16>, vector<8x512xf32> -> vector<8x512xf32>
    %92 = arith.truncf %16 : vector<8x128xf32> to vector<8x128xbf16>
    %c0_44 = arith.constant 0 : index
    %c0_45 = arith.constant 0 : index
    %93 = vector.load %arg5[%c0_44, %c0_45] : memref<128x512xbf16, #tpu.memory_space<vmem>>, vector<128x512xbf16>
    %cst_46 = arith.constant dense<0.000000e+00> : vector<8x512xf32>
    %94 = tpu.matmul %92, %93, %cst_46 {dimension_numbers = #tpu.dot_dimension_numbers<[1], [0], [0], [1], [0, 0, 1, 1], [], []>} : vector<8x128xbf16>, vector<128x512xbf16>, vector<8x512xf32> -> vector<8x512xf32>
    %95 = arith.addf %91, %94 : vector<8x512xf32>
    %96 = arith.addf %95, %9 : vector<8x512xf32>
    %97 = vector.extract_strided_slice %96 {offsets = [0, 0], sizes = [8, 128], strides = [1, 1]} : vector<8x512xf32> to vector<8x128xf32>
    %cst_47 = arith.constant 5.000000e-01 : f32
    %98 = vector.broadcast %cst_47 : f32 to vector<8x128xf32>
    %99 = arith.mulf %98, %97 : vector<8x128xf32>
    %100 = math.tanh %99 : vector<8x128xf32>
    %cst_48 = arith.constant 1.000000e+00 : f32
    %101 = vector.broadcast %cst_48 : f32 to vector<8x128xf32>
    %102 = arith.addf %100, %101 : vector<8x128xf32>
    %cst_49 = arith.constant 5.000000e-01 : f32
    %103 = vector.broadcast %cst_49 : f32 to vector<8x128xf32>
    %104 = arith.mulf %103, %102 : vector<8x128xf32>
    %105 = vector.extract_strided_slice %96 {offsets = [0, 128], sizes = [8, 128], strides = [1, 1]} : vector<8x512xf32> to vector<8x128xf32>
    %cst_50 = arith.constant 5.000000e-01 : f32
    %106 = vector.broadcast %cst_50 : f32 to vector<8x128xf32>
    %107 = arith.mulf %106, %105 : vector<8x128xf32>
    %108 = math.tanh %107 : vector<8x128xf32>
    %cst_51 = arith.constant 1.000000e+00 : f32
    %109 = vector.broadcast %cst_51 : f32 to vector<8x128xf32>
    %110 = arith.addf %108, %109 : vector<8x128xf32>
    %cst_52 = arith.constant 5.000000e-01 : f32
    %111 = vector.broadcast %cst_52 : f32 to vector<8x128xf32>
    %112 = arith.mulf %111, %110 : vector<8x128xf32>
    %113 = vector.extract_strided_slice %96 {offsets = [0, 256], sizes = [8, 128], strides = [1, 1]} : vector<8x512xf32> to vector<8x128xf32>
    %114 = math.tanh %113 : vector<8x128xf32>
    %115 = vector.extract_strided_slice %96 {offsets = [0, 384], sizes = [8, 128], strides = [1, 1]} : vector<8x512xf32> to vector<8x128xf32>
    %cst_53 = arith.constant 5.000000e-01 : f32
    %116 = vector.broadcast %cst_53 : f32 to vector<8x128xf32>
    %117 = arith.mulf %116, %115 : vector<8x128xf32>
    %118 = math.tanh %117 : vector<8x128xf32>
    %cst_54 = arith.constant 1.000000e+00 : f32
    %119 = vector.broadcast %cst_54 : f32 to vector<8x128xf32>
    %120 = arith.addf %118, %119 : vector<8x128xf32>
    %cst_55 = arith.constant 5.000000e-01 : f32
    %121 = vector.broadcast %cst_55 : f32 to vector<8x128xf32>
    %122 = arith.mulf %121, %120 : vector<8x128xf32>
    %123 = arith.mulf %112, %16 : vector<8x128xf32>
    %124 = arith.mulf %104, %114 : vector<8x128xf32>
    %125 = arith.addf %123, %124 : vector<8x128xf32>
    %126 = math.tanh %125 : vector<8x128xf32>
    %127 = arith.mulf %122, %126 : vector<8x128xf32>
    %c16 = arith.constant 16 : index
    %c0_56 = arith.constant 0 : index
    %128 = vector.load %arg15[%c16, %c0_56] : memref<64x512xf32, #tpu.memory_space<vmem>>, vector<8x512xf32>
    %129 = arith.truncf %88 : vector<8x128xf32> to vector<8x128xbf16>
    %c0_57 = arith.constant 0 : index
    %c0_58 = arith.constant 0 : index
    %130 = vector.load %arg2[%c0_57, %c0_58] : memref<128x512xbf16, #tpu.memory_space<vmem>>, vector<128x512xbf16>
    %cst_59 = arith.constant dense<0.000000e+00> : vector<8x512xf32>
    %131 = tpu.matmul %129, %130, %cst_59 {dimension_numbers = #tpu.dot_dimension_numbers<[1], [0], [0], [1], [0, 0, 1, 1], [], []>} : vector<8x128xbf16>, vector<128x512xbf16>, vector<8x512xf32> -> vector<8x512xf32>
    %132 = arith.addf %128, %131 : vector<8x512xf32>
    %133 = vector.extract_strided_slice %132 {offsets = [0, 0], sizes = [8, 128], strides = [1, 1]} : vector<8x512xf32> to vector<8x128xf32>
    %cst_60 = arith.constant 5.000000e-01 : f32
    %134 = vector.broadcast %cst_60 : f32 to vector<8x128xf32>
    %135 = arith.mulf %134, %133 : vector<8x128xf32>
    %136 = math.tanh %135 : vector<8x128xf32>
    %cst_61 = arith.constant 1.000000e+00 : f32
    %137 = vector.broadcast %cst_61 : f32 to vector<8x128xf32>
    %138 = arith.addf %136, %137 : vector<8x128xf32>
    %cst_62 = arith.constant 5.000000e-01 : f32
    %139 = vector.broadcast %cst_62 : f32 to vector<8x128xf32>
    %140 = arith.mulf %139, %138 : vector<8x128xf32>
    %141 = vector.extract_strided_slice %132 {offsets = [0, 128], sizes = [8, 128], strides = [1, 1]} : vector<8x512xf32> to vector<8x128xf32>
    %cst_63 = arith.constant 5.000000e-01 : f32
    %142 = vector.broadcast %cst_63 : f32 to vector<8x128xf32>
    %143 = arith.mulf %142, %141 : vector<8x128xf32>
    %144 = math.tanh %143 : vector<8x128xf32>
    %cst_64 = arith.constant 1.000000e+00 : f32
    %145 = vector.broadcast %cst_64 : f32 to vector<8x128xf32>
    %146 = arith.addf %144, %145 : vector<8x128xf32>
    %cst_65 = arith.constant 5.000000e-01 : f32
    %147 = vector.broadcast %cst_65 : f32 to vector<8x128xf32>
    %148 = arith.mulf %147, %146 : vector<8x128xf32>
    %149 = vector.extract_strided_slice %132 {offsets = [0, 256], sizes = [8, 128], strides = [1, 1]} : vector<8x512xf32> to vector<8x128xf32>
    %150 = math.tanh %149 : vector<8x128xf32>
    %151 = vector.extract_strided_slice %132 {offsets = [0, 384], sizes = [8, 128], strides = [1, 1]} : vector<8x512xf32> to vector<8x128xf32>
    %cst_66 = arith.constant 5.000000e-01 : f32
    %152 = vector.broadcast %cst_66 : f32 to vector<8x128xf32>
    %153 = arith.mulf %152, %151 : vector<8x128xf32>
    %154 = math.tanh %153 : vector<8x128xf32>
    %cst_67 = arith.constant 1.000000e+00 : f32
    %155 = vector.broadcast %cst_67 : f32 to vector<8x128xf32>
    %156 = arith.addf %154, %155 : vector<8x128xf32>
    %cst_68 = arith.constant 5.000000e-01 : f32
    %157 = vector.broadcast %cst_68 : f32 to vector<8x128xf32>
    %158 = arith.mulf %157, %156 : vector<8x128xf32>
    %159 = arith.mulf %148, %86 : vector<8x128xf32>
    %160 = arith.mulf %140, %150 : vector<8x128xf32>
    %161 = arith.addf %159, %160 : vector<8x128xf32>
    %162 = math.tanh %161 : vector<8x128xf32>
    %163 = arith.mulf %158, %162 : vector<8x128xf32>
    %164 = arith.truncf %88 : vector<8x128xf32> to vector<8x128xbf16>
    %c0_69 = arith.constant 0 : index
    %c0_70 = arith.constant 0 : index
    %165 = vector.load %arg4[%c0_69, %c0_70] : memref<128x512xbf16, #tpu.memory_space<vmem>>, vector<128x512xbf16>
    %cst_71 = arith.constant dense<0.000000e+00> : vector<8x512xf32>
    %166 = tpu.matmul %164, %165, %cst_71 {dimension_numbers = #tpu.dot_dimension_numbers<[1], [0], [0], [1], [0, 0, 1, 1], [], []>} : vector<8x128xbf16>, vector<128x512xbf16>, vector<8x512xf32> -> vector<8x512xf32>
    %167 = arith.truncf %127 : vector<8x128xf32> to vector<8x128xbf16>
    %c0_72 = arith.constant 0 : index
    %c0_73 = arith.constant 0 : index
    %168 = vector.load %arg5[%c0_72, %c0_73] : memref<128x512xbf16, #tpu.memory_space<vmem>>, vector<128x512xbf16>
    %cst_74 = arith.constant dense<0.000000e+00> : vector<8x512xf32>
    %169 = tpu.matmul %167, %168, %cst_74 {dimension_numbers = #tpu.dot_dimension_numbers<[1], [0], [0], [1], [0, 0, 1, 1], [], []>} : vector<8x128xbf16>, vector<128x512xbf16>, vector<8x512xf32> -> vector<8x512xf32>
    %170 = arith.addf %166, %169 : vector<8x512xf32>
    %171 = arith.addf %170, %9 : vector<8x512xf32>
    %172 = vector.extract_strided_slice %171 {offsets = [0, 0], sizes = [8, 128], strides = [1, 1]} : vector<8x512xf32> to vector<8x128xf32>
    %cst_75 = arith.constant 5.000000e-01 : f32
    %173 = vector.broadcast %cst_75 : f32 to vector<8x128xf32>
    %174 = arith.mulf %173, %172 : vector<8x128xf32>
    %175 = math.tanh %174 : vector<8x128xf32>
    %cst_76 = arith.constant 1.000000e+00 : f32
    %176 = vector.broadcast %cst_76 : f32 to vector<8x128xf32>
    %177 = arith.addf %175, %176 : vector<8x128xf32>
    %cst_77 = arith.constant 5.000000e-01 : f32
    %178 = vector.broadcast %cst_77 : f32 to vector<8x128xf32>
    %179 = arith.mulf %178, %177 : vector<8x128xf32>
    %180 = vector.extract_strided_slice %171 {offsets = [0, 128], sizes = [8, 128], strides = [1, 1]} : vector<8x512xf32> to vector<8x128xf32>
    %cst_78 = arith.constant 5.000000e-01 : f32
    %181 = vector.broadcast %cst_78 : f32 to vector<8x128xf32>
    %182 = arith.mulf %181, %180 : vector<8x128xf32>
    %183 = math.tanh %182 : vector<8x128xf32>
    %cst_79 = arith.constant 1.000000e+00 : f32
    %184 = vector.broadcast %cst_79 : f32 to vector<8x128xf32>
    %185 = arith.addf %183, %184 : vector<8x128xf32>
    %cst_80 = arith.constant 5.000000e-01 : f32
    %186 = vector.broadcast %cst_80 : f32 to vector<8x128xf32>
    %187 = arith.mulf %186, %185 : vector<8x128xf32>
    %188 = vector.extract_strided_slice %171 {offsets = [0, 256], sizes = [8, 128], strides = [1, 1]} : vector<8x512xf32> to vector<8x128xf32>
    %189 = math.tanh %188 : vector<8x128xf32>
    %190 = vector.extract_strided_slice %171 {offsets = [0, 384], sizes = [8, 128], strides = [1, 1]} : vector<8x512xf32> to vector<8x128xf32>
    %cst_81 = arith.constant 5.000000e-01 : f32
    %191 = vector.broadcast %cst_81 : f32 to vector<8x128xf32>
    %192 = arith.mulf %191, %190 : vector<8x128xf32>
    %193 = math.tanh %192 : vector<8x128xf32>
    %cst_82 = arith.constant 1.000000e+00 : f32
    %194 = vector.broadcast %cst_82 : f32 to vector<8x128xf32>
    %195 = arith.addf %193, %194 : vector<8x128xf32>
    %cst_83 = arith.constant 5.000000e-01 : f32
    %196 = vector.broadcast %cst_83 : f32 to vector<8x128xf32>
    %197 = arith.mulf %196, %195 : vector<8x128xf32>
    %198 = arith.mulf %187, %125 : vector<8x128xf32>
    %199 = arith.mulf %179, %189 : vector<8x128xf32>
    %200 = arith.addf %198, %199 : vector<8x128xf32>
    %201 = math.tanh %200 : vector<8x128xf32>
    %202 = arith.mulf %197, %201 : vector<8x128xf32>
    %203 = arith.truncf %127 : vector<8x128xf32> to vector<8x128xbf16>
    %c0_84 = arith.constant 0 : index
    %c0_85 = arith.constant 0 : index
    %204 = vector.load %arg7[%c0_84, %c0_85] : memref<128x512xbf16, #tpu.memory_space<vmem>>, vector<128x512xbf16>
    %cst_86 = arith.constant dense<0.000000e+00> : vector<8x512xf32>
    %205 = tpu.matmul %203, %204, %cst_86 {dimension_numbers = #tpu.dot_dimension_numbers<[1], [0], [0], [1], [0, 0, 1, 1], [], []>} : vector<8x128xbf16>, vector<128x512xbf16>, vector<8x512xf32> -> vector<8x512xf32>
    %206 = arith.truncf %16 : vector<8x128xf32> to vector<8x128xbf16>
    %c0_87 = arith.constant 0 : index
    %c0_88 = arith.constant 0 : index
    %207 = vector.load %arg8[%c0_87, %c0_88] : memref<128x512xbf16, #tpu.memory_space<vmem>>, vector<128x512xbf16>
    %cst_89 = arith.constant dense<0.000000e+00> : vector<8x512xf32>
    %208 = tpu.matmul %206, %207, %cst_89 {dimension_numbers = #tpu.dot_dimension_numbers<[1], [0], [0], [1], [0, 0, 1, 1], [], []>} : vector<8x128xbf16>, vector<128x512xbf16>, vector<8x512xf32> -> vector<8x512xf32>
    %209 = arith.addf %205, %208 : vector<8x512xf32>
    %210 = arith.addf %209, %12 : vector<8x512xf32>
    %211 = vector.extract_strided_slice %210 {offsets = [0, 0], sizes = [8, 128], strides = [1, 1]} : vector<8x512xf32> to vector<8x128xf32>
    %cst_90 = arith.constant 5.000000e-01 : f32
    %212 = vector.broadcast %cst_90 : f32 to vector<8x128xf32>
    %213 = arith.mulf %212, %211 : vector<8x128xf32>
    %214 = math.tanh %213 : vector<8x128xf32>
    %cst_91 = arith.constant 1.000000e+00 : f32
    %215 = vector.broadcast %cst_91 : f32 to vector<8x128xf32>
    %216 = arith.addf %214, %215 : vector<8x128xf32>
    %cst_92 = arith.constant 5.000000e-01 : f32
    %217 = vector.broadcast %cst_92 : f32 to vector<8x128xf32>
    %218 = arith.mulf %217, %216 : vector<8x128xf32>
    %219 = vector.extract_strided_slice %210 {offsets = [0, 128], sizes = [8, 128], strides = [1, 1]} : vector<8x512xf32> to vector<8x128xf32>
    %cst_93 = arith.constant 5.000000e-01 : f32
    %220 = vector.broadcast %cst_93 : f32 to vector<8x128xf32>
    %221 = arith.mulf %220, %219 : vector<8x128xf32>
    %222 = math.tanh %221 : vector<8x128xf32>
    %cst_94 = arith.constant 1.000000e+00 : f32
    %223 = vector.broadcast %cst_94 : f32 to vector<8x128xf32>
    %224 = arith.addf %222, %223 : vector<8x128xf32>
    %cst_95 = arith.constant 5.000000e-01 : f32
    %225 = vector.broadcast %cst_95 : f32 to vector<8x128xf32>
    %226 = arith.mulf %225, %224 : vector<8x128xf32>
    %227 = vector.extract_strided_slice %210 {offsets = [0, 256], sizes = [8, 128], strides = [1, 1]} : vector<8x512xf32> to vector<8x128xf32>
    %228 = math.tanh %227 : vector<8x128xf32>
    %229 = vector.extract_strided_slice %210 {offsets = [0, 384], sizes = [8, 128], strides = [1, 1]} : vector<8x512xf32> to vector<8x128xf32>
    %cst_96 = arith.constant 5.000000e-01 : f32
    %230 = vector.broadcast %cst_96 : f32 to vector<8x128xf32>
    %231 = arith.mulf %230, %229 : vector<8x128xf32>
    %232 = math.tanh %231 : vector<8x128xf32>
    %cst_97 = arith.constant 1.000000e+00 : f32
    %233 = vector.broadcast %cst_97 : f32 to vector<8x128xf32>
    %234 = arith.addf %232, %233 : vector<8x128xf32>
    %cst_98 = arith.constant 5.000000e-01 : f32
    %235 = vector.broadcast %cst_98 : f32 to vector<8x128xf32>
    %236 = arith.mulf %235, %234 : vector<8x128xf32>
    %237 = arith.mulf %226, %16 : vector<8x128xf32>
    %238 = arith.mulf %218, %228 : vector<8x128xf32>
    %239 = arith.addf %237, %238 : vector<8x128xf32>
    %240 = math.tanh %239 : vector<8x128xf32>
    %241 = arith.mulf %236, %240 : vector<8x128xf32>
    %242 = arith.truncf %241 : vector<8x128xf32> to vector<8x128xbf16>
    %c0_99 = arith.constant 0 : index
    %c0_100 = arith.constant 0 : index
    %243 = vector.load %arg10[%c0_99, %c0_100] : memref<128x256xbf16, #tpu.memory_space<vmem>>, vector<128x256xbf16>
    %cst_101 = arith.constant dense<0.000000e+00> : vector<8x256xf32>
    %244 = tpu.matmul %242, %243, %cst_101 {dimension_numbers = #tpu.dot_dimension_numbers<[1], [0], [0], [1], [0, 0, 1, 1], [], []>} : vector<8x128xbf16>, vector<128x256xbf16>, vector<8x256xf32> -> vector<8x256xf32>
    %245 = arith.addf %244, %15 : vector<8x256xf32>
    %c0_102 = arith.constant 0 : index
    %c0_103 = arith.constant 0 : index
    %246 = vector.load %arg12[%c0_102, %c0_103] : memref<64x256xf32, #tpu.memory_space<vmem>>, vector<8x256xf32>
    tpu.vector_store %arg12[%c0_102, %c0_103], %245 {strides = array<i32>} : memref<64x256xf32, #tpu.memory_space<vmem>>, vector<8x256xf32>,
    %c24 = arith.constant 24 : index
    %c0_104 = arith.constant 0 : index
    %247 = vector.load %arg15[%c24, %c0_104] : memref<64x512xf32, #tpu.memory_space<vmem>>, vector<8x512xf32>
    %248 = arith.truncf %163 : vector<8x128xf32> to vector<8x128xbf16>
    %c0_105 = arith.constant 0 : index
    %c0_106 = arith.constant 0 : index
    %249 = vector.load %arg2[%c0_105, %c0_106] : memref<128x512xbf16, #tpu.memory_space<vmem>>, vector<128x512xbf16>
    %cst_107 = arith.constant dense<0.000000e+00> : vector<8x512xf32>
    %250 = tpu.matmul %248, %249, %cst_107 {dimension_numbers = #tpu.dot_dimension_numbers<[1], [0], [0], [1], [0, 0, 1, 1], [], []>} : vector<8x128xbf16>, vector<128x512xbf16>, vector<8x512xf32> -> vector<8x512xf32>
    %251 = arith.addf %247, %250 : vector<8x512xf32>
    %252 = vector.extract_strided_slice %251 {offsets = [0, 0], sizes = [8, 128], strides = [1, 1]} : vector<8x512xf32> to vector<8x128xf32>
    %cst_108 = arith.constant 5.000000e-01 : f32
    %253 = vector.broadcast %cst_108 : f32 to vector<8x128xf32>
    %254 = arith.mulf %253, %252 : vector<8x128xf32>
    %255 = math.tanh %254 : vector<8x128xf32>
    %cst_109 = arith.constant 1.000000e+00 : f32
    %256 = vector.broadcast %cst_109 : f32 to vector<8x128xf32>
    %257 = arith.addf %255, %256 : vector<8x128xf32>
    %cst_110 = arith.constant 5.000000e-01 : f32
    %258 = vector.broadcast %cst_110 : f32 to vector<8x128xf32>
    %259 = arith.mulf %258, %257 : vector<8x128xf32>
    %260 = vector.extract_strided_slice %251 {offsets = [0, 128], sizes = [8, 128], strides = [1, 1]} : vector<8x512xf32> to vector<8x128xf32>
    %cst_111 = arith.constant 5.000000e-01 : f32
    %261 = vector.broadcast %cst_111 : f32 to vector<8x128xf32>
    %262 = arith.mulf %261, %260 : vector<8x128xf32>
    %263 = math.tanh %262 : vector<8x128xf32>
    %cst_112 = arith.constant 1.000000e+00 : f32
    %264 = vector.broadcast %cst_112 : f32 to vector<8x128xf32>
    %265 = arith.addf %263, %264 : vector<8x128xf32>
    %cst_113 = arith.constant 5.000000e-01 : f32
    %266 = vector.broadcast %cst_113 : f32 to vector<8x128xf32>
    %267 = arith.mulf %266, %265 : vector<8x128xf32>
    %268 = vector.extract_strided_slice %251 {offsets = [0, 256], sizes = [8, 128], strides = [1, 1]} : vector<8x512xf32> to vector<8x128xf32>
    %269 = math.tanh %268 : vector<8x128xf32>
    %270 = vector.extract_strided_slice %251 {offsets = [0, 384], sizes = [8, 128], strides = [1, 1]} : vector<8x512xf32> to vector<8x128xf32>
    %cst_114 = arith.constant 5.000000e-01 : f32
    %271 = vector.broadcast %cst_114 : f32 to vector<8x128xf32>
    %272 = arith.mulf %271, %270 : vector<8x128xf32>
    %273 = math.tanh %272 : vector<8x128xf32>
    %cst_115 = arith.constant 1.000000e+00 : f32
    %274 = vector.broadcast %cst_115 : f32 to vector<8x128xf32>
    %275 = arith.addf %273, %274 : vector<8x128xf32>
    %cst_116 = arith.constant 5.000000e-01 : f32
    %276 = vector.broadcast %cst_116 : f32 to vector<8x128xf32>
    %277 = arith.mulf %276, %275 : vector<8x128xf32>
    %278 = arith.mulf %267, %161 : vector<8x128xf32>
    %279 = arith.mulf %259, %269 : vector<8x128xf32>
    %280 = arith.addf %278, %279 : vector<8x128xf32>
    %281 = math.tanh %280 : vector<8x128xf32>
    %282 = arith.mulf %277, %281 : vector<8x128xf32>
    %283 = arith.truncf %163 : vector<8x128xf32> to vector<8x128xbf16>
    %c0_117 = arith.constant 0 : index
    %c0_118 = arith.constant 0 : index
    %284 = vector.load %arg4[%c0_117, %c0_118] : memref<128x512xbf16, #tpu.memory_space<vmem>>, vector<128x512xbf16>
    %cst_119 = arith.constant dense<0.000000e+00> : vector<8x512xf32>
    %285 = tpu.matmul %283, %284, %cst_119 {dimension_numbers = #tpu.dot_dimension_numbers<[1], [0], [0], [1], [0, 0, 1, 1], [], []>} : vector<8x128xbf16>, vector<128x512xbf16>, vector<8x512xf32> -> vector<8x512xf32>
    %286 = arith.truncf %202 : vector<8x128xf32> to vector<8x128xbf16>
    %c0_120 = arith.constant 0 : index
    %c0_121 = arith.constant 0 : index
    %287 = vector.load %arg5[%c0_120, %c0_121] : memref<128x512xbf16, #tpu.memory_space<vmem>>, vector<128x512xbf16>
    %cst_122 = arith.constant dense<0.000000e+00> : vector<8x512xf32>
    %288 = tpu.matmul %286, %287, %cst_122 {dimension_numbers = #tpu.dot_dimension_numbers<[1], [0], [0], [1], [0, 0, 1, 1], [], []>} : vector<8x128xbf16>, vector<128x512xbf16>, vector<8x512xf32> -> vector<8x512xf32>
    %289 = arith.addf %285, %288 : vector<8x512xf32>
    %290 = arith.addf %289, %9 : vector<8x512xf32>
    %291 = vector.extract_strided_slice %290 {offsets = [0, 0], sizes = [8, 128], strides = [1, 1]} : vector<8x512xf32> to vector<8x128xf32>
    %cst_123 = arith.constant 5.000000e-01 : f32
    %292 = vector.broadcast %cst_123 : f32 to vector<8x128xf32>
    %293 = arith.mulf %292, %291 : vector<8x128xf32>
    %294 = math.tanh %293 : vector<8x128xf32>
    %cst_124 = arith.constant 1.000000e+00 : f32
    %295 = vector.broadcast %cst_124 : f32 to vector<8x128xf32>
    %296 = arith.addf %294, %295 : vector<8x128xf32>
    %cst_125 = arith.constant 5.000000e-01 : f32
    %297 = vector.broadcast %cst_125 : f32 to vector<8x128xf32>
    %298 = arith.mulf %297, %296 : vector<8x128xf32>
    %299 = vector.extract_strided_slice %290 {offsets = [0, 128], sizes = [8, 128], strides = [1, 1]} : vector<8x512xf32> to vector<8x128xf32>
    %cst_126 = arith.constant 5.000000e-01 : f32
    %300 = vector.broadcast %cst_126 : f32 to vector<8x128xf32>
    %301 = arith.mulf %300, %299 : vector<8x128xf32>
    %302 = math.tanh %301 : vector<8x128xf32>
    %cst_127 = arith.constant 1.000000e+00 : f32
    %303 = vector.broadcast %cst_127 : f32 to vector<8x128xf32>
    %304 = arith.addf %302, %303 : vector<8x128xf32>
    %cst_128 = arith.constant 5.000000e-01 : f32
    %305 = vector.broadcast %cst_128 : f32 to vector<8x128xf32>
    %306 = arith.mulf %305, %304 : vector<8x128xf32>
    %307 = vector.extract_strided_slice %290 {offsets = [0, 256], sizes = [8, 128], strides = [1, 1]} : vector<8x512xf32> to vector<8x128xf32>
    %308 = math.tanh %307 : vector<8x128xf32>
    %309 = vector.extract_strided_slice %290 {offsets = [0, 384], sizes = [8, 128], strides = [1, 1]} : vector<8x512xf32> to vector<8x128xf32>
    %cst_129 = arith.constant 5.000000e-01 : f32
    %310 = vector.broadcast %cst_129 : f32 to vector<8x128xf32>
    %311 = arith.mulf %310, %309 : vector<8x128xf32>
    %312 = math.tanh %311 : vector<8x128xf32>
    %cst_130 = arith.constant 1.000000e+00 : f32
    %313 = vector.broadcast %cst_130 : f32 to vector<8x128xf32>
    %314 = arith.addf %312, %313 : vector<8x128xf32>
    %cst_131 = arith.constant 5.000000e-01 : f32
    %315 = vector.broadcast %cst_131 : f32 to vector<8x128xf32>
    %316 = arith.mulf %315, %314 : vector<8x128xf32>
    %317 = arith.mulf %306, %200 : vector<8x128xf32>
    %318 = arith.mulf %298, %308 : vector<8x128xf32>
    %319 = arith.addf %317, %318 : vector<8x128xf32>
    %320 = math.tanh %319 : vector<8x128xf32>
    %321 = arith.mulf %316, %320 : vector<8x128xf32>
    %322 = arith.truncf %202 : vector<8x128xf32> to vector<8x128xbf16>
    %c0_132 = arith.constant 0 : index
    %c0_133 = arith.constant 0 : index
    %323 = vector.load %arg7[%c0_132, %c0_133] : memref<128x512xbf16, #tpu.memory_space<vmem>>, vector<128x512xbf16>
    %cst_134 = arith.constant dense<0.000000e+00> : vector<8x512xf32>
    %324 = tpu.matmul %322, %323, %cst_134 {dimension_numbers = #tpu.dot_dimension_numbers<[1], [0], [0], [1], [0, 0, 1, 1], [], []>} : vector<8x128xbf16>, vector<128x512xbf16>, vector<8x512xf32> -> vector<8x512xf32>
    %325 = arith.truncf %241 : vector<8x128xf32> to vector<8x128xbf16>
    %c0_135 = arith.constant 0 : index
    %c0_136 = arith.constant 0 : index
    %326 = vector.load %arg8[%c0_135, %c0_136] : memref<128x512xbf16, #tpu.memory_space<vmem>>, vector<128x512xbf16>
    %cst_137 = arith.constant dense<0.000000e+00> : vector<8x512xf32>
    %327 = tpu.matmul %325, %326, %cst_137 {dimension_numbers = #tpu.dot_dimension_numbers<[1], [0], [0], [1], [0, 0, 1, 1], [], []>} : vector<8x128xbf16>, vector<128x512xbf16>, vector<8x512xf32> -> vector<8x512xf32>
    %328 = arith.addf %324, %327 : vector<8x512xf32>
    %329 = arith.addf %328, %12 : vector<8x512xf32>
    %330 = vector.extract_strided_slice %329 {offsets = [0, 0], sizes = [8, 128], strides = [1, 1]} : vector<8x512xf32> to vector<8x128xf32>
    %cst_138 = arith.constant 5.000000e-01 : f32
    %331 = vector.broadcast %cst_138 : f32 to vector<8x128xf32>
    %332 = arith.mulf %331, %330 : vector<8x128xf32>
    %333 = math.tanh %332 : vector<8x128xf32>
    %cst_139 = arith.constant 1.000000e+00 : f32
    %334 = vector.broadcast %cst_139 : f32 to vector<8x128xf32>
    %335 = arith.addf %333, %334 : vector<8x128xf32>
    %cst_140 = arith.constant 5.000000e-01 : f32
    %336 = vector.broadcast %cst_140 : f32 to vector<8x128xf32>
    %337 = arith.mulf %336, %335 : vector<8x128xf32>
    %338 = vector.extract_strided_slice %329 {offsets = [0, 128], sizes = [8, 128], strides = [1, 1]} : vector<8x512xf32> to vector<8x128xf32>
    %cst_141 = arith.constant 5.000000e-01 : f32
    %339 = vector.broadcast %cst_141 : f32 to vector<8x128xf32>
    %340 = arith.mulf %339, %338 : vector<8x128xf32>
    %341 = math.tanh %340 : vector<8x128xf32>
    %cst_142 = arith.constant 1.000000e+00 : f32
    %342 = vector.broadcast %cst_142 : f32 to vector<8x128xf32>
    %343 = arith.addf %341, %342 : vector<8x128xf32>
    %cst_143 = arith.constant 5.000000e-01 : f32
    %344 = vector.broadcast %cst_143 : f32 to vector<8x128xf32>
    %345 = arith.mulf %344, %343 : vector<8x128xf32>
    %346 = vector.extract_strided_slice %329 {offsets = [0, 256], sizes = [8, 128], strides = [1, 1]} : vector<8x512xf32> to vector<8x128xf32>
    %347 = math.tanh %346 : vector<8x128xf32>
    %348 = vector.extract_strided_slice %329 {offsets = [0, 384], sizes = [8, 128], strides = [1, 1]} : vector<8x512xf32> to vector<8x128xf32>
    %cst_144 = arith.constant 5.000000e-01 : f32
    %349 = vector.broadcast %cst_144 : f32 to vector<8x128xf32>
    %350 = arith.mulf %349, %348 : vector<8x128xf32>
    %351 = math.tanh %350 : vector<8x128xf32>
    %cst_145 = arith.constant 1.000000e+00 : f32
    %352 = vector.broadcast %cst_145 : f32 to vector<8x128xf32>
    %353 = arith.addf %351, %352 : vector<8x128xf32>
    %cst_146 = arith.constant 5.000000e-01 : f32
    %354 = vector.broadcast %cst_146 : f32 to vector<8x128xf32>
    %355 = arith.mulf %354, %353 : vector<8x128xf32>
    %356 = arith.mulf %345, %239 : vector<8x128xf32>
    %357 = arith.mulf %337, %347 : vector<8x128xf32>
    %358 = arith.addf %356, %357 : vector<8x128xf32>
    %359 = math.tanh %358 : vector<8x128xf32>
    %360 = arith.mulf %355, %359 : vector<8x128xf32>
    %361 = arith.truncf %360 : vector<8x128xf32> to vector<8x128xbf16>
    %c0_147 = arith.constant 0 : index
    %c0_148 = arith.constant 0 : index
    %362 = vector.load %arg10[%c0_147, %c0_148] : memref<128x256xbf16, #tpu.memory_space<vmem>>, vector<128x256xbf16>
    %cst_149 = arith.constant dense<0.000000e+00> : vector<8x256xf32>
    %363 = tpu.matmul %361, %362, %cst_149 {dimension_numbers = #tpu.dot_dimension_numbers<[1], [0], [0], [1], [0, 0, 1, 1], [], []>} : vector<8x128xbf16>, vector<128x256xbf16>, vector<8x256xf32> -> vector<8x256xf32>
    %364 = arith.addf %363, %15 : vector<8x256xf32>
    %c8_150 = arith.constant 8 : index
    %c0_151 = arith.constant 0 : index
    %365 = vector.load %arg12[%c8_150, %c0_151] : memref<64x256xf32, #tpu.memory_space<vmem>>, vector<8x256xf32>
    tpu.vector_store %arg12[%c8_150, %c0_151], %364 {strides = array<i32>} : memref<64x256xf32, #tpu.memory_space<vmem>>, vector<8x256xf32>,
    %c32 = arith.constant 32 : index
    %c0_152 = arith.constant 0 : index
    %366 = vector.load %arg15[%c32, %c0_152] : memref<64x512xf32, #tpu.memory_space<vmem>>, vector<8x512xf32>
    %367 = arith.truncf %282 : vector<8x128xf32> to vector<8x128xbf16>
    %c0_153 = arith.constant 0 : index
    %c0_154 = arith.constant 0 : index
    %368 = vector.load %arg2[%c0_153, %c0_154] : memref<128x512xbf16, #tpu.memory_space<vmem>>, vector<128x512xbf16>
    %cst_155 = arith.constant dense<0.000000e+00> : vector<8x512xf32>
    %369 = tpu.matmul %367, %368, %cst_155 {dimension_numbers = #tpu.dot_dimension_numbers<[1], [0], [0], [1], [0, 0, 1, 1], [], []>} : vector<8x128xbf16>, vector<128x512xbf16>, vector<8x512xf32> -> vector<8x512xf32>
    %370 = arith.addf %366, %369 : vector<8x512xf32>
    %371 = vector.extract_strided_slice %370 {offsets = [0, 0], sizes = [8, 128], strides = [1, 1]} : vector<8x512xf32> to vector<8x128xf32>
    %cst_156 = arith.constant 5.000000e-01 : f32
    %372 = vector.broadcast %cst_156 : f32 to vector<8x128xf32>
    %373 = arith.mulf %372, %371 : vector<8x128xf32>
    %374 = math.tanh %373 : vector<8x128xf32>
    %cst_157 = arith.constant 1.000000e+00 : f32
    %375 = vector.broadcast %cst_157 : f32 to vector<8x128xf32>
    %376 = arith.addf %374, %375 : vector<8x128xf32>
    %cst_158 = arith.constant 5.000000e-01 : f32
    %377 = vector.broadcast %cst_158 : f32 to vector<8x128xf32>
    %378 = arith.mulf %377, %376 : vector<8x128xf32>
    %379 = vector.extract_strided_slice %370 {offsets = [0, 128], sizes = [8, 128], strides = [1, 1]} : vector<8x512xf32> to vector<8x128xf32>
    %cst_159 = arith.constant 5.000000e-01 : f32
    %380 = vector.broadcast %cst_159 : f32 to vector<8x128xf32>
    %381 = arith.mulf %380, %379 : vector<8x128xf32>
    %382 = math.tanh %381 : vector<8x128xf32>
    %cst_160 = arith.constant 1.000000e+00 : f32
    %383 = vector.broadcast %cst_160 : f32 to vector<8x128xf32>
    %384 = arith.addf %382, %383 : vector<8x128xf32>
    %cst_161 = arith.constant 5.000000e-01 : f32
    %385 = vector.broadcast %cst_161 : f32 to vector<8x128xf32>
    %386 = arith.mulf %385, %384 : vector<8x128xf32>
    %387 = vector.extract_strided_slice %370 {offsets = [0, 256], sizes = [8, 128], strides = [1, 1]} : vector<8x512xf32> to vector<8x128xf32>
    %388 = math.tanh %387 : vector<8x128xf32>
    %389 = vector.extract_strided_slice %370 {offsets = [0, 384], sizes = [8, 128], strides = [1, 1]} : vector<8x512xf32> to vector<8x128xf32>
    %cst_162 = arith.constant 5.000000e-01 : f32
    %390 = vector.broadcast %cst_162 : f32 to vector<8x128xf32>
    %391 = arith.mulf %390, %389 : vector<8x128xf32>
    %392 = math.tanh %391 : vector<8x128xf32>
    %cst_163 = arith.constant 1.000000e+00 : f32
    %393 = vector.broadcast %cst_163 : f32 to vector<8x128xf32>
    %394 = arith.addf %392, %393 : vector<8x128xf32>
    %cst_164 = arith.constant 5.000000e-01 : f32
    %395 = vector.broadcast %cst_164 : f32 to vector<8x128xf32>
    %396 = arith.mulf %395, %394 : vector<8x128xf32>
    %397 = arith.mulf %386, %280 : vector<8x128xf32>
    %398 = arith.mulf %378, %388 : vector<8x128xf32>
    %399 = arith.addf %397, %398 : vector<8x128xf32>
    %400 = math.tanh %399 : vector<8x128xf32>
    %401 = arith.mulf %396, %400 : vector<8x128xf32>
    %402 = arith.truncf %282 : vector<8x128xf32> to vector<8x128xbf16>
    %c0_165 = arith.constant 0 : index
    %c0_166 = arith.constant 0 : index
    %403 = vector.load %arg4[%c0_165, %c0_166] : memref<128x512xbf16, #tpu.memory_space<vmem>>, vector<128x512xbf16>
    %cst_167 = arith.constant dense<0.000000e+00> : vector<8x512xf32>
    %404 = tpu.matmul %402, %403, %cst_167 {dimension_numbers = #tpu.dot_dimension_numbers<[1], [0], [0], [1], [0, 0, 1, 1], [], []>} : vector<8x128xbf16>, vector<128x512xbf16>, vector<8x512xf32> -> vector<8x512xf32>
    %405 = arith.truncf %321 : vector<8x128xf32> to vector<8x128xbf16>
    %c0_168 = arith.constant 0 : index
    %c0_169 = arith.constant 0 : index
    %406 = vector.load %arg5[%c0_168, %c0_169] : memref<128x512xbf16, #tpu.memory_space<vmem>>, vector<128x512xbf16>
    %cst_170 = arith.constant dense<0.000000e+00> : vector<8x512xf32>
    %407 = tpu.matmul %405, %406, %cst_170 {dimension_numbers = #tpu.dot_dimension_numbers<[1], [0], [0], [1], [0, 0, 1, 1], [], []>} : vector<8x128xbf16>, vector<128x512xbf16>, vector<8x512xf32> -> vector<8x512xf32>
    %408 = arith.addf %404, %407 : vector<8x512xf32>
    %409 = arith.addf %408, %9 : vector<8x512xf32>
    %410 = vector.extract_strided_slice %409 {offsets = [0, 0], sizes = [8, 128], strides = [1, 1]} : vector<8x512xf32> to vector<8x128xf32>
    %cst_171 = arith.constant 5.000000e-01 : f32
    %411 = vector.broadcast %cst_171 : f32 to vector<8x128xf32>
    %412 = arith.mulf %411, %410 : vector<8x128xf32>
    %413 = math.tanh %412 : vector<8x128xf32>
    %cst_172 = arith.constant 1.000000e+00 : f32
    %414 = vector.broadcast %cst_172 : f32 to vector<8x128xf32>
    %415 = arith.addf %413, %414 : vector<8x128xf32>
    %cst_173 = arith.constant 5.000000e-01 : f32
    %416 = vector.broadcast %cst_173 : f32 to vector<8x128xf32>
    %417 = arith.mulf %416, %415 : vector<8x128xf32>
    %418 = vector.extract_strided_slice %409 {offsets = [0, 128], sizes = [8, 128], strides = [1, 1]} : vector<8x512xf32> to vector<8x128xf32>
    %cst_174 = arith.constant 5.000000e-01 : f32
    %419 = vector.broadcast %cst_174 : f32 to vector<8x128xf32>
    %420 = arith.mulf %419, %418 : vector<8x128xf32>
    %421 = math.tanh %420 : vector<8x128xf32>
    %cst_175 = arith.constant 1.000000e+00 : f32
    %422 = vector.broadcast %cst_175 : f32 to vector<8x128xf32>
    %423 = arith.addf %421, %422 : vector<8x128xf32>
    %cst_176 = arith.constant 5.000000e-01 : f32
    %424 = vector.broadcast %cst_176 : f32 to vector<8x128xf32>
    %425 = arith.mulf %424, %423 : vector<8x128xf32>
    %426 = vector.extract_strided_slice %409 {offsets = [0, 256], sizes = [8, 128], strides = [1, 1]} : vector<8x512xf32> to vector<8x128xf32>
    %427 = math.tanh %426 : vector<8x128xf32>
    %428 = vector.extract_strided_slice %409 {offsets = [0, 384], sizes = [8, 128], strides = [1, 1]} : vector<8x512xf32> to vector<8x128xf32>
    %cst_177 = arith.constant 5.000000e-01 : f32
    %429 = vector.broadcast %cst_177 : f32 to vector<8x128xf32>
    %430 = arith.mulf %429, %428 : vector<8x128xf32>
    %431 = math.tanh %430 : vector<8x128xf32>
    %cst_178 = arith.constant 1.000000e+00 : f32
    %432 = vector.broadcast %cst_178 : f32 to vector<8x128xf32>
    %433 = arith.addf %431, %432 : vector<8x128xf32>
    %cst_179 = arith.constant 5.000000e-01 : f32
    %434 = vector.broadcast %cst_179 : f32 to vector<8x128xf32>
    %435 = arith.mulf %434, %433 : vector<8x128xf32>
    %436 = arith.mulf %425, %319 : vector<8x128xf32>
    %437 = arith.mulf %417, %427 : vector<8x128xf32>
    %438 = arith.addf %436, %437 : vector<8x128xf32>
    %439 = math.tanh %438 : vector<8x128xf32>
    %440 = arith.mulf %435, %439 : vector<8x128xf32>
    %441 = arith.truncf %321 : vector<8x128xf32> to vector<8x128xbf16>
    %c0_180 = arith.constant 0 : index
    %c0_181 = arith.constant 0 : index
    %442 = vector.load %arg7[%c0_180, %c0_181] : memref<128x512xbf16, #tpu.memory_space<vmem>>, vector<128x512xbf16>
    %cst_182 = arith.constant dense<0.000000e+00> : vector<8x512xf32>
    %443 = tpu.matmul %441, %442, %cst_182 {dimension_numbers = #tpu.dot_dimension_numbers<[1], [0], [0], [1], [0, 0, 1, 1], [], []>} : vector<8x128xbf16>, vector<128x512xbf16>, vector<8x512xf32> -> vector<8x512xf32>
    %444 = arith.truncf %360 : vector<8x128xf32> to vector<8x128xbf16>
    %c0_183 = arith.constant 0 : index
    %c0_184 = arith.constant 0 : index
    %445 = vector.load %arg8[%c0_183, %c0_184] : memref<128x512xbf16, #tpu.memory_space<vmem>>, vector<128x512xbf16>
    %cst_185 = arith.constant dense<0.000000e+00> : vector<8x512xf32>
    %446 = tpu.matmul %444, %445, %cst_185 {dimension_numbers = #tpu.dot_dimension_numbers<[1], [0], [0], [1], [0, 0, 1, 1], [], []>} : vector<8x128xbf16>, vector<128x512xbf16>, vector<8x512xf32> -> vector<8x512xf32>
    %447 = arith.addf %443, %446 : vector<8x512xf32>
    %448 = arith.addf %447, %12 : vector<8x512xf32>
    %449 = vector.extract_strided_slice %448 {offsets = [0, 0], sizes = [8, 128], strides = [1, 1]} : vector<8x512xf32> to vector<8x128xf32>
    %cst_186 = arith.constant 5.000000e-01 : f32
    %450 = vector.broadcast %cst_186 : f32 to vector<8x128xf32>
    %451 = arith.mulf %450, %449 : vector<8x128xf32>
    %452 = math.tanh %451 : vector<8x128xf32>
    %cst_187 = arith.constant 1.000000e+00 : f32
    %453 = vector.broadcast %cst_187 : f32 to vector<8x128xf32>
    %454 = arith.addf %452, %453 : vector<8x128xf32>
    %cst_188 = arith.constant 5.000000e-01 : f32
    %455 = vector.broadcast %cst_188 : f32 to vector<8x128xf32>
    %456 = arith.mulf %455, %454 : vector<8x128xf32>
    %457 = vector.extract_strided_slice %448 {offsets = [0, 128], sizes = [8, 128], strides = [1, 1]} : vector<8x512xf32> to vector<8x128xf32>
    %cst_189 = arith.constant 5.000000e-01 : f32
    %458 = vector.broadcast %cst_189 : f32 to vector<8x128xf32>
    %459 = arith.mulf %458, %457 : vector<8x128xf32>
    %460 = math.tanh %459 : vector<8x128xf32>
    %cst_190 = arith.constant 1.000000e+00 : f32
    %461 = vector.broadcast %cst_190 : f32 to vector<8x128xf32>
    %462 = arith.addf %460, %461 : vector<8x128xf32>
    %cst_191 = arith.constant 5.000000e-01 : f32
    %463 = vector.broadcast %cst_191 : f32 to vector<8x128xf32>
    %464 = arith.mulf %463, %462 : vector<8x128xf32>
    %465 = vector.extract_strided_slice %448 {offsets = [0, 256], sizes = [8, 128], strides = [1, 1]} : vector<8x512xf32> to vector<8x128xf32>
    %466 = math.tanh %465 : vector<8x128xf32>
    %467 = vector.extract_strided_slice %448 {offsets = [0, 384], sizes = [8, 128], strides = [1, 1]} : vector<8x512xf32> to vector<8x128xf32>
    %cst_192 = arith.constant 5.000000e-01 : f32
    %468 = vector.broadcast %cst_192 : f32 to vector<8x128xf32>
    %469 = arith.mulf %468, %467 : vector<8x128xf32>
    %470 = math.tanh %469 : vector<8x128xf32>
    %cst_193 = arith.constant 1.000000e+00 : f32
    %471 = vector.broadcast %cst_193 : f32 to vector<8x128xf32>
    %472 = arith.addf %470, %471 : vector<8x128xf32>
    %cst_194 = arith.constant 5.000000e-01 : f32
    %473 = vector.broadcast %cst_194 : f32 to vector<8x128xf32>
    %474 = arith.mulf %473, %472 : vector<8x128xf32>
    %475 = arith.mulf %464, %358 : vector<8x128xf32>
    %476 = arith.mulf %456, %466 : vector<8x128xf32>
    %477 = arith.addf %475, %476 : vector<8x128xf32>
    %478 = math.tanh %477 : vector<8x128xf32>
    %479 = arith.mulf %474, %478 : vector<8x128xf32>
    %480 = arith.truncf %479 : vector<8x128xf32> to vector<8x128xbf16>
    %c0_195 = arith.constant 0 : index
    %c0_196 = arith.constant 0 : index
    %481 = vector.load %arg10[%c0_195, %c0_196] : memref<128x256xbf16, #tpu.memory_space<vmem>>, vector<128x256xbf16>
    %cst_197 = arith.constant dense<0.000000e+00> : vector<8x256xf32>
    %482 = tpu.matmul %480, %481, %cst_197 {dimension_numbers = #tpu.dot_dimension_numbers<[1], [0], [0], [1], [0, 0, 1, 1], [], []>} : vector<8x128xbf16>, vector<128x256xbf16>, vector<8x256xf32> -> vector<8x256xf32>
    %483 = arith.addf %482, %15 : vector<8x256xf32>
    %c16_198 = arith.constant 16 : index
    %c0_199 = arith.constant 0 : index
    %484 = vector.load %arg12[%c16_198, %c0_199] : memref<64x256xf32, #tpu.memory_space<vmem>>, vector<8x256xf32>
    tpu.vector_store %arg12[%c16_198, %c0_199], %483 {strides = array<i32>} : memref<64x256xf32, #tpu.memory_space<vmem>>, vector<8x256xf32>,
    %c40 = arith.constant 40 : index
    %c0_200 = arith.constant 0 : index
    %485 = vector.load %arg15[%c40, %c0_200] : memref<64x512xf32, #tpu.memory_space<vmem>>, vector<8x512xf32>
    %486 = arith.truncf %401 : vector<8x128xf32> to vector<8x128xbf16>
    %c0_201 = arith.constant 0 : index
    %c0_202 = arith.constant 0 : index
    %487 = vector.load %arg2[%c0_201, %c0_202] : memref<128x512xbf16, #tpu.memory_space<vmem>>, vector<128x512xbf16>
    %cst_203 = arith.constant dense<0.000000e+00> : vector<8x512xf32>
    %488 = tpu.matmul %486, %487, %cst_203 {dimension_numbers = #tpu.dot_dimension_numbers<[1], [0], [0], [1], [0, 0, 1, 1], [], []>} : vector<8x128xbf16>, vector<128x512xbf16>, vector<8x512xf32> -> vector<8x512xf32>
    %489 = arith.addf %485, %488 : vector<8x512xf32>
    %490 = vector.extract_strided_slice %489 {offsets = [0, 0], sizes = [8, 128], strides = [1, 1]} : vector<8x512xf32> to vector<8x128xf32>
    %cst_204 = arith.constant 5.000000e-01 : f32
    %491 = vector.broadcast %cst_204 : f32 to vector<8x128xf32>
    %492 = arith.mulf %491, %490 : vector<8x128xf32>
    %493 = math.tanh %492 : vector<8x128xf32>
    %cst_205 = arith.constant 1.000000e+00 : f32
    %494 = vector.broadcast %cst_205 : f32 to vector<8x128xf32>
    %495 = arith.addf %493, %494 : vector<8x128xf32>
    %cst_206 = arith.constant 5.000000e-01 : f32
    %496 = vector.broadcast %cst_206 : f32 to vector<8x128xf32>
    %497 = arith.mulf %496, %495 : vector<8x128xf32>
    %498 = vector.extract_strided_slice %489 {offsets = [0, 128], sizes = [8, 128], strides = [1, 1]} : vector<8x512xf32> to vector<8x128xf32>
    %cst_207 = arith.constant 5.000000e-01 : f32
    %499 = vector.broadcast %cst_207 : f32 to vector<8x128xf32>
    %500 = arith.mulf %499, %498 : vector<8x128xf32>
    %501 = math.tanh %500 : vector<8x128xf32>
    %cst_208 = arith.constant 1.000000e+00 : f32
    %502 = vector.broadcast %cst_208 : f32 to vector<8x128xf32>
    %503 = arith.addf %501, %502 : vector<8x128xf32>
    %cst_209 = arith.constant 5.000000e-01 : f32
    %504 = vector.broadcast %cst_209 : f32 to vector<8x128xf32>
    %505 = arith.mulf %504, %503 : vector<8x128xf32>
    %506 = vector.extract_strided_slice %489 {offsets = [0, 256], sizes = [8, 128], strides = [1, 1]} : vector<8x512xf32> to vector<8x128xf32>
    %507 = math.tanh %506 : vector<8x128xf32>
    %508 = vector.extract_strided_slice %489 {offsets = [0, 384], sizes = [8, 128], strides = [1, 1]} : vector<8x512xf32> to vector<8x128xf32>
    %cst_210 = arith.constant 5.000000e-01 : f32
    %509 = vector.broadcast %cst_210 : f32 to vector<8x128xf32>
    %510 = arith.mulf %509, %508 : vector<8x128xf32>
    %511 = math.tanh %510 : vector<8x128xf32>
    %cst_211 = arith.constant 1.000000e+00 : f32
    %512 = vector.broadcast %cst_211 : f32 to vector<8x128xf32>
    %513 = arith.addf %511, %512 : vector<8x128xf32>
    %cst_212 = arith.constant 5.000000e-01 : f32
    %514 = vector.broadcast %cst_212 : f32 to vector<8x128xf32>
    %515 = arith.mulf %514, %513 : vector<8x128xf32>
    %516 = arith.mulf %505, %399 : vector<8x128xf32>
    %517 = arith.mulf %497, %507 : vector<8x128xf32>
    %518 = arith.addf %516, %517 : vector<8x128xf32>
    %519 = math.tanh %518 : vector<8x128xf32>
    %520 = arith.mulf %515, %519 : vector<8x128xf32>
    %521 = arith.truncf %401 : vector<8x128xf32> to vector<8x128xbf16>
    %c0_213 = arith.constant 0 : index
    %c0_214 = arith.constant 0 : index
    %522 = vector.load %arg4[%c0_213, %c0_214] : memref<128x512xbf16, #tpu.memory_space<vmem>>, vector<128x512xbf16>
    %cst_215 = arith.constant dense<0.000000e+00> : vector<8x512xf32>
    %523 = tpu.matmul %521, %522, %cst_215 {dimension_numbers = #tpu.dot_dimension_numbers<[1], [0], [0], [1], [0, 0, 1, 1], [], []>} : vector<8x128xbf16>, vector<128x512xbf16>, vector<8x512xf32> -> vector<8x512xf32>
    %524 = arith.truncf %440 : vector<8x128xf32> to vector<8x128xbf16>
    %c0_216 = arith.constant 0 : index
    %c0_217 = arith.constant 0 : index
    %525 = vector.load %arg5[%c0_216, %c0_217] : memref<128x512xbf16, #tpu.memory_space<vmem>>, vector<128x512xbf16>
    %cst_218 = arith.constant dense<0.000000e+00> : vector<8x512xf32>
    %526 = tpu.matmul %524, %525, %cst_218 {dimension_numbers = #tpu.dot_dimension_numbers<[1], [0], [0], [1], [0, 0, 1, 1], [], []>} : vector<8x128xbf16>, vector<128x512xbf16>, vector<8x512xf32> -> vector<8x512xf32>
    %527 = arith.addf %523, %526 : vector<8x512xf32>
    %528 = arith.addf %527, %9 : vector<8x512xf32>
    %529 = vector.extract_strided_slice %528 {offsets = [0, 0], sizes = [8, 128], strides = [1, 1]} : vector<8x512xf32> to vector<8x128xf32>
    %cst_219 = arith.constant 5.000000e-01 : f32
    %530 = vector.broadcast %cst_219 : f32 to vector<8x128xf32>
    %531 = arith.mulf %530, %529 : vector<8x128xf32>
    %532 = math.tanh %531 : vector<8x128xf32>
    %cst_220 = arith.constant 1.000000e+00 : f32
    %533 = vector.broadcast %cst_220 : f32 to vector<8x128xf32>
    %534 = arith.addf %532, %533 : vector<8x128xf32>
    %cst_221 = arith.constant 5.000000e-01 : f32
    %535 = vector.broadcast %cst_221 : f32 to vector<8x128xf32>
    %536 = arith.mulf %535, %534 : vector<8x128xf32>
    %537 = vector.extract_strided_slice %528 {offsets = [0, 128], sizes = [8, 128], strides = [1, 1]} : vector<8x512xf32> to vector<8x128xf32>
    %cst_222 = arith.constant 5.000000e-01 : f32
    %538 = vector.broadcast %cst_222 : f32 to vector<8x128xf32>
    %539 = arith.mulf %538, %537 : vector<8x128xf32>
    %540 = math.tanh %539 : vector<8x128xf32>
    %cst_223 = arith.constant 1.000000e+00 : f32
    %541 = vector.broadcast %cst_223 : f32 to vector<8x128xf32>
    %542 = arith.addf %540, %541 : vector<8x128xf32>
    %cst_224 = arith.constant 5.000000e-01 : f32
    %543 = vector.broadcast %cst_224 : f32 to vector<8x128xf32>
    %544 = arith.mulf %543, %542 : vector<8x128xf32>
    %545 = vector.extract_strided_slice %528 {offsets = [0, 256], sizes = [8, 128], strides = [1, 1]} : vector<8x512xf32> to vector<8x128xf32>
    %546 = math.tanh %545 : vector<8x128xf32>
    %547 = vector.extract_strided_slice %528 {offsets = [0, 384], sizes = [8, 128], strides = [1, 1]} : vector<8x512xf32> to vector<8x128xf32>
    %cst_225 = arith.constant 5.000000e-01 : f32
    %548 = vector.broadcast %cst_225 : f32 to vector<8x128xf32>
    %549 = arith.mulf %548, %547 : vector<8x128xf32>
    %550 = math.tanh %549 : vector<8x128xf32>
    %cst_226 = arith.constant 1.000000e+00 : f32
    %551 = vector.broadcast %cst_226 : f32 to vector<8x128xf32>
    %552 = arith.addf %550, %551 : vector<8x128xf32>
    %cst_227 = arith.constant 5.000000e-01 : f32
    %553 = vector.broadcast %cst_227 : f32 to vector<8x128xf32>
    %554 = arith.mulf %553, %552 : vector<8x128xf32>
    %555 = arith.mulf %544, %438 : vector<8x128xf32>
    %556 = arith.mulf %536, %546 : vector<8x128xf32>
    %557 = arith.addf %555, %556 : vector<8x128xf32>
    %558 = math.tanh %557 : vector<8x128xf32>
    %559 = arith.mulf %554, %558 : vector<8x128xf32>
    %560 = arith.truncf %440 : vector<8x128xf32> to vector<8x128xbf16>
    %c0_228 = arith.constant 0 : index
    %c0_229 = arith.constant 0 : index
    %561 = vector.load %arg7[%c0_228, %c0_229] : memref<128x512xbf16, #tpu.memory_space<vmem>>, vector<128x512xbf16>
    %cst_230 = arith.constant dense<0.000000e+00> : vector<8x512xf32>
    %562 = tpu.matmul %560, %561, %cst_230 {dimension_numbers = #tpu.dot_dimension_numbers<[1], [0], [0], [1], [0, 0, 1, 1], [], []>} : vector<8x128xbf16>, vector<128x512xbf16>, vector<8x512xf32> -> vector<8x512xf32>
    %563 = arith.truncf %479 : vector<8x128xf32> to vector<8x128xbf16>
    %c0_231 = arith.constant 0 : index
    %c0_232 = arith.constant 0 : index
    %564 = vector.load %arg8[%c0_231, %c0_232] : memref<128x512xbf16, #tpu.memory_space<vmem>>, vector<128x512xbf16>
    %cst_233 = arith.constant dense<0.000000e+00> : vector<8x512xf32>
    %565 = tpu.matmul %563, %564, %cst_233 {dimension_numbers = #tpu.dot_dimension_numbers<[1], [0], [0], [1], [0, 0, 1, 1], [], []>} : vector<8x128xbf16>, vector<128x512xbf16>, vector<8x512xf32> -> vector<8x512xf32>
    %566 = arith.addf %562, %565 : vector<8x512xf32>
    %567 = arith.addf %566, %12 : vector<8x512xf32>
    %568 = vector.extract_strided_slice %567 {offsets = [0, 0], sizes = [8, 128], strides = [1, 1]} : vector<8x512xf32> to vector<8x128xf32>
    %cst_234 = arith.constant 5.000000e-01 : f32
    %569 = vector.broadcast %cst_234 : f32 to vector<8x128xf32>
    %570 = arith.mulf %569, %568 : vector<8x128xf32>
    %571 = math.tanh %570 : vector<8x128xf32>
    %cst_235 = arith.constant 1.000000e+00 : f32
    %572 = vector.broadcast %cst_235 : f32 to vector<8x128xf32>
    %573 = arith.addf %571, %572 : vector<8x128xf32>
    %cst_236 = arith.constant 5.000000e-01 : f32
    %574 = vector.broadcast %cst_236 : f32 to vector<8x128xf32>
    %575 = arith.mulf %574, %573 : vector<8x128xf32>
    %576 = vector.extract_strided_slice %567 {offsets = [0, 128], sizes = [8, 128], strides = [1, 1]} : vector<8x512xf32> to vector<8x128xf32>
    %cst_237 = arith.constant 5.000000e-01 : f32
    %577 = vector.broadcast %cst_237 : f32 to vector<8x128xf32>
    %578 = arith.mulf %577, %576 : vector<8x128xf32>
    %579 = math.tanh %578 : vector<8x128xf32>
    %cst_238 = arith.constant 1.000000e+00 : f32
    %580 = vector.broadcast %cst_238 : f32 to vector<8x128xf32>
    %581 = arith.addf %579, %580 : vector<8x128xf32>
    %cst_239 = arith.constant 5.000000e-01 : f32
    %582 = vector.broadcast %cst_239 : f32 to vector<8x128xf32>
    %583 = arith.mulf %582, %581 : vector<8x128xf32>
    %584 = vector.extract_strided_slice %567 {offsets = [0, 256], sizes = [8, 128], strides = [1, 1]} : vector<8x512xf32> to vector<8x128xf32>
    %585 = math.tanh %584 : vector<8x128xf32>
    %586 = vector.extract_strided_slice %567 {offsets = [0, 384], sizes = [8, 128], strides = [1, 1]} : vector<8x512xf32> to vector<8x128xf32>
    %cst_240 = arith.constant 5.000000e-01 : f32
    %587 = vector.broadcast %cst_240 : f32 to vector<8x128xf32>
    %588 = arith.mulf %587, %586 : vector<8x128xf32>
    %589 = math.tanh %588 : vector<8x128xf32>
    %cst_241 = arith.constant 1.000000e+00 : f32
    %590 = vector.broadcast %cst_241 : f32 to vector<8x128xf32>
    %591 = arith.addf %589, %590 : vector<8x128xf32>
    %cst_242 = arith.constant 5.000000e-01 : f32
    %592 = vector.broadcast %cst_242 : f32 to vector<8x128xf32>
    %593 = arith.mulf %592, %591 : vector<8x128xf32>
    %594 = arith.mulf %583, %477 : vector<8x128xf32>
    %595 = arith.mulf %575, %585 : vector<8x128xf32>
    %596 = arith.addf %594, %595 : vector<8x128xf32>
    %597 = math.tanh %596 : vector<8x128xf32>
    %598 = arith.mulf %593, %597 : vector<8x128xf32>
    %599 = arith.truncf %598 : vector<8x128xf32> to vector<8x128xbf16>
    %c0_243 = arith.constant 0 : index
    %c0_244 = arith.constant 0 : index
    %600 = vector.load %arg10[%c0_243, %c0_244] : memref<128x256xbf16, #tpu.memory_space<vmem>>, vector<128x256xbf16>
    %cst_245 = arith.constant dense<0.000000e+00> : vector<8x256xf32>
    %601 = tpu.matmul %599, %600, %cst_245 {dimension_numbers = #tpu.dot_dimension_numbers<[1], [0], [0], [1], [0, 0, 1, 1], [], []>} : vector<8x128xbf16>, vector<128x256xbf16>, vector<8x256xf32> -> vector<8x256xf32>
    %602 = arith.addf %601, %15 : vector<8x256xf32>
    %c24_246 = arith.constant 24 : index
    %c0_247 = arith.constant 0 : index
    %603 = vector.load %arg12[%c24_246, %c0_247] : memref<64x256xf32, #tpu.memory_space<vmem>>, vector<8x256xf32>
    tpu.vector_store %arg12[%c24_246, %c0_247], %602 {strides = array<i32>} : memref<64x256xf32, #tpu.memory_space<vmem>>, vector<8x256xf32>,
    %c48 = arith.constant 48 : index
    %c0_248 = arith.constant 0 : index
    %604 = vector.load %arg15[%c48, %c0_248] : memref<64x512xf32, #tpu.memory_space<vmem>>, vector<8x512xf32>
    %605 = arith.truncf %520 : vector<8x128xf32> to vector<8x128xbf16>
    %c0_249 = arith.constant 0 : index
    %c0_250 = arith.constant 0 : index
    %606 = vector.load %arg2[%c0_249, %c0_250] : memref<128x512xbf16, #tpu.memory_space<vmem>>, vector<128x512xbf16>
    %cst_251 = arith.constant dense<0.000000e+00> : vector<8x512xf32>
    %607 = tpu.matmul %605, %606, %cst_251 {dimension_numbers = #tpu.dot_dimension_numbers<[1], [0], [0], [1], [0, 0, 1, 1], [], []>} : vector<8x128xbf16>, vector<128x512xbf16>, vector<8x512xf32> -> vector<8x512xf32>
    %608 = arith.addf %604, %607 : vector<8x512xf32>
    %609 = vector.extract_strided_slice %608 {offsets = [0, 0], sizes = [8, 128], strides = [1, 1]} : vector<8x512xf32> to vector<8x128xf32>
    %cst_252 = arith.constant 5.000000e-01 : f32
    %610 = vector.broadcast %cst_252 : f32 to vector<8x128xf32>
    %611 = arith.mulf %610, %609 : vector<8x128xf32>
    %612 = math.tanh %611 : vector<8x128xf32>
    %cst_253 = arith.constant 1.000000e+00 : f32
    %613 = vector.broadcast %cst_253 : f32 to vector<8x128xf32>
    %614 = arith.addf %612, %613 : vector<8x128xf32>
    %cst_254 = arith.constant 5.000000e-01 : f32
    %615 = vector.broadcast %cst_254 : f32 to vector<8x128xf32>
    %616 = arith.mulf %615, %614 : vector<8x128xf32>
    %617 = vector.extract_strided_slice %608 {offsets = [0, 128], sizes = [8, 128], strides = [1, 1]} : vector<8x512xf32> to vector<8x128xf32>
    %cst_255 = arith.constant 5.000000e-01 : f32
    %618 = vector.broadcast %cst_255 : f32 to vector<8x128xf32>
    %619 = arith.mulf %618, %617 : vector<8x128xf32>
    %620 = math.tanh %619 : vector<8x128xf32>
    %cst_256 = arith.constant 1.000000e+00 : f32
    %621 = vector.broadcast %cst_256 : f32 to vector<8x128xf32>
    %622 = arith.addf %620, %621 : vector<8x128xf32>
    %cst_257 = arith.constant 5.000000e-01 : f32
    %623 = vector.broadcast %cst_257 : f32 to vector<8x128xf32>
    %624 = arith.mulf %623, %622 : vector<8x128xf32>
    %625 = vector.extract_strided_slice %608 {offsets = [0, 256], sizes = [8, 128], strides = [1, 1]} : vector<8x512xf32> to vector<8x128xf32>
    %626 = math.tanh %625 : vector<8x128xf32>
    %627 = vector.extract_strided_slice %608 {offsets = [0, 384], sizes = [8, 128], strides = [1, 1]} : vector<8x512xf32> to vector<8x128xf32>
    %cst_258 = arith.constant 5.000000e-01 : f32
    %628 = vector.broadcast %cst_258 : f32 to vector<8x128xf32>
    %629 = arith.mulf %628, %627 : vector<8x128xf32>
    %630 = math.tanh %629 : vector<8x128xf32>
    %cst_259 = arith.constant 1.000000e+00 : f32
    %631 = vector.broadcast %cst_259 : f32 to vector<8x128xf32>
    %632 = arith.addf %630, %631 : vector<8x128xf32>
    %cst_260 = arith.constant 5.000000e-01 : f32
    %633 = vector.broadcast %cst_260 : f32 to vector<8x128xf32>
    %634 = arith.mulf %633, %632 : vector<8x128xf32>
    %635 = arith.mulf %624, %518 : vector<8x128xf32>
    %636 = arith.mulf %616, %626 : vector<8x128xf32>
    %637 = arith.addf %635, %636 : vector<8x128xf32>
    %638 = math.tanh %637 : vector<8x128xf32>
    %639 = arith.mulf %634, %638 : vector<8x128xf32>
    %640 = arith.truncf %520 : vector<8x128xf32> to vector<8x128xbf16>
    %c0_261 = arith.constant 0 : index
    %c0_262 = arith.constant 0 : index
    %641 = vector.load %arg4[%c0_261, %c0_262] : memref<128x512xbf16, #tpu.memory_space<vmem>>, vector<128x512xbf16>
    %cst_263 = arith.constant dense<0.000000e+00> : vector<8x512xf32>
    %642 = tpu.matmul %640, %641, %cst_263 {dimension_numbers = #tpu.dot_dimension_numbers<[1], [0], [0], [1], [0, 0, 1, 1], [], []>} : vector<8x128xbf16>, vector<128x512xbf16>, vector<8x512xf32> -> vector<8x512xf32>
    %643 = arith.truncf %559 : vector<8x128xf32> to vector<8x128xbf16>
    %c0_264 = arith.constant 0 : index
    %c0_265 = arith.constant 0 : index
    %644 = vector.load %arg5[%c0_264, %c0_265] : memref<128x512xbf16, #tpu.memory_space<vmem>>, vector<128x512xbf16>
    %cst_266 = arith.constant dense<0.000000e+00> : vector<8x512xf32>
    %645 = tpu.matmul %643, %644, %cst_266 {dimension_numbers = #tpu.dot_dimension_numbers<[1], [0], [0], [1], [0, 0, 1, 1], [], []>} : vector<8x128xbf16>, vector<128x512xbf16>, vector<8x512xf32> -> vector<8x512xf32>
    %646 = arith.addf %642, %645 : vector<8x512xf32>
    %647 = arith.addf %646, %9 : vector<8x512xf32>
    %648 = vector.extract_strided_slice %647 {offsets = [0, 0], sizes = [8, 128], strides = [1, 1]} : vector<8x512xf32> to vector<8x128xf32>
    %cst_267 = arith.constant 5.000000e-01 : f32
    %649 = vector.broadcast %cst_267 : f32 to vector<8x128xf32>
    %650 = arith.mulf %649, %648 : vector<8x128xf32>
    %651 = math.tanh %650 : vector<8x128xf32>
    %cst_268 = arith.constant 1.000000e+00 : f32
    %652 = vector.broadcast %cst_268 : f32 to vector<8x128xf32>
    %653 = arith.addf %651, %652 : vector<8x128xf32>
    %cst_269 = arith.constant 5.000000e-01 : f32
    %654 = vector.broadcast %cst_269 : f32 to vector<8x128xf32>
    %655 = arith.mulf %654, %653 : vector<8x128xf32>
    %656 = vector.extract_strided_slice %647 {offsets = [0, 128], sizes = [8, 128], strides = [1, 1]} : vector<8x512xf32> to vector<8x128xf32>
    %cst_270 = arith.constant 5.000000e-01 : f32
    %657 = vector.broadcast %cst_270 : f32 to vector<8x128xf32>
    %658 = arith.mulf %657, %656 : vector<8x128xf32>
    %659 = math.tanh %658 : vector<8x128xf32>
    %cst_271 = arith.constant 1.000000e+00 : f32
    %660 = vector.broadcast %cst_271 : f32 to vector<8x128xf32>
    %661 = arith.addf %659, %660 : vector<8x128xf32>
    %cst_272 = arith.constant 5.000000e-01 : f32
    %662 = vector.broadcast %cst_272 : f32 to vector<8x128xf32>
    %663 = arith.mulf %662, %661 : vector<8x128xf32>
    %664 = vector.extract_strided_slice %647 {offsets = [0, 256], sizes = [8, 128], strides = [1, 1]} : vector<8x512xf32> to vector<8x128xf32>
    %665 = math.tanh %664 : vector<8x128xf32>
    %666 = vector.extract_strided_slice %647 {offsets = [0, 384], sizes = [8, 128], strides = [1, 1]} : vector<8x512xf32> to vector<8x128xf32>
    %cst_273 = arith.constant 5.000000e-01 : f32
    %667 = vector.broadcast %cst_273 : f32 to vector<8x128xf32>
    %668 = arith.mulf %667, %666 : vector<8x128xf32>
    %669 = math.tanh %668 : vector<8x128xf32>
    %cst_274 = arith.constant 1.000000e+00 : f32
    %670 = vector.broadcast %cst_274 : f32 to vector<8x128xf32>
    %671 = arith.addf %669, %670 : vector<8x128xf32>
    %cst_275 = arith.constant 5.000000e-01 : f32
    %672 = vector.broadcast %cst_275 : f32 to vector<8x128xf32>
    %673 = arith.mulf %672, %671 : vector<8x128xf32>
    %674 = arith.mulf %663, %557 : vector<8x128xf32>
    %675 = arith.mulf %655, %665 : vector<8x128xf32>
    %676 = arith.addf %674, %675 : vector<8x128xf32>
    %677 = math.tanh %676 : vector<8x128xf32>
    %678 = arith.mulf %673, %677 : vector<8x128xf32>
    %679 = arith.truncf %559 : vector<8x128xf32> to vector<8x128xbf16>
    %c0_276 = arith.constant 0 : index
    %c0_277 = arith.constant 0 : index
    %680 = vector.load %arg7[%c0_276, %c0_277] : memref<128x512xbf16, #tpu.memory_space<vmem>>, vector<128x512xbf16>
    %cst_278 = arith.constant dense<0.000000e+00> : vector<8x512xf32>
    %681 = tpu.matmul %679, %680, %cst_278 {dimension_numbers = #tpu.dot_dimension_numbers<[1], [0], [0], [1], [0, 0, 1, 1], [], []>} : vector<8x128xbf16>, vector<128x512xbf16>, vector<8x512xf32> -> vector<8x512xf32>
    %682 = arith.truncf %598 : vector<8x128xf32> to vector<8x128xbf16>
    %c0_279 = arith.constant 0 : index
    %c0_280 = arith.constant 0 : index
    %683 = vector.load %arg8[%c0_279, %c0_280] : memref<128x512xbf16, #tpu.memory_space<vmem>>, vector<128x512xbf16>
    %cst_281 = arith.constant dense<0.000000e+00> : vector<8x512xf32>
    %684 = tpu.matmul %682, %683, %cst_281 {dimension_numbers = #tpu.dot_dimension_numbers<[1], [0], [0], [1], [0, 0, 1, 1], [], []>} : vector<8x128xbf16>, vector<128x512xbf16>, vector<8x512xf32> -> vector<8x512xf32>
    %685 = arith.addf %681, %684 : vector<8x512xf32>
    %686 = arith.addf %685, %12 : vector<8x512xf32>
    %687 = vector.extract_strided_slice %686 {offsets = [0, 0], sizes = [8, 128], strides = [1, 1]} : vector<8x512xf32> to vector<8x128xf32>
    %cst_282 = arith.constant 5.000000e-01 : f32
    %688 = vector.broadcast %cst_282 : f32 to vector<8x128xf32>
    %689 = arith.mulf %688, %687 : vector<8x128xf32>
    %690 = math.tanh %689 : vector<8x128xf32>
    %cst_283 = arith.constant 1.000000e+00 : f32
    %691 = vector.broadcast %cst_283 : f32 to vector<8x128xf32>
    %692 = arith.addf %690, %691 : vector<8x128xf32>
    %cst_284 = arith.constant 5.000000e-01 : f32
    %693 = vector.broadcast %cst_284 : f32 to vector<8x128xf32>
    %694 = arith.mulf %693, %692 : vector<8x128xf32>
    %695 = vector.extract_strided_slice %686 {offsets = [0, 128], sizes = [8, 128], strides = [1, 1]} : vector<8x512xf32> to vector<8x128xf32>
    %cst_285 = arith.constant 5.000000e-01 : f32
    %696 = vector.broadcast %cst_285 : f32 to vector<8x128xf32>
    %697 = arith.mulf %696, %695 : vector<8x128xf32>
    %698 = math.tanh %697 : vector<8x128xf32>
    %cst_286 = arith.constant 1.000000e+00 : f32
    %699 = vector.broadcast %cst_286 : f32 to vector<8x128xf32>
    %700 = arith.addf %698, %699 : vector<8x128xf32>
    %cst_287 = arith.constant 5.000000e-01 : f32
    %701 = vector.broadcast %cst_287 : f32 to vector<8x128xf32>
    %702 = arith.mulf %701, %700 : vector<8x128xf32>
    %703 = vector.extract_strided_slice %686 {offsets = [0, 256], sizes = [8, 128], strides = [1, 1]} : vector<8x512xf32> to vector<8x128xf32>
    %704 = math.tanh %703 : vector<8x128xf32>
    %705 = vector.extract_strided_slice %686 {offsets = [0, 384], sizes = [8, 128], strides = [1, 1]} : vector<8x512xf32> to vector<8x128xf32>
    %cst_288 = arith.constant 5.000000e-01 : f32
    %706 = vector.broadcast %cst_288 : f32 to vector<8x128xf32>
    %707 = arith.mulf %706, %705 : vector<8x128xf32>
    %708 = math.tanh %707 : vector<8x128xf32>
    %cst_289 = arith.constant 1.000000e+00 : f32
    %709 = vector.broadcast %cst_289 : f32 to vector<8x128xf32>
    %710 = arith.addf %708, %709 : vector<8x128xf32>
    %cst_290 = arith.constant 5.000000e-01 : f32
    %711 = vector.broadcast %cst_290 : f32 to vector<8x128xf32>
    %712 = arith.mulf %711, %710 : vector<8x128xf32>
    %713 = arith.mulf %702, %596 : vector<8x128xf32>
    %714 = arith.mulf %694, %704 : vector<8x128xf32>
    %715 = arith.addf %713, %714 : vector<8x128xf32>
    %716 = math.tanh %715 : vector<8x128xf32>
    %717 = arith.mulf %712, %716 : vector<8x128xf32>
    %718 = arith.truncf %717 : vector<8x128xf32> to vector<8x128xbf16>
    %c0_291 = arith.constant 0 : index
    %c0_292 = arith.constant 0 : index
    %719 = vector.load %arg10[%c0_291, %c0_292] : memref<128x256xbf16, #tpu.memory_space<vmem>>, vector<128x256xbf16>
    %cst_293 = arith.constant dense<0.000000e+00> : vector<8x256xf32>
    %720 = tpu.matmul %718, %719, %cst_293 {dimension_numbers = #tpu.dot_dimension_numbers<[1], [0], [0], [1], [0, 0, 1, 1], [], []>} : vector<8x128xbf16>, vector<128x256xbf16>, vector<8x256xf32> -> vector<8x256xf32>
    %721 = arith.addf %720, %15 : vector<8x256xf32>
    %c32_294 = arith.constant 32 : index
    %c0_295 = arith.constant 0 : index
    %722 = vector.load %arg12[%c32_294, %c0_295] : memref<64x256xf32, #tpu.memory_space<vmem>>, vector<8x256xf32>
    tpu.vector_store %arg12[%c32_294, %c0_295], %721 {strides = array<i32>} : memref<64x256xf32, #tpu.memory_space<vmem>>, vector<8x256xf32>,
    %c56 = arith.constant 56 : index
    %c0_296 = arith.constant 0 : index
    %723 = vector.load %arg15[%c56, %c0_296] : memref<64x512xf32, #tpu.memory_space<vmem>>, vector<8x512xf32>
    %724 = arith.truncf %639 : vector<8x128xf32> to vector<8x128xbf16>
    %c0_297 = arith.constant 0 : index
    %c0_298 = arith.constant 0 : index
    %725 = vector.load %arg2[%c0_297, %c0_298] : memref<128x512xbf16, #tpu.memory_space<vmem>>, vector<128x512xbf16>
    %cst_299 = arith.constant dense<0.000000e+00> : vector<8x512xf32>
    %726 = tpu.matmul %724, %725, %cst_299 {dimension_numbers = #tpu.dot_dimension_numbers<[1], [0], [0], [1], [0, 0, 1, 1], [], []>} : vector<8x128xbf16>, vector<128x512xbf16>, vector<8x512xf32> -> vector<8x512xf32>
    %727 = arith.addf %723, %726 : vector<8x512xf32>
    %728 = vector.extract_strided_slice %727 {offsets = [0, 0], sizes = [8, 128], strides = [1, 1]} : vector<8x512xf32> to vector<8x128xf32>
    %cst_300 = arith.constant 5.000000e-01 : f32
    %729 = vector.broadcast %cst_300 : f32 to vector<8x128xf32>
    %730 = arith.mulf %729, %728 : vector<8x128xf32>
    %731 = math.tanh %730 : vector<8x128xf32>
    %cst_301 = arith.constant 1.000000e+00 : f32
    %732 = vector.broadcast %cst_301 : f32 to vector<8x128xf32>
    %733 = arith.addf %731, %732 : vector<8x128xf32>
    %cst_302 = arith.constant 5.000000e-01 : f32
    %734 = vector.broadcast %cst_302 : f32 to vector<8x128xf32>
    %735 = arith.mulf %734, %733 : vector<8x128xf32>
    %736 = vector.extract_strided_slice %727 {offsets = [0, 128], sizes = [8, 128], strides = [1, 1]} : vector<8x512xf32> to vector<8x128xf32>
    %cst_303 = arith.constant 5.000000e-01 : f32
    %737 = vector.broadcast %cst_303 : f32 to vector<8x128xf32>
    %738 = arith.mulf %737, %736 : vector<8x128xf32>
    %739 = math.tanh %738 : vector<8x128xf32>
    %cst_304 = arith.constant 1.000000e+00 : f32
    %740 = vector.broadcast %cst_304 : f32 to vector<8x128xf32>
    %741 = arith.addf %739, %740 : vector<8x128xf32>
    %cst_305 = arith.constant 5.000000e-01 : f32
    %742 = vector.broadcast %cst_305 : f32 to vector<8x128xf32>
    %743 = arith.mulf %742, %741 : vector<8x128xf32>
    %744 = vector.extract_strided_slice %727 {offsets = [0, 256], sizes = [8, 128], strides = [1, 1]} : vector<8x512xf32> to vector<8x128xf32>
    %745 = math.tanh %744 : vector<8x128xf32>
    %746 = vector.extract_strided_slice %727 {offsets = [0, 384], sizes = [8, 128], strides = [1, 1]} : vector<8x512xf32> to vector<8x128xf32>
    %cst_306 = arith.constant 5.000000e-01 : f32
    %747 = vector.broadcast %cst_306 : f32 to vector<8x128xf32>
    %748 = arith.mulf %747, %746 : vector<8x128xf32>
    %749 = math.tanh %748 : vector<8x128xf32>
    %cst_307 = arith.constant 1.000000e+00 : f32
    %750 = vector.broadcast %cst_307 : f32 to vector<8x128xf32>
    %751 = arith.addf %749, %750 : vector<8x128xf32>
    %cst_308 = arith.constant 5.000000e-01 : f32
    %752 = vector.broadcast %cst_308 : f32 to vector<8x128xf32>
    %753 = arith.mulf %752, %751 : vector<8x128xf32>
    %754 = arith.mulf %743, %637 : vector<8x128xf32>
    %755 = arith.mulf %735, %745 : vector<8x128xf32>
    %756 = arith.addf %754, %755 : vector<8x128xf32>
    %757 = math.tanh %756 : vector<8x128xf32>
    %758 = arith.mulf %753, %757 : vector<8x128xf32>
    %759 = arith.truncf %639 : vector<8x128xf32> to vector<8x128xbf16>
    %c0_309 = arith.constant 0 : index
    %c0_310 = arith.constant 0 : index
    %760 = vector.load %arg4[%c0_309, %c0_310] : memref<128x512xbf16, #tpu.memory_space<vmem>>, vector<128x512xbf16>
    %cst_311 = arith.constant dense<0.000000e+00> : vector<8x512xf32>
    %761 = tpu.matmul %759, %760, %cst_311 {dimension_numbers = #tpu.dot_dimension_numbers<[1], [0], [0], [1], [0, 0, 1, 1], [], []>} : vector<8x128xbf16>, vector<128x512xbf16>, vector<8x512xf32> -> vector<8x512xf32>
    %762 = arith.truncf %678 : vector<8x128xf32> to vector<8x128xbf16>
    %c0_312 = arith.constant 0 : index
    %c0_313 = arith.constant 0 : index
    %763 = vector.load %arg5[%c0_312, %c0_313] : memref<128x512xbf16, #tpu.memory_space<vmem>>, vector<128x512xbf16>
    %cst_314 = arith.constant dense<0.000000e+00> : vector<8x512xf32>
    %764 = tpu.matmul %762, %763, %cst_314 {dimension_numbers = #tpu.dot_dimension_numbers<[1], [0], [0], [1], [0, 0, 1, 1], [], []>} : vector<8x128xbf16>, vector<128x512xbf16>, vector<8x512xf32> -> vector<8x512xf32>
    %765 = arith.addf %761, %764 : vector<8x512xf32>
    %766 = arith.addf %765, %9 : vector<8x512xf32>
    %767 = vector.extract_strided_slice %766 {offsets = [0, 0], sizes = [8, 128], strides = [1, 1]} : vector<8x512xf32> to vector<8x128xf32>
    %cst_315 = arith.constant 5.000000e-01 : f32
    %768 = vector.broadcast %cst_315 : f32 to vector<8x128xf32>
    %769 = arith.mulf %768, %767 : vector<8x128xf32>
    %770 = math.tanh %769 : vector<8x128xf32>
    %cst_316 = arith.constant 1.000000e+00 : f32
    %771 = vector.broadcast %cst_316 : f32 to vector<8x128xf32>
    %772 = arith.addf %770, %771 : vector<8x128xf32>
    %cst_317 = arith.constant 5.000000e-01 : f32
    %773 = vector.broadcast %cst_317 : f32 to vector<8x128xf32>
    %774 = arith.mulf %773, %772 : vector<8x128xf32>
    %775 = vector.extract_strided_slice %766 {offsets = [0, 128], sizes = [8, 128], strides = [1, 1]} : vector<8x512xf32> to vector<8x128xf32>
    %cst_318 = arith.constant 5.000000e-01 : f32
    %776 = vector.broadcast %cst_318 : f32 to vector<8x128xf32>
    %777 = arith.mulf %776, %775 : vector<8x128xf32>
    %778 = math.tanh %777 : vector<8x128xf32>
    %cst_319 = arith.constant 1.000000e+00 : f32
    %779 = vector.broadcast %cst_319 : f32 to vector<8x128xf32>
    %780 = arith.addf %778, %779 : vector<8x128xf32>
    %cst_320 = arith.constant 5.000000e-01 : f32
    %781 = vector.broadcast %cst_320 : f32 to vector<8x128xf32>
    %782 = arith.mulf %781, %780 : vector<8x128xf32>
    %783 = vector.extract_strided_slice %766 {offsets = [0, 256], sizes = [8, 128], strides = [1, 1]} : vector<8x512xf32> to vector<8x128xf32>
    %784 = math.tanh %783 : vector<8x128xf32>
    %785 = vector.extract_strided_slice %766 {offsets = [0, 384], sizes = [8, 128], strides = [1, 1]} : vector<8x512xf32> to vector<8x128xf32>
    %cst_321 = arith.constant 5.000000e-01 : f32
    %786 = vector.broadcast %cst_321 : f32 to vector<8x128xf32>
    %787 = arith.mulf %786, %785 : vector<8x128xf32>
    %788 = math.tanh %787 : vector<8x128xf32>
    %cst_322 = arith.constant 1.000000e+00 : f32
    %789 = vector.broadcast %cst_322 : f32 to vector<8x128xf32>
    %790 = arith.addf %788, %789 : vector<8x128xf32>
    %cst_323 = arith.constant 5.000000e-01 : f32
    %791 = vector.broadcast %cst_323 : f32 to vector<8x128xf32>
    %792 = arith.mulf %791, %790 : vector<8x128xf32>
    %793 = arith.mulf %782, %676 : vector<8x128xf32>
    %794 = arith.mulf %774, %784 : vector<8x128xf32>
    %795 = arith.addf %793, %794 : vector<8x128xf32>
    %796 = math.tanh %795 : vector<8x128xf32>
    %797 = arith.mulf %792, %796 : vector<8x128xf32>
    %798 = arith.truncf %678 : vector<8x128xf32> to vector<8x128xbf16>
    %c0_324 = arith.constant 0 : index
    %c0_325 = arith.constant 0 : index
    %799 = vector.load %arg7[%c0_324, %c0_325] : memref<128x512xbf16, #tpu.memory_space<vmem>>, vector<128x512xbf16>
    %cst_326 = arith.constant dense<0.000000e+00> : vector<8x512xf32>
    %800 = tpu.matmul %798, %799, %cst_326 {dimension_numbers = #tpu.dot_dimension_numbers<[1], [0], [0], [1], [0, 0, 1, 1], [], []>} : vector<8x128xbf16>, vector<128x512xbf16>, vector<8x512xf32> -> vector<8x512xf32>
    %801 = arith.truncf %717 : vector<8x128xf32> to vector<8x128xbf16>
    %c0_327 = arith.constant 0 : index
    %c0_328 = arith.constant 0 : index
    %802 = vector.load %arg8[%c0_327, %c0_328] : memref<128x512xbf16, #tpu.memory_space<vmem>>, vector<128x512xbf16>
    %cst_329 = arith.constant dense<0.000000e+00> : vector<8x512xf32>
    %803 = tpu.matmul %801, %802, %cst_329 {dimension_numbers = #tpu.dot_dimension_numbers<[1], [0], [0], [1], [0, 0, 1, 1], [], []>} : vector<8x128xbf16>, vector<128x512xbf16>, vector<8x512xf32> -> vector<8x512xf32>
    %804 = arith.addf %800, %803 : vector<8x512xf32>
    %805 = arith.addf %804, %12 : vector<8x512xf32>
    %806 = vector.extract_strided_slice %805 {offsets = [0, 0], sizes = [8, 128], strides = [1, 1]} : vector<8x512xf32> to vector<8x128xf32>
    %cst_330 = arith.constant 5.000000e-01 : f32
    %807 = vector.broadcast %cst_330 : f32 to vector<8x128xf32>
    %808 = arith.mulf %807, %806 : vector<8x128xf32>
    %809 = math.tanh %808 : vector<8x128xf32>
    %cst_331 = arith.constant 1.000000e+00 : f32
    %810 = vector.broadcast %cst_331 : f32 to vector<8x128xf32>
    %811 = arith.addf %809, %810 : vector<8x128xf32>
    %cst_332 = arith.constant 5.000000e-01 : f32
    %812 = vector.broadcast %cst_332 : f32 to vector<8x128xf32>
    %813 = arith.mulf %812, %811 : vector<8x128xf32>
    %814 = vector.extract_strided_slice %805 {offsets = [0, 128], sizes = [8, 128], strides = [1, 1]} : vector<8x512xf32> to vector<8x128xf32>
    %cst_333 = arith.constant 5.000000e-01 : f32
    %815 = vector.broadcast %cst_333 : f32 to vector<8x128xf32>
    %816 = arith.mulf %815, %814 : vector<8x128xf32>
    %817 = math.tanh %816 : vector<8x128xf32>
    %cst_334 = arith.constant 1.000000e+00 : f32
    %818 = vector.broadcast %cst_334 : f32 to vector<8x128xf32>
    %819 = arith.addf %817, %818 : vector<8x128xf32>
    %cst_335 = arith.constant 5.000000e-01 : f32
    %820 = vector.broadcast %cst_335 : f32 to vector<8x128xf32>
    %821 = arith.mulf %820, %819 : vector<8x128xf32>
    %822 = vector.extract_strided_slice %805 {offsets = [0, 256], sizes = [8, 128], strides = [1, 1]} : vector<8x512xf32> to vector<8x128xf32>
    %823 = math.tanh %822 : vector<8x128xf32>
    %824 = vector.extract_strided_slice %805 {offsets = [0, 384], sizes = [8, 128], strides = [1, 1]} : vector<8x512xf32> to vector<8x128xf32>
    %cst_336 = arith.constant 5.000000e-01 : f32
    %825 = vector.broadcast %cst_336 : f32 to vector<8x128xf32>
    %826 = arith.mulf %825, %824 : vector<8x128xf32>
    %827 = math.tanh %826 : vector<8x128xf32>
    %cst_337 = arith.constant 1.000000e+00 : f32
    %828 = vector.broadcast %cst_337 : f32 to vector<8x128xf32>
    %829 = arith.addf %827, %828 : vector<8x128xf32>
    %cst_338 = arith.constant 5.000000e-01 : f32
    %830 = vector.broadcast %cst_338 : f32 to vector<8x128xf32>
    %831 = arith.mulf %830, %829 : vector<8x128xf32>
    %832 = arith.mulf %821, %715 : vector<8x128xf32>
    %833 = arith.mulf %813, %823 : vector<8x128xf32>
    %834 = arith.addf %832, %833 : vector<8x128xf32>
    %835 = math.tanh %834 : vector<8x128xf32>
    %836 = arith.mulf %831, %835 : vector<8x128xf32>
    %837 = arith.truncf %836 : vector<8x128xf32> to vector<8x128xbf16>
    %c0_339 = arith.constant 0 : index
    %c0_340 = arith.constant 0 : index
    %838 = vector.load %arg10[%c0_339, %c0_340] : memref<128x256xbf16, #tpu.memory_space<vmem>>, vector<128x256xbf16>
    %cst_341 = arith.constant dense<0.000000e+00> : vector<8x256xf32>
    %839 = tpu.matmul %837, %838, %cst_341 {dimension_numbers = #tpu.dot_dimension_numbers<[1], [0], [0], [1], [0, 0, 1, 1], [], []>} : vector<8x128xbf16>, vector<128x256xbf16>, vector<8x256xf32> -> vector<8x256xf32>
    %840 = arith.addf %839, %15 : vector<8x256xf32>
    %c40_342 = arith.constant 40 : index
    %c0_343 = arith.constant 0 : index
    %841 = vector.load %arg12[%c40_342, %c0_343] : memref<64x256xf32, #tpu.memory_space<vmem>>, vector<8x256xf32>
    tpu.vector_store %arg12[%c40_342, %c0_343], %840 {strides = array<i32>} : memref<64x256xf32, #tpu.memory_space<vmem>>, vector<8x256xf32>,
    %842 = arith.truncf %758 : vector<8x128xf32> to vector<8x128xbf16>
    %c0_344 = arith.constant 0 : index
    %c0_345 = arith.constant 0 : index
    %843 = vector.load %arg4[%c0_344, %c0_345] : memref<128x512xbf16, #tpu.memory_space<vmem>>, vector<128x512xbf16>
    %cst_346 = arith.constant dense<0.000000e+00> : vector<8x512xf32>
    %844 = tpu.matmul %842, %843, %cst_346 {dimension_numbers = #tpu.dot_dimension_numbers<[1], [0], [0], [1], [0, 0, 1, 1], [], []>} : vector<8x128xbf16>, vector<128x512xbf16>, vector<8x512xf32> -> vector<8x512xf32>
    %845 = arith.truncf %797 : vector<8x128xf32> to vector<8x128xbf16>
    %c0_347 = arith.constant 0 : index
    %c0_348 = arith.constant 0 : index
    %846 = vector.load %arg5[%c0_347, %c0_348] : memref<128x512xbf16, #tpu.memory_space<vmem>>, vector<128x512xbf16>
    %cst_349 = arith.constant dense<0.000000e+00> : vector<8x512xf32>
    %847 = tpu.matmul %845, %846, %cst_349 {dimension_numbers = #tpu.dot_dimension_numbers<[1], [0], [0], [1], [0, 0, 1, 1], [], []>} : vector<8x128xbf16>, vector<128x512xbf16>, vector<8x512xf32> -> vector<8x512xf32>
    %848 = arith.addf %844, %847 : vector<8x512xf32>
    %849 = arith.addf %848, %9 : vector<8x512xf32>
    %850 = vector.extract_strided_slice %849 {offsets = [0, 0], sizes = [8, 128], strides = [1, 1]} : vector<8x512xf32> to vector<8x128xf32>
    %cst_350 = arith.constant 5.000000e-01 : f32
    %851 = vector.broadcast %cst_350 : f32 to vector<8x128xf32>
    %852 = arith.mulf %851, %850 : vector<8x128xf32>
    %853 = math.tanh %852 : vector<8x128xf32>
    %cst_351 = arith.constant 1.000000e+00 : f32
    %854 = vector.broadcast %cst_351 : f32 to vector<8x128xf32>
    %855 = arith.addf %853, %854 : vector<8x128xf32>
    %cst_352 = arith.constant 5.000000e-01 : f32
    %856 = vector.broadcast %cst_352 : f32 to vector<8x128xf32>
    %857 = arith.mulf %856, %855 : vector<8x128xf32>
    %858 = vector.extract_strided_slice %849 {offsets = [0, 128], sizes = [8, 128], strides = [1, 1]} : vector<8x512xf32> to vector<8x128xf32>
    %cst_353 = arith.constant 5.000000e-01 : f32
    %859 = vector.broadcast %cst_353 : f32 to vector<8x128xf32>
    %860 = arith.mulf %859, %858 : vector<8x128xf32>
    %861 = math.tanh %860 : vector<8x128xf32>
    %cst_354 = arith.constant 1.000000e+00 : f32
    %862 = vector.broadcast %cst_354 : f32 to vector<8x128xf32>
    %863 = arith.addf %861, %862 : vector<8x128xf32>
    %cst_355 = arith.constant 5.000000e-01 : f32
    %864 = vector.broadcast %cst_355 : f32 to vector<8x128xf32>
    %865 = arith.mulf %864, %863 : vector<8x128xf32>
    %866 = vector.extract_strided_slice %849 {offsets = [0, 256], sizes = [8, 128], strides = [1, 1]} : vector<8x512xf32> to vector<8x128xf32>
    %867 = math.tanh %866 : vector<8x128xf32>
    %868 = vector.extract_strided_slice %849 {offsets = [0, 384], sizes = [8, 128], strides = [1, 1]} : vector<8x512xf32> to vector<8x128xf32>
    %cst_356 = arith.constant 5.000000e-01 : f32
    %869 = vector.broadcast %cst_356 : f32 to vector<8x128xf32>
    %870 = arith.mulf %869, %868 : vector<8x128xf32>
    %871 = math.tanh %870 : vector<8x128xf32>
    %cst_357 = arith.constant 1.000000e+00 : f32
    %872 = vector.broadcast %cst_357 : f32 to vector<8x128xf32>
    %873 = arith.addf %871, %872 : vector<8x128xf32>
    %cst_358 = arith.constant 5.000000e-01 : f32
    %874 = vector.broadcast %cst_358 : f32 to vector<8x128xf32>
    %875 = arith.mulf %874, %873 : vector<8x128xf32>
    %876 = arith.mulf %865, %795 : vector<8x128xf32>
    %877 = arith.mulf %857, %867 : vector<8x128xf32>
    %878 = arith.addf %876, %877 : vector<8x128xf32>
    %879 = math.tanh %878 : vector<8x128xf32>
    %880 = arith.mulf %875, %879 : vector<8x128xf32>
    %881 = arith.truncf %797 : vector<8x128xf32> to vector<8x128xbf16>
    %c0_359 = arith.constant 0 : index
    %c0_360 = arith.constant 0 : index
    %882 = vector.load %arg7[%c0_359, %c0_360] : memref<128x512xbf16, #tpu.memory_space<vmem>>, vector<128x512xbf16>
    %cst_361 = arith.constant dense<0.000000e+00> : vector<8x512xf32>
    %883 = tpu.matmul %881, %882, %cst_361 {dimension_numbers = #tpu.dot_dimension_numbers<[1], [0], [0], [1], [0, 0, 1, 1], [], []>} : vector<8x128xbf16>, vector<128x512xbf16>, vector<8x512xf32> -> vector<8x512xf32>
    %884 = arith.truncf %836 : vector<8x128xf32> to vector<8x128xbf16>
    %c0_362 = arith.constant 0 : index
    %c0_363 = arith.constant 0 : index
    %885 = vector.load %arg8[%c0_362, %c0_363] : memref<128x512xbf16, #tpu.memory_space<vmem>>, vector<128x512xbf16>
    %cst_364 = arith.constant dense<0.000000e+00> : vector<8x512xf32>
    %886 = tpu.matmul %884, %885, %cst_364 {dimension_numbers = #tpu.dot_dimension_numbers<[1], [0], [0], [1], [0, 0, 1, 1], [], []>} : vector<8x128xbf16>, vector<128x512xbf16>, vector<8x512xf32> -> vector<8x512xf32>
    %887 = arith.addf %883, %886 : vector<8x512xf32>
    %888 = arith.addf %887, %12 : vector<8x512xf32>
    %889 = vector.extract_strided_slice %888 {offsets = [0, 0], sizes = [8, 128], strides = [1, 1]} : vector<8x512xf32> to vector<8x128xf32>
    %cst_365 = arith.constant 5.000000e-01 : f32
    %890 = vector.broadcast %cst_365 : f32 to vector<8x128xf32>
    %891 = arith.mulf %890, %889 : vector<8x128xf32>
    %892 = math.tanh %891 : vector<8x128xf32>
    %cst_366 = arith.constant 1.000000e+00 : f32
    %893 = vector.broadcast %cst_366 : f32 to vector<8x128xf32>
    %894 = arith.addf %892, %893 : vector<8x128xf32>
    %cst_367 = arith.constant 5.000000e-01 : f32
    %895 = vector.broadcast %cst_367 : f32 to vector<8x128xf32>
    %896 = arith.mulf %895, %894 : vector<8x128xf32>
    %897 = vector.extract_strided_slice %888 {offsets = [0, 128], sizes = [8, 128], strides = [1, 1]} : vector<8x512xf32> to vector<8x128xf32>
    %cst_368 = arith.constant 5.000000e-01 : f32
    %898 = vector.broadcast %cst_368 : f32 to vector<8x128xf32>
    %899 = arith.mulf %898, %897 : vector<8x128xf32>
    %900 = math.tanh %899 : vector<8x128xf32>
    %cst_369 = arith.constant 1.000000e+00 : f32
    %901 = vector.broadcast %cst_369 : f32 to vector<8x128xf32>
    %902 = arith.addf %900, %901 : vector<8x128xf32>
    %cst_370 = arith.constant 5.000000e-01 : f32
    %903 = vector.broadcast %cst_370 : f32 to vector<8x128xf32>
    %904 = arith.mulf %903, %902 : vector<8x128xf32>
    %905 = vector.extract_strided_slice %888 {offsets = [0, 256], sizes = [8, 128], strides = [1, 1]} : vector<8x512xf32> to vector<8x128xf32>
    %906 = math.tanh %905 : vector<8x128xf32>
    %907 = vector.extract_strided_slice %888 {offsets = [0, 384], sizes = [8, 128], strides = [1, 1]} : vector<8x512xf32> to vector<8x128xf32>
    %cst_371 = arith.constant 5.000000e-01 : f32
    %908 = vector.broadcast %cst_371 : f32 to vector<8x128xf32>
    %909 = arith.mulf %908, %907 : vector<8x128xf32>
    %910 = math.tanh %909 : vector<8x128xf32>
    %cst_372 = arith.constant 1.000000e+00 : f32
    %911 = vector.broadcast %cst_372 : f32 to vector<8x128xf32>
    %912 = arith.addf %910, %911 : vector<8x128xf32>
    %cst_373 = arith.constant 5.000000e-01 : f32
    %913 = vector.broadcast %cst_373 : f32 to vector<8x128xf32>
    %914 = arith.mulf %913, %912 : vector<8x128xf32>
    %915 = arith.mulf %904, %834 : vector<8x128xf32>
    %916 = arith.mulf %896, %906 : vector<8x128xf32>
    %917 = arith.addf %915, %916 : vector<8x128xf32>
    %918 = math.tanh %917 : vector<8x128xf32>
    %919 = arith.mulf %914, %918 : vector<8x128xf32>
    %920 = arith.truncf %919 : vector<8x128xf32> to vector<8x128xbf16>
    %c0_374 = arith.constant 0 : index
    %c0_375 = arith.constant 0 : index
    %921 = vector.load %arg10[%c0_374, %c0_375] : memref<128x256xbf16, #tpu.memory_space<vmem>>, vector<128x256xbf16>
    %cst_376 = arith.constant dense<0.000000e+00> : vector<8x256xf32>
    %922 = tpu.matmul %920, %921, %cst_376 {dimension_numbers = #tpu.dot_dimension_numbers<[1], [0], [0], [1], [0, 0, 1, 1], [], []>} : vector<8x128xbf16>, vector<128x256xbf16>, vector<8x256xf32> -> vector<8x256xf32>
    %923 = arith.addf %922, %15 : vector<8x256xf32>
    %c48_377 = arith.constant 48 : index
    %c0_378 = arith.constant 0 : index
    %924 = vector.load %arg12[%c48_377, %c0_378] : memref<64x256xf32, #tpu.memory_space<vmem>>, vector<8x256xf32>
    tpu.vector_store %arg12[%c48_377, %c0_378], %923 {strides = array<i32>} : memref<64x256xf32, #tpu.memory_space<vmem>>, vector<8x256xf32>,
    %925 = arith.truncf %880 : vector<8x128xf32> to vector<8x128xbf16>
    %c0_379 = arith.constant 0 : index
    %c0_380 = arith.constant 0 : index
    %926 = vector.load %arg7[%c0_379, %c0_380] : memref<128x512xbf16, #tpu.memory_space<vmem>>, vector<128x512xbf16>
    %cst_381 = arith.constant dense<0.000000e+00> : vector<8x512xf32>
    %927 = tpu.matmul %925, %926, %cst_381 {dimension_numbers = #tpu.dot_dimension_numbers<[1], [0], [0], [1], [0, 0, 1, 1], [], []>} : vector<8x128xbf16>, vector<128x512xbf16>, vector<8x512xf32> -> vector<8x512xf32>
    %928 = arith.truncf %919 : vector<8x128xf32> to vector<8x128xbf16>
    %c0_382 = arith.constant 0 : index
    %c0_383 = arith.constant 0 : index
    %929 = vector.load %arg8[%c0_382, %c0_383] : memref<128x512xbf16, #tpu.memory_space<vmem>>, vector<128x512xbf16>
    %cst_384 = arith.constant dense<0.000000e+00> : vector<8x512xf32>
    %930 = tpu.matmul %928, %929, %cst_384 {dimension_numbers = #tpu.dot_dimension_numbers<[1], [0], [0], [1], [0, 0, 1, 1], [], []>} : vector<8x128xbf16>, vector<128x512xbf16>, vector<8x512xf32> -> vector<8x512xf32>
    %931 = arith.addf %927, %930 : vector<8x512xf32>
    %932 = arith.addf %931, %12 : vector<8x512xf32>
    %933 = vector.extract_strided_slice %932 {offsets = [0, 0], sizes = [8, 128], strides = [1, 1]} : vector<8x512xf32> to vector<8x128xf32>
    %cst_385 = arith.constant 5.000000e-01 : f32
    %934 = vector.broadcast %cst_385 : f32 to vector<8x128xf32>
    %935 = arith.mulf %934, %933 : vector<8x128xf32>
    %936 = math.tanh %935 : vector<8x128xf32>
    %cst_386 = arith.constant 1.000000e+00 : f32
    %937 = vector.broadcast %cst_386 : f32 to vector<8x128xf32>
    %938 = arith.addf %936, %937 : vector<8x128xf32>
    %cst_387 = arith.constant 5.000000e-01 : f32
    %939 = vector.broadcast %cst_387 : f32 to vector<8x128xf32>
    %940 = arith.mulf %939, %938 : vector<8x128xf32>
    %941 = vector.extract_strided_slice %932 {offsets = [0, 128], sizes = [8, 128], strides = [1, 1]} : vector<8x512xf32> to vector<8x128xf32>
    %cst_388 = arith.constant 5.000000e-01 : f32
    %942 = vector.broadcast %cst_388 : f32 to vector<8x128xf32>
    %943 = arith.mulf %942, %941 : vector<8x128xf32>
    %944 = math.tanh %943 : vector<8x128xf32>
    %cst_389 = arith.constant 1.000000e+00 : f32
    %945 = vector.broadcast %cst_389 : f32 to vector<8x128xf32>
    %946 = arith.addf %944, %945 : vector<8x128xf32>
    %cst_390 = arith.constant 5.000000e-01 : f32
    %947 = vector.broadcast %cst_390 : f32 to vector<8x128xf32>
    %948 = arith.mulf %947, %946 : vector<8x128xf32>
    %949 = vector.extract_strided_slice %932 {offsets = [0, 256], sizes = [8, 128], strides = [1, 1]} : vector<8x512xf32> to vector<8x128xf32>
    %950 = math.tanh %949 : vector<8x128xf32>
    %951 = vector.extract_strided_slice %932 {offsets = [0, 384], sizes = [8, 128], strides = [1, 1]} : vector<8x512xf32> to vector<8x128xf32>
    %cst_391 = arith.constant 5.000000e-01 : f32
    %952 = vector.broadcast %cst_391 : f32 to vector<8x128xf32>
    %953 = arith.mulf %952, %951 : vector<8x128xf32>
    %954 = math.tanh %953 : vector<8x128xf32>
    %cst_392 = arith.constant 1.000000e+00 : f32
    %955 = vector.broadcast %cst_392 : f32 to vector<8x128xf32>
    %956 = arith.addf %954, %955 : vector<8x128xf32>
    %cst_393 = arith.constant 5.000000e-01 : f32
    %957 = vector.broadcast %cst_393 : f32 to vector<8x128xf32>
    %958 = arith.mulf %957, %956 : vector<8x128xf32>
    %959 = arith.mulf %948, %917 : vector<8x128xf32>
    %960 = arith.mulf %940, %950 : vector<8x128xf32>
    %961 = arith.addf %959, %960 : vector<8x128xf32>
    %962 = math.tanh %961 : vector<8x128xf32>
    %963 = arith.mulf %958, %962 : vector<8x128xf32>
    %964 = arith.truncf %963 : vector<8x128xf32> to vector<8x128xbf16>
    %c0_394 = arith.constant 0 : index
    %c0_395 = arith.constant 0 : index
    %965 = vector.load %arg10[%c0_394, %c0_395] : memref<128x256xbf16, #tpu.memory_space<vmem>>, vector<128x256xbf16>
    %cst_396 = arith.constant dense<0.000000e+00> : vector<8x256xf32>
    %966 = tpu.matmul %964, %965, %cst_396 {dimension_numbers = #tpu.dot_dimension_numbers<[1], [0], [0], [1], [0, 0, 1, 1], [], []>} : vector<8x128xbf16>, vector<128x256xbf16>, vector<8x256xf32> -> vector<8x256xf32>
    %967 = arith.addf %966, %15 : vector<8x256xf32>
    %c56_397 = arith.constant 56 : index
    %c0_398 = arith.constant 0 : index
    %968 = vector.load %arg12[%c56_397, %c0_398] : memref<64x256xf32, #tpu.memory_space<vmem>>, vector<8x256xf32>
    tpu.vector_store %arg12[%c56_397, %c0_398], %967 {strides = array<i32>} : memref<64x256xf32, #tpu.memory_space<vmem>>, vector<8x256xf32>,
    %c0_399 = arith.constant 0 : index
    %c0_400 = arith.constant 0 : index
    %c0_401 = arith.constant 0 : index
    %969 = vector.load %arg13[%c0_399, %c0_400, %c0_401] : memref<3x8x128xf32, #tpu.memory_space<vmem>>, vector<1x8x128xf32>
    %970 = vector.shape_cast %969 : vector<1x8x128xf32> to vector<8x128xf32>
    %971 = vector.shape_cast %758 : vector<8x128xf32> to vector<1x8x128xf32>
    tpu.vector_store %arg13[%c0_399, %c0_400, %c0_401], %971 {strides = array<i32>} : memref<3x8x128xf32, #tpu.memory_space<vmem>>, vector<1x8x128xf32>,
    %c1 = arith.constant 1 : index
    %c0_402 = arith.constant 0 : index
    %c0_403 = arith.constant 0 : index
    %972 = vector.load %arg13[%c1, %c0_402, %c0_403] : memref<3x8x128xf32, #tpu.memory_space<vmem>>, vector<1x8x128xf32>
    %973 = vector.shape_cast %972 : vector<1x8x128xf32> to vector<8x128xf32>
    %974 = vector.shape_cast %880 : vector<8x128xf32> to vector<1x8x128xf32>
    tpu.vector_store %arg13[%c1, %c0_402, %c0_403], %974 {strides = array<i32>} : memref<3x8x128xf32, #tpu.memory_space<vmem>>, vector<1x8x128xf32>,
    %c2 = arith.constant 2 : index
    %c0_404 = arith.constant 0 : index
    %c0_405 = arith.constant 0 : index
    %975 = vector.load %arg13[%c2, %c0_404, %c0_405] : memref<3x8x128xf32, #tpu.memory_space<vmem>>, vector<1x8x128xf32>
    %976 = vector.shape_cast %975 : vector<1x8x128xf32> to vector<8x128xf32>
    %977 = vector.shape_cast %963 : vector<8x128xf32> to vector<1x8x128xf32>
    tpu.vector_store %arg13[%c2, %c0_404, %c0_405], %977 {strides = array<i32>} : memref<3x8x128xf32, #tpu.memory_space<vmem>>, vector<1x8x128xf32>,
    %c0_406 = arith.constant 0 : index
    %c0_407 = arith.constant 0 : index
    %c0_408 = arith.constant 0 : index
    %978 = vector.load %arg14[%c0_406, %c0_407, %c0_408] : memref<3x8x128xf32, #tpu.memory_space<vmem>>, vector<1x8x128xf32>
    %979 = vector.shape_cast %978 : vector<1x8x128xf32> to vector<8x128xf32>
    %980 = vector.shape_cast %756 : vector<8x128xf32> to vector<1x8x128xf32>
    tpu.vector_store %arg14[%c0_406, %c0_407, %c0_408], %980 {strides = array<i32>} : memref<3x8x128xf32, #tpu.memory_space<vmem>>, vector<1x8x128xf32>,
    %c1_409 = arith.constant 1 : index
    %c0_410 = arith.constant 0 : index
    %c0_411 = arith.constant 0 : index
    %981 = vector.load %arg14[%c1_409, %c0_410, %c0_411] : memref<3x8x128xf32, #tpu.memory_space<vmem>>, vector<1x8x128xf32>
    %982 = vector.shape_cast %981 : vector<1x8x128xf32> to vector<8x128xf32>
    %983 = vector.shape_cast %878 : vector<8x128xf32> to vector<1x8x128xf32>
    tpu.vector_store %arg14[%c1_409, %c0_410, %c0_411], %983 {strides = array<i32>} : memref<3x8x128xf32, #tpu.memory_space<vmem>>, vector<1x8x128xf32>,
    %c2_412 = arith.constant 2 : index
    %c0_413 = arith.constant 0 : index
    %c0_414 = arith.constant 0 : index
    %984 = vector.load %arg14[%c2_412, %c0_413, %c0_414] : memref<3x8x128xf32, #tpu.memory_space<vmem>>, vector<1x8x128xf32>
    %985 = vector.shape_cast %984 : vector<1x8x128xf32> to vector<8x128xf32>
    %986 = vector.shape_cast %961 : vector<8x128xf32> to vector<1x8x128xf32>
    tpu.vector_store %arg14[%c2_412, %c0_413, %c0_414], %986 {strides = array<i32>} : memref<3x8x128xf32, #tpu.memory_space<vmem>>, vector<1x8x128xf32>,
    return
  }
}

</mosaic_0001>

<bundles_post_ra>
// kernel: poetry_forward.1
= control target key start
LH: loop header
LB: loop body
LE: loop exit
PB: predicated region body
PF: predicated region fallthrough
CT: control target
= control target key end

     0   :  { %20 = vsyncpa [#allocation4], 0  ;;  %v21216_v2 = vmov 0   ;;  %s21201_s0 = inlined_call_operand.vmem [shape: bf16[64,128], index: 0, kind: input, shape index: {}]   ;;  %s21202_s1 = inlined_call_operand.vmem [shape: bf16[128,512], index: 1, kind: input, shape index: {}]   ;;  %s21203_s2 = inlined_call_operand.vmem [shape: bf16[128,512], index: 2, kind: input, shape index: {}]   ;;  %s21204_s3 = inlined_call_operand.vmem [shape: f32[1,512], index: 3, kind: input, shape index: {}]   ;;  %s21205_s4 = inlined_call_operand.vmem [shape: bf16[128,512], index: 4, kind: input, shape index: {}]   ;;  %s21206_s5 = inlined_call_operand.vmem [shape: bf16[128,512], index: 5, kind: input, shape index: {}]   ;;  %s21207_s6 = inlined_call_operand.vmem [shape: f32[1,512], index: 6, kind: input, shape index: {}]   ;;  %s21208_s7 = inlined_call_operand.vmem [shape: bf16[128,512], index: 7, kind: input, shape index: {}]   ;;  %s21209_s8 = inlined_call_operand.vmem [shape: bf16[128,512], index: 8, kind: input, shape index: {}]   ;;  %s21210_s9 = inlined_call_operand.vmem [shape: f32[1,512], index: 9, kind: input, shape index: {}]   ;;  %s21211_s10 = inlined_call_operand.vmem [shape: bf16[128,256], index: 10, kind: input, shape index: {}]   ;;  %s21212_s11 = inlined_call_operand.vmem [shape: f32[1,256], index: 11, kind: input, shape index: {}]   ;;  %s21213_s12 = inlined_call_operand.hbm [shape: f32[64,256], index: 12, kind: output, shape index: {0}]   ;;  %s21214_s13 = inlined_call_operand.hbm [shape: f32[3,8,128], index: 13, kind: output, shape index: {1}]   ;;  %s21215_s14 = inlined_call_operand.hbm [shape: f32[3,8,128], index: 14, kind: output, shape index: {2}]  }
   0x1   :  { %v13796_v0 = vld [vmem:[%s21202_s1 + $0x4] ss:$16 sps:$4 sm:$0xff]   ;;  %v13798_v1 = vld [vmem:[%s21202_s1 + $0xc] ss:$16 sps:$4 sm:$0xff]   ;;  %325 = vmatprep.mubr.bf16.mxu0 %v21216_v2  ;;  %398 = vmatprep.mubr.bf16.mxu1 %v21216_v2  ;;  %v13800_v3 = vld [vmem:[%s21202_s1] ss:$16 sps:$4 sm:$0xff]  }
   0x2   :  { %293 = vmatprep.subr.bf16.mxu0 %v13796_v0  ;;  %v13801_v4 = vld [vmem:[%s21202_s1 + $0x8] ss:$16 sps:$4 sm:$0xff]   ;;  %366 = vmatprep.subr.bf16.mxu1 %v13798_v1  ;;  %v13802_v5 = vld [vmem:[%s21202_s1 + $0x24] ss:$16 sps:$4 sm:$0xff]   ;;  %v13804_v6 = vld [vmem:[%s21202_s1 + $0x2c] ss:$16 sps:$4 sm:$0xff]  }
   0x3   :  { %294 = vmatpush1.bf16.msra.mxu0 %v13800_v3  ;;  %367 = vmatpush1.bf16.msra.mxu1 %v13801_v4  ;;  %v13806_v7 = vld [vmem:[%s21202_s1 + $0x20] ss:$16 sps:$4 sm:$0xff]   ;;  %v13807_v8 = vld [vmem:[%s21202_s1 + $0x28] ss:$16 sps:$4 sm:$0xff]   ;;  %v13808_v9 = vld [vmem:[%s21202_s1 + $0x44] ss:$16 sps:$4 sm:$0xff]  }
   0x4   :  { %295 = vmatprep.subr.bf16.mxu0 %v13802_v5  ;;  %368 = vmatprep.subr.bf16.mxu1 %v13804_v6  ;;  %v13810_v10 = vld [vmem:[%s21202_s1 + $0x4c] ss:$16 sps:$4 sm:$0xff]   ;;  %v13812_v11 = vld [vmem:[%s21202_s1 + $0x40] ss:$16 sps:$4 sm:$0xff]   ;;  %v13813_v12 = vld [vmem:[%s21202_s1 + $0x48] ss:$16 sps:$4 sm:$0xff]  }
   0x5   :  { %v13814_v13 = vld [vmem:[%s21202_s1 + $0x64] ss:$16 sps:$4 sm:$0xff]   ;;  %v13816_v14 = vld [vmem:[%s21202_s1 + $0x6c] ss:$16 sps:$4 sm:$0xff]   ;;  %v13818_v15 = vld [vmem:[%s21202_s1 + $0x60] ss:$16 sps:$4 sm:$0xff]  }
   0x6   :  { %v13819_v16 = vld [vmem:[%s21202_s1 + $0x68] ss:$16 sps:$4 sm:$0xff]   ;;  %v13820_v17 = vld [vmem:[%s21202_s1 + $0x84] ss:$16 sps:$4 sm:$0xff]   ;;  %v13822_v18 = vld [vmem:[%s21202_s1 + $0x8c] ss:$16 sps:$4 sm:$0xff]  }
   0x7   :  { %296 = vmatpush1.bf16.msra.mxu0 %v13806_v7  ;;  %369 = vmatpush1.bf16.msra.mxu1 %v13807_v8  ;;  %v13824_v19 = vld [vmem:[%s21202_s1 + $0x80] ss:$16 sps:$4 sm:$0xff]   ;;  %v13825_v20 = vld [vmem:[%s21202_s1 + $0x88] ss:$16 sps:$4 sm:$0xff]   ;;  %v13826_v21 = vld [vmem:[%s21202_s1 + $0xa4] ss:$16 sps:$4 sm:$0xff]   ;;  %v89_v8 = vlaneseq }
   0x8   :  { %297 = vmatprep.subr.bf16.mxu0 %v13808_v9  ;;  %370 = vmatprep.subr.bf16.mxu1 %v13810_v10  ;;  %v13828_v22 = vld [vmem:[%s21202_s1 + $0xac] ss:$16 sps:$4 sm:$0xff]   ;;  %v13830_v23 = vld [vmem:[%s21202_s1 + $0xa0] ss:$16 sps:$4 sm:$0xff]   ;;  %v13831_v24 = vld [vmem:[%s21202_s1 + $0xa8] ss:$16 sps:$4 sm:$0xff]  }
   0x9   :  { %v13832_v25 = vld [vmem:[%s21202_s1 + $0xc4] ss:$16 sps:$4 sm:$0xff]   ;;  %v13834_v26 = vld [vmem:[%s21202_s1 + $0xcc] ss:$16 sps:$4 sm:$0xff]   ;;  %v13836_v27 = vld [vmem:[%s21202_s1 + $0xc0] ss:$16 sps:$4 sm:$0xff]  }
   0xa   :  { %v13837_v28 = vld [vmem:[%s21202_s1 + $0xc8] ss:$16 sps:$4 sm:$0xff]   ;;  %v13838_v29 = vld [vmem:[%s21202_s1 + $0xe4] ss:$16 sps:$4 sm:$0xff]   ;;  %v13840_v30 = vld [vmem:[%s21202_s1 + $0xec] ss:$16 sps:$4 sm:$0xff]  }
   0xb   :  { %298 = vmatpush1.bf16.msra.mxu0 %v13812_v11  ;;  %371 = vmatpush1.bf16.msra.mxu1 %v13813_v12  ;;  %v13842_v31 = vld [vmem:[%s21202_s1 + $0xe0] ss:$16 sps:$4 sm:$0xff]   ;;  %v13843_v32 = vld [vmem:[%s21202_s1 + $0xe8] ss:$16 sps:$4 sm:$0xff]   ;;  %v16168_v33 = vld [vmem:[%s21203_s2 + $0x4] ss:$16 sps:$4 sm:$0xff]  }
   0xc   :  { %299 = vmatprep.subr.bf16.mxu0 %v13814_v13  ;;  %372 = vmatprep.subr.bf16.mxu1 %v13816_v14  ;;  %v16173_v34 = vld [vmem:[%s21203_s2 + $0xc] ss:$16 sps:$4 sm:$0xff]   ;;  %v13844_v35 = vld [vmem:[%s21201_s0] sm:$0xff]   ;;  %v16186_v37 = vld [vmem:[%s21203_s2 + $0x8] ss:$16 sps:$4 sm:$0xff]   ;;  %v90_v9 = vshrl.u32 %v89_v8, 7 }
   0xd   :  { %v16181_v36 = vld [vmem:[%s21203_s2] ss:$16 sps:$4 sm:$0xff]   ;;  %v16193_v38 = vld [vmem:[%s21203_s2 + $0x24] ss:$16 sps:$4 sm:$0xff]   ;;  %v16198_v39 = vld [vmem:[%s21203_s2 + $0x2c] ss:$16 sps:$4 sm:$0xff]  }
   0xe   :  { %v16203_v40 = vld [vmem:[%s21203_s2 + $0x20] ss:$16 sps:$4 sm:$0xff]   ;;  %v16210_v41 = vld [vmem:[%s21203_s2 + $0x28] ss:$16 sps:$4 sm:$0xff]   ;;  %v16217_v42 = vld [vmem:[%s21203_s2 + $0x44] ss:$16 sps:$4 sm:$0xff]  }
   0xf   :  { %300 = vmatpush1.bf16.msra.mxu0 %v13818_v15  ;;  %373 = vmatpush1.bf16.msra.mxu1 %v13819_v16  ;;  %v16222_v43 = vld [vmem:[%s21203_s2 + $0x4c] ss:$16 sps:$4 sm:$0xff]   ;;  %v16232_v45 = vld [vmem:[%s21203_s2 + $0x40] ss:$16 sps:$4 sm:$0xff]   ;;  %v16237_v46 = vld [vmem:[%s21203_s2 + $0x48] ss:$16 sps:$4 sm:$0xff]  }
  0x10   :  { %301 = vmatprep.subr.bf16.mxu0 %v13820_v17  ;;  %374 = vmatprep.subr.bf16.mxu1 %v13822_v18  ;;  %v13857_v44 = vld [vmem:[%s21201_s0 + $0x8] sm:$0xff]   ;;  %v16244_v47 = vld [vmem:[%s21203_s2 + $0x64] ss:$16 sps:$4 sm:$0xff]   ;;  %v16256_v49 = vld [vmem:[%s21203_s2 + $0x60] ss:$16 sps:$4 sm:$0xff]   ;;  %v16363_v10 = vsub.s32 2, %v90_v9 }
  0x11   :  { %v16251_v48 = vld [vmem:[%s21203_s2 + $0x6c] ss:$16 sps:$4 sm:$0xff]   ;;  %v16261_v50 = vld [vmem:[%s21203_s2 + $0x68] ss:$16 sps:$4 sm:$0xff]   ;;  %v16268_v51 = vld [vmem:[%s21203_s2 + $0x84] ss:$16 sps:$4 sm:$0xff]  }
  0x12   :  { %v16275_v52 = vld [vmem:[%s21203_s2 + $0x8c] ss:$16 sps:$4 sm:$0xff]   ;;  %v13870_v53 = vld [vmem:[%s21201_s0 + $0x10] sm:$0xff]   ;;  %v13874_v55 = vld [vmem:[%s21203_s2 + $0x88] ss:$16 sps:$4 sm:$0xff]   ;;  %v16365_v11 = vsub.s32 3, %v90_v9 }
  0x13   :  { %302 = vmatpush1.bf16.msra.mxu0 %v13824_v19  ;;  %375 = vmatpush1.bf16.msra.mxu1 %v13825_v20  ;;  %v13871_v54 = vld [vmem:[%s21203_s2 + $0x80] ss:$16 sps:$4 sm:$0xff]   ;;  %v13879_v56 = vld [vmem:[%s21203_s2 + $0xa4] ss:$16 sps:$4 sm:$0xff]   ;;  %v13882_v57 = vld [vmem:[%s21203_s2 + $0xac] ss:$16 sps:$4 sm:$0xff]  }
  0x14   :  { %303 = vmatprep.subr.bf16.mxu0 %v13826_v21  ;;  %376 = vmatprep.subr.bf16.mxu1 %v13828_v22  ;;  %v13877_v58 = vld [vmem:[%s21203_s2 + $0xa0] ss:$16 sps:$4 sm:$0xff]   ;;  %v13880_v59 = vld [vmem:[%s21203_s2 + $0xa8] ss:$16 sps:$4 sm:$0xff]   ;;  %v13886_v60 = vld [vmem:[%s21203_s2 + $0xc4] ss:$16 sps:$4 sm:$0xff]  }
  0x15   :  { %v13889_v61 = vld [vmem:[%s21203_s2 + $0xcc] ss:$16 sps:$4 sm:$0xff]   ;;  %v13884_v63 = vld [vmem:[%s21203_s2 + $0xc0] ss:$16 sps:$4 sm:$0xff]   ;;  %v13887_v0 = vld [vmem:[%s21203_s2 + $0xc8] ss:$16 sps:$4 sm:$0xff]  }
  0x16   :  { %v13883_v62 = vld [vmem:[%s21201_s0 + $0x18] sm:$0xff]   ;;  %v13892_v1 = vld [vmem:[%s21203_s2 + $0xe4] ss:$16 sps:$4 sm:$0xff]   ;;  %v13890_v4 = vld [vmem:[%s21203_s2 + $0xe0] ss:$16 sps:$4 sm:$0xff]   ;;  %v16367_v12 = vsub.s32 0, %v90_v9 }
  0x17   :  { %304 = vmatpush1.bf16.msra.mxu0 %v13830_v23  ;;  %377 = vmatpush1.bf16.msra.mxu1 %v13831_v24  ;;  %v13895_v3 = vld [vmem:[%s21203_s2 + $0xec] ss:$16 sps:$4 sm:$0xff]   ;;  %v13893_v5 = vld [vmem:[%s21203_s2 + $0xe8] ss:$16 sps:$4 sm:$0xff]   ;;  %v13898_v6 = vld [vmem:[%s21206_s5 + $0x4] ss:$16 sps:$4 sm:$0xff]  }
  0x18   :  { %305 = vmatprep.subr.bf16.mxu0 %v13832_v25  ;;  %378 = vmatprep.subr.bf16.mxu1 %v13834_v26  ;;  %v13901_v7 = vld [vmem:[%s21206_s5 + $0xc] ss:$16 sps:$4 sm:$0xff]   ;;  %v87_v13 = vld [vmem:[%s21204_s3] sm:$0xf]  ;;  %v16372_v14 = vsub.s32 1, %v90_v9 }
  0x19   :  { %v16375_v15 = vrot.slane %v87_v13, %v16363_v10  ;;  %v16382_v18 = vrot.slane %v87_v13, %v16365_v11  ;;  %v92_v19 = vrot.slane %v87_v13, %v16367_v12 }
  0x1a   :  { %v96_v22 = vrot.slane %v87_v13, %v16372_v14 }
  0x1b   :  { %306 = vmatpush1.bf16.msra.mxu0 %v13836_v27  ;;  %379 = vmatpush1.bf16.msra.mxu1 %v13837_v28 }
  0x1c   :  { %307 = vmatprep.subr.bf16.mxu0 %v13838_v29  ;;  %380 = vmatprep.subr.bf16.mxu1 %v13840_v30 }
  0x1f   :  { %308 = vmatpush1.bf16.msra.mxu0 %v13842_v31  ;;  %381 = vmatpush1.bf16.msra.mxu1 %v13843_v32 }
  0x20   :  { %723 = vmatprep.subr.bf16.mxu0 %v16168_v33  ;;  %764 = vmatprep.subr.bf16.mxu1 %v16173_v34 }
  0x22   :  { %326 = vmatmul.mubr.bf16.vlgmr.msra.gmra.mrb[0].mxu0 %v13844_v35  ;;  %399 = vmatmul.mubr.bf16.vlgmr.msra.gmra.mrb[0].mxu1 %v13844_v35 }
  0x23   :  { %724 = vmatpush1.bf16.msra.mxu0 %v16181_v36  ;;  %765 = vmatpush1.bf16.msra.mxu1 %v16186_v37 }
  0x24   :  { %725 = vmatprep.subr.bf16.mxu0 %v16193_v38  ;;  %766 = vmatprep.subr.bf16.mxu1 %v16198_v39 }
  0x25   :  { %335 = vmatprep.mubr.bf16.mxu0 %v21216_v2  ;;  %408 = vmatprep.mubr.bf16.mxu1 %v21216_v2 }
  0x27   :  { %726 = vmatpush1.bf16.msra.mxu0 %v16203_v40  ;;  %767 = vmatpush1.bf16.msra.mxu1 %v16210_v41 }
  0x28   :  { %727 = vmatprep.subr.bf16.mxu0 %v16217_v42  ;;  %768 = vmatprep.subr.bf16.mxu1 %v16222_v43 }
  0x2a   :  { %336 = vmatmul.mubr.bf16.gmra.mrb[4].mxu0 %v13857_v44  ;;  %409 = vmatmul.mubr.bf16.gmra.mrb[4].mxu1 %v13857_v44 }
  0x2b   :  { %728 = vmatpush1.bf16.msra.mxu0 %v16232_v45  ;;  %769 = vmatpush1.bf16.msra.mxu1 %v16237_v46 }
  0x2c   :  { %729 = vmatprep.subr.bf16.mxu0 %v16244_v47  ;;  %770 = vmatprep.subr.bf16.mxu1 %v16251_v48 }
  0x2d   :  { %345 = vmatprep.mubr.bf16.mxu0 %v21216_v2  ;;  %418 = vmatprep.mubr.bf16.mxu1 %v21216_v2 }
  0x2f   :  { %730 = vmatpush1.bf16.msra.mxu0 %v16256_v49  ;;  %771 = vmatpush1.bf16.msra.mxu1 %v16261_v50 }
  0x30   :  { %731 = vmatprep.subr.bf16.mxu0 %v16268_v51  ;;  %772 = vmatprep.subr.bf16.mxu1 %v16275_v52 }
  0x32   :  { %346 = vmatmul.mubr.bf16.gmra.mrb[8].mxu0 %v13870_v53  ;;  %419 = vmatmul.mubr.bf16.gmra.mrb[8].mxu1 %v13870_v53 }
  0x33   :  { %732 = vmatpush1.bf16.msra.mxu0 %v13871_v54  ;;  %773 = vmatpush1.bf16.msra.mxu1 %v13874_v55 }
  0x34   :  { %733 = vmatprep.subr.bf16.mxu0 %v13879_v56  ;;  %774 = vmatprep.subr.bf16.mxu1 %v13882_v57 }
  0x35   :  { %355 = vmatprep.mubr.bf16.mxu0 %v21216_v2  ;;  %428 = vmatprep.mubr.bf16.mxu1 %v21216_v2 }
  0x37   :  { %734 = vmatpush1.bf16.msra.mxu0 %v13877_v58  ;;  %775 = vmatpush1.bf16.msra.mxu1 %v13880_v59 }
  0x38   :  { %735 = vmatprep.subr.bf16.mxu0 %v13886_v60  ;;  %776 = vmatprep.subr.bf16.mxu1 %v13889_v61 }
  0x3a   :  { %356 = vmatmul.mubr.bf16.gmra.mrb[12].mxu0 %v13883_v62  ;;  %429 = vmatmul.mubr.bf16.gmra.mrb[12].mxu1 %v13883_v62 }
  0x3b   :  { %736 = vmatpush1.bf16.msra.mxu0 %v13884_v63  ;;  %777 = vmatpush1.bf16.msra.mxu1 %v13887_v0 }
  0x3c   :  { %737 = vmatprep.subr.bf16.mxu0 %v13892_v1  ;;  %778 = vmatprep.subr.bf16.mxu1 %v13895_v3 }
  0x3d   :  { %755 = vmatprep.mubr.bf16.mxu0 %v21216_v2  ;;  %796 = vmatprep.mubr.bf16.mxu1 %v21216_v2 }
  0x3f   :  { %738 = vmatpush1.bf16.msra.mxu0 %v13890_v4  ;;  %779 = vmatpush1.bf16.msra.mxu1 %v13893_v5 }
  0x40   :  { %832 = vmatprep.subr.bf16.mxu0 %v16168_v33  ;;  %873 = vmatprep.subr.bf16.mxu1 %v16173_v34 }
  0x42   :  { %756 = vmatmul.mubr.bf16.vlgmr.msra.gmra.mrb[16].mxu0 %v21216_v2  ;;  %797 = vmatmul.mubr.bf16.vlgmr.msra.gmra.mrb[16].mxu1 %v21216_v2 }
  0x43   :  { %833 = vmatpush1.bf16.msra.mxu0 %v16181_v36  ;;  %874 = vmatpush1.bf16.msra.mxu1 %v16186_v37 }
  0x44   :  { %834 = vmatprep.subr.bf16.mxu0 %v16193_v38  ;;  %875 = vmatprep.subr.bf16.mxu1 %v16198_v39 }
  0x45   :  { %864 = vmatprep.mubr.bf16.mxu0 %v21216_v2  ;;  %905 = vmatprep.mubr.bf16.mxu1 %v21216_v2 }
  0x47   :  { %835 = vmatpush1.bf16.msra.mxu0 %v16203_v40  ;;  %876 = vmatpush1.bf16.msra.mxu1 %v16210_v41 }
  0x48   :  { %836 = vmatprep.subr.bf16.mxu0 %v16217_v42  ;;  %877 = vmatprep.subr.bf16.mxu1 %v16222_v43 }
  0x4b   :  { %837 = vmatpush1.bf16.msra.mxu0 %v16232_v45  ;;  %878 = vmatpush1.bf16.msra.mxu1 %v16237_v46 }
  0x4c   :  { %838 = vmatprep.subr.bf16.mxu0 %v16244_v47  ;;  %879 = vmatprep.subr.bf16.mxu1 %v16251_v48 }
  0x4f   :  { %839 = vmatpush1.bf16.msra.mxu0 %v16256_v49  ;;  %880 = vmatpush1.bf16.msra.mxu1 %v16261_v50 }
  0x50   :  { %840 = vmatprep.subr.bf16.mxu0 %v16268_v51  ;;  %881 = vmatprep.subr.bf16.mxu1 %v16275_v52 }
  0x53   :  { %841 = vmatpush1.bf16.msra.mxu0 %v13871_v54  ;;  %882 = vmatpush1.bf16.msra.mxu1 %v13874_v55 }
  0x54   :  { %842 = vmatprep.subr.bf16.mxu0 %v13879_v56  ;;  %883 = vmatprep.subr.bf16.mxu1 %v13882_v57 }
  0x57   :  { %843 = vmatpush1.bf16.msra.mxu0 %v13877_v58  ;;  %884 = vmatpush1.bf16.msra.mxu1 %v13880_v59 }
  0x58   :  { %844 = vmatprep.subr.bf16.mxu0 %v13886_v60  ;;  %885 = vmatprep.subr.bf16.mxu1 %v13889_v61 }
  0x5b   :  { %845 = vmatpush1.bf16.msra.mxu0 %v13884_v63  ;;  %886 = vmatpush1.bf16.msra.mxu1 %v13887_v0 }
  0x5c   :  { %846 = vmatprep.subr.bf16.mxu0 %v13892_v1  ;;  %887 = vmatprep.subr.bf16.mxu1 %v13895_v3 }
  0x5f   :  { %847 = vmatpush1.bf16.msra.mxu0 %v13890_v4  ;;  %888 = vmatpush1.bf16.msra.mxu1 %v13893_v5 }
  0x60   :  { %1160 = vmatprep.subr.bf16.mxu0 %v13898_v6  ;;  %1201 = vmatprep.subr.bf16.mxu1 %v13901_v7 }
  0xf5   :  { %v16377_v16 = vpop.f32.mrb[0].mxu0  ;;  %v16379_v17 = vpop.f32.mrb[0].mxu1 }
  0xf6   :  { %v329_v20 = vpop.f32.mrb[1].mxu0  ;;  %v402_v21 = vpop.f32.mrb[1].mxu1 }
  0xf7   :  { %v331_v23 = vpop.f32.mrb[2].mxu0  ;;  %v404_v24 = vpop.f32.mrb[2].mxu1 }
  0xf8   :  { %v16386_v25 = vadd.f32 %v331_v23, %v92_v19  ;;  %v333_v26 = vpop.f32.mrb[3].mxu0  ;;  %v16389_v27 = vadd.f32 %v404_v24, %v16375_v15  ;;  %v406_v28 = vpop.f32.mrb[3].mxu1 }
  0xf9   :  { %v16391_v29 = vadd.f32 %v333_v26, %v96_v22  ;;  %v16394_v30 = vadd.f32 %v406_v28, %v16382_v18 }
  0xfd   :  { %v337_v31 = vpop.f32.mrb[4].mxu0  ;;  %v410_v32 = vpop.f32.mrb[4].mxu1 }
  0xfe   :  { %v16396_v33 = vadd.f32 %v337_v31, %v92_v19  ;;  %v339_v34 = vpop.f32.mrb[5].mxu0  ;;  %v16399_v35 = vadd.f32 %v410_v32, %v16375_v15  ;;  %v412_v36 = vpop.f32.mrb[5].mxu1  ;;  %v328_v32 = vadd.f32 %v16377_v16, %v92_v19 }
  0xff   :  { %v16401_v37 = vadd.f32 %v339_v34, %v96_v22  ;;  %v341_v38 = vpop.f32.mrb[6].mxu0  ;;  %v16404_v39 = vadd.f32 %v412_v36, %v16382_v18  ;;  %v414_v40 = vpop.f32.mrb[6].mxu1  ;;  %v401_v34 = vadd.f32 %v16379_v17, %v16375_v15  ;;  %v330_v36 = vadd.f32 %v329_v20, %v96_v22 }
 0x100   :  { %v16406_v41 = vadd.f32 %v341_v38, %v92_v19  ;;  %v343_v42 = vpop.f32.mrb[7].mxu0  ;;  %v16409_v43 = vadd.f32 %v414_v40, %v16375_v15  ;;  %v416_v44 = vpop.f32.mrb[7].mxu1  ;;  %v403_v38 = vadd.f32 %v402_v21, %v16382_v18 }
 0x101   :  { %v16411_v45 = vadd.f32 %v343_v42, %v96_v22  ;;  %v16414_v46 = vadd.f32 %v416_v44, %v16382_v18 }
 0x102   :  { %21244 = vst [vmem:[#allocation10_spill] sm:$0xff] %v16406_v41  ;;  %21245 = vst [vmem:[#allocation11_spill] sm:$0xff] %v16409_v43 }
 0x103   :  { %21246 = vst [vmem:[#allocation12_spill] sm:$0xff] %v16411_v45  ;;  %21247 = vst [vmem:[#allocation13_spill] sm:$0xff] %v16414_v46 }
 0x105   :  { %v347_v47 = vpop.f32.mrb[8].mxu0  ;;  %v420_v48 = vpop.f32.mrb[8].mxu1 }
 0x106   :  { %v16416_v49 = vadd.f32 %v347_v47, %v92_v19  ;;  %v349_v50 = vpop.f32.mrb[9].mxu0  ;;  %v16419_v51 = vadd.f32 %v420_v48, %v16375_v15  ;;  %v422_v52 = vpop.f32.mrb[9].mxu1 }
 0x107   :  { %v16421_v53 = vadd.f32 %v349_v50, %v96_v22  ;;  %v351_v54 = vpop.f32.mrb[10].mxu0  ;;  %v16424_v55 = vadd.f32 %v422_v52, %v16382_v18  ;;  %v424_v56 = vpop.f32.mrb[10].mxu1 }
 0x108   :  { %21248 = vst [vmem:[#allocation14_spill] sm:$0xff] %v16416_v49  ;;  %21249 = vst [vmem:[#allocation15_spill] sm:$0xff] %v16419_v51  ;;  %v16426_v57 = vadd.f32 %v351_v54, %v92_v19  ;;  %v353_v58 = vpop.f32.mrb[11].mxu0  ;;  %v16429_v59 = vadd.f32 %v424_v56, %v16375_v15  ;;  %v426_v60 = vpop.f32.mrb[11].mxu1 }
 0x109   :  { %21250 = vst [vmem:[#allocation16_spill] sm:$0xff] %v16421_v53  ;;  %21251 = vst [vmem:[#allocation17_spill] sm:$0xff] %v16424_v55  ;;  %v16431_v61 = vadd.f32 %v353_v58, %v96_v22  ;;  %v16434_v62 = vadd.f32 %v426_v60, %v16382_v18 }
 0x10a   :  { %21252 = vst [vmem:[#allocation18_spill] sm:$0xff] %v16426_v57  ;;  %21253 = vst [vmem:[#allocation19_spill] sm:$0xff] %v16429_v59 }
 0x10b   :  { %21254 = vst [vmem:[#allocation20_spill] sm:$0xff] %v16431_v61  ;;  %21255 = vst [vmem:[#allocation21_spill] sm:$0xff] %v16434_v62 }
 0x10d   :  { %v357_v63 = vpop.f32.mrb[12].mxu0  ;;  %v430_v0 = vpop.f32.mrb[12].mxu1 }
 0x10e   :  { %v16436_v1 = vadd.f32 %v357_v63, %v92_v19  ;;  %v359_v3 = vpop.f32.mrb[13].mxu0  ;;  %v16439_v4 = vadd.f32 %v430_v0, %v16375_v15  ;;  %v432_v5 = vpop.f32.mrb[13].mxu1 }
 0x10f   :  { %v16441_v6 = vadd.f32 %v359_v3, %v96_v22  ;;  %v361_v7 = vpop.f32.mrb[14].mxu0  ;;  %v16444_v8 = vadd.f32 %v432_v5, %v16382_v18  ;;  %v434_v9 = vpop.f32.mrb[14].mxu1 }
 0x110   :  { %21256 = vst [vmem:[#allocation22_spill] sm:$0xff] %v16436_v1  ;;  %21257 = vst [vmem:[#allocation23_spill] sm:$0xff] %v16439_v4  ;;  %v16446_v13 = vadd.f32 %v361_v7, %v92_v19  ;;  %v363_v23 = vpop.f32.mrb[15].mxu0  ;;  %v16449_v24 = vadd.f32 %v434_v9, %v16375_v15  ;;  %v436_v26 = vpop.f32.mrb[15].mxu1 }
 0x111   :  { %21258 = vst [vmem:[#allocation24_spill] sm:$0xff] %v16441_v6  ;;  %21259 = vst [vmem:[#allocation25_spill] sm:$0xff] %v16444_v8  ;;  %v16451_v28 = vadd.f32 %v363_v23, %v96_v22  ;;  %v16454_v31 = vadd.f32 %v436_v26, %v16382_v18 }
 0x112   :  { %21260 = vst [vmem:[#allocation26_spill] sm:$0xff] %v16446_v13  ;;  %21261 = vst [vmem:[#allocation27_spill] sm:$0xff] %v16449_v24 }
 0x113   :  { %21262 = vst [vmem:[#allocation28_spill] sm:$0xff] %v16451_v28  ;;  %21263 = vst [vmem:[#allocation29_spill] sm:$0xff] %v16454_v31 }
 0x115   :  { %v757_v40 = vpop.f32.mrb[16].mxu0  ;;  %v798_v42 = vpop.f32.mrb[16].mxu1 }
 0x116   :  { %v805_v44 = vadd.f32 %v757_v40, %v328_v32  ;;  %v807_v47 = vadd.f32 %v798_v42, %v401_v34  ;;  %v759_v48 = vpop.f32.mrb[17].mxu0  ;;  %v800_v50 = vpop.f32.mrb[17].mxu1  ;;  %v13904_v42 = vld [vmem:[%s21206_s5 + $0x24] ss:$16 sps:$4 sm:$0xff]  }
 0x117   :  { %v806_v52 = vadd.f32 %v759_v48, %v330_v36  ;;  %v808_v54 = vadd.f32 %v800_v50, %v403_v38  ;;  %v761_v56 = vpop.f32.mrb[18].mxu0  ;;  %v802_v58 = vpop.f32.mrb[18].mxu1  ;;  %v13896_v36 = vld [vmem:[%s21206_s5] ss:$16 sps:$4 sm:$0xff]   ;;  %v13899_v38 = vld [vmem:[%s21206_s5 + $0x8] ss:$16 sps:$4 sm:$0xff]  }
 0x118   :  { %v809_v60 = vmul.f32 0.5, %v805_v44  ;;  %v762_v63 = vpop.f32.mrb[19].mxu0  ;;  %v803_v0 = vpop.f32.mrb[19].mxu1  ;;  %v13907_v44 = vld [vmem:[%s21206_s5 + $0x2c] ss:$16 sps:$4 sm:$0xff]  }
 0x119   :  { %v813_v16 = vmul.f32 0.5, %v806_v52  ;;  %v818_v15 = vmul.f32 0.5, %v808_v54  ;;  %v13902_v48 = vld [vmem:[%s21206_s5 + $0x20] ss:$16 sps:$4 sm:$0xff]   ;;  %v13905_v50 = vld [vmem:[%s21206_s5 + $0x28] ss:$16 sps:$4 sm:$0xff]  }
 0x11a   :  { %15600 = vtanh.f32 %v809_v60  ;;  %v13910_v52 = vld [vmem:[%s21206_s5 + $0x44] ss:$16 sps:$4 sm:$0xff]   ;;  %v13913_v54 = vld [vmem:[%s21206_s5 + $0x4c] ss:$16 sps:$4 sm:$0xff]   ;;  %v13908_v56 = vld [vmem:[%s21206_s5 + $0x40] ss:$16 sps:$4 sm:$0xff]  }
 0x11b   :  { %15602 = vtanh.f32 %v813_v16  ;;  %v13911_v58 = vld [vmem:[%s21206_s5 + $0x48] ss:$16 sps:$4 sm:$0xff]   ;;  %v13916_v60 = vld [vmem:[%s21206_s5 + $0x64] ss:$16 sps:$4 sm:$0xff]   ;;  %v13919_v63 = vld [vmem:[%s21206_s5 + $0x6c] ss:$16 sps:$4 sm:$0xff]  }
 0x11c   :  { %15604 = vtanh.f32 %v807_v47  ;;  %v13914_v0 = vld [vmem:[%s21206_s5 + $0x60] ss:$16 sps:$4 sm:$0xff]   ;;  %v13917_v16 = vld [vmem:[%s21206_s5 + $0x68] ss:$16 sps:$4 sm:$0xff]  }
 0x11d   :  { %15606 = vtanh.f32 %v818_v15  ;;  %v13922_v15 = vld [vmem:[%s21206_s5 + $0x84] ss:$16 sps:$4 sm:$0xff]  }
 0x124   :  { %v15601_v17 = vpop.eup %15600 }
 0x125   :  { %v15603_v18 = vpop.eup %15602  ;;  %v811_v19 = vadd.f32 1.0, %v15601_v17  ;;  %v13925_v17 = vld [vmem:[%s21206_s5 + $0x8c] ss:$16 sps:$4 sm:$0xff]  }
 0x126   :  { %v815_v20 = vadd.f32 1.0, %v15603_v18  ;;  %v15605_v22 = vpop.eup %15604  ;;  %v13920_v18 = vld [vmem:[%s21206_s5 + $0x80] ss:$16 sps:$4 sm:$0xff]  }
 0x127   :  { %v812_v21 = vmul.f32 0.5, %v811_v19  ;;  %v15607_v23 = vpop.eup %15606  ;;  %v13923_v19 = vld [vmem:[%s21206_s5 + $0x88] ss:$16 sps:$4 sm:$0xff]  }
 0x128   :  { %v816_v3 = vmul.f32 0.5, %v815_v20  ;;  %v820_v26 = vadd.f32 1.0, %v15607_v23  ;;  %v13928_v20 = vld [vmem:[%s21206_s5 + $0xa4] ss:$16 sps:$4 sm:$0xff]   ;;  %v13932_v23 = vld [vmem:[%s21206_s5 + $0xc0] ss:$16 sps:$4 sm:$0xff]  }
 0x129   :  { %v823_v5 = vmul.f32 %v15605_v22, %v812_v21  ;;  %v13931_v21 = vld [vmem:[%s21206_s5 + $0xac] ss:$16 sps:$4 sm:$0xff]   ;;  %v13926_v22 = vld [vmem:[%s21206_s5 + $0xa0] ss:$16 sps:$4 sm:$0xff]  }
 0x12a   :  { %v822_v7 = vmul.f32 0.0, %v816_v3  ;;  %v821_v32 = vmul.f32 0.5, %v820_v26  ;;  %v13929_v3 = vld [vmem:[%s21206_s5 + $0xa8] ss:$16 sps:$4 sm:$0xff]  }
 0x12b   :  { %v13935_v26 = vld [vmem:[%s21206_s5 + $0xc8] ss:$16 sps:$4 sm:$0xff]  }
 0x12c   :  { %v16460_v9 = vadd.f32 %v823_v5, %v822_v7  ;;  %v13934_v5 = vld [vmem:[%s21206_s5 + $0xc4] ss:$16 sps:$4 sm:$0xff]   ;;  %v13937_v7 = vld [vmem:[%s21206_s5 + $0xcc] ss:$16 sps:$4 sm:$0xff]  }
 0x12e   :  { %15608 = vtanh.f32 %v16460_v9 }
 0x138   :  { %v15609_v34 = vpop.eup %15608 }
 0x139   :  { %v826_v40 = vmul.f32 %v15609_v34, %v821_v32  ;;  %v13940_v32 = vld [vmem:[%s21206_s5 + $0xe4] ss:$16 sps:$4 sm:$0xff]   ;;  %v13943_v34 = vld [vmem:[%s21206_s5 + $0xec] ss:$16 sps:$4 sm:$0xff]  }
 0x13b   :  { %v16475_v47 = vpack.c.bf16 %v826_v40, %v826_v40  ;;  %v13946_v40 = vld [vmem:[%s21205_s4 + $0x4] ss:$16 sps:$4 sm:$0xff]  }
 0x13d   :  { %865 = vmatmul.mubr.bf16.vlgmr.msra.gmra.mrb[20].mxu0 %v16475_v47  ;;  %906 = vmatmul.mubr.bf16.vlgmr.msra.gmra.mrb[20].mxu1 %v16475_v47 }
 0x13e   :  { %1161 = vmatpush1.bf16.msra.mxu0 %v13896_v36  ;;  %1202 = vmatpush1.bf16.msra.mxu1 %v13899_v38  ;;  %v13938_v36 = vld [vmem:[%s21206_s5 + $0xe0] ss:$16 sps:$4 sm:$0xff]   ;;  %v13941_v38 = vld [vmem:[%s21206_s5 + $0xe8] ss:$16 sps:$4 sm:$0xff]  }
 0x13f   :  { %1162 = vmatprep.subr.bf16.mxu0 %v13904_v42  ;;  %1203 = vmatprep.subr.bf16.mxu1 %v13907_v44  ;;  %v13949_v42 = vld [vmem:[%s21205_s4 + $0xc] ss:$16 sps:$4 sm:$0xff]   ;;  %v13944_v44 = vld [vmem:[%s21205_s4] ss:$16 sps:$4 sm:$0xff]  }
 0x140   :  { %1192 = vmatprep.mubr.bf16.mxu0 %v21216_v2  ;;  %1233 = vmatprep.mubr.bf16.mxu1 %v21216_v2 }
 0x142   :  { %1163 = vmatpush1.bf16.msra.mxu0 %v13902_v48  ;;  %1204 = vmatpush1.bf16.msra.mxu1 %v13905_v50  ;;  %v13947_v48 = vld [vmem:[%s21205_s4 + $0x8] ss:$16 sps:$4 sm:$0xff]   ;;  %v13952_v50 = vld [vmem:[%s21205_s4 + $0x24] ss:$16 sps:$4 sm:$0xff]  }
 0x143   :  { %1164 = vmatprep.subr.bf16.mxu0 %v13910_v52  ;;  %1205 = vmatprep.subr.bf16.mxu1 %v13913_v54  ;;  %v13955_v52 = vld [vmem:[%s21205_s4 + $0x2c] ss:$16 sps:$4 sm:$0xff]   ;;  %v13950_v54 = vld [vmem:[%s21205_s4 + $0x20] ss:$16 sps:$4 sm:$0xff]  }
 0x146   :  { %1165 = vmatpush1.bf16.msra.mxu0 %v13908_v56  ;;  %1206 = vmatpush1.bf16.msra.mxu1 %v13911_v58  ;;  %v13953_v56 = vld [vmem:[%s21205_s4 + $0x28] ss:$16 sps:$4 sm:$0xff]   ;;  %v13958_v58 = vld [vmem:[%s21205_s4 + $0x44] ss:$16 sps:$4 sm:$0xff]  }
 0x147   :  { %1166 = vmatprep.subr.bf16.mxu0 %v13916_v60  ;;  %1207 = vmatprep.subr.bf16.mxu1 %v13919_v63  ;;  %v13961_v60 = vld [vmem:[%s21205_s4 + $0x4c] ss:$16 sps:$4 sm:$0xff]   ;;  %v16594_v63 = vld [vmem:[%s21205_s4 + $0x40] ss:$16 sps:$4 sm:$0xff]  }
 0x14a   :  { %1167 = vmatpush1.bf16.msra.mxu0 %v13914_v0  ;;  %1208 = vmatpush1.bf16.msra.mxu1 %v13917_v16  ;;  %v16599_v0 = vld [vmem:[%s21205_s4 + $0x48] ss:$16 sps:$4 sm:$0xff]   ;;  %v16606_v16 = vld [vmem:[%s21205_s4 + $0x64] ss:$16 sps:$4 sm:$0xff]  }
 0x14b   :  { %1168 = vmatprep.subr.bf16.mxu0 %v13922_v15  ;;  %1209 = vmatprep.subr.bf16.mxu1 %v13925_v17  ;;  %v16611_v15 = vld [vmem:[%s21205_s4 + $0x6c] ss:$16 sps:$4 sm:$0xff]   ;;  %v16616_v17 = vld [vmem:[%s21205_s4 + $0x60] ss:$16 sps:$4 sm:$0xff]  }
 0x14e   :  { %1169 = vmatpush1.bf16.msra.mxu0 %v13920_v18  ;;  %1210 = vmatpush1.bf16.msra.mxu1 %v13923_v19  ;;  %v16621_v18 = vld [vmem:[%s21205_s4 + $0x68] ss:$16 sps:$4 sm:$0xff]   ;;  %v16626_v19 = vld [vmem:[%s21205_s4 + $0x84] ss:$16 sps:$4 sm:$0xff]  }
 0x14f   :  { %1170 = vmatprep.subr.bf16.mxu0 %v13928_v20  ;;  %1211 = vmatprep.subr.bf16.mxu1 %v13931_v21  ;;  %v16631_v20 = vld [vmem:[%s21205_s4 + $0x8c] ss:$16 sps:$4 sm:$0xff]   ;;  %v16640_v21 = vld [vmem:[%s21205_s4 + $0x80] ss:$16 sps:$4 sm:$0xff]  }
 0x152   :  { %1171 = vmatpush1.bf16.msra.mxu0 %v13926_v22  ;;  %1212 = vmatpush1.bf16.msra.mxu1 %v13929_v3  ;;  %v16645_v22 = vld [vmem:[%s21205_s4 + $0x88] ss:$16 sps:$4 sm:$0xff]   ;;  %v16650_v3 = vld [vmem:[%s21205_s4 + $0xa4] ss:$16 sps:$4 sm:$0xff]  }
 0x153   :  { %1172 = vmatprep.subr.bf16.mxu0 %v13934_v5  ;;  %1213 = vmatprep.subr.bf16.mxu1 %v13937_v7  ;;  %v16655_v5 = vld [vmem:[%s21205_s4 + $0xac] ss:$16 sps:$4 sm:$0xff]   ;;  %v16664_v7 = vld [vmem:[%s21205_s4 + $0xa0] ss:$16 sps:$4 sm:$0xff]  }
 0x156   :  { %1173 = vmatpush1.bf16.msra.mxu0 %v13932_v23  ;;  %1214 = vmatpush1.bf16.msra.mxu1 %v13935_v26  ;;  %v16669_v23 = vld [vmem:[%s21205_s4 + $0xa8] ss:$16 sps:$4 sm:$0xff]   ;;  %v16674_v26 = vld [vmem:[%s21205_s4 + $0xc4] ss:$16 sps:$4 sm:$0xff]  }
 0x157   :  { %1174 = vmatprep.subr.bf16.mxu0 %v13940_v32  ;;  %1215 = vmatprep.subr.bf16.mxu1 %v13943_v34  ;;  %v16679_v32 = vld [vmem:[%s21205_s4 + $0xcc] ss:$16 sps:$4 sm:$0xff]   ;;  %v16688_v34 = vld [vmem:[%s21205_s4 + $0xc0] ss:$16 sps:$4 sm:$0xff]  }
 0x15a   :  { %1175 = vmatpush1.bf16.msra.mxu0 %v13938_v36  ;;  %1216 = vmatpush1.bf16.msra.mxu1 %v13941_v38  ;;  %v16693_v36 = vld [vmem:[%s21205_s4 + $0xc8] ss:$16 sps:$4 sm:$0xff]   ;;  %v16698_v38 = vld [vmem:[%s21205_s4 + $0xe4] ss:$16 sps:$4 sm:$0xff]  }
 0x15b   :  { %1402 = vmatprep.subr.bf16.mxu0 %v13946_v40  ;;  %1443 = vmatprep.subr.bf16.mxu1 %v13949_v42  ;;  %v16703_v40 = vld [vmem:[%s21205_s4 + $0xec] ss:$16 sps:$4 sm:$0xff]   ;;  %v16712_v42 = vld [vmem:[%s21205_s4 + $0xe0] ss:$16 sps:$4 sm:$0xff]  }
 0x15d   :  { %1193 = vmatmul.mubr.bf16.vlgmr.msra.gmra.mrb[24].mxu0 %v21216_v2  ;;  %1234 = vmatmul.mubr.bf16.vlgmr.msra.gmra.mrb[24].mxu1 %v21216_v2 }
 0x15e   :  { %1403 = vmatpush1.bf16.msra.mxu0 %v13944_v44  ;;  %1444 = vmatpush1.bf16.msra.mxu1 %v13947_v48  ;;  %v16717_v44 = vld [vmem:[%s21205_s4 + $0xe8] ss:$16 sps:$4 sm:$0xff]   ;;  %v15840_v48 = vld [vmem:[%s21203_s2 + $0x4] ss:$16 sps:$4 sm:$0xff]  }
 0x15f   :  { %1404 = vmatprep.subr.bf16.mxu0 %v13952_v50  ;;  %1445 = vmatprep.subr.bf16.mxu1 %v13955_v52  ;;  %v15841_v50 = vld [vmem:[%s21203_s2 + $0xc] ss:$16 sps:$4 sm:$0xff]   ;;  %v15842_v52 = vld [vmem:[%s21203_s2] ss:$16 sps:$4 sm:$0xff]  }
 0x160   :  { %1434 = vmatprep.mubr.bf16.mxu0 %v21216_v2  ;;  %1475 = vmatprep.mubr.bf16.mxu1 %v21216_v2 }
 0x162   :  { %1405 = vmatpush1.bf16.msra.mxu0 %v13950_v54  ;;  %1446 = vmatpush1.bf16.msra.mxu1 %v13953_v56  ;;  %v15843_v54 = vld [vmem:[%s21203_s2 + $0x8] ss:$16 sps:$4 sm:$0xff]   ;;  %v15844_v56 = vld [vmem:[%s21203_s2 + $0x24] ss:$16 sps:$4 sm:$0xff]  }
 0x163   :  { %1406 = vmatprep.subr.bf16.mxu0 %v13958_v58  ;;  %1447 = vmatprep.subr.bf16.mxu1 %v13961_v60  ;;  %v15845_v58 = vld [vmem:[%s21203_s2 + $0x2c] ss:$16 sps:$4 sm:$0xff]   ;;  %v15847_v60 = vld [vmem:[%s21203_s2 + $0x28] ss:$16 sps:$4 sm:$0xff]  }
 0x166   :  { %1407 = vmatpush1.bf16.msra.mxu0 %v16594_v63  ;;  %1448 = vmatpush1.bf16.msra.mxu1 %v16599_v0 }
 0x167   :  { %1408 = vmatprep.subr.bf16.mxu0 %v16606_v16  ;;  %1449 = vmatprep.subr.bf16.mxu1 %v16611_v15 }
 0x16a   :  { %1409 = vmatpush1.bf16.msra.mxu0 %v16616_v17  ;;  %1450 = vmatpush1.bf16.msra.mxu1 %v16621_v18 }
 0x16b   :  { %1410 = vmatprep.subr.bf16.mxu0 %v16626_v19  ;;  %1451 = vmatprep.subr.bf16.mxu1 %v16631_v20 }
 0x16e   :  { %1411 = vmatpush1.bf16.msra.mxu0 %v16640_v21  ;;  %1452 = vmatpush1.bf16.msra.mxu1 %v16645_v22 }
 0x16f   :  { %1412 = vmatprep.subr.bf16.mxu0 %v16650_v3  ;;  %1453 = vmatprep.subr.bf16.mxu1 %v16655_v5 }
 0x172   :  { %1413 = vmatpush1.bf16.msra.mxu0 %v16664_v7  ;;  %1454 = vmatpush1.bf16.msra.mxu1 %v16669_v23 }
 0x173   :  { %1414 = vmatprep.subr.bf16.mxu0 %v16674_v26  ;;  %1455 = vmatprep.subr.bf16.mxu1 %v16679_v32 }
 0x176   :  { %1415 = vmatpush1.bf16.msra.mxu0 %v16688_v34  ;;  %1456 = vmatpush1.bf16.msra.mxu1 %v16693_v36 }
 0x177   :  { %1416 = vmatprep.subr.bf16.mxu0 %v16698_v38  ;;  %1457 = vmatprep.subr.bf16.mxu1 %v16703_v40 }
 0x17a   :  { %1417 = vmatpush1.bf16.msra.mxu0 %v16712_v42  ;;  %1458 = vmatpush1.bf16.msra.mxu1 %v16717_v44 }
 0x17b   :  { %1511 = vmatprep.subr.bf16.mxu0 %v15840_v48  ;;  %1552 = vmatprep.subr.bf16.mxu1 %v15841_v50  ;;  %v15848_v48 = vld [vmem:[%s21203_s2 + $0x44] ss:$16 sps:$4 sm:$0xff]   ;;  %v15849_v50 = vld [vmem:[%s21203_s2 + $0x4c] ss:$16 sps:$4 sm:$0xff]  }
 0x17d   :  { %1435 = vmatmul.mubr.bf16.vlgmr.msra.gmra.mrb[28].mxu0 %v16475_v47  ;;  %1476 = vmatmul.mubr.bf16.vlgmr.msra.gmra.mrb[28].mxu1 %v16475_v47  ;;  %v15846_v47 = vld [vmem:[%s21203_s2 + $0x20] ss:$16 sps:$4 sm:$0xff]  }
 0x17e   :  { %1512 = vmatpush1.bf16.msra.mxu0 %v15842_v52  ;;  %1553 = vmatpush1.bf16.msra.mxu1 %v15843_v54  ;;  %v15850_v52 = vld [vmem:[%s21203_s2 + $0x40] ss:$16 sps:$4 sm:$0xff]   ;;  %v15851_v54 = vld [vmem:[%s21203_s2 + $0x48] ss:$16 sps:$4 sm:$0xff]  }
 0x17f   :  { %1513 = vmatprep.subr.bf16.mxu0 %v15844_v56  ;;  %1554 = vmatprep.subr.bf16.mxu1 %v15845_v58  ;;  %v15852_v56 = vld [vmem:[%s21203_s2 + $0x64] ss:$16 sps:$4 sm:$0xff]   ;;  %v15853_v58 = vld [vmem:[%s21203_s2 + $0x6c] ss:$16 sps:$4 sm:$0xff]  }
 0x180   :  { %1543 = vmatprep.mubr.bf16.mxu0 %v21216_v2  ;;  %1584 = vmatprep.mubr.bf16.mxu1 %v21216_v2 }
 0x182   :  { %1514 = vmatpush1.bf16.msra.mxu0 %v15846_v47  ;;  %1555 = vmatpush1.bf16.msra.mxu1 %v15847_v60  ;;  %v15854_v47 = vld [vmem:[%s21203_s2 + $0x60] ss:$16 sps:$4 sm:$0xff]   ;;  %v15855_v60 = vld [vmem:[%s21203_s2 + $0x68] ss:$16 sps:$4 sm:$0xff]  }
 0x183   :  { %1515 = vmatprep.subr.bf16.mxu0 %v15848_v48  ;;  %1556 = vmatprep.subr.bf16.mxu1 %v15849_v50  ;;  %v15856_v48 = vld [vmem:[%s21203_s2 + $0x84] ss:$16 sps:$4 sm:$0xff]   ;;  %v15857_v50 = vld [vmem:[%s21203_s2 + $0x8c] ss:$16 sps:$4 sm:$0xff]  }
 0x186   :  { %1516 = vmatpush1.bf16.msra.mxu0 %v15850_v52  ;;  %1557 = vmatpush1.bf16.msra.mxu1 %v15851_v54  ;;  %v15858_v52 = vld [vmem:[%s21203_s2 + $0x80] ss:$16 sps:$4 sm:$0xff]   ;;  %v15859_v54 = vld [vmem:[%s21203_s2 + $0x88] ss:$16 sps:$4 sm:$0xff]  }
 0x187   :  { %1517 = vmatprep.subr.bf16.mxu0 %v15852_v56  ;;  %1558 = vmatprep.subr.bf16.mxu1 %v15853_v58  ;;  %v15860_v56 = vld [vmem:[%s21203_s2 + $0xa4] ss:$16 sps:$4 sm:$0xff]   ;;  %v15861_v58 = vld [vmem:[%s21203_s2 + $0xac] ss:$16 sps:$4 sm:$0xff]  }
 0x18a   :  { %1518 = vmatpush1.bf16.msra.mxu0 %v15854_v47  ;;  %1559 = vmatpush1.bf16.msra.mxu1 %v15855_v60  ;;  %v15862_v47 = vld [vmem:[%s21203_s2 + $0xa0] ss:$16 sps:$4 sm:$0xff]   ;;  %v15863_v60 = vld [vmem:[%s21203_s2 + $0xa8] ss:$16 sps:$4 sm:$0xff]  }
 0x18b   :  { %1519 = vmatprep.subr.bf16.mxu0 %v15856_v48  ;;  %1560 = vmatprep.subr.bf16.mxu1 %v15857_v50  ;;  %v15864_v48 = vld [vmem:[%s21203_s2 + $0xc4] ss:$16 sps:$4 sm:$0xff]   ;;  %v15865_v50 = vld [vmem:[%s21203_s2 + $0xcc] ss:$16 sps:$4 sm:$0xff]  }
 0x18e   :  { %1520 = vmatpush1.bf16.msra.mxu0 %v15858_v52  ;;  %1561 = vmatpush1.bf16.msra.mxu1 %v15859_v54  ;;  %v15866_v52 = vld [vmem:[%s21203_s2 + $0xc0] ss:$16 sps:$4 sm:$0xff]   ;;  %v15867_v54 = vld [vmem:[%s21203_s2 + $0xc8] ss:$16 sps:$4 sm:$0xff]  }
 0x18f   :  { %1521 = vmatprep.subr.bf16.mxu0 %v15860_v56  ;;  %1562 = vmatprep.subr.bf16.mxu1 %v15861_v58  ;;  %v15868_v56 = vld [vmem:[%s21203_s2 + $0xe4] ss:$16 sps:$4 sm:$0xff]   ;;  %v15869_v58 = vld [vmem:[%s21203_s2 + $0xec] ss:$16 sps:$4 sm:$0xff]  }
 0x192   :  { %1522 = vmatpush1.bf16.msra.mxu0 %v15862_v47  ;;  %1563 = vmatpush1.bf16.msra.mxu1 %v15863_v60  ;;  %v15870_v47 = vld [vmem:[%s21203_s2 + $0xe0] ss:$16 sps:$4 sm:$0xff]   ;;  %v15871_v60 = vld [vmem:[%s21203_s2 + $0xe8] ss:$16 sps:$4 sm:$0xff]  }
 0x193   :  { %1523 = vmatprep.subr.bf16.mxu0 %v15864_v48  ;;  %1564 = vmatprep.subr.bf16.mxu1 %v15865_v50  ;;  %v15872_v48 = vld [vmem:[%s21206_s5 + $0x4] ss:$16 sps:$4 sm:$0xff]   ;;  %v15873_v50 = vld [vmem:[%s21206_s5 + $0xc] ss:$16 sps:$4 sm:$0xff]  }
 0x196   :  { %1524 = vmatpush1.bf16.msra.mxu0 %v15866_v52  ;;  %1565 = vmatpush1.bf16.msra.mxu1 %v15867_v54 }
 0x197   :  { %1525 = vmatprep.subr.bf16.mxu0 %v15868_v56  ;;  %1566 = vmatprep.subr.bf16.mxu1 %v15869_v58 }
 0x19a   :  { %1526 = vmatpush1.bf16.msra.mxu0 %v15870_v47  ;;  %1567 = vmatpush1.bf16.msra.mxu1 %v15871_v60 }
 0x19b   :  { %1616 = vmatprep.subr.bf16.mxu0 %v15872_v48  ;;  %1657 = vmatprep.subr.bf16.mxu1 %v15873_v50 }
 0x19c   :  { %21 = vsyncpa [#allocation6], 0 }
 0x210   :  { %v866_v52 = vpop.f32.mrb[20].mxu0  ;;  %v907_v54 = vpop.f32.mrb[20].mxu1 }
 0x211   :  { %v914_v56 = vadd.f32 %v866_v52, %v16386_v25  ;;  %v916_v58 = vadd.f32 %v907_v54, %v16389_v27  ;;  %v868_v47 = vpop.f32.mrb[21].mxu0  ;;  %v909_v2 = vpop.f32.mrb[21].mxu1 }
 0x212   :  { %v915_v60 = vadd.f32 %v868_v47, %v16391_v29  ;;  %v917_v31 = vadd.f32 %v909_v2, %v16394_v30  ;;  %v870_v24 = vpop.f32.mrb[22].mxu0  ;;  %v911_v48 = vpop.f32.mrb[22].mxu1 }
 0x213   :  { %v918_v28 = vmul.f32 0.5, %v914_v56  ;;  %v871_v13 = vpop.f32.mrb[23].mxu0  ;;  %v912_v8 = vpop.f32.mrb[23].mxu1 }
 0x214   :  { %v922_v4 = vmul.f32 0.5, %v915_v60  ;;  %v927_v50 = vmul.f32 0.5, %v917_v31 }
 0x215   :  { %15610 = vtanh.f32 %v918_v28 }
 0x216   :  { %15612 = vtanh.f32 %v922_v4 }
 0x217   :  { %15614 = vtanh.f32 %v916_v58 }
 0x218   :  { %15616 = vtanh.f32 %v927_v50 }
 0x21f   :  { %v15611_v6 = vpop.eup %15610 }
 0x220   :  { %v15613_v25 = vpop.eup %15612  ;;  %v920_v52 = vadd.f32 1.0, %v15611_v6 }
 0x221   :  { %v924_v27 = vadd.f32 1.0, %v15613_v25  ;;  %v15615_v1 = vpop.eup %15614  ;;  %v15874_v25 = vld [vmem:[%s21206_s5] ss:$16 sps:$4 sm:$0xff]  }
 0x222   :  { %v921_v54 = vmul.f32 0.5, %v920_v52  ;;  %v15617_v8 = vpop.eup %15616  ;;  %v15875_v52 = vld [vmem:[%s21206_s5 + $0x8] ss:$16 sps:$4 sm:$0xff]  }
 0x223   :  { %v925_v29 = vmul.f32 0.5, %v924_v27  ;;  %v929_v13 = vadd.f32 1.0, %v15617_v8  ;;  %v15876_v27 = vld [vmem:[%s21206_s5 + $0x24] ss:$16 sps:$4 sm:$0xff]  }
 0x224   :  { %v932_v47 = vmul.f32 %v15615_v1, %v921_v54  ;;  %v15877_v54 = vld [vmem:[%s21206_s5 + $0x2c] ss:$16 sps:$4 sm:$0xff]   ;;  %v15880_v8 = vld [vmem:[%s21206_s5 + $0x44] ss:$16 sps:$4 sm:$0xff]  }
 0x225   :  { %v931_v2 = vmul.f32 %v925_v29, %v16460_v9  ;;  %v930_v31 = vmul.f32 0.5, %v929_v13  ;;  %v21264_v29 = vmov 0   ;;  %v15881_v13 = vld [vmem:[%s21206_s5 + $0x4c] ss:$16 sps:$4 sm:$0xff]  }
 0x227   :  { %v16836_v30 = vadd.f32 %v932_v47, %v931_v2  ;;  %v15878_v47 = vld [vmem:[%s21206_s5 + $0x20] ss:$16 sps:$4 sm:$0xff]   ;;  %v15879_v2 = vld [vmem:[%s21206_s5 + $0x28] ss:$16 sps:$4 sm:$0xff]  }
 0x229   :  { %15618 = vtanh.f32 %v16836_v30 }
 0x230   :  { %v16839_v4 = vpop.f32.mrb[24].mxu0  ;;  %v16841_v24 = vpop.f32.mrb[24].mxu1 }
 0x231   :  { %v16843_v28 = vpop.f32.mrb[25].mxu0  ;;  %v16845_v6 = vpop.f32.mrb[25].mxu1 }
 0x232   :  { %v1198_v56 = vpop.f32.mrb[26].mxu0  ;;  %v1239_v58 = vpop.f32.mrb[26].mxu1 }
 0x233   :  { %v15619_v1 = vpop.eup %15618  ;;  %v1199_v60 = vpop.f32.mrb[27].mxu0  ;;  %v15883_v56 = vld [vmem:[%s21206_s5 + $0x48] ss:$16 sps:$4 sm:$0xff]   ;;  %v15884_v58 = vld [vmem:[%s21206_s5 + $0x64] ss:$16 sps:$4 sm:$0xff]  }
 0x234   :  { %v1240_v9 = vpop.f32.mrb[27].mxu1  ;;  %v935_v48 = vmul.f32 %v15619_v1, %v930_v31  ;;  %v15882_v31 = vld [vmem:[%s21206_s5 + $0x40] ss:$16 sps:$4 sm:$0xff]   ;;  %v15885_v1 = vld [vmem:[%s21206_s5 + $0x6c] ss:$16 sps:$4 sm:$0xff]  }
 0x235   :  { %v15886_v60 = vld [vmem:[%s21206_s5 + $0x60] ss:$16 sps:$4 sm:$0xff]   ;;  %v15887_v9 = vld [vmem:[%s21206_s5 + $0x68] ss:$16 sps:$4 sm:$0xff]  }
 0x236   :  { %v16847_v50 = vpack.c.bf16 %v935_v48, %v935_v48  ;;  %v15888_v48 = vld [vmem:[%s21206_s5 + $0x84] ss:$16 sps:$4 sm:$0xff]  }
 0x238   :  { %1544 = vmatmul.mubr.bf16.vlgmr.msra.gmra.mrb[32].mxu0 %v16847_v50  ;;  %1585 = vmatmul.mubr.bf16.vlgmr.msra.gmra.mrb[32].mxu1 %v16847_v50 }
 0x239   :  { %1617 = vmatpush1.bf16.msra.mxu0 %v15874_v25  ;;  %1658 = vmatpush1.bf16.msra.mxu1 %v15875_v52  ;;  %v15889_v25 = vld [vmem:[%s21206_s5 + $0x8c] ss:$16 sps:$4 sm:$0xff]   ;;  %v15890_v52 = vld [vmem:[%s21206_s5 + $0x80] ss:$16 sps:$4 sm:$0xff]  }
 0x23a   :  { %1618 = vmatprep.subr.bf16.mxu0 %v15876_v27  ;;  %1659 = vmatprep.subr.bf16.mxu1 %v15877_v54  ;;  %v15891_v27 = vld [vmem:[%s21206_s5 + $0x88] ss:$16 sps:$4 sm:$0xff]   ;;  %v15892_v54 = vld [vmem:[%s21206_s5 + $0xa4] ss:$16 sps:$4 sm:$0xff]  }
 0x23b   :  { %1648 = vmatprep.mubr.bf16.mxu0 %v21264_v29  ;;  %1689 = vmatprep.mubr.bf16.mxu1 %v21264_v29 }
 0x23d   :  { %1619 = vmatpush1.bf16.msra.mxu0 %v15878_v47  ;;  %1660 = vmatpush1.bf16.msra.mxu1 %v15879_v2  ;;  %v15893_v47 = vld [vmem:[%s21206_s5 + $0xac] ss:$16 sps:$4 sm:$0xff]   ;;  %v471_v2 = vld [vmem:[%s21207_s6] sm:$0xf] }
 0x23e   :  { %1620 = vmatprep.subr.bf16.mxu0 %v15880_v8  ;;  %1661 = vmatprep.subr.bf16.mxu1 %v15881_v13  ;;  %v15894_v8 = vld [vmem:[%s21206_s5 + $0xa0] ss:$16 sps:$4 sm:$0xff]   ;;  %v15895_v13 = vld [vmem:[%s21206_s5 + $0xa8] ss:$16 sps:$4 sm:$0xff]  }
 0x241   :  { %1621 = vmatpush1.bf16.msra.mxu0 %v15882_v31  ;;  %1662 = vmatpush1.bf16.msra.mxu1 %v15883_v56  ;;  %v15896_v31 = vld [vmem:[%s21206_s5 + $0xc4] ss:$16 sps:$4 sm:$0xff]   ;;  %v15897_v56 = vld [vmem:[%s21206_s5 + $0xcc] ss:$16 sps:$4 sm:$0xff]  }
 0x242   :  { %1622 = vmatprep.subr.bf16.mxu0 %v15884_v58  ;;  %1663 = vmatprep.subr.bf16.mxu1 %v15885_v1  ;;  %v16929_v58 = vrot.slane %v471_v2, %v16367_v12 }
 0x244   :  { %21265 = vst [vmem:[#allocation30_spill] sm:$0xff] %v16929_v58 }
 0x245   :  { %1623 = vmatpush1.bf16.msra.mxu0 %v15886_v60  ;;  %1664 = vmatpush1.bf16.msra.mxu1 %v15887_v9  ;;  %v16932_v9 = vrot.slane %v471_v2, %v16372_v14 }
 0x246   :  { %1624 = vmatprep.subr.bf16.mxu0 %v15888_v48  ;;  %1665 = vmatprep.subr.bf16.mxu1 %v15889_v25 }
 0x249   :  { %1625 = vmatpush1.bf16.msra.mxu0 %v15890_v52  ;;  %1666 = vmatpush1.bf16.msra.mxu1 %v15891_v27 }
 0x24a   :  { %1626 = vmatprep.subr.bf16.mxu0 %v15892_v54  ;;  %1667 = vmatprep.subr.bf16.mxu1 %v15893_v47  ;;  %v15898_v54 = vld [vmem:[%s21206_s5 + $0xc0] ss:$16 sps:$4 sm:$0xff]   ;;  %v15899_v47 = vld [vmem:[%s21206_s5 + $0xc8] ss:$16 sps:$4 sm:$0xff]  }
 0x24d   :  { %1627 = vmatpush1.bf16.msra.mxu0 %v15894_v8  ;;  %1668 = vmatpush1.bf16.msra.mxu1 %v15895_v13 }
 0x24e   :  { %1628 = vmatprep.subr.bf16.mxu0 %v15896_v31  ;;  %1669 = vmatprep.subr.bf16.mxu1 %v15897_v56  ;;  %v15901_v56 = vld [vmem:[%s21206_s5 + $0xec] ss:$16 sps:$4 sm:$0xff]  }
 0x250   :  { %v1436_v1 = vpop.f32.mrb[28].mxu0  ;;  %v1477_v60 = vpop.f32.mrb[28].mxu1 }
 0x251   :  { %v1437_v48 = vadd.f32 %v1436_v1, %v16839_v4  ;;  %v1478_v25 = vadd.f32 %v1477_v60, %v16841_v24  ;;  %v1438_v52 = vpop.f32.mrb[29].mxu0  ;;  %v1479_v27 = vpop.f32.mrb[29].mxu1  ;;  %1629 = vmatpush1.bf16.msra.mxu0 %v15898_v54  ;;  %1670 = vmatpush1.bf16.msra.mxu1 %v15899_v47  ;;  %v15900_v24 = vld [vmem:[%s21206_s5 + $0xe4] ss:$16 sps:$4 sm:$0xff]   ;;  %v16952_v60 = vrot.slane %v471_v2, %v16363_v10  ;;  %v15902_v54 = vld [vmem:[%s21206_s5 + $0xe0] ss:$16 sps:$4 sm:$0xff]  }
 0x252   :  { %v1439_v8 = vadd.f32 %v1438_v52, %v16843_v28  ;;  %v1480_v13 = vadd.f32 %v1479_v27, %v16845_v6  ;;  %v1440_v31 = vpop.f32.mrb[30].mxu0  ;;  %v1481_v4 = vpop.f32.mrb[30].mxu1  ;;  %1630 = vmatprep.subr.bf16.mxu0 %v15900_v24  ;;  %1671 = vmatprep.subr.bf16.mxu1 %v15901_v56  ;;  %v15903_v47 = vld [vmem:[%s21206_s5 + $0xe8] ss:$16 sps:$4 sm:$0xff]   ;;  %v16969_v24 = vrot.slane %v471_v2, %v16365_v11 }
 0x253   :  { %v1484_v1 = vadd.f32 %v1437_v48, %v16929_v58  ;;  %21266 = vst [vmem:[#allocation31_spill] sm:$0xff] %v16952_v60  ;;  %v1441_v28 = vpop.f32.mrb[31].mxu0  ;;  %v1482_v52 = vpop.f32.mrb[31].mxu1  ;;  %v15904_v48 = vld [vmem:[%s21205_s4 + $0x4] ss:$16 sps:$4 sm:$0xff]   ;;  %v1486_v4 = vadd.f32 %v1478_v25, %v16952_v60 }
 0x254   :  { %v1485_v6 = vadd.f32 %v1439_v8, %v16932_v9  ;;  %v15905_v8 = vld [vmem:[%s21205_s4 + $0xc] ss:$16 sps:$4 sm:$0xff]   ;;  %21267 = vst [vmem:[#allocation32_spill] sm:$0xff] %v16969_v24  ;;  %v1487_v56 = vadd.f32 %v1480_v13, %v16969_v24 }
 0x255   :  { %v1488_v27 = vmul.f32 0.5, %v1484_v1  ;;  %1631 = vmatpush1.bf16.msra.mxu0 %v15902_v54  ;;  %1672 = vmatpush1.bf16.msra.mxu1 %v15903_v47 }
 0x256   :  { %v1492_v31 = vmul.f32 0.5, %v1485_v6  ;;  %1698 = vmatprep.subr.bf16.mxu0 %v15904_v48  ;;  %1739 = vmatprep.subr.bf16.mxu1 %v15905_v8  ;;  %v1497_v1 = vmul.f32 0.5, %v1487_v56 }
 0x257   :  { %15620 = vtanh.f32 %v1488_v27 }
 0x258   :  { %15622 = vtanh.f32 %v1492_v31 }
 0x259   :  { %15624 = vtanh.f32 %v1486_v4 }
 0x25a   :  { %15626 = vtanh.f32 %v1497_v1  ;;  %v15906_v1 = vld [vmem:[%s21205_s4] ss:$16 sps:$4 sm:$0xff]  }
 0x261   :  { %v15621_v28 = vpop.eup %15620 }
 0x262   :  { %v15623_v52 = vpop.eup %15622  ;;  %v1490_v6 = vadd.f32 1.0, %v15621_v28  ;;  %v15908_v28 = vld [vmem:[%s21205_s4 + $0x24] ss:$16 sps:$4 sm:$0xff]  }
 0x263   :  { %v1494_v54 = vadd.f32 1.0, %v15623_v52  ;;  %v15625_v48 = vpop.eup %15624  ;;  %v15909_v52 = vld [vmem:[%s21205_s4 + $0x2c] ss:$16 sps:$4 sm:$0xff]  }
 0x264   :  { %v1491_v47 = vmul.f32 0.5, %v1490_v6  ;;  %v15627_v2 = vpop.eup %15626  ;;  %v15910_v6 = vld [vmem:[%s21205_s4 + $0x20] ss:$16 sps:$4 sm:$0xff]  }
 0x265   :  { %v1495_v62 = vmul.f32 0.5, %v1494_v54  ;;  %v1499_v25 = vadd.f32 1.0, %v15627_v2  ;;  %v15911_v54 = vld [vmem:[%s21205_s4 + $0x28] ss:$16 sps:$4 sm:$0xff]   ;;  %v14033_v2 = vld [vmem:[%s21209_s8 + $0xcc] ss:$16 sps:$4 sm:$0xff]  }
 0x266   :  { %v1502_v8 = vmul.f32 %v15625_v48, %v1491_v47  ;;  %v15912_v47 = vld [vmem:[%s21205_s4 + $0x44] ss:$16 sps:$4 sm:$0xff]   ;;  %v15913_v48 = vld [vmem:[%s21205_s4 + $0x4c] ss:$16 sps:$4 sm:$0xff]  }
 0x267   :  { %v1501_v27 = vmul.f32 0.0, %v1495_v62  ;;  %v1500_v31 = vmul.f32 0.5, %v1499_v25  ;;  %v15907_v62 = vld [vmem:[%s21205_s4 + $0x8] ss:$16 sps:$4 sm:$0xff]   ;;  %v17150_v25 = vld [vmem:[%s21209_s8 + $0xc0] ss:$16 sps:$4 sm:$0xff]  }
 0x269   :  { %v16972_v59 = vadd.f32 %v1502_v8, %v1501_v27  ;;  %v14025_v8 = vld [vmem:[%s21209_s8 + $0xa8] ss:$16 sps:$4 sm:$0xff]   ;;  %v17141_v27 = vld [vmem:[%s21209_s8 + $0xc4] ss:$16 sps:$4 sm:$0xff]  }
 0x26b   :  { %15628 = vtanh.f32 %v16972_v59 }
 0x275   :  { %v15629_v4 = vpop.eup %15628 }
 0x276   :  { %v1505_v13 = vmul.f32 %v15629_v4, %v1500_v31  ;;  %v14031_v31 = vld [vmem:[%s21209_s8 + $0xc8] ss:$16 sps:$4 sm:$0xff]   ;;  %v17159_v4 = vld [vmem:[%s21209_s8 + $0xe4] ss:$16 sps:$4 sm:$0xff]  }
 0x278   :  { %v16975_v56 = vpack.c.bf16 %v1505_v13, %v1505_v13  ;;  %v14039_v13 = vld [vmem:[%s21209_s8 + $0xec] ss:$16 sps:$4 sm:$0xff]  }
 0x27a   :  { %1649 = vmatmul.mubr.bf16.vlgmr.msra.gmra.mrb[36].mxu0 %v16975_v56  ;;  %1690 = vmatmul.mubr.bf16.vlgmr.msra.gmra.mrb[36].mxu1 %v16975_v56 }
 0x27b   :  { %1699 = vmatpush1.bf16.msra.mxu0 %v15906_v1  ;;  %1740 = vmatpush1.bf16.msra.mxu1 %v15907_v62  ;;  %v17168_v1 = vld [vmem:[%s21209_s8 + $0xe0] ss:$16 sps:$4 sm:$0xff]   ;;  %v14037_v62 = vld [vmem:[%s21209_s8 + $0xe8] ss:$16 sps:$4 sm:$0xff]  }
 0x27c   :  { %1700 = vmatprep.subr.bf16.mxu0 %v15908_v28  ;;  %1741 = vmatprep.subr.bf16.mxu1 %v15909_v52  ;;  %v17177_v28 = vld [vmem:[%s21208_s7 + $0x4] ss:$16 sps:$4 sm:$0xff]   ;;  %v14045_v52 = vld [vmem:[%s21208_s7 + $0xc] ss:$16 sps:$4 sm:$0xff]  }
 0x27d   :  { %1730 = vmatprep.mubr.bf16.mxu0 %v21264_v29  ;;  %1771 = vmatprep.mubr.bf16.mxu1 %v21264_v29 }
 0x27f   :  { %1701 = vmatpush1.bf16.msra.mxu0 %v15910_v6  ;;  %1742 = vmatpush1.bf16.msra.mxu1 %v15911_v54  ;;  %v17186_v6 = vld [vmem:[%s21208_s7] ss:$16 sps:$4 sm:$0xff]   ;;  %v14043_v54 = vld [vmem:[%s21208_s7 + $0x8] ss:$16 sps:$4 sm:$0xff]  }
 0x280   :  { %1702 = vmatprep.subr.bf16.mxu0 %v15912_v47  ;;  %1743 = vmatprep.subr.bf16.mxu1 %v15913_v48  ;;  %v17195_v47 = vld [vmem:[%s21208_s7 + $0x24] ss:$16 sps:$4 sm:$0xff]   ;;  %v14051_v48 = vld [vmem:[%s21208_s7 + $0x2c] ss:$16 sps:$4 sm:$0xff]  }
 0x283   :  { %1703 = vmatpush1.bf16.msra.mxu0 %v16594_v63  ;;  %1744 = vmatpush1.bf16.msra.mxu1 %v16599_v0  ;;  %v17028_v63 = vld [vmem:[%s21209_s8 + $0x4] ss:$16 sps:$4 sm:$0xff]   ;;  %v13997_v0 = vld [vmem:[%s21209_s8 + $0xc] ss:$16 sps:$4 sm:$0xff]  }
 0x284   :  { %1704 = vmatprep.subr.bf16.mxu0 %v16606_v16  ;;  %1745 = vmatprep.subr.bf16.mxu1 %v16611_v15  ;;  %v17038_v16 = vld [vmem:[%s21209_s8] ss:$16 sps:$4 sm:$0xff]   ;;  %v13995_v15 = vld [vmem:[%s21209_s8 + $0x8] ss:$16 sps:$4 sm:$0xff]  }
 0x287   :  { %1705 = vmatpush1.bf16.msra.mxu0 %v16616_v17  ;;  %1746 = vmatpush1.bf16.msra.mxu1 %v16621_v18  ;;  %v17047_v17 = vld [vmem:[%s21209_s8 + $0x24] ss:$16 sps:$4 sm:$0xff]   ;;  %v14003_v18 = vld [vmem:[%s21209_s8 + $0x2c] ss:$16 sps:$4 sm:$0xff]  }
 0x288   :  { %1706 = vmatprep.subr.bf16.mxu0 %v16626_v19  ;;  %1747 = vmatprep.subr.bf16.mxu1 %v16631_v20  ;;  %v17058_v19 = vld [vmem:[%s21209_s8 + $0x20] ss:$16 sps:$4 sm:$0xff]   ;;  %v14001_v20 = vld [vmem:[%s21209_s8 + $0x28] ss:$16 sps:$4 sm:$0xff]  }
 0x28b   :  { %1707 = vmatpush1.bf16.msra.mxu0 %v16640_v21  ;;  %1748 = vmatpush1.bf16.msra.mxu1 %v16645_v22  ;;  %v17067_v21 = vld [vmem:[%s21209_s8 + $0x44] ss:$16 sps:$4 sm:$0xff]   ;;  %v14009_v22 = vld [vmem:[%s21209_s8 + $0x4c] ss:$16 sps:$4 sm:$0xff]  }
 0x28c   :  { %1708 = vmatprep.subr.bf16.mxu0 %v16650_v3  ;;  %1749 = vmatprep.subr.bf16.mxu1 %v16655_v5  ;;  %v17078_v3 = vld [vmem:[%s21209_s8 + $0x40] ss:$16 sps:$4 sm:$0xff]   ;;  %v14007_v5 = vld [vmem:[%s21209_s8 + $0x48] ss:$16 sps:$4 sm:$0xff]  }
 0x28f   :  { %1709 = vmatpush1.bf16.msra.mxu0 %v16664_v7  ;;  %1750 = vmatpush1.bf16.msra.mxu1 %v16669_v23  ;;  %v17087_v7 = vld [vmem:[%s21209_s8 + $0x64] ss:$16 sps:$4 sm:$0xff]   ;;  %v14015_v23 = vld [vmem:[%s21209_s8 + $0x6c] ss:$16 sps:$4 sm:$0xff]  }
 0x290   :  { %1710 = vmatprep.subr.bf16.mxu0 %v16674_v26  ;;  %1751 = vmatprep.subr.bf16.mxu1 %v16679_v32  ;;  %v17096_v26 = vld [vmem:[%s21209_s8 + $0x60] ss:$16 sps:$4 sm:$0xff]   ;;  %v14013_v32 = vld [vmem:[%s21209_s8 + $0x68] ss:$16 sps:$4 sm:$0xff]  }
 0x293   :  { %1711 = vmatpush1.bf16.msra.mxu0 %v16688_v34  ;;  %1752 = vmatpush1.bf16.msra.mxu1 %v16693_v36  ;;  %v17105_v34 = vld [vmem:[%s21209_s8 + $0x84] ss:$16 sps:$4 sm:$0xff]   ;;  %v14021_v36 = vld [vmem:[%s21209_s8 + $0x8c] ss:$16 sps:$4 sm:$0xff]  }
 0x294   :  { %1712 = vmatprep.subr.bf16.mxu0 %v16698_v38  ;;  %1753 = vmatprep.subr.bf16.mxu1 %v16703_v40  ;;  %v17114_v38 = vld [vmem:[%s21209_s8 + $0x80] ss:$16 sps:$4 sm:$0xff]   ;;  %v14019_v40 = vld [vmem:[%s21209_s8 + $0x88] ss:$16 sps:$4 sm:$0xff]  }
 0x297   :  { %1713 = vmatpush1.bf16.msra.mxu0 %v16712_v42  ;;  %1754 = vmatpush1.bf16.msra.mxu1 %v16717_v44  ;;  %v17123_v42 = vld [vmem:[%s21209_s8 + $0xa4] ss:$16 sps:$4 sm:$0xff]   ;;  %v14027_v44 = vld [vmem:[%s21209_s8 + $0xac] ss:$16 sps:$4 sm:$0xff]  }
 0x298   :  { %2026 = vmatprep.subr.bf16.mxu0 %v17028_v63  ;;  %2067 = vmatprep.subr.bf16.mxu1 %v13997_v0  ;;  %v17206_v0 = vld [vmem:[%s21208_s7 + $0x20] ss:$16 sps:$4 sm:$0xff]  }
 0x29a   :  { %1731 = vmatmul.mubr.bf16.vlgmr.msra.gmra.mrb[40].mxu0 %v16847_v50  ;;  %1772 = vmatmul.mubr.bf16.vlgmr.msra.gmra.mrb[40].mxu1 %v16847_v50  ;;  %v17132_v50 = vld [vmem:[%s21209_s8 + $0xa0] ss:$16 sps:$4 sm:$0xff]  }
 0x29b   :  { %2027 = vmatpush1.bf16.msra.mxu0 %v17038_v16  ;;  %2068 = vmatpush1.bf16.msra.mxu1 %v13995_v15  ;;  %v14049_v15 = vld [vmem:[%s21208_s7 + $0x28] ss:$16 sps:$4 sm:$0xff]  }
 0x29c   :  { %2028 = vmatprep.subr.bf16.mxu0 %v17047_v17  ;;  %2069 = vmatprep.subr.bf16.mxu1 %v14003_v18  ;;  %v17215_v18 = vld [vmem:[%s21208_s7 + $0x44] ss:$16 sps:$4 sm:$0xff]  }
 0x29d   :  { %2058 = vmatprep.mubr.bf16.mxu0 %v21264_v29  ;;  %2099 = vmatprep.mubr.bf16.mxu1 %v21264_v29 }
 0x29f   :  { %2029 = vmatpush1.bf16.msra.mxu0 %v17058_v19  ;;  %2070 = vmatpush1.bf16.msra.mxu1 %v14001_v20  ;;  %v14057_v20 = vld [vmem:[%s21208_s7 + $0x4c] ss:$16 sps:$4 sm:$0xff]  }
 0x2a0   :  { %2030 = vmatprep.subr.bf16.mxu0 %v17067_v21  ;;  %2071 = vmatprep.subr.bf16.mxu1 %v14009_v22  ;;  %v17226_v22 = vld [vmem:[%s21208_s7 + $0x40] ss:$16 sps:$4 sm:$0xff]  }
 0x2a3   :  { %2031 = vmatpush1.bf16.msra.mxu0 %v17078_v3  ;;  %2072 = vmatpush1.bf16.msra.mxu1 %v14007_v5  ;;  %v14055_v5 = vld [vmem:[%s21208_s7 + $0x48] ss:$16 sps:$4 sm:$0xff]  }
 0x2a4   :  { %2032 = vmatprep.subr.bf16.mxu0 %v17087_v7  ;;  %2073 = vmatprep.subr.bf16.mxu1 %v14015_v23  ;;  %v17235_v23 = vld [vmem:[%s21208_s7 + $0x64] ss:$16 sps:$4 sm:$0xff]  }
 0x2a7   :  { %2033 = vmatpush1.bf16.msra.mxu0 %v17096_v26  ;;  %2074 = vmatpush1.bf16.msra.mxu1 %v14013_v32  ;;  %v14063_v32 = vld [vmem:[%s21208_s7 + $0x6c] ss:$16 sps:$4 sm:$0xff]  }
 0x2a8   :  { %2034 = vmatprep.subr.bf16.mxu0 %v17105_v34  ;;  %2075 = vmatprep.subr.bf16.mxu1 %v14021_v36  ;;  %v17244_v36 = vld [vmem:[%s21208_s7 + $0x60] ss:$16 sps:$4 sm:$0xff]  }
 0x2ab   :  { %2035 = vmatpush1.bf16.msra.mxu0 %v17114_v38  ;;  %2076 = vmatpush1.bf16.msra.mxu1 %v14019_v40  ;;  %v14061_v40 = vld [vmem:[%s21208_s7 + $0x68] ss:$16 sps:$4 sm:$0xff]  }
 0x2ac   :  { %2036 = vmatprep.subr.bf16.mxu0 %v17123_v42  ;;  %2077 = vmatprep.subr.bf16.mxu1 %v14027_v44  ;;  %v17253_v44 = vld [vmem:[%s21208_s7 + $0x84] ss:$16 sps:$4 sm:$0xff]  }
 0x2af   :  { %2037 = vmatpush1.bf16.msra.mxu0 %v17132_v50  ;;  %2078 = vmatpush1.bf16.msra.mxu1 %v14025_v8  ;;  %v14069_v8 = vld [vmem:[%s21208_s7 + $0x8c] ss:$16 sps:$4 sm:$0xff]  }
 0x2b0   :  { %2038 = vmatprep.subr.bf16.mxu0 %v17141_v27  ;;  %2079 = vmatprep.subr.bf16.mxu1 %v14033_v2  ;;  %v17262_v2 = vld [vmem:[%s21208_s7 + $0x80] ss:$16 sps:$4 sm:$0xff]  }
 0x2b3   :  { %2039 = vmatpush1.bf16.msra.mxu0 %v17150_v25  ;;  %2080 = vmatpush1.bf16.msra.mxu1 %v14031_v31  ;;  %v14067_v31 = vld [vmem:[%s21208_s7 + $0x88] ss:$16 sps:$4 sm:$0xff]  }
 0x2b4   :  { %2040 = vmatprep.subr.bf16.mxu0 %v17159_v4  ;;  %2081 = vmatprep.subr.bf16.mxu1 %v14039_v13  ;;  %v17271_v13 = vld [vmem:[%s21208_s7 + $0xa4] ss:$16 sps:$4 sm:$0xff]  }
 0x2b7   :  { %2041 = vmatpush1.bf16.msra.mxu0 %v17168_v1  ;;  %2082 = vmatpush1.bf16.msra.mxu1 %v14037_v62  ;;  %v14075_v62 = vld [vmem:[%s21208_s7 + $0xac] ss:$16 sps:$4 sm:$0xff]  }
 0x2b8   :  { %2268 = vmatprep.subr.bf16.mxu0 %v17177_v28  ;;  %2309 = vmatprep.subr.bf16.mxu1 %v14045_v52  ;;  %v17280_v52 = vld [vmem:[%s21208_s7 + $0xa0] ss:$16 sps:$4 sm:$0xff]  }
 0x2ba   :  { %2059 = vmatmul.mubr.bf16.vlgmr.msra.gmra.mrb[44].mxu0 %v21264_v29  ;;  %2100 = vmatmul.mubr.bf16.vlgmr.msra.gmra.mrb[44].mxu1 %v21264_v29 }
 0x2bb   :  { %2269 = vmatpush1.bf16.msra.mxu0 %v17186_v6  ;;  %2310 = vmatpush1.bf16.msra.mxu1 %v14043_v54  ;;  %v14073_v54 = vld [vmem:[%s21208_s7 + $0xa8] ss:$16 sps:$4 sm:$0xff]  }
 0x2bc   :  { %2270 = vmatprep.subr.bf16.mxu0 %v17195_v47  ;;  %2311 = vmatprep.subr.bf16.mxu1 %v14051_v48  ;;  %v17289_v48 = vld [vmem:[%s21208_s7 + $0xc4] ss:$16 sps:$4 sm:$0xff]  }
 0x2bd   :  { %2300 = vmatprep.mubr.bf16.mxu0 %v21264_v29  ;;  %2341 = vmatprep.mubr.bf16.mxu1 %v21264_v29 }
 0x2bf   :  { %2271 = vmatpush1.bf16.msra.mxu0 %v17206_v0  ;;  %2312 = vmatpush1.bf16.msra.mxu1 %v14049_v15  ;;  %v14081_v15 = vld [vmem:[%s21208_s7 + $0xcc] ss:$16 sps:$4 sm:$0xff]  }
 0x2c0   :  { %2272 = vmatprep.subr.bf16.mxu0 %v17215_v18  ;;  %2313 = vmatprep.subr.bf16.mxu1 %v14057_v20  ;;  %v17298_v20 = vld [vmem:[%s21208_s7 + $0xc0] ss:$16 sps:$4 sm:$0xff]  }
 0x2c3   :  { %2273 = vmatpush1.bf16.msra.mxu0 %v17226_v22  ;;  %2314 = vmatpush1.bf16.msra.mxu1 %v14055_v5  ;;  %v14079_v5 = vld [vmem:[%s21208_s7 + $0xc8] ss:$16 sps:$4 sm:$0xff]  }
 0x2c4   :  { %2274 = vmatprep.subr.bf16.mxu0 %v17235_v23  ;;  %2315 = vmatprep.subr.bf16.mxu1 %v14063_v32  ;;  %v17307_v32 = vld [vmem:[%s21208_s7 + $0xe4] ss:$16 sps:$4 sm:$0xff]  }
 0x2c7   :  { %2275 = vmatpush1.bf16.msra.mxu0 %v17244_v36  ;;  %2316 = vmatpush1.bf16.msra.mxu1 %v14061_v40  ;;  %v14087_v40 = vld [vmem:[%s21208_s7 + $0xec] ss:$16 sps:$4 sm:$0xff]  }
 0x2c8   :  { %2276 = vmatprep.subr.bf16.mxu0 %v17253_v44  ;;  %2317 = vmatprep.subr.bf16.mxu1 %v14069_v8  ;;  %v17316_v8 = vld [vmem:[%s21208_s7 + $0xe0] ss:$16 sps:$4 sm:$0xff]  }
 0x2cb   :  { %2277 = vmatpush1.bf16.msra.mxu0 %v17262_v2  ;;  %2318 = vmatpush1.bf16.msra.mxu1 %v14067_v31  ;;  %v14085_v31 = vld [vmem:[%s21208_s7 + $0xe8] ss:$16 sps:$4 sm:$0xff]  }
 0x2cc   :  { %2278 = vmatprep.subr.bf16.mxu0 %v17271_v13  ;;  %2319 = vmatprep.subr.bf16.mxu1 %v14075_v62  ;;  %v14090_v62 = vld [vmem:[%s21203_s2 + $0x4] ss:$16 sps:$4 sm:$0xff]  }
 0x2cf   :  { %2279 = vmatpush1.bf16.msra.mxu0 %v17280_v52  ;;  %2320 = vmatpush1.bf16.msra.mxu1 %v14073_v54  ;;  %v14088_v54 = vld [vmem:[%s21203_s2] ss:$16 sps:$4 sm:$0xff]  }
 0x2d0   :  { %2280 = vmatprep.subr.bf16.mxu0 %v17289_v48  ;;  %2321 = vmatprep.subr.bf16.mxu1 %v14081_v15  ;;  %v14093_v15 = vld [vmem:[%s21203_s2 + $0x24] ss:$16 sps:$4 sm:$0xff]  }
 0x2d3   :  { %2281 = vmatpush1.bf16.msra.mxu0 %v17298_v20  ;;  %2322 = vmatpush1.bf16.msra.mxu1 %v14079_v5  ;;  %v14091_v5 = vld [vmem:[%s21203_s2 + $0x20] ss:$16 sps:$4 sm:$0xff]  }
 0x2d4   :  { %2282 = vmatprep.subr.bf16.mxu0 %v17307_v32  ;;  %2323 = vmatprep.subr.bf16.mxu1 %v14087_v40  ;;  %v14096_v40 = vld [vmem:[%s21203_s2 + $0x44] ss:$16 sps:$4 sm:$0xff]  }
 0x2d7   :  { %2283 = vmatpush1.bf16.msra.mxu0 %v17316_v8  ;;  %2324 = vmatpush1.bf16.msra.mxu1 %v14085_v31  ;;  %v14094_v31 = vld [vmem:[%s21203_s2 + $0x40] ss:$16 sps:$4 sm:$0xff]  }
 0x2d8   :  { %2709 = vmatprep.subr.bf16.mxu1 %v14090_v62  ;;  %v14097_v62 = vld [vmem:[%s21203_s2 + $0x60] ss:$16 sps:$4 sm:$0xff]  }
 0x2da   :  { %2301 = vmatmul.mubr.bf16.vlgmr.msra.gmra.mrb[48].mxu0 %v16975_v56  ;;  %2342 = vmatmul.mubr.bf16.vlgmr.msra.gmra.mrb[48].mxu1 %v16975_v56  ;;  %v14099_v56 = vld [vmem:[%s21203_s2 + $0x64] ss:$16 sps:$4 sm:$0xff]  }
 0x2db   :  { %2710 = vmatpush1.bf16.msra.mxu1 %v14088_v54  ;;  %2741 = vmatprep.mubr.bf16.mxu1 %v21264_v29  ;;  %v14102_v54 = vld [vmem:[%s21203_s2 + $0x84] ss:$16 sps:$4 sm:$0xff]  }
 0x2dc   :  { %2711 = vmatprep.subr.bf16.mxu1 %v14093_v15  ;;  %2501 = vmatprep.mubr.bf16.mxu0 %v21264_v29  ;;  %v14100_v15 = vld [vmem:[%s21203_s2 + $0x80] ss:$16 sps:$4 sm:$0xff]  }
 0x2df   :  { %2712 = vmatpush1.bf16.msra.mxu1 %v14091_v5  ;;  %v14105_v5 = vld [vmem:[%s21203_s2 + $0xa4] ss:$16 sps:$4 sm:$0xff]  }
 0x2e0   :  { %2713 = vmatprep.subr.bf16.mxu1 %v14096_v40  ;;  %v14103_v40 = vld [vmem:[%s21203_s2 + $0xa0] ss:$16 sps:$4 sm:$0xff]  }
 0x2e3   :  { %2714 = vmatpush1.bf16.msra.mxu1 %v14094_v31  ;;  %v14108_v31 = vld [vmem:[%s21203_s2 + $0xc4] ss:$16 sps:$4 sm:$0xff]  }
 0x2e4   :  { %2715 = vmatprep.subr.bf16.mxu1 %v14099_v56  ;;  %v14106_v56 = vld [vmem:[%s21203_s2 + $0xc0] ss:$16 sps:$4 sm:$0xff]  }
 0x2e7   :  { %2716 = vmatpush1.bf16.msra.mxu1 %v14097_v62  ;;  %v14111_v62 = vld [vmem:[%s21203_s2 + $0xe4] ss:$16 sps:$4 sm:$0xff]  }
 0x2e8   :  { %2717 = vmatprep.subr.bf16.mxu1 %v14102_v54  ;;  %v14109_v54 = vld [vmem:[%s21203_s2 + $0xe0] ss:$16 sps:$4 sm:$0xff]  }
 0x2eb   :  { %2718 = vmatpush1.bf16.msra.mxu1 %v14100_v15  ;;  %v14114_v15 = vld [vmem:[%s21206_s5 + $0x4] ss:$16 sps:$4 sm:$0xff]  }
 0x2ec   :  { %2719 = vmatprep.subr.bf16.mxu1 %v14105_v5 }
 0x2ef   :  { %2720 = vmatpush1.bf16.msra.mxu1 %v14103_v40 }
 0x2f0   :  { %2721 = vmatprep.subr.bf16.mxu1 %v14108_v31 }
 0x2f3   :  { %2722 = vmatpush1.bf16.msra.mxu1 %v14106_v56 }
 0x2f4   :  { %2723 = vmatprep.subr.bf16.mxu1 %v14111_v62 }
 0x2f7   :  { %2724 = vmatpush1.bf16.msra.mxu1 %v14109_v54 }
 0x2f8   :  { %3038 = vmatprep.subr.bf16.mxu1 %v14114_v15 }
 0x30b   :  { %v1545_v5 = vpop.f32.mrb[32].mxu0  ;;  %v1586_v40 = vpop.f32.mrb[32].mxu1 }
 0x30c   :  { %v1593_v31 = vadd.f32 %v1545_v5, %v16396_v33  ;;  %v1595_v61 = vadd.f32 %v1586_v40, %v16399_v35  ;;  %v1547_v57 = vpop.f32.mrb[33].mxu0  ;;  %v1588_v55 = vpop.f32.mrb[33].mxu1 }
 0x30d   :  { %v1594_v56 = vadd.f32 %v1547_v57, %v16401_v37  ;;  %v1596_v51 = vadd.f32 %v1588_v55, %v16404_v39  ;;  %v1549_v53 = vpop.f32.mrb[34].mxu0  ;;  %v1590_v62 = vpop.f32.mrb[34].mxu1  ;;  %v14112_v55 = vld [vmem:[%s21206_s5] ss:$16 sps:$4 sm:$0xff]  }
 0x30e   :  { %v1597_v49 = vmul.f32 0.5, %v1593_v31  ;;  %v1550_v46 = vpop.f32.mrb[35].mxu0  ;;  %v1591_v43 = vpop.f32.mrb[35].mxu1  ;;  %v14120_v31 = vld [vmem:[%s21206_s5 + $0x44] ss:$16 sps:$4 sm:$0xff]  }
 0x30f   :  { %v1601_v45 = vmul.f32 0.5, %v1594_v56  ;;  %v1606_v54 = vmul.f32 0.5, %v1596_v51  ;;  %v14162_v56 = vld [vmem:[%s21211_s10 + $0x4] ss:$8 sps:$4 sm:$0xff]   ;;  %v14160_v62 = vld [vmem:[%s21211_s10] ss:$8 sps:$4 sm:$0xff]  }
 0x310   :  { %15630 = vtanh.f32 %v1597_v49  ;;  %2469 = vmatprep.subr.bf16.mxu0 %v14162_v56  ;;  %v14177_v56 = vld [vmem:[%s21211_s10 + $0x54] ss:$8 sps:$4 sm:$0xff]  }
 0x311   :  { %15632 = vtanh.f32 %v1601_v45  ;;  %2470 = vmatpush1.bf16.msra.mxu0 %v14160_v62  ;;  %v14135_v62 = vld [vmem:[%s21206_s5 + $0xe4] ss:$16 sps:$4 sm:$0xff]  }
 0x312   :  { %15634 = vtanh.f32 %v1595_v61 }
 0x313   :  { %15636 = vtanh.f32 %v1606_v54  ;;  %v14118_v54 = vld [vmem:[%s21206_s5 + $0x40] ss:$16 sps:$4 sm:$0xff]  }
 0x31a   :  { %v15631_v15 = vpop.eup %15630 }
 0x31b   :  { %v15633_v33 = vpop.eup %15632  ;;  %v1599_v5 = vadd.f32 1.0, %v15631_v15  ;;  %v14123_v15 = vld [vmem:[%s21206_s5 + $0x64] ss:$16 sps:$4 sm:$0xff]  }
 0x31c   :  { %v1603_v35 = vadd.f32 1.0, %v15633_v33  ;;  %v15635_v41 = vpop.eup %15634  ;;  %v14165_v33 = vld [vmem:[%s21211_s10 + $0x14] ss:$8 sps:$4 sm:$0xff]  }
 0x31d   :  { %v1600_v40 = vmul.f32 0.5, %v1599_v5  ;;  %v15637_v43 = vpop.eup %15636  ;;  %v14163_v5 = vld [vmem:[%s21211_s10 + $0x10] ss:$8 sps:$4 sm:$0xff]   ;;  %2471 = vmatprep.subr.bf16.mxu0 %v14165_v33  ;;  %v14180_v33 = vld [vmem:[%s21211_s10 + $0x64] ss:$8 sps:$4 sm:$0xff]  }
 0x31e   :  { %v1604_v37 = vmul.f32 0.5, %v1603_v35  ;;  %v1608_v46 = vadd.f32 1.0, %v15637_v43  ;;  %v14121_v35 = vld [vmem:[%s21206_s5 + $0x60] ss:$16 sps:$4 sm:$0xff]   ;;  %2472 = vmatpush1.bf16.msra.mxu0 %v14163_v5  ;;  %v14129_v43 = vld [vmem:[%s21206_s5 + $0xa4] ss:$16 sps:$4 sm:$0xff]  }
 0x31f   :  { %v1611_v57 = vmul.f32 %v15635_v41, %v1600_v40  ;;  %v14117_v41 = vld [vmem:[%s21206_s5 + $0x24] ss:$16 sps:$4 sm:$0xff]  }
 0x320   :  { %v1610_v39 = vmul.f32 %v1604_v37, %v16836_v30  ;;  %v1609_v45 = vmul.f32 0.5, %v1608_v46  ;;  %v14115_v30 = vld [vmem:[%s21206_s5 + $0x20] ss:$16 sps:$4 sm:$0xff]   ;;  %v14126_v40 = vld [vmem:[%s21206_s5 + $0x84] ss:$16 sps:$4 sm:$0xff]  }
 0x321   :  { %v14168_v37 = vld [vmem:[%s21211_s10 + $0x24] ss:$8 sps:$4 sm:$0xff]   ;;  %v14171_v46 = vld [vmem:[%s21211_s10 + $0x34] ss:$8 sps:$4 sm:$0xff]  }
 0x322   :  { %v17383_v53 = vadd.f32 %v1611_v57, %v1610_v39  ;;  %v14166_v57 = vld [vmem:[%s21211_s10 + $0x20] ss:$8 sps:$4 sm:$0xff]   ;;  %2473 = vmatprep.subr.bf16.mxu0 %v14168_v37 }
 0x323   :  { %v14124_v39 = vld [vmem:[%s21206_s5 + $0x80] ss:$16 sps:$4 sm:$0xff]   ;;  %2474 = vmatpush1.bf16.msra.mxu0 %v14166_v57 }
 0x324   :  { %21268 = vst [vmem:[#allocation33_spill] sm:$0xff] %v17383_v53  ;;  %15638 = vtanh.f32 %v17383_v53  ;;  %2475 = vmatprep.subr.bf16.mxu0 %v14171_v46 }
 0x32e   :  { %v15639_v49 = vpop.eup %15638 }
 0x32f   :  { %v1614_v51 = vmul.f32 %v15639_v49, %v1609_v45  ;;  %v14169_v45 = vld [vmem:[%s21211_s10 + $0x30] ss:$8 sps:$4 sm:$0xff]  }
 0x330   :  { %v14127_v49 = vld [vmem:[%s21206_s5 + $0xa0] ss:$16 sps:$4 sm:$0xff]   ;;  %2476 = vmatpush1.bf16.msra.mxu0 %v14169_v45 }
 0x331   :  { %v17389_v61 = vpack.c.bf16 %v1614_v51, %v1614_v51  ;;  %v14132_v51 = vld [vmem:[%s21206_s5 + $0xc4] ss:$16 sps:$4 sm:$0xff]  }
 0x333   :  { %2742 = vmatmul.mubr.bf16.vlgmr.msra.gmra.mrb[52].mxu1 %v17389_v61 }
 0x334   :  { %3039 = vmatpush1.bf16.msra.mxu1 %v14112_v55  ;;  %3070 = vmatprep.mubr.bf16.mxu1 %v21264_v29  ;;  %v14174_v55 = vld [vmem:[%s21211_s10 + $0x44] ss:$8 sps:$4 sm:$0xff]  }
 0x335   :  { %3040 = vmatprep.subr.bf16.mxu1 %v14117_v41  ;;  %v14172_v41 = vld [vmem:[%s21211_s10 + $0x40] ss:$8 sps:$4 sm:$0xff]   ;;  %2477 = vmatprep.subr.bf16.mxu0 %v14174_v55  ;;  %v14186_v55 = vld [vmem:[%s21203_s2 + $0xc] ss:$16 sps:$4 sm:$0xff]  }
 0x336   :  { %2478 = vmatpush1.bf16.msra.mxu0 %v14172_v41 }
 0x337   :  { %2479 = vmatprep.subr.bf16.mxu0 %v14177_v56 }
 0x338   :  { %3041 = vmatpush1.bf16.msra.mxu1 %v14115_v30  ;;  %v14130_v30 = vld [vmem:[%s21206_s5 + $0xc0] ss:$16 sps:$4 sm:$0xff]  }
 0x339   :  { %3042 = vmatprep.subr.bf16.mxu1 %v14120_v31  ;;  %v14175_v31 = vld [vmem:[%s21211_s10 + $0x50] ss:$8 sps:$4 sm:$0xff]  }
 0x33a   :  { %2480 = vmatpush1.bf16.msra.mxu0 %v14175_v31 }
 0x33b   :  { %2481 = vmatprep.subr.bf16.mxu0 %v14180_v33 }
 0x33c   :  { %3043 = vmatpush1.bf16.msra.mxu1 %v14118_v54  ;;  %v14133_v54 = vld [vmem:[%s21206_s5 + $0xe0] ss:$16 sps:$4 sm:$0xff]  }
 0x33d   :  { %3044 = vmatprep.subr.bf16.mxu1 %v14123_v15  ;;  %v14178_v15 = vld [vmem:[%s21211_s10 + $0x60] ss:$8 sps:$4 sm:$0xff]  }
 0x33e   :  { %2482 = vmatpush1.bf16.msra.mxu0 %v14178_v15 }
 0x340   :  { %3045 = vmatpush1.bf16.msra.mxu1 %v14121_v35 }
 0x341   :  { %3046 = vmatprep.subr.bf16.mxu1 %v14126_v40  ;;  %v14138_v40 = vld [vmem:[%s21205_s4 + $0x4] ss:$16 sps:$4 sm:$0xff]  }
 0x344   :  { %3047 = vmatpush1.bf16.msra.mxu1 %v14124_v39 }
 0x345   :  { %3048 = vmatprep.subr.bf16.mxu1 %v14129_v43 }
 0x348   :  { %3049 = vmatpush1.bf16.msra.mxu1 %v14127_v49  ;;  %v14181_v49 = vld [vmem:[%s21211_s10 + $0x70] ss:$8 sps:$4 sm:$0xff]  }
 0x349   :  { %3050 = vmatprep.subr.bf16.mxu1 %v14132_v51  ;;  %v14183_v51 = vld [vmem:[%s21211_s10 + $0x74] ss:$8 sps:$4 sm:$0xff]  }
 0x34a   :  { %2483 = vmatprep.subr.bf16.mxu0 %v14183_v51 }
 0x34b   :  { %2484 = vmatpush1.bf16.msra.mxu0 %v14181_v49 }
 0x34c   :  { %3051 = vmatpush1.bf16.msra.mxu1 %v14130_v30  ;;  %2750 = vmatprep.subr.bf16.mxu0 %v14186_v55 }
 0x34d   :  { %v1650_v5 = vpop.f32.mrb[36].mxu0  ;;  %v1691_v35 = vpop.f32.mrb[36].mxu1  ;;  %3052 = vmatprep.subr.bf16.mxu1 %v14135_v62 }
 0x34e   :  { %v1652_v37 = vpop.f32.mrb[37].mxu0  ;;  %v1693_v57 = vpop.f32.mrb[37].mxu1 }
 0x34f   :  { %v1654_v39 = vpop.f32.mrb[38].mxu0  ;;  %v1695_v43 = vpop.f32.mrb[38].mxu1 }
 0x350   :  { %v1655_v46 = vpop.f32.mrb[39].mxu0  ;;  %v1696_v45 = vpop.f32.mrb[39].mxu1  ;;  %3053 = vmatpush1.bf16.msra.mxu1 %v14133_v54 }
 0x351   :  { %3280 = vmatprep.subr.bf16.mxu1 %v14138_v40 }
 0x36d   :  { %v1732_v41 = vpop.f32.mrb[40].mxu0  ;;  %v1773_v30 = vpop.f32.mrb[40].mxu1 }
 0x36e   :  { %v1733_v31 = vadd.f32 %v1732_v41, %v1650_v5  ;;  %v1774_v56 = vadd.f32 %v1773_v30, %v1691_v35  ;;  %v1734_v62 = vpop.f32.mrb[41].mxu0  ;;  %v1775_v54 = vpop.f32.mrb[41].mxu1 }
 0x36f   :  { %v1735_v15 = vadd.f32 %v1734_v62, %v1652_v37  ;;  %v1776_v33 = vadd.f32 %v1775_v54, %v1693_v57  ;;  %v1736_v39 = vpop.f32.mrb[42].mxu0  ;;  %v1777_v43 = vpop.f32.mrb[42].mxu1 }
 0x370   :  { %v1780_v46 = vadd.f32 %v1733_v31, %v16929_v58  ;;  %v1737_v40 = vpop.f32.mrb[43].mxu0  ;;  %v1778_v45 = vpop.f32.mrb[43].mxu1  ;;  %v1782_v55 = vadd.f32 %v1774_v56, %v16952_v60  ;;  %v14157_v58 = vld [vmem:[%s21205_s4 + $0xe0] ss:$16 sps:$4 sm:$0xff]  }
 0x371   :  { %v1781_v49 = vadd.f32 %v1735_v15, %v16932_v9  ;;  %v1783_v5 = vadd.f32 %v1776_v33, %v16969_v24 }
 0x372   :  { %v1784_v51 = vmul.f32 0.5, %v1780_v46 }
 0x373   :  { %v1788_v53 = vmul.f32 0.5, %v1781_v49  ;;  %v1793_v35 = vmul.f32 0.5, %v1783_v5 }
 0x374   :  { %15640 = vtanh.f32 %v1784_v51 }
 0x375   :  { %15642 = vtanh.f32 %v1788_v53 }
 0x376   :  { %15644 = vtanh.f32 %v1782_v55 }
 0x377   :  { %15646 = vtanh.f32 %v1793_v35 }
 0x37e   :  { %v15641_v37 = vpop.eup %15640 }
 0x37f   :  { %v15643_v57 = vpop.eup %15642  ;;  %v1786_v41 = vadd.f32 1.0, %v15641_v37 }
 0x380   :  { %v1790_v30 = vadd.f32 1.0, %v15643_v57  ;;  %v15645_v62 = vpop.eup %15644 }
 0x381   :  { %v1787_v31 = vmul.f32 0.5, %v1786_v41  ;;  %v15647_v53 = vpop.eup %15646 }
 0x382   :  { %v1791_v54 = vmul.f32 0.5, %v1790_v30  ;;  %v1795_v56 = vadd.f32 1.0, %v15647_v53  ;;  %v14141_v30 = vld [vmem:[%s21205_s4 + $0x24] ss:$16 sps:$4 sm:$0xff]  }
 0x383   :  { %v1798_v39 = vmul.f32 %v15645_v62, %v1787_v31  ;;  %v14139_v31 = vld [vmem:[%s21205_s4 + $0x20] ss:$16 sps:$4 sm:$0xff]   ;;  %v14144_v62 = vld [vmem:[%s21205_s4 + $0x44] ss:$16 sps:$4 sm:$0xff]  }
 0x384   :  { %v1797_v15 = vmul.f32 %v1791_v54, %v16972_v59  ;;  %v1796_v35 = vmul.f32 0.5, %v1795_v56  ;;  %v14136_v59 = vld [vmem:[%s21205_s4] ss:$16 sps:$4 sm:$0xff]   ;;  %v14150_v53 = vld [vmem:[%s21205_s4 + $0x84] ss:$16 sps:$4 sm:$0xff]  }
 0x385   :  { %v14142_v54 = vld [vmem:[%s21205_s4 + $0x40] ss:$16 sps:$4 sm:$0xff]  }
 0x386   :  { %v17494_v43 = vadd.f32 %v1798_v39, %v1797_v15  ;;  %v14147_v39 = vld [vmem:[%s21205_s4 + $0x64] ss:$16 sps:$4 sm:$0xff]   ;;  %v14145_v15 = vld [vmem:[%s21205_s4 + $0x60] ss:$16 sps:$4 sm:$0xff]  }
 0x387   :  { %v14148_v56 = vld [vmem:[%s21205_s4 + $0x80] ss:$16 sps:$4 sm:$0xff]  }
 0x388   :  { %21269 = vst [vmem:[#allocation34_spill] sm:$0xff] %v17494_v43  ;;  %15648 = vtanh.f32 %v17494_v43 }
 0x38d   :  { %v2060_v46 = vpop.f32.mrb[44].mxu0  ;;  %v2101_v33 = vpop.f32.mrb[44].mxu1 }
 0x38e   :  { %v2062_v40 = vpop.f32.mrb[45].mxu0  ;;  %v2103_v45 = vpop.f32.mrb[45].mxu1 }
 0x38f   :  { %v2064_v49 = vpop.f32.mrb[46].mxu0  ;;  %v2105_v51 = vpop.f32.mrb[46].mxu1 }
 0x390   :  { %v2065_v55 = vpop.f32.mrb[47].mxu0  ;;  %v2106_v5 = vpop.f32.mrb[47].mxu1  ;;  %v14153_v49 = vld [vmem:[%s21205_s4 + $0xa4] ss:$16 sps:$4 sm:$0xff]   ;;  %v14151_v51 = vld [vmem:[%s21205_s4 + $0xa0] ss:$16 sps:$4 sm:$0xff]  }
 0x391   :  { %v493_v55 = vld [vmem:[%s21210_s9] sm:$0xf]  ;;  %v14156_v5 = vld [vmem:[%s21205_s4 + $0xc4] ss:$16 sps:$4 sm:$0xff]  }
 0x392   :  { %v15649_v37 = vpop.eup %15648  ;;  %v17554_v24 = vrot.slane %v493_v55, %v16363_v10 }
 0x393   :  { %v1801_v57 = vmul.f32 %v15649_v37, %v1796_v35  ;;  %v17541_v35 = vrot.slane %v493_v55, %v16367_v12  ;;  %v14154_v37 = vld [vmem:[%s21205_s4 + $0xc0] ss:$16 sps:$4 sm:$0xff]  }
 0x395   :  { %v17500_v41 = vpack.c.bf16 %v1801_v57, %v1801_v57 }
 0x397   :  { %3071 = vmatmul.mubr.bf16.vlgmr.msra.gmra.mrb[56].mxu1 %v17500_v41 }
 0x398   :  { %3281 = vmatpush1.bf16.msra.mxu1 %v14136_v59  ;;  %3312 = vmatprep.mubr.bf16.mxu1 %v21264_v29 }
 0x399   :  { %3282 = vmatprep.subr.bf16.mxu1 %v14141_v30  ;;  %v17547_v30 = vrot.slane %v493_v55, %v16372_v14 }
 0x39c   :  { %3283 = vmatpush1.bf16.msra.mxu1 %v14139_v31  ;;  %v14159_v31 = vld [vmem:[%s21205_s4 + $0xe4] ss:$16 sps:$4 sm:$0xff]  }
 0x39d   :  { %3284 = vmatprep.subr.bf16.mxu1 %v14144_v62 }
 0x3a0   :  { %3285 = vmatpush1.bf16.msra.mxu1 %v14142_v54 }
 0x3a1   :  { %3286 = vmatprep.subr.bf16.mxu1 %v14147_v39 }
 0x3a4   :  { %3287 = vmatpush1.bf16.msra.mxu1 %v14145_v15 }
 0x3a5   :  { %3288 = vmatprep.subr.bf16.mxu1 %v14150_v53 }
 0x3a8   :  { %3289 = vmatpush1.bf16.msra.mxu1 %v14148_v56 }
 0x3a9   :  { %3290 = vmatprep.subr.bf16.mxu1 %v14153_v49 }
 0x3ac   :  { %3291 = vmatpush1.bf16.msra.mxu1 %v14151_v51 }
 0x3ad   :  { %v2302_v57 = vpop.f32.mrb[48].mxu0  ;;  %v2343_v59 = vpop.f32.mrb[48].mxu1  ;;  %3292 = vmatprep.subr.bf16.mxu1 %v14156_v5 }
 0x3ae   :  { %v2303_v62 = vadd.f32 %v2302_v57, %v2060_v46  ;;  %v2344_v54 = vadd.f32 %v2343_v59, %v2101_v33  ;;  %v2304_v39 = vpop.f32.mrb[49].mxu0  ;;  %v2345_v15 = vpop.f32.mrb[49].mxu1  ;;  %v17562_v57 = vrot.slane %v493_v55, %v16365_v11 }
 0x3af   :  { %v2305_v53 = vadd.f32 %v2304_v39, %v2062_v40  ;;  %v2346_v56 = vadd.f32 %v2345_v15, %v2103_v45  ;;  %v2306_v49 = vpop.f32.mrb[50].mxu0  ;;  %v2347_v51 = vpop.f32.mrb[50].mxu1  ;;  %v14225_v39 = vld [vmem:[%s21206_s5 + $0xac] ss:$16 sps:$4 sm:$0xff]  }
 0x3b0   :  { %v2350_v43 = vadd.f32 %v2303_v62, %v17541_v35  ;;  %3293 = vmatpush1.bf16.msra.mxu1 %v14154_v37  ;;  %v2307_v60 = vpop.f32.mrb[51].mxu0  ;;  %v2348_v5 = vpop.f32.mrb[51].mxu1  ;;  %v2352_v45 = vadd.f32 %v2344_v54, %v17554_v24  ;;  %v14222_v62 = vld [vmem:[%s21206_s5 + $0x8c] ss:$16 sps:$4 sm:$0xff]   ;;  %v14220_v54 = vld [vmem:[%s21206_s5 + $0x88] ss:$16 sps:$4 sm:$0xff]  }
 0x3b1   :  { %v2351_v46 = vadd.f32 %v2305_v53, %v17547_v30  ;;  %3294 = vmatprep.subr.bf16.mxu1 %v14159_v31  ;;  %v2353_v10 = vadd.f32 %v2346_v56, %v17562_v57  ;;  %v21270_v53 = vld [vmem:[#allocation10_spill] sm:$0xff]  ;;  %v21271_v51 = vld [vmem:[#allocation12_spill] sm:$0xff] }
 0x3b2   :  { %v2354_v33 = vmul.f32 0.5, %v2350_v43 }
 0x3b3   :  { %v2358_v40 = vmul.f32 0.5, %v2351_v46  ;;  %v2363_v60 = vmul.f32 0.5, %v2353_v10  ;;  %v14226_v10 = vld [vmem:[%s21206_s5 + $0xc8] ss:$16 sps:$4 sm:$0xff]  }
 0x3b4   :  { %15650 = vtanh.f32 %v2354_v33  ;;  %3295 = vmatpush1.bf16.msra.mxu1 %v14157_v58  ;;  %v14223_v33 = vld [vmem:[%s21206_s5 + $0xa8] ss:$16 sps:$4 sm:$0xff]  }
 0x3b5   :  { %15652 = vtanh.f32 %v2358_v40  ;;  %3608 = vmatprep.subr.bf16.mxu1 %v17028_v63 }
 0x3b6   :  { %15654 = vtanh.f32 %v2352_v45  ;;  %v14228_v45 = vld [vmem:[%s21206_s5 + $0xcc] ss:$16 sps:$4 sm:$0xff]  }
 0x3b7   :  { %3313 = vmatmul.mubr.bf16.vlgmr.msra.gmra.mrb[60].mxu1 %v17389_v61  ;;  %15656 = vtanh.f32 %v2363_v60  ;;  %v14231_v60 = vld [vmem:[%s21206_s5 + $0xec] ss:$16 sps:$4 sm:$0xff]  }
 0x3b8   :  { %3609 = vmatpush1.bf16.msra.mxu1 %v17038_v16  ;;  %3640 = vmatprep.mubr.bf16.mxu1 %v21264_v29 }
 0x3b9   :  { %3610 = vmatprep.subr.bf16.mxu1 %v17047_v17 }
 0x3bc   :  { %3611 = vmatpush1.bf16.msra.mxu1 %v17058_v19 }
 0x3bd   :  { %3612 = vmatprep.subr.bf16.mxu1 %v17067_v21 }
 0x3be   :  { %v15651_v11 = vpop.eup %15650 }
 0x3bf   :  { %v15653_v58 = vpop.eup %15652  ;;  %v2356_v43 = vadd.f32 1.0, %v15651_v11  ;;  %v14229_v11 = vld [vmem:[%s21206_s5 + $0xe8] ss:$16 sps:$4 sm:$0xff]  }
 0x3c0   :  { %v2360_v63 = vadd.f32 1.0, %v15653_v58  ;;  %3613 = vmatpush1.bf16.msra.mxu1 %v17078_v3  ;;  %v15655_v16 = vpop.eup %15654  ;;  %v14234_v58 = vld [vmem:[%s21205_s4 + $0xc] ss:$16 sps:$4 sm:$0xff]  }
 0x3c1   :  { %v2357_v55 = vmul.f32 0.5, %v2356_v43  ;;  %3614 = vmatprep.subr.bf16.mxu1 %v17087_v7  ;;  %v15657_v19 = vpop.eup %15656  ;;  %v14232_v43 = vld [vmem:[%s21205_s4 + $0x8] ss:$16 sps:$4 sm:$0xff]  }
 0x3c2   :  { %v2361_v37 = vmul.f32 0.5, %v2360_v63  ;;  %v2365_v21 = vadd.f32 1.0, %v15657_v19  ;;  %v14237_v63 = vld [vmem:[%s21205_s4 + $0x2c] ss:$16 sps:$4 sm:$0xff]  }
 0x3c3   :  { %v2368_v59 = vmul.f32 %v15655_v16, %v2357_v55  ;;  %v14235_v55 = vld [vmem:[%s21205_s4 + $0x28] ss:$16 sps:$4 sm:$0xff]   ;;  %v14240_v16 = vld [vmem:[%s21205_s4 + $0x4c] ss:$16 sps:$4 sm:$0xff]  }
 0x3c4   :  { %v2367_v31 = vmul.f32 0.0, %v2361_v37  ;;  %3615 = vmatpush1.bf16.msra.mxu1 %v17096_v26  ;;  %v2366_v3 = vmul.f32 0.5, %v2365_v21  ;;  %v14238_v37 = vld [vmem:[%s21205_s4 + $0x48] ss:$16 sps:$4 sm:$0xff]   ;;  %v14246_v19 = vld [vmem:[%s21205_s4 + $0x8c] ss:$16 sps:$4 sm:$0xff]  }
 0x3c5   :  { %3616 = vmatprep.subr.bf16.mxu1 %v17105_v34  ;;  %v14184_v34 = vld [vmem:[%s21203_s2 + $0x8] ss:$16 sps:$4 sm:$0xff]  }
 0x3c6   :  { %v17576_v17 = vadd.f32 %v2368_v59, %v2367_v31  ;;  %v14243_v59 = vld [vmem:[%s21205_s4 + $0x6c] ss:$16 sps:$4 sm:$0xff]   ;;  %v14241_v31 = vld [vmem:[%s21205_s4 + $0x68] ss:$16 sps:$4 sm:$0xff]  }
 0x3c7   :  { %v14244_v21 = vld [vmem:[%s21205_s4 + $0x88] ss:$16 sps:$4 sm:$0xff]  }
 0x3c8   :  { %15658 = vtanh.f32 %v17576_v17  ;;  %3617 = vmatpush1.bf16.msra.mxu1 %v17114_v38 }
 0x3c9   :  { %3618 = vmatprep.subr.bf16.mxu1 %v17123_v42  ;;  %v14189_v42 = vld [vmem:[%s21203_s2 + $0x2c] ss:$16 sps:$4 sm:$0xff]  }
 0x3cc   :  { %3619 = vmatpush1.bf16.msra.mxu1 %v17132_v50  ;;  %v14187_v50 = vld [vmem:[%s21203_s2 + $0x28] ss:$16 sps:$4 sm:$0xff]  }
 0x3cd   :  { %3620 = vmatprep.subr.bf16.mxu1 %v17141_v27  ;;  %v14192_v27 = vld [vmem:[%s21203_s2 + $0x4c] ss:$16 sps:$4 sm:$0xff]  }
 0x3d0   :  { %3621 = vmatpush1.bf16.msra.mxu1 %v17150_v25  ;;  %v14190_v25 = vld [vmem:[%s21203_s2 + $0x48] ss:$16 sps:$4 sm:$0xff]  }
 0x3d1   :  { %3622 = vmatprep.subr.bf16.mxu1 %v17159_v4  ;;  %v14195_v4 = vld [vmem:[%s21203_s2 + $0x6c] ss:$16 sps:$4 sm:$0xff]  }
 0x3d2   :  { %v15659_v7 = vpop.eup %15658 }
 0x3d3   :  { %v2371_v26 = vmul.f32 %v15659_v7, %v2366_v3  ;;  %v14249_v3 = vld [vmem:[%s21205_s4 + $0xac] ss:$16 sps:$4 sm:$0xff]   ;;  %v14247_v7 = vld [vmem:[%s21205_s4 + $0xa8] ss:$16 sps:$4 sm:$0xff]  }
 0x3d4   :  { %3623 = vmatpush1.bf16.msra.mxu1 %v17168_v1  ;;  %v14193_v1 = vld [vmem:[%s21203_s2 + $0x68] ss:$16 sps:$4 sm:$0xff]  }
 0x3d5   :  { %3850 = vmatprep.subr.bf16.mxu1 %v17177_v28  ;;  %v17590_v38 = vpack.c.bf16 %v2371_v26, %v2371_v26  ;;  %v14198_v28 = vld [vmem:[%s21203_s2 + $0x8c] ss:$16 sps:$4 sm:$0xff]  }
 0x3d6   :  { %v14252_v26 = vld [vmem:[%s21205_s4 + $0xcc] ss:$16 sps:$4 sm:$0xff]  }
 0x3d7   :  { %2502 = vmatmul.mubr.bf16.vlgmr.msra.gmra.mrb[52].mxu0 %v17590_v38  ;;  %3641 = vmatmul.mubr.bf16.vlgmr.msra.gmra.mrb[64].mxu1 %v17590_v38 }
 0x3d8   :  { %2751 = vmatpush1.bf16.msra.mxu0 %v14184_v34  ;;  %3851 = vmatpush1.bf16.msra.mxu1 %v17186_v6  ;;  %v14196_v6 = vld [vmem:[%s21203_s2 + $0x88] ss:$16 sps:$4 sm:$0xff]  }
 0x3d9   :  { %2752 = vmatprep.subr.bf16.mxu0 %v14189_v42  ;;  %3852 = vmatprep.subr.bf16.mxu1 %v17195_v47  ;;  %v14201_v47 = vld [vmem:[%s21203_s2 + $0xac] ss:$16 sps:$4 sm:$0xff]   ;;  %v14250_v34 = vld [vmem:[%s21205_s4 + $0xc8] ss:$16 sps:$4 sm:$0xff]  }
 0x3da   :  { %2782 = vmatprep.mubr.bf16.mxu0 %v21264_v29  ;;  %3882 = vmatprep.mubr.bf16.mxu1 %v21264_v29  ;;  %v14255_v42 = vld [vmem:[%s21205_s4 + $0xec] ss:$16 sps:$4 sm:$0xff]  }
 0x3dc   :  { %2753 = vmatpush1.bf16.msra.mxu0 %v14187_v50  ;;  %3853 = vmatpush1.bf16.msra.mxu1 %v17206_v0  ;;  %v14199_v0 = vld [vmem:[%s21203_s2 + $0xa8] ss:$16 sps:$4 sm:$0xff]  }
 0x3dd   :  { %2754 = vmatprep.subr.bf16.mxu0 %v14192_v27  ;;  %3854 = vmatprep.subr.bf16.mxu1 %v17215_v18  ;;  %v14204_v18 = vld [vmem:[%s21203_s2 + $0xcc] ss:$16 sps:$4 sm:$0xff]   ;;  %v14253_v50 = vld [vmem:[%s21205_s4 + $0xe8] ss:$16 sps:$4 sm:$0xff]  }
 0x3de   :  { %v14258_v27 = vld [vmem:[%s21209_s8 + $0xc] ss:$16 sps:$4 sm:$0xff]  }
 0x3e0   :  { %2755 = vmatpush1.bf16.msra.mxu0 %v14190_v25  ;;  %3855 = vmatpush1.bf16.msra.mxu1 %v17226_v22  ;;  %v14202_v22 = vld [vmem:[%s21203_s2 + $0xc8] ss:$16 sps:$4 sm:$0xff]  }
 0x3e1   :  { %2756 = vmatprep.subr.bf16.mxu0 %v14195_v4  ;;  %3856 = vmatprep.subr.bf16.mxu1 %v17235_v23  ;;  %v14207_v23 = vld [vmem:[%s21203_s2 + $0xec] ss:$16 sps:$4 sm:$0xff]   ;;  %v14256_v25 = vld [vmem:[%s21209_s8 + $0x8] ss:$16 sps:$4 sm:$0xff]  }
 0x3e2   :  { %v14261_v4 = vld [vmem:[%s21209_s8 + $0x2c] ss:$16 sps:$4 sm:$0xff]  }
 0x3e4   :  { %2757 = vmatpush1.bf16.msra.mxu0 %v14193_v1  ;;  %3857 = vmatpush1.bf16.msra.mxu1 %v17244_v36  ;;  %v14205_v36 = vld [vmem:[%s21203_s2 + $0xe8] ss:$16 sps:$4 sm:$0xff]  }
 0x3e5   :  { %2758 = vmatprep.subr.bf16.mxu0 %v14198_v28  ;;  %3858 = vmatprep.subr.bf16.mxu1 %v17253_v44  ;;  %v14210_v44 = vld [vmem:[%s21206_s5 + $0xc] ss:$16 sps:$4 sm:$0xff]   ;;  %v14259_v1 = vld [vmem:[%s21209_s8 + $0x28] ss:$16 sps:$4 sm:$0xff]  }
 0x3e6   :  { %v14264_v28 = vld [vmem:[%s21209_s8 + $0x4c] ss:$16 sps:$4 sm:$0xff]  }
 0x3e8   :  { %2759 = vmatpush1.bf16.msra.mxu0 %v14196_v6  ;;  %3859 = vmatpush1.bf16.msra.mxu1 %v17262_v2  ;;  %v14208_v2 = vld [vmem:[%s21206_s5 + $0x8] ss:$16 sps:$4 sm:$0xff]  }
 0x3e9   :  { %2760 = vmatprep.subr.bf16.mxu0 %v14201_v47  ;;  %3860 = vmatprep.subr.bf16.mxu1 %v17271_v13  ;;  %v14213_v13 = vld [vmem:[%s21206_s5 + $0x2c] ss:$16 sps:$4 sm:$0xff]   ;;  %v14262_v6 = vld [vmem:[%s21209_s8 + $0x48] ss:$16 sps:$4 sm:$0xff]  }
 0x3ea   :  { %v14265_v47 = vld [vmem:[%s21209_s8 + $0x68] ss:$16 sps:$4 sm:$0xff]  }
 0x3ec   :  { %2761 = vmatpush1.bf16.msra.mxu0 %v14199_v0  ;;  %3861 = vmatpush1.bf16.msra.mxu1 %v17280_v52  ;;  %v14211_v52 = vld [vmem:[%s21206_s5 + $0x28] ss:$16 sps:$4 sm:$0xff]   ;;  %v14270_v0 = vld [vmem:[%s21209_s8 + $0x8c] ss:$16 sps:$4 sm:$0xff]  }
 0x3ed   :  { %2762 = vmatprep.subr.bf16.mxu0 %v14204_v18  ;;  %3862 = vmatprep.subr.bf16.mxu1 %v17289_v48  ;;  %v14216_v48 = vld [vmem:[%s21206_s5 + $0x4c] ss:$16 sps:$4 sm:$0xff]   ;;  %v14268_v18 = vld [vmem:[%s21209_s8 + $0x88] ss:$16 sps:$4 sm:$0xff]  }
 0x3f0   :  { %2763 = vmatpush1.bf16.msra.mxu0 %v14202_v22  ;;  %3863 = vmatpush1.bf16.msra.mxu1 %v17298_v20  ;;  %v14214_v20 = vld [vmem:[%s21206_s5 + $0x48] ss:$16 sps:$4 sm:$0xff]   ;;  %v14273_v22 = vld [vmem:[%s21209_s8 + $0xac] ss:$16 sps:$4 sm:$0xff]  }
 0x3f1   :  { %2764 = vmatprep.subr.bf16.mxu0 %v14207_v23  ;;  %3864 = vmatprep.subr.bf16.mxu1 %v17307_v32  ;;  %v14219_v32 = vld [vmem:[%s21206_s5 + $0x6c] ss:$16 sps:$4 sm:$0xff]   ;;  %v14271_v23 = vld [vmem:[%s21209_s8 + $0xa8] ss:$16 sps:$4 sm:$0xff]  }
 0x3f4   :  { %2765 = vmatpush1.bf16.msra.mxu0 %v14205_v36  ;;  %3865 = vmatpush1.bf16.msra.mxu1 %v17316_v8  ;;  %v14217_v8 = vld [vmem:[%s21206_s5 + $0x68] ss:$16 sps:$4 sm:$0xff]   ;;  %v14276_v36 = vld [vmem:[%s21209_s8 + $0xcc] ss:$16 sps:$4 sm:$0xff]  }
 0x3f5   :  { %3079 = vmatprep.subr.bf16.mxu0 %v14210_v44  ;;  %v14274_v44 = vld [vmem:[%s21209_s8 + $0xc8] ss:$16 sps:$4 sm:$0xff]  }
 0x3f7   :  { %2783 = vmatmul.mubr.bf16.vlgmr.msra.gmra.mrb[56].mxu0 %v17389_v61  ;;  %3883 = vmatmul.mubr.bf16.vlgmr.msra.gmra.mrb[68].mxu1 %v17500_v41 }
 0x3f8   :  { %3080 = vmatpush1.bf16.msra.mxu0 %v14208_v2  ;;  %3111 = vmatprep.mubr.bf16.mxu0 %v21264_v29  ;;  %v14279_v2 = vld [vmem:[%s21209_s8 + $0xec] ss:$16 sps:$4 sm:$0xff]  }
 0x3f9   :  { %3081 = vmatprep.subr.bf16.mxu0 %v14213_v13  ;;  %4083 = vmatprep.mubr.bf16.mxu1 %v21264_v29  ;;  %v14277_v13 = vld [vmem:[%s21209_s8 + $0xe8] ss:$16 sps:$4 sm:$0xff]  }
 0x3fc   :  { %3082 = vmatpush1.bf16.msra.mxu0 %v14211_v52  ;;  %v14282_v52 = vld [vmem:[%s21208_s7 + $0xc] ss:$16 sps:$4 sm:$0xff]  }
 0x3fd   :  { %3083 = vmatprep.subr.bf16.mxu0 %v14216_v48  ;;  %v14280_v48 = vld [vmem:[%s21208_s7 + $0x8] ss:$16 sps:$4 sm:$0xff]  }
 0x400   :  { %3084 = vmatpush1.bf16.msra.mxu0 %v14214_v20  ;;  %v14285_v20 = vld [vmem:[%s21208_s7 + $0x2c] ss:$16 sps:$4 sm:$0xff]  }
 0x401   :  { %3085 = vmatprep.subr.bf16.mxu0 %v14219_v32  ;;  %v14283_v32 = vld [vmem:[%s21208_s7 + $0x28] ss:$16 sps:$4 sm:$0xff]  }
 0x404   :  { %3086 = vmatpush1.bf16.msra.mxu0 %v14217_v8  ;;  %v14288_v8 = vld [vmem:[%s21208_s7 + $0x4c] ss:$16 sps:$4 sm:$0xff]  }
 0x405   :  { %3087 = vmatprep.subr.bf16.mxu0 %v14222_v62  ;;  %v14286_v62 = vld [vmem:[%s21208_s7 + $0x48] ss:$16 sps:$4 sm:$0xff]  }
 0x406   :  { %v2743_v15 = vpop.f32.mrb[52].mxu1 }
 0x407   :  { %v17691_v56 = vadd.f32 %v2743_v15, %v21270_v53  ;;  %v2745_v49 = vpop.f32.mrb[53].mxu1  ;;  %v14292_v15 = vld [vmem:[%s21208_s7 + $0x88] ss:$16 sps:$4 sm:$0xff]   ;;  %v14297_v53 = vld [vmem:[%s21208_s7 + $0xac] ss:$16 sps:$4 sm:$0xff]  }
 0x408   :  { %3088 = vmatpush1.bf16.msra.mxu0 %v14220_v54  ;;  %v17694_v5 = vadd.f32 %v2745_v49, %v21271_v51  ;;  %v2747_v46 = vpop.f32.mrb[54].mxu1  ;;  %v14289_v54 = vld [vmem:[%s21208_s7 + $0x68] ss:$16 sps:$4 sm:$0xff]   ;;  %v14300_v51 = vld [vmem:[%s21208_s7 + $0xcc] ss:$16 sps:$4 sm:$0xff]  }
 0x409   :  { %3089 = vmatprep.subr.bf16.mxu0 %v14225_v39  ;;  %v2748_v40 = vpop.f32.mrb[55].mxu1  ;;  %v14294_v39 = vld [vmem:[%s21208_s7 + $0x8c] ss:$16 sps:$4 sm:$0xff]   ;;  %v14295_v49 = vld [vmem:[%s21208_s7 + $0xa8] ss:$16 sps:$4 sm:$0xff]  }
 0x40c   :  { %3090 = vmatpush1.bf16.msra.mxu0 %v14223_v33 }
 0x40d   :  { %3091 = vmatprep.subr.bf16.mxu0 %v14228_v45  ;;  %v14298_v45 = vld [vmem:[%s21208_s7 + $0xc8] ss:$16 sps:$4 sm:$0xff]  }
 0x410   :  { %3092 = vmatpush1.bf16.msra.mxu0 %v14226_v10 }
 0x411   :  { %3093 = vmatprep.subr.bf16.mxu0 %v14231_v60  ;;  %v14303_v60 = vld [vmem:[%s21208_s7 + $0xec] ss:$16 sps:$4 sm:$0xff]  }
 0x414   :  { %3094 = vmatpush1.bf16.msra.mxu0 %v14229_v11  ;;  %v14301_v11 = vld [vmem:[%s21208_s7 + $0xe8] ss:$16 sps:$4 sm:$0xff]  }
 0x415   :  { %3321 = vmatprep.subr.bf16.mxu0 %v14234_v58  ;;  %v14306_v58 = vld [vmem:[%s21203_s2 + $0x4] ss:$16 sps:$4 sm:$0xff]  }
 0x417   :  { %3112 = vmatmul.mubr.bf16.vlgmr.msra.gmra.mrb[60].mxu0 %v17500_v41 }
 0x418   :  { %3322 = vmatpush1.bf16.msra.mxu0 %v14232_v43  ;;  %3353 = vmatprep.mubr.bf16.mxu0 %v21264_v29  ;;  %v14304_v43 = vld [vmem:[%s21203_s2] ss:$16 sps:$4 sm:$0xff]  }
 0x419   :  { %3323 = vmatprep.subr.bf16.mxu0 %v14237_v63  ;;  %v14309_v63 = vld [vmem:[%s21203_s2 + $0x24] ss:$16 sps:$4 sm:$0xff]  }
 0x41c   :  { %3324 = vmatpush1.bf16.msra.mxu0 %v14235_v55  ;;  %v14307_v55 = vld [vmem:[%s21203_s2 + $0x20] ss:$16 sps:$4 sm:$0xff]  }
 0x41d   :  { %3325 = vmatprep.subr.bf16.mxu0 %v14240_v16  ;;  %v14312_v16 = vld [vmem:[%s21203_s2 + $0x44] ss:$16 sps:$4 sm:$0xff]  }
 0x420   :  { %3326 = vmatpush1.bf16.msra.mxu0 %v14238_v37  ;;  %v14310_v37 = vld [vmem:[%s21203_s2 + $0x40] ss:$16 sps:$4 sm:$0xff]  }
 0x421   :  { %3327 = vmatprep.subr.bf16.mxu0 %v14243_v59  ;;  %v14313_v59 = vld [vmem:[%s21203_s2 + $0x60] ss:$16 sps:$4 sm:$0xff]  }
 0x424   :  { %3328 = vmatpush1.bf16.msra.mxu0 %v14241_v31  ;;  %v14318_v31 = vld [vmem:[%s21203_s2 + $0x84] ss:$16 sps:$4 sm:$0xff]  }
 0x425   :  { %3329 = vmatprep.subr.bf16.mxu0 %v14246_v19  ;;  %v14316_v19 = vld [vmem:[%s21203_s2 + $0x80] ss:$16 sps:$4 sm:$0xff]  }
 0x428   :  { %3330 = vmatpush1.bf16.msra.mxu0 %v14244_v21  ;;  %v14321_v21 = vld [vmem:[%s21203_s2 + $0xa4] ss:$16 sps:$4 sm:$0xff]  }
 0x429   :  { %3331 = vmatprep.subr.bf16.mxu0 %v14249_v3  ;;  %v14319_v3 = vld [vmem:[%s21203_s2 + $0xa0] ss:$16 sps:$4 sm:$0xff]  }
 0x42c   :  { %3332 = vmatpush1.bf16.msra.mxu0 %v14247_v7  ;;  %v14324_v7 = vld [vmem:[%s21203_s2 + $0xc4] ss:$16 sps:$4 sm:$0xff]  }
 0x42d   :  { %3333 = vmatprep.subr.bf16.mxu0 %v14252_v26 }
 0x430   :  { %3334 = vmatpush1.bf16.msra.mxu0 %v14250_v34 }
 0x431   :  { %3335 = vmatprep.subr.bf16.mxu0 %v14255_v42 }
 0x434   :  { %3336 = vmatpush1.bf16.msra.mxu0 %v14253_v50 }
 0x435   :  { %3649 = vmatprep.subr.bf16.mxu0 %v14258_v27 }
 0x437   :  { %3354 = vmatmul.mubr.bf16.vlgmr.msra.gmra.mrb[64].mxu0 %v17389_v61  ;;  %v14267_v61 = vld [vmem:[%s21209_s8 + $0x6c] ss:$16 sps:$4 sm:$0xff]  }
 0x438   :  { %3650 = vmatpush1.bf16.msra.mxu0 %v14256_v25  ;;  %3681 = vmatprep.mubr.bf16.mxu0 %v21264_v29  ;;  %v14322_v25 = vld [vmem:[%s21203_s2 + $0xc0] ss:$16 sps:$4 sm:$0xff]  }
 0x439   :  { %3651 = vmatprep.subr.bf16.mxu0 %v14261_v4 }
 0x43c   :  { %3652 = vmatpush1.bf16.msra.mxu0 %v14259_v1  ;;  %v14327_v1 = vld [vmem:[%s21203_s2 + $0xe4] ss:$16 sps:$4 sm:$0xff]  }
 0x43d   :  { %3653 = vmatprep.subr.bf16.mxu0 %v14264_v28  ;;  %v14325_v28 = vld [vmem:[%s21203_s2 + $0xe0] ss:$16 sps:$4 sm:$0xff]  }
 0x440   :  { %3654 = vmatpush1.bf16.msra.mxu0 %v14262_v6  ;;  %v14330_v6 = vld [vmem:[%s21206_s5 + $0x4] ss:$16 sps:$4 sm:$0xff]  }
 0x441   :  { %3655 = vmatprep.subr.bf16.mxu0 %v14267_v61  ;;  %v515_v61 = vld [vmem:[%s21212_s11] sm:$0x3] }
 0x444   :  { %3656 = vmatpush1.bf16.msra.mxu0 %v14265_v47  ;;  %v17922_v47 = vrot.slane %v515_v61, %v16367_v12  ;;  %v2799_v12 = vmul.f32 0.5, %v17694_v5 }
 0x445   :  { %3657 = vmatprep.subr.bf16.mxu0 %v14270_v0  ;;  %v17925_v0 = vrot.slane %v515_v61, %v16372_v14  ;;  %v14412_v61 = vld [vmem:[%s21211_s10 + $0x60] ss:$8 sps:$4 sm:$0xff]  }
 0x446   :  { %21272 = vst [vmem:[#allocation10_spill] sm:$0xff] %v17922_v47  ;;  %15660 = vtanh.f32 %v2799_v12  ;;  %v14426_v12 = vld [vmem:[%s21203_s2 + $0xc] ss:$16 sps:$4 sm:$0xff]  }
 0x448   :  { %3658 = vmatpush1.bf16.msra.mxu0 %v14268_v18 }
 0x449   :  { %3659 = vmatprep.subr.bf16.mxu0 %v14273_v22 }
 0x44c   :  { %3660 = vmatpush1.bf16.msra.mxu0 %v14271_v23 }
 0x44d   :  { %3661 = vmatprep.subr.bf16.mxu0 %v14276_v36 }
 0x450   :  { %3662 = vmatpush1.bf16.msra.mxu0 %v14274_v44 }
 0x451   :  { %3663 = vmatprep.subr.bf16.mxu0 %v14279_v2 }
 0x454   :  { %3664 = vmatpush1.bf16.msra.mxu0 %v14277_v13 }
 0x455   :  { %3891 = vmatprep.subr.bf16.mxu0 %v14282_v52 }
 0x457   :  { %3682 = vmatmul.mubr.bf16.vlgmr.msra.gmra.mrb[68].mxu0 %v17590_v38  ;;  %v14291_v38 = vld [vmem:[%s21208_s7 + $0x6c] ss:$16 sps:$4 sm:$0xff]  }
 0x458   :  { %3892 = vmatpush1.bf16.msra.mxu0 %v14280_v48  ;;  %3923 = vmatprep.mubr.bf16.mxu0 %v21264_v29 }
 0x459   :  { %3893 = vmatprep.subr.bf16.mxu0 %v14285_v20 }
 0x45c   :  { %3894 = vmatpush1.bf16.msra.mxu0 %v14283_v32  ;;  %v2795_v32 = vmul.f32 0.5, %v17691_v56 }
 0x45d   :  { %3895 = vmatprep.subr.bf16.mxu0 %v14288_v8 }
 0x45e   :  { %15662 = vtanh.f32 %v2795_v32 }
 0x460   :  { %3896 = vmatpush1.bf16.msra.mxu0 %v14286_v62  ;;  %v21273_v62 = vld [vmem:[#allocation11_spill] sm:$0xff] }
 0x461   :  { %3897 = vmatprep.subr.bf16.mxu0 %v14291_v38 }
 0x464   :  { %3898 = vmatpush1.bf16.msra.mxu0 %v14289_v54 }
 0x465   :  { %3899 = vmatprep.subr.bf16.mxu0 %v14294_v39 }
 0x468   :  { %3900 = vmatpush1.bf16.msra.mxu0 %v14292_v15 }
 0x469   :  { %3901 = vmatprep.subr.bf16.mxu0 %v14297_v53  ;;  %v14378_v53 = vld [vmem:[%s21211_s10 + $0x4] ss:$8 sps:$4 sm:$0xff]  }
 0x46a   :  { %v3072_v46 = vpop.f32.mrb[56].mxu1  ;;  %4051 = vmatprep.subr.bf16.mxu1 %v14378_v53  ;;  %v14337_v53 = vld [vmem:[%s21206_s5 + $0x60] ss:$16 sps:$4 sm:$0xff]  }
 0x46b   :  { %v3074_v33 = vpop.f32.mrb[57].mxu1 }
 0x46c   :  { %3902 = vmatpush1.bf16.msra.mxu0 %v14295_v49  ;;  %v3076_v40 = vpop.f32.mrb[58].mxu1  ;;  %v21274_v49 = vld [vmem:[#allocation13_spill] sm:$0xff] }
 0x46d   :  { %v3077_v10 = vpop.f32.mrb[59].mxu1  ;;  %3903 = vmatprep.subr.bf16.mxu0 %v14300_v51  ;;  %v15661_v40 = vpop.eup %15660 }
 0x470   :  { %3904 = vmatpush1.bf16.msra.mxu0 %v14298_v45 }
 0x471   :  { %3905 = vmatprep.subr.bf16.mxu0 %v14303_v60  ;;  %v15663_v60 = vpop.eup %15662 }
 0x474   :  { %3906 = vmatpush1.bf16.msra.mxu0 %v14301_v11  ;;  %v14384_v11 = vld [vmem:[%s21211_s10 + $0x14] ss:$8 sps:$4 sm:$0xff]  }
 0x475   :  { %4291 = vmatprep.subr.bf16.mxu0 %v14306_v58  ;;  %v2801_v58 = vadd.f32 1.0, %v15661_v40  ;;  %v14348_v40 = vld [vmem:[%s21206_s5 + $0xc4] ss:$16 sps:$4 sm:$0xff]  }
 0x477   :  { %3924 = vmatmul.mubr.bf16.vlgmr.msra.gmra.mrb[72].mxu0 %v17500_v41  ;;  %v14315_v41 = vld [vmem:[%s21203_s2 + $0x64] ss:$16 sps:$4 sm:$0xff]  }
 0x478   :  { %4292 = vmatpush1.bf16.msra.mxu0 %v14304_v43  ;;  %4323 = vmatprep.mubr.bf16.mxu0 %v21264_v29 }
 0x479   :  { %4293 = vmatprep.subr.bf16.mxu0 %v14309_v63  ;;  %v14382_v63 = vld [vmem:[%s21211_s10 + $0x10] ss:$8 sps:$4 sm:$0xff]  }
 0x47c   :  { %4294 = vmatpush1.bf16.msra.mxu0 %v14307_v55  ;;  %v2797_v55 = vadd.f32 1.0, %v15663_v60  ;;  %v14346_v60 = vld [vmem:[%s21206_s5 + $0xc0] ss:$16 sps:$4 sm:$0xff]  }
 0x47d   :  { %4295 = vmatprep.subr.bf16.mxu0 %v14312_v16  ;;  %v14390_v16 = vld [vmem:[%s21211_s10 + $0x24] ss:$8 sps:$4 sm:$0xff]  }
 0x480   :  { %4296 = vmatpush1.bf16.msra.mxu0 %v14310_v37  ;;  %v2802_v37 = vmul.f32 0.5, %v2801_v58  ;;  %v14351_v58 = vld [vmem:[%s21206_s5 + $0xe4] ss:$16 sps:$4 sm:$0xff]  }
 0x481   :  { %4297 = vmatprep.subr.bf16.mxu0 %v14315_v41  ;;  %v14388_v41 = vld [vmem:[%s21211_s10 + $0x20] ss:$8 sps:$4 sm:$0xff]  }
 0x484   :  { %4298 = vmatpush1.bf16.msra.mxu0 %v14313_v59  ;;  %v2798_v59 = vmul.f32 0.5, %v2797_v55 }
 0x485   :  { %4299 = vmatprep.subr.bf16.mxu0 %v14318_v31 }
 0x488   :  { %4300 = vmatpush1.bf16.msra.mxu0 %v14316_v19  ;;  %v14396_v19 = vld [vmem:[%s21211_s10 + $0x34] ss:$8 sps:$4 sm:$0xff]  }
 0x489   :  { %4301 = vmatprep.subr.bf16.mxu0 %v14321_v21  ;;  %v21275_v21 = vld [vmem:[#allocation33_spill] sm:$0xff] }
 0x48a   :  { %v3314_v26 = vpop.f32.mrb[60].mxu1 }
 0x48b   :  { %v17902_v34 = vadd.f32 %v3314_v26, %v3072_v46  ;;  %v3316_v42 = vpop.f32.mrb[61].mxu1  ;;  %v14394_v26 = vld [vmem:[%s21211_s10 + $0x30] ss:$8 sps:$4 sm:$0xff]  }
 0x48c   :  { %v17904_v50 = vadd.f32 %v3316_v42, %v3074_v33  ;;  %v3318_v27 = vpop.f32.mrb[62].mxu1  ;;  %4302 = vmatpush1.bf16.msra.mxu0 %v14319_v3  ;;  %v14376_v33 = vld [vmem:[%s21211_s10] ss:$8 sps:$4 sm:$0xff]   ;;  %v2808_v3 = vmul.f32 %v2802_v37, %v21275_v21 }
 0x48d   :  { %v3319_v4 = vpop.f32.mrb[63].mxu1  ;;  %4303 = vmatprep.subr.bf16.mxu0 %v14324_v7  ;;  %4052 = vmatpush1.bf16.msra.mxu1 %v14376_v33  ;;  %v14402_v27 = vld [vmem:[%s21211_s10 + $0x44] ss:$8 sps:$4 sm:$0xff]  }
 0x48e   :  { %4053 = vmatprep.subr.bf16.mxu1 %v14384_v11  ;;  %v3363_v33 = vadd.f32 %v17904_v50, %v16932_v9  ;;  %v21278_v21 = vld [vmem:[#allocation32_spill] sm:$0xff] }
 0x490   :  { %4304 = vmatpush1.bf16.msra.mxu0 %v14322_v25  ;;  %v14400_v25 = vld [vmem:[%s21211_s10 + $0x40] ss:$8 sps:$4 sm:$0xff]   ;;  %v3370_v11 = vmul.f32 0.5, %v3363_v33  ;;  %v14369_v33 = vld [vmem:[%s21205_s4 + $0xa4] ss:$16 sps:$4 sm:$0xff]  }
 0x491   :  { %4305 = vmatprep.subr.bf16.mxu0 %v14327_v1  ;;  %4054 = vmatpush1.bf16.msra.mxu1 %v14382_v63  ;;  %v14406_v1 = vld [vmem:[%s21211_s10 + $0x50] ss:$8 sps:$4 sm:$0xff]  }
 0x492   :  { %4055 = vmatprep.subr.bf16.mxu1 %v14390_v16 }
 0x494   :  { %4306 = vmatpush1.bf16.msra.mxu0 %v14325_v28  ;;  %v14408_v28 = vld [vmem:[%s21211_s10 + $0x54] ss:$8 sps:$4 sm:$0xff]  }
 0x495   :  { %4620 = vmatprep.subr.bf16.mxu0 %v14330_v6  ;;  %4056 = vmatpush1.bf16.msra.mxu1 %v14388_v41 }
 0x496   :  { %4057 = vmatprep.subr.bf16.mxu1 %v14396_v19 }
 0x499   :  { %4058 = vmatpush1.bf16.msra.mxu1 %v14394_v26 }
 0x49a   :  { %4059 = vmatprep.subr.bf16.mxu1 %v14402_v27 }
 0x49d   :  { %4060 = vmatpush1.bf16.msra.mxu1 %v14400_v25 }
 0x49e   :  { %4061 = vmatprep.subr.bf16.mxu1 %v14408_v28 }
 0x4a1   :  { %4062 = vmatpush1.bf16.msra.mxu1 %v14406_v1 }
 0x4aa   :  { %v2503_v18 = vpop.f32.mrb[52].mxu0  ;;  %v3642_v22 = vpop.f32.mrb[64].mxu1 }
 0x4ab   :  { %v2504_v23 = vadd.f32 %v2503_v18, %v17922_v47  ;;  %v2505_v36 = vpop.f32.mrb[53].mxu0  ;;  %v3644_v44 = vpop.f32.mrb[65].mxu1  ;;  %v14414_v18 = vld [vmem:[%s21211_s10 + $0x64] ss:$8 sps:$4 sm:$0xff]  }
 0x4ac   :  { %v2506_v2 = vadd.f32 %v2505_v36, %v17925_v0  ;;  %v2507_v13 = vpop.f32.mrb[54].mxu0  ;;  %v3646_v52 = vpop.f32.mrb[66].mxu1  ;;  %4063 = vmatprep.subr.bf16.mxu1 %v14414_v18  ;;  %v14418_v36 = vld [vmem:[%s21211_s10 + $0x70] ss:$8 sps:$4 sm:$0xff]  }
 0x4ad   :  { %2510 = vst [vmem:[#allocation3] sm:$0xff] %v2504_v23  ;;  %v2508_v48 = vpop.f32.mrb[55].mxu0  ;;  %v3647_v20 = vpop.f32.mrb[67].mxu1  ;;  %4064 = vmatpush1.bf16.msra.mxu1 %v14412_v61  ;;  %v14328_v13 = vld [vmem:[%s21206_s5] ss:$16 sps:$4 sm:$0xff]  }
 0x4ae   :  { %2511 = vst [vmem:[#allocation3 + $0x8] sm:$0xff] %v2506_v2  ;;  %v14333_v48 = vld [vmem:[%s21206_s5 + $0x24] ss:$16 sps:$4 sm:$0xff]  }
 0x4af   :  { %v21279_v61 = vld [vmem:[#allocation34_spill] sm:$0xff] }
 0x4ca   :  { %v2784_v14 = vpop.f32.mrb[56].mxu0  ;;  %v3884_v8 = vpop.f32.mrb[68].mxu1 }
 0x4cb   :  { %v2793_v38 = vadd.f32 %v2784_v14, %v21273_v62  ;;  %v17932_v54 = vadd.f32 %v3884_v8, %v3642_v22  ;;  %v2786_v39 = vpop.f32.mrb[57].mxu0  ;;  %v3886_v15 = vpop.f32.mrb[69].mxu1  ;;  %v14331_v8 = vld [vmem:[%s21206_s5 + $0x20] ss:$16 sps:$4 sm:$0xff]  }
 0x4cc   :  { %v2794_v51 = vadd.f32 %v2786_v39, %v21274_v49  ;;  %v17938_v46 = vadd.f32 %v3886_v15, %v3644_v44  ;;  %v2788_v5 = vpop.f32.mrb[58].mxu0  ;;  %v3888_v56 = vpop.f32.mrb[70].mxu1  ;;  %v14420_v44 = vld [vmem:[%s21211_s10 + $0x74] ss:$8 sps:$4 sm:$0xff]   ;;  %v14334_v39 = vld [vmem:[%s21206_s5 + $0x40] ss:$16 sps:$4 sm:$0xff]  }
 0x4cd   :  { %15664 = vtanh.f32 %v2793_v38  ;;  %v2789_v45 = vpop.f32.mrb[59].mxu0  ;;  %v3889_v10 = vpop.f32.mrb[71].mxu1  ;;  %4065 = vmatprep.subr.bf16.mxu1 %v14420_v44  ;;  %v14336_v38 = vld [vmem:[%s21206_s5 + $0x44] ss:$16 sps:$4 sm:$0xff]   ;;  %v14343_v56 = vld [vmem:[%s21206_s5 + $0xa0] ss:$16 sps:$4 sm:$0xff]  }
 0x4ce   :  { %v2804_v43 = vmul.f32 0.5, %v2794_v51  ;;  %4066 = vmatpush1.bf16.msra.mxu1 %v14418_v36  ;;  %v14339_v15 = vld [vmem:[%s21206_s5 + $0x64] ss:$16 sps:$4 sm:$0xff]   ;;  %v14340_v51 = vld [vmem:[%s21206_s5 + $0x80] ss:$16 sps:$4 sm:$0xff]  }
 0x4cf   :  { %4332 = vmatprep.subr.bf16.mxu1 %v14426_v12  ;;  %v14342_v49 = vld [vmem:[%s21206_s5 + $0x84] ss:$16 sps:$4 sm:$0xff]   ;;  %v14352_v12 = vld [vmem:[%s21205_s4] ss:$16 sps:$4 sm:$0xff]  }
 0x4d0   :  { %15666 = vtanh.f32 %v2804_v43  ;;  %v14345_v5 = vld [vmem:[%s21206_s5 + $0xa4] ss:$16 sps:$4 sm:$0xff]   ;;  %v14349_v43 = vld [vmem:[%s21206_s5 + $0xe0] ss:$16 sps:$4 sm:$0xff]  }
 0x4d1   :  { %v21276_v45 = vld [vmem:[#allocation30_spill] sm:$0xff] }
 0x4d2   :  { %v3362_v10 = vadd.f32 %v17902_v34, %v21276_v45  ;;  %v14354_v34 = vld [vmem:[%s21205_s4 + $0x4] ss:$16 sps:$4 sm:$0xff]  }
 0x4d4   :  { %v3366_v50 = vmul.f32 0.5, %v3362_v10  ;;  %v14367_v10 = vld [vmem:[%s21205_s4 + $0xa0] ss:$16 sps:$4 sm:$0xff]  }
 0x4d7   :  { %v15665_v31 = vpop.eup %15664 }
 0x4d8   :  { %v2809_v7 = vmul.f32 %v15665_v31, %v2798_v59  ;;  %v21277_v59 = vld [vmem:[#allocation31_spill] sm:$0xff] }
 0x4da   :  { %v17962_v42 = vadd.f32 %v2809_v7, %v2808_v3  ;;  %v15667_v4 = vpop.eup %15666 }
 0x4db   :  { %v2806_v6 = vadd.f32 1.0, %v15667_v4 }
 0x4dc   :  { %15668 = vtanh.f32 %v17962_v42 }
 0x4dd   :  { %v2807_v22 = vmul.f32 0.5, %v2806_v6  ;;  %15670 = vtanh.f32 %v3370_v11  ;;  %v14372_v11 = vld [vmem:[%s21205_s4 + $0xc4] ss:$16 sps:$4 sm:$0xff]  }
 0x4de   :  { %15672 = vtanh.f32 %v3366_v50  ;;  %v14370_v50 = vld [vmem:[%s21205_s4 + $0xc0] ss:$16 sps:$4 sm:$0xff]  }
 0x4e6   :  { %v15669_v23 = vpop.eup %15668 }
 0x4e7   :  { %v2812_v2 = vmul.f32 %v15669_v23, %v2807_v22  ;;  %v15671_v7 = vpop.eup %15670 }
 0x4e8   :  { %v15673_v26 = vpop.eup %15672  ;;  %v3372_v27 = vadd.f32 1.0, %v15671_v7 }
 0x4e9   :  { %v17992_v52 = vpack.c.bf16 %v2812_v2, %v2812_v2  ;;  %v3368_v4 = vadd.f32 1.0, %v15673_v26 }
 0x4ea   :  { %v3113_v20 = vpop.f32.mrb[60].mxu0  ;;  %v3373_v1 = vmul.f32 0.5, %v3372_v27  ;;  %v14385_v27 = vld [vmem:[%s21209_s8 + $0x20] ss:$16 sps:$4 sm:$0xff]  }
 0x4eb   :  { %v3115_v32 = vpop.f32.mrb[61].mxu0  ;;  %4324 = vmatmul.mubr.bf16.vlgmr.msra.gmra.mrb[76].mxu0 %v17992_v52  ;;  %v3369_v28 = vmul.f32 0.5, %v3368_v4  ;;  %v14393_v4 = vld [vmem:[%s21209_s8 + $0x44] ss:$16 sps:$4 sm:$0xff]  }
 0x4ec   :  { %v3117_v14 = vpop.f32.mrb[62].mxu0  ;;  %4621 = vmatpush1.bf16.msra.mxu0 %v14328_v13  ;;  %4652 = vmatprep.mubr.bf16.mxu0 %v21264_v29  ;;  %v3379_v18 = vmul.f32 %v3373_v1, %v21279_v61  ;;  %v14391_v61 = vld [vmem:[%s21209_s8 + $0x40] ss:$16 sps:$4 sm:$0xff]  }
 0x4ed   :  { %v3118_v62 = vpop.f32.mrb[63].mxu0  ;;  %4622 = vmatprep.subr.bf16.mxu0 %v14333_v48 }
 0x4f0   :  { %4623 = vmatpush1.bf16.msra.mxu0 %v14331_v8  ;;  %v14357_v8 = vld [vmem:[%s21205_s4 + $0x24] ss:$16 sps:$4 sm:$0xff]  }
 0x4f1   :  { %4624 = vmatprep.subr.bf16.mxu0 %v14336_v38 }
 0x4f4   :  { %4625 = vmatpush1.bf16.msra.mxu0 %v14334_v39  ;;  %v14355_v39 = vld [vmem:[%s21205_s4 + $0x20] ss:$16 sps:$4 sm:$0xff]  }
 0x4f5   :  { %4626 = vmatprep.subr.bf16.mxu0 %v14339_v15  ;;  %v14360_v15 = vld [vmem:[%s21205_s4 + $0x44] ss:$16 sps:$4 sm:$0xff]  }
 0x4f8   :  { %4627 = vmatpush1.bf16.msra.mxu0 %v14337_v53  ;;  %v14358_v53 = vld [vmem:[%s21205_s4 + $0x40] ss:$16 sps:$4 sm:$0xff]  }
 0x4f9   :  { %4628 = vmatprep.subr.bf16.mxu0 %v14342_v49  ;;  %v14363_v49 = vld [vmem:[%s21205_s4 + $0x64] ss:$16 sps:$4 sm:$0xff]  }
 0x4fc   :  { %4629 = vmatpush1.bf16.msra.mxu0 %v14340_v51  ;;  %v14361_v51 = vld [vmem:[%s21205_s4 + $0x60] ss:$16 sps:$4 sm:$0xff]  }
 0x4fd   :  { %4630 = vmatprep.subr.bf16.mxu0 %v14345_v5  ;;  %v14366_v5 = vld [vmem:[%s21205_s4 + $0x84] ss:$16 sps:$4 sm:$0xff]  }
 0x500   :  { %4631 = vmatpush1.bf16.msra.mxu0 %v14343_v56  ;;  %v14364_v56 = vld [vmem:[%s21205_s4 + $0x80] ss:$16 sps:$4 sm:$0xff]  }
 0x501   :  { %4632 = vmatprep.subr.bf16.mxu0 %v14348_v40  ;;  %v3933_v40 = vadd.f32 %v17938_v46, %v17547_v30 }
 0x504   :  { %4633 = vmatpush1.bf16.msra.mxu0 %v14346_v60  ;;  %v3932_v60 = vadd.f32 %v17932_v54, %v17541_v35  ;;  %v14373_v54 = vld [vmem:[%s21205_s4 + $0xe0] ss:$16 sps:$4 sm:$0xff]  }
 0x505   :  { %4634 = vmatprep.subr.bf16.mxu0 %v14351_v58  ;;  %v3940_v58 = vmul.f32 0.5, %v3933_v40 }
 0x506   :  { %v3936_v46 = vmul.f32 0.5, %v3932_v60  ;;  %v14427_v60 = vld [vmem:[%s21208_s7] ss:$16 sps:$4 sm:$0xff]  }
 0x508   :  { %4635 = vmatpush1.bf16.msra.mxu0 %v14349_v43  ;;  %v14375_v43 = vld [vmem:[%s21205_s4 + $0xe4] ss:$16 sps:$4 sm:$0xff]  }
 0x509   :  { %4862 = vmatprep.subr.bf16.mxu0 %v14354_v34  ;;  %v14381_v34 = vld [vmem:[%s21209_s8 + $0x4] ss:$16 sps:$4 sm:$0xff]  }
 0x50a   :  { %v3355_v63 = vpop.f32.mrb[64].mxu0 }
 0x50b   :  { %v3356_v55 = vadd.f32 %v3355_v63, %v3113_v20  ;;  %v3357_v16 = vpop.f32.mrb[65].mxu0 }
 0x50c   :  { %v3358_v37 = vadd.f32 %v3357_v16, %v3115_v32  ;;  %v3359_v41 = vpop.f32.mrb[66].mxu0 }
 0x50d   :  { %v3364_v31 = vadd.f32 %v3356_v55, %v21277_v59  ;;  %v3360_v19 = vpop.f32.mrb[67].mxu0  ;;  %v14379_v55 = vld [vmem:[%s21209_s8] ss:$16 sps:$4 sm:$0xff]   ;;  %v14387_v41 = vld [vmem:[%s21209_s8 + $0x24] ss:$16 sps:$4 sm:$0xff]  }
 0x50e   :  { %v3365_v3 = vadd.f32 %v3358_v37, %v21278_v21 }
 0x50f   :  { %15674 = vtanh.f32 %v3364_v31 }
 0x510   :  { %v3375_v25 = vmul.f32 0.5, %v3365_v3 }
 0x512   :  { %15676 = vtanh.f32 %v3375_v25 }
 0x519   :  { %v15675_v6 = vpop.eup %15674 }
 0x51a   :  { %v3380_v22 = vmul.f32 %v15675_v6, %v3369_v28 }
 0x51c   :  { %v18051_v23 = vadd.f32 %v3380_v22, %v3379_v18  ;;  %v15677_v36 = vpop.eup %15676  ;;  %v14399_v18 = vld [vmem:[%s21209_s8 + $0x64] ss:$16 sps:$4 sm:$0xff]  }
 0x51d   :  { %v3377_v44 = vadd.f32 1.0, %v15677_v36 }
 0x51e   :  { %15678 = vtanh.f32 %v18051_v23 }
 0x51f   :  { %v3378_v2 = vmul.f32 0.5, %v3377_v44  ;;  %15680 = vtanh.f32 %v3940_v58  ;;  %v14397_v44 = vld [vmem:[%s21209_s8 + $0x60] ss:$16 sps:$4 sm:$0xff]   ;;  %v14432_v58 = vld [vmem:[%s21203_s2 + $0x2c] ss:$16 sps:$4 sm:$0xff]  }
 0x520   :  { %15682 = vtanh.f32 %v3936_v46  ;;  %v14430_v46 = vld [vmem:[%s21203_s2 + $0x28] ss:$16 sps:$4 sm:$0xff]  }
 0x528   :  { %v15679_v13 = vpop.eup %15678 }
 0x529   :  { %v3383_v48 = vmul.f32 %v15679_v13, %v3378_v2  ;;  %v15681_v25 = vpop.eup %15680  ;;  %v14405_v2 = vld [vmem:[%s21209_s8 + $0x84] ss:$16 sps:$4 sm:$0xff]  }
 0x52a   :  { %v3683_v20 = vpop.f32.mrb[68].mxu0  ;;  %v15683_v1 = vpop.eup %15682  ;;  %v3942_v28 = vadd.f32 1.0, %v15681_v25  ;;  %v14459_v25 = vld [vmem:[%s21208_s7 + $0xa4] ss:$16 sps:$4 sm:$0xff]  }
 0x52b   :  { %v3685_v32 = vpop.f32.mrb[69].mxu0  ;;  %v18057_v14 = vpack.c.bf16 %v3383_v48, %v3383_v48  ;;  %v3938_v22 = vadd.f32 1.0, %v15683_v1  ;;  %v14457_v1 = vld [vmem:[%s21208_s7 + $0xa0] ss:$16 sps:$4 sm:$0xff]  }
 0x52c   :  { %v3687_v62 = vpop.f32.mrb[70].mxu0  ;;  %v3943_v36 = vmul.f32 0.5, %v3942_v28  ;;  %v14462_v28 = vld [vmem:[%s21203_s2 + $0xcc] ss:$16 sps:$4 sm:$0xff]  }
 0x52d   :  { %v3688_v38 = vpop.f32.mrb[71].mxu0  ;;  %4653 = vmatmul.mubr.bf16.vlgmr.msra.gmra.mrb[80].mxu0 %v18057_v14  ;;  %v3939_v13 = vmul.f32 0.5, %v3938_v22  ;;  %v14468_v22 = vld [vmem:[%s21203_s2 + $0xec] ss:$16 sps:$4 sm:$0xff]  }
 0x52e   :  { %4863 = vmatpush1.bf16.msra.mxu0 %v14352_v12  ;;  %4894 = vmatprep.mubr.bf16.mxu0 %v21264_v29  ;;  %v14417_v38 = vld [vmem:[%s21209_s8 + $0xc4] ss:$16 sps:$4 sm:$0xff]  }
 0x52f   :  { %4864 = vmatprep.subr.bf16.mxu0 %v14357_v8  ;;  %v14411_v8 = vld [vmem:[%s21209_s8 + $0xa4] ss:$16 sps:$4 sm:$0xff]  }
 0x532   :  { %4865 = vmatpush1.bf16.msra.mxu0 %v14355_v39 }
 0x533   :  { %4866 = vmatprep.subr.bf16.mxu0 %v14360_v15  ;;  %v14415_v15 = vld [vmem:[%s21209_s8 + $0xc0] ss:$16 sps:$4 sm:$0xff]  }
 0x536   :  { %4867 = vmatpush1.bf16.msra.mxu0 %v14358_v53 }
 0x537   :  { %4868 = vmatprep.subr.bf16.mxu0 %v14363_v49  ;;  %v14423_v49 = vld [vmem:[%s21209_s8 + $0xe4] ss:$16 sps:$4 sm:$0xff]  }
 0x53a   :  { %4869 = vmatpush1.bf16.msra.mxu0 %v14361_v51  ;;  %v14421_v51 = vld [vmem:[%s21209_s8 + $0xe0] ss:$16 sps:$4 sm:$0xff]  }
 0x53b   :  { %4870 = vmatprep.subr.bf16.mxu0 %v14366_v5 }
 0x53e   :  { %4871 = vmatpush1.bf16.msra.mxu0 %v14364_v56  ;;  %v14429_v56 = vld [vmem:[%s21208_s7 + $0x4] ss:$16 sps:$4 sm:$0xff]  }
 0x53f   :  { %4872 = vmatprep.subr.bf16.mxu0 %v14369_v33 }
 0x542   :  { %4873 = vmatpush1.bf16.msra.mxu0 %v14367_v10  ;;  %v14424_v10 = vld [vmem:[%s21203_s2 + $0x8] ss:$16 sps:$4 sm:$0xff]  }
 0x543   :  { %4874 = vmatprep.subr.bf16.mxu0 %v14372_v11 }
 0x546   :  { %4875 = vmatpush1.bf16.msra.mxu0 %v14370_v50  ;;  %v14435_v50 = vld [vmem:[%s21208_s7 + $0x24] ss:$16 sps:$4 sm:$0xff]  }
 0x547   :  { %4876 = vmatprep.subr.bf16.mxu0 %v14375_v43  ;;  %v14433_v43 = vld [vmem:[%s21208_s7 + $0x20] ss:$16 sps:$4 sm:$0xff]  }
 0x54a   :  { %4877 = vmatpush1.bf16.msra.mxu0 %v14373_v54  ;;  %v3925_v63 = vpop.f32.mrb[72].mxu0  ;;  %v14438_v54 = vld [vmem:[%s21203_s2 + $0x4c] ss:$16 sps:$4 sm:$0xff]  }
 0x54b   :  { %v3926_v16 = vadd.f32 %v3925_v63, %v3683_v20  ;;  %v3927_v37 = vpop.f32.mrb[73].mxu0  ;;  %5190 = vmatprep.subr.bf16.mxu0 %v14381_v34  ;;  %v3949_v20 = vmul.f32 %v3943_v36, %v17576_v17  ;;  %v14409_v17 = vld [vmem:[%s21209_s8 + $0xa0] ss:$16 sps:$4 sm:$0xff]   ;;  %v14441_v34 = vld [vmem:[%s21208_s7 + $0x44] ss:$16 sps:$4 sm:$0xff]  }
 0x54c   :  { %v3928_v31 = vadd.f32 %v3927_v37, %v3685_v32  ;;  %v3929_v19 = vpop.f32.mrb[74].mxu0  ;;  %v14403_v32 = vld [vmem:[%s21209_s8 + $0x80] ss:$16 sps:$4 sm:$0xff]   ;;  %v14436_v63 = vld [vmem:[%s21203_s2 + $0x48] ss:$16 sps:$4 sm:$0xff]  }
 0x54d   :  { %v3934_v3 = vadd.f32 %v3926_v16, %v17554_v24  ;;  %4895 = vmatmul.mubr.bf16.vlgmr.msra.gmra.mrb[84].mxu0 %v17992_v52  ;;  %v3930_v7 = vpop.f32.mrb[75].mxu0  ;;  %v14444_v16 = vld [vmem:[%s21203_s2 + $0x6c] ss:$16 sps:$4 sm:$0xff]   ;;  %v14447_v37 = vld [vmem:[%s21208_s7 + $0x64] ss:$16 sps:$4 sm:$0xff]  }
 0x54e   :  { %v3935_v26 = vadd.f32 %v3928_v31, %v17562_v57  ;;  %5191 = vmatpush1.bf16.msra.mxu0 %v14379_v55  ;;  %5222 = vmatprep.mubr.bf16.mxu0 %v21264_v29  ;;  %v14439_v55 = vld [vmem:[%s21208_s7 + $0x40] ss:$16 sps:$4 sm:$0xff]   ;;  %v14450_v19 = vld [vmem:[%s21203_s2 + $0x8c] ss:$16 sps:$4 sm:$0xff]   ;;  %v14448_v7 = vld [vmem:[%s21203_s2 + $0x88] ss:$16 sps:$4 sm:$0xff]  }
 0x54f   :  { %15684 = vtanh.f32 %v3934_v3  ;;  %5192 = vmatprep.subr.bf16.mxu0 %v14387_v41  ;;  %v14442_v41 = vld [vmem:[%s21203_s2 + $0x68] ss:$16 sps:$4 sm:$0xff]   ;;  %v14445_v31 = vld [vmem:[%s21208_s7 + $0x60] ss:$16 sps:$4 sm:$0xff]   ;;  %v14453_v3 = vld [vmem:[%s21208_s7 + $0x84] ss:$16 sps:$4 sm:$0xff]  }
 0x550   :  { %v3945_v6 = vmul.f32 0.5, %v3935_v26  ;;  %v14451_v26 = vld [vmem:[%s21208_s7 + $0x80] ss:$16 sps:$4 sm:$0xff]   ;;  %v14471_v36 = vld [vmem:[%s21208_s7 + $0xe4] ss:$16 sps:$4 sm:$0xff]  }
 0x552   :  { %5193 = vmatpush1.bf16.msra.mxu0 %v14385_v27  ;;  %15686 = vtanh.f32 %v3945_v6  ;;  %v14456_v27 = vld [vmem:[%s21203_s2 + $0xac] ss:$16 sps:$4 sm:$0xff]   ;;  %v14465_v6 = vld [vmem:[%s21208_s7 + $0xc4] ss:$16 sps:$4 sm:$0xff]  }
 0x553   :  { %5194 = vmatprep.subr.bf16.mxu0 %v14393_v4  ;;  %v14454_v4 = vld [vmem:[%s21203_s2 + $0xa8] ss:$16 sps:$4 sm:$0xff]  }
 0x556   :  { %5195 = vmatpush1.bf16.msra.mxu0 %v14391_v61  ;;  %v14460_v61 = vld [vmem:[%s21203_s2 + $0xc8] ss:$16 sps:$4 sm:$0xff]  }
 0x557   :  { %5196 = vmatprep.subr.bf16.mxu0 %v14399_v18  ;;  %v14463_v18 = vld [vmem:[%s21208_s7 + $0xc0] ss:$16 sps:$4 sm:$0xff]  }
 0x559   :  { %v15685_v48 = vpop.eup %15684 }
 0x55a   :  { %v3950_v12 = vmul.f32 %v15685_v48, %v3939_v13  ;;  %5197 = vmatpush1.bf16.msra.mxu0 %v14397_v44  ;;  %v14466_v44 = vld [vmem:[%s21203_s2 + $0xe8] ss:$16 sps:$4 sm:$0xff]   ;;  %v14474_v13 = vld [vmem:[%s21206_s5 + $0xc] ss:$16 sps:$4 sm:$0xff]  }
 0x55b   :  { %5198 = vmatprep.subr.bf16.mxu0 %v14405_v2  ;;  %v14469_v2 = vld [vmem:[%s21208_s7 + $0xe0] ss:$16 sps:$4 sm:$0xff]   ;;  %v14472_v48 = vld [vmem:[%s21206_s5 + $0x8] ss:$16 sps:$4 sm:$0xff]  }
 0x55c   :  { %v18145_v62 = vadd.f32 %v3950_v12, %v3949_v20  ;;  %v15687_v39 = vpop.eup %15686  ;;  %v14477_v20 = vld [vmem:[%s21206_s5 + $0x2c] ss:$16 sps:$4 sm:$0xff]   ;;  %v14475_v12 = vld [vmem:[%s21206_s5 + $0x28] ss:$16 sps:$4 sm:$0xff]  }
 0x55d   :  { %v3947_v53 = vadd.f32 1.0, %v15687_v39  ;;  %v14486_v39 = vld [vmem:[%s21206_s5 + $0x8c] ss:$16 sps:$4 sm:$0xff]  }
 0x55e   :  { %15688 = vtanh.f32 %v18145_v62  ;;  %5199 = vmatpush1.bf16.msra.mxu0 %v14403_v32  ;;  %v14480_v32 = vld [vmem:[%s21206_s5 + $0x4c] ss:$16 sps:$4 sm:$0xff]  }
 0x55f   :  { %5200 = vmatprep.subr.bf16.mxu0 %v14411_v8  ;;  %v3948_v5 = vmul.f32 0.5, %v3947_v53  ;;  %v14478_v8 = vld [vmem:[%s21206_s5 + $0x48] ss:$16 sps:$4 sm:$0xff]   ;;  %v14489_v53 = vld [vmem:[%s21206_s5 + $0xac] ss:$16 sps:$4 sm:$0xff]  }
 0x562   :  { %5201 = vmatpush1.bf16.msra.mxu0 %v14409_v17  ;;  %v14483_v17 = vld [vmem:[%s21206_s5 + $0x6c] ss:$16 sps:$4 sm:$0xff]  }
 0x563   :  { %5202 = vmatprep.subr.bf16.mxu0 %v14417_v38  ;;  %v14481_v38 = vld [vmem:[%s21206_s5 + $0x68] ss:$16 sps:$4 sm:$0xff]  }
 0x566   :  { %5203 = vmatpush1.bf16.msra.mxu0 %v14415_v15  ;;  %v14484_v15 = vld [vmem:[%s21206_s5 + $0x88] ss:$16 sps:$4 sm:$0xff]  }
 0x567   :  { %5204 = vmatprep.subr.bf16.mxu0 %v14423_v49  ;;  %v14487_v49 = vld [vmem:[%s21206_s5 + $0xa8] ss:$16 sps:$4 sm:$0xff]  }
 0x568   :  { %v15689_v33 = vpop.eup %15688 }
 0x569   :  { %v3953_v40 = vmul.f32 %v15689_v33, %v3948_v5  ;;  %v14490_v5 = vld [vmem:[%s21206_s5 + $0xc8] ss:$16 sps:$4 sm:$0xff]  }
 0x56a   :  { %5205 = vmatpush1.bf16.msra.mxu0 %v14421_v51  ;;  %v14492_v51 = vld [vmem:[%s21206_s5 + $0xcc] ss:$16 sps:$4 sm:$0xff]   ;;  %v14493_v33 = vld [vmem:[%s21206_s5 + $0xe8] ss:$16 sps:$4 sm:$0xff]  }
 0x56b   :  { %5432 = vmatprep.subr.bf16.mxu0 %v14429_v56  ;;  %v18172_v11 = vpack.c.bf16 %v3953_v40, %v3953_v40  ;;  %v14495_v56 = vld [vmem:[%s21206_s5 + $0xec] ss:$16 sps:$4 sm:$0xff]  }
 0x56c   :  { %v14498_v40 = vld [vmem:[%s21205_s4 + $0xc] ss:$16 sps:$4 sm:$0xff]  }
 0x56d   :  { %4084 = vmatmul.mubr.bf16.vlgmr.msra.gmra.mrb[72].mxu1 %v18172_v11  ;;  %5223 = vmatmul.mubr.bf16.vlgmr.msra.gmra.mrb[88].mxu0 %v18172_v11 }
 0x56e   :  { %4333 = vmatpush1.bf16.msra.mxu1 %v14424_v10  ;;  %5433 = vmatpush1.bf16.msra.mxu0 %v14427_v60  ;;  %v14496_v10 = vld [vmem:[%s21205_s4 + $0x8] ss:$16 sps:$4 sm:$0xff]   ;;  %v14501_v60 = vld [vmem:[%s21205_s4 + $0x2c] ss:$16 sps:$4 sm:$0xff]  }
 0x56f   :  { %4334 = vmatprep.subr.bf16.mxu1 %v14432_v58  ;;  %5434 = vmatprep.subr.bf16.mxu0 %v14435_v50  ;;  %v14499_v58 = vld [vmem:[%s21205_s4 + $0x28] ss:$16 sps:$4 sm:$0xff]   ;;  %v14504_v50 = vld [vmem:[%s21205_s4 + $0x4c] ss:$16 sps:$4 sm:$0xff]  }
 0x570   :  { %4364 = vmatprep.mubr.bf16.mxu1 %v21264_v29  ;;  %5464 = vmatprep.mubr.bf16.mxu0 %v21264_v29 }
 0x572   :  { %4335 = vmatpush1.bf16.msra.mxu1 %v14430_v46  ;;  %5435 = vmatpush1.bf16.msra.mxu0 %v14433_v43  ;;  %v14502_v46 = vld [vmem:[%s21205_s4 + $0x48] ss:$16 sps:$4 sm:$0xff]   ;;  %v14507_v43 = vld [vmem:[%s21205_s4 + $0x6c] ss:$16 sps:$4 sm:$0xff]  }
 0x573   :  { %4336 = vmatprep.subr.bf16.mxu1 %v14438_v54  ;;  %5436 = vmatprep.subr.bf16.mxu0 %v14441_v34  ;;  %v14505_v54 = vld [vmem:[%s21205_s4 + $0x68] ss:$16 sps:$4 sm:$0xff]   ;;  %v14510_v34 = vld [vmem:[%s21205_s4 + $0x8c] ss:$16 sps:$4 sm:$0xff]  }
 0x576   :  { %4337 = vmatpush1.bf16.msra.mxu1 %v14436_v63  ;;  %5437 = vmatpush1.bf16.msra.mxu0 %v14439_v55  ;;  %v14508_v63 = vld [vmem:[%s21205_s4 + $0x88] ss:$16 sps:$4 sm:$0xff]   ;;  %v14513_v55 = vld [vmem:[%s21205_s4 + $0xac] ss:$16 sps:$4 sm:$0xff]  }
 0x577   :  { %4338 = vmatprep.subr.bf16.mxu1 %v14444_v16  ;;  %5438 = vmatprep.subr.bf16.mxu0 %v14447_v37  ;;  %v14511_v37 = vld [vmem:[%s21205_s4 + $0xa8] ss:$16 sps:$4 sm:$0xff]  }
 0x57a   :  { %4339 = vmatpush1.bf16.msra.mxu1 %v14442_v41  ;;  %5439 = vmatpush1.bf16.msra.mxu0 %v14445_v31  ;;  %v21280_v41 = vld [vmem:[#allocation14_spill] sm:$0xff] }
 0x57b   :  { %4340 = vmatprep.subr.bf16.mxu1 %v14450_v19  ;;  %5440 = vmatprep.subr.bf16.mxu0 %v14453_v3  ;;  %v14516_v3 = vld [vmem:[%s21205_s4 + $0xcc] ss:$16 sps:$4 sm:$0xff]  }
 0x57e   :  { %4341 = vmatpush1.bf16.msra.mxu1 %v14448_v7  ;;  %5441 = vmatpush1.bf16.msra.mxu0 %v14451_v26  ;;  %v21281_v7 = vld [vmem:[#allocation16_spill] sm:$0xff] }
 0x57f   :  { %4342 = vmatprep.subr.bf16.mxu1 %v14456_v27  ;;  %5442 = vmatprep.subr.bf16.mxu0 %v14459_v25 }
 0x582   :  { %4343 = vmatpush1.bf16.msra.mxu1 %v14454_v4  ;;  %5443 = vmatpush1.bf16.msra.mxu0 %v14457_v1  ;;  %v14514_v4 = vld [vmem:[%s21205_s4 + $0xc8] ss:$16 sps:$4 sm:$0xff]   ;;  %v14519_v1 = vld [vmem:[%s21205_s4 + $0xec] ss:$16 sps:$4 sm:$0xff]  }
 0x583   :  { %4344 = vmatprep.subr.bf16.mxu1 %v14462_v28  ;;  %5444 = vmatprep.subr.bf16.mxu0 %v14465_v6  ;;  %v14517_v28 = vld [vmem:[%s21205_s4 + $0xe8] ss:$16 sps:$4 sm:$0xff]   ;;  %v14522_v6 = vld [vmem:[%s21209_s8 + $0xc] ss:$16 sps:$4 sm:$0xff]  }
 0x586   :  { %4345 = vmatpush1.bf16.msra.mxu1 %v14460_v61  ;;  %5445 = vmatpush1.bf16.msra.mxu0 %v14463_v18  ;;  %v14520_v61 = vld [vmem:[%s21209_s8 + $0x8] ss:$16 sps:$4 sm:$0xff]   ;;  %v14525_v18 = vld [vmem:[%s21209_s8 + $0x2c] ss:$16 sps:$4 sm:$0xff]  }
 0x587   :  { %4346 = vmatprep.subr.bf16.mxu1 %v14468_v22  ;;  %5446 = vmatprep.subr.bf16.mxu0 %v14471_v36  ;;  %v14523_v22 = vld [vmem:[%s21209_s8 + $0x28] ss:$16 sps:$4 sm:$0xff]   ;;  %v14528_v36 = vld [vmem:[%s21209_s8 + $0x4c] ss:$16 sps:$4 sm:$0xff]  }
 0x58a   :  { %4347 = vmatpush1.bf16.msra.mxu1 %v14466_v44  ;;  %5447 = vmatpush1.bf16.msra.mxu0 %v14469_v2  ;;  %v14526_v44 = vld [vmem:[%s21209_s8 + $0x48] ss:$16 sps:$4 sm:$0xff]  }
 0x58b   :  { %4661 = vmatprep.subr.bf16.mxu1 %v14474_v13  ;;  %v14529_v2 = vld [vmem:[%s21209_s8 + $0x68] ss:$16 sps:$4 sm:$0xff]   ;;  %v14534_v13 = vld [vmem:[%s21209_s8 + $0x8c] ss:$16 sps:$4 sm:$0xff]  }
 0x58d   :  { %4365 = vmatmul.mubr.bf16.vlgmr.msra.gmra.mrb[76].mxu1 %v17992_v52  ;;  %5465 = vmatmul.mubr.bf16.vlgmr.msra.gmra.mrb[92].mxu0 %v18057_v14 }
 0x58e   :  { %4662 = vmatpush1.bf16.msra.mxu1 %v14472_v48  ;;  %4693 = vmatprep.mubr.bf16.mxu1 %v21264_v29  ;;  %v14532_v48 = vld [vmem:[%s21209_s8 + $0x88] ss:$16 sps:$4 sm:$0xff]  }
 0x58f   :  { %4663 = vmatprep.subr.bf16.mxu1 %v14477_v20  ;;  %5665 = vmatprep.mubr.bf16.mxu0 %v21264_v29  ;;  %v14537_v20 = vld [vmem:[%s21209_s8 + $0xac] ss:$16 sps:$4 sm:$0xff]  }
 0x592   :  { %4664 = vmatpush1.bf16.msra.mxu1 %v14475_v12  ;;  %v14535_v12 = vld [vmem:[%s21209_s8 + $0xa8] ss:$16 sps:$4 sm:$0xff]  }
 0x593   :  { %4665 = vmatprep.subr.bf16.mxu1 %v14480_v32  ;;  %v14540_v32 = vld [vmem:[%s21209_s8 + $0xcc] ss:$16 sps:$4 sm:$0xff]  }
 0x596   :  { %4666 = vmatpush1.bf16.msra.mxu1 %v14478_v8  ;;  %v14538_v8 = vld [vmem:[%s21209_s8 + $0xc8] ss:$16 sps:$4 sm:$0xff]  }
 0x597   :  { %4667 = vmatprep.subr.bf16.mxu1 %v14483_v17  ;;  %v14543_v17 = vld [vmem:[%s21209_s8 + $0xec] ss:$16 sps:$4 sm:$0xff]  }
 0x59a   :  { %4668 = vmatpush1.bf16.msra.mxu1 %v14481_v38  ;;  %v14541_v38 = vld [vmem:[%s21209_s8 + $0xe8] ss:$16 sps:$4 sm:$0xff]  }
 0x59b   :  { %4669 = vmatprep.subr.bf16.mxu1 %v14486_v39  ;;  %v14546_v39 = vld [vmem:[%s21208_s7 + $0xc] ss:$16 sps:$4 sm:$0xff]  }
 0x59e   :  { %4670 = vmatpush1.bf16.msra.mxu1 %v14484_v15  ;;  %v14544_v15 = vld [vmem:[%s21208_s7 + $0x8] ss:$16 sps:$4 sm:$0xff]  }
 0x59f   :  { %4671 = vmatprep.subr.bf16.mxu1 %v14489_v53  ;;  %v14549_v53 = vld [vmem:[%s21208_s7 + $0x2c] ss:$16 sps:$4 sm:$0xff]  }
 0x5a2   :  { %4672 = vmatpush1.bf16.msra.mxu1 %v14487_v49  ;;  %v14547_v49 = vld [vmem:[%s21208_s7 + $0x28] ss:$16 sps:$4 sm:$0xff]  }
 0x5a3   :  { %4673 = vmatprep.subr.bf16.mxu1 %v14492_v51  ;;  %v14552_v51 = vld [vmem:[%s21208_s7 + $0x4c] ss:$16 sps:$4 sm:$0xff]  }
 0x5a6   :  { %4674 = vmatpush1.bf16.msra.mxu1 %v14490_v5  ;;  %v14550_v5 = vld [vmem:[%s21208_s7 + $0x48] ss:$16 sps:$4 sm:$0xff]  }
 0x5a7   :  { %4675 = vmatprep.subr.bf16.mxu1 %v14495_v56  ;;  %v14553_v56 = vld [vmem:[%s21208_s7 + $0x68] ss:$16 sps:$4 sm:$0xff]  }
 0x5aa   :  { %4676 = vmatpush1.bf16.msra.mxu1 %v14493_v33  ;;  %v14558_v33 = vld [vmem:[%s21208_s7 + $0x8c] ss:$16 sps:$4 sm:$0xff]  }
 0x5ab   :  { %4903 = vmatprep.subr.bf16.mxu1 %v14498_v40  ;;  %v14556_v40 = vld [vmem:[%s21208_s7 + $0x88] ss:$16 sps:$4 sm:$0xff]  }
 0x5ad   :  { %4694 = vmatmul.mubr.bf16.vlgmr.msra.gmra.mrb[80].mxu1 %v18057_v14 }
 0x5ae   :  { %4904 = vmatpush1.bf16.msra.mxu1 %v14496_v10  ;;  %4935 = vmatprep.mubr.bf16.mxu1 %v21264_v29  ;;  %v14561_v10 = vld [vmem:[%s21208_s7 + $0xac] ss:$16 sps:$4 sm:$0xff]  }
 0x5af   :  { %4905 = vmatprep.subr.bf16.mxu1 %v14501_v60  ;;  %v14559_v60 = vld [vmem:[%s21208_s7 + $0xa8] ss:$16 sps:$4 sm:$0xff]  }
 0x5b2   :  { %4906 = vmatpush1.bf16.msra.mxu1 %v14499_v58  ;;  %v14564_v58 = vld [vmem:[%s21208_s7 + $0xcc] ss:$16 sps:$4 sm:$0xff]  }
 0x5b3   :  { %4907 = vmatprep.subr.bf16.mxu1 %v14504_v50 }
 0x5b6   :  { %4908 = vmatpush1.bf16.msra.mxu1 %v14502_v46 }
 0x5b7   :  { %4909 = vmatprep.subr.bf16.mxu1 %v14507_v43 }
 0x5ba   :  { %4910 = vmatpush1.bf16.msra.mxu1 %v14505_v54  ;;  %v14562_v54 = vld [vmem:[%s21208_s7 + $0xc8] ss:$16 sps:$4 sm:$0xff]  }
 0x5bb   :  { %4911 = vmatprep.subr.bf16.mxu1 %v14510_v34 }
 0x5be   :  { %4912 = vmatpush1.bf16.msra.mxu1 %v14508_v63  ;;  %v4325_v16 = vpop.f32.mrb[76].mxu0  ;;  %v14567_v63 = vld [vmem:[%s21208_s7 + $0xec] ss:$16 sps:$4 sm:$0xff]  }
 0x5bf   :  { %v18353_v31 = vadd.f32 %v4325_v16, %v21280_v41  ;;  %v4327_v19 = vpop.f32.mrb[77].mxu0  ;;  %4913 = vmatprep.subr.bf16.mxu1 %v14513_v55  ;;  %v14565_v55 = vld [vmem:[%s21208_s7 + $0xe8] ss:$16 sps:$4 sm:$0xff]   ;;  %v14570_v16 = vld [vmem:[%s21203_s2 + $0x4] ss:$16 sps:$4 sm:$0xff]  }
 0x5c0   :  { %v18359_v26 = vadd.f32 %v4327_v19, %v21281_v7  ;;  %v4329_v27 = vpop.f32.mrb[78].mxu0  ;;  %v14573_v41 = vld [vmem:[%s21203_s2 + $0x24] ss:$16 sps:$4 sm:$0xff]   ;;  %v14571_v19 = vld [vmem:[%s21203_s2 + $0x20] ss:$16 sps:$4 sm:$0xff]  }
 0x5c1   :  { %v4330_v25 = vpop.f32.mrb[79].mxu0  ;;  %v14574_v7 = vld [vmem:[%s21203_s2 + $0x40] ss:$16 sps:$4 sm:$0xff]  }
 0x5c2   :  { %4914 = vmatpush1.bf16.msra.mxu1 %v14511_v37  ;;  %v14568_v37 = vld [vmem:[%s21203_s2] ss:$16 sps:$4 sm:$0xff]   ;;  %v14582_v25 = vld [vmem:[%s21203_s2 + $0x84] ss:$16 sps:$4 sm:$0xff]  }
 0x5c3   :  { %4915 = vmatprep.subr.bf16.mxu1 %v14516_v3  ;;  %v14576_v3 = vld [vmem:[%s21203_s2 + $0x44] ss:$16 sps:$4 sm:$0xff]   ;;  %v14577_v27 = vld [vmem:[%s21203_s2 + $0x60] ss:$16 sps:$4 sm:$0xff]  }
 0x5c6   :  { %4916 = vmatpush1.bf16.msra.mxu1 %v14514_v4  ;;  %v14580_v4 = vld [vmem:[%s21203_s2 + $0x80] ss:$16 sps:$4 sm:$0xff]  }
 0x5c7   :  { %4917 = vmatprep.subr.bf16.mxu1 %v14519_v1  ;;  %v14585_v1 = vld [vmem:[%s21203_s2 + $0xa4] ss:$16 sps:$4 sm:$0xff]  }
 0x5ca   :  { %4918 = vmatpush1.bf16.msra.mxu1 %v14517_v28  ;;  %v14583_v28 = vld [vmem:[%s21203_s2 + $0xa0] ss:$16 sps:$4 sm:$0xff]  }
 0x5cb   :  { %5231 = vmatprep.subr.bf16.mxu1 %v14522_v6  ;;  %v14588_v6 = vld [vmem:[%s21203_s2 + $0xc4] ss:$16 sps:$4 sm:$0xff]  }
 0x5cd   :  { %4936 = vmatmul.mubr.bf16.vlgmr.msra.gmra.mrb[84].mxu1 %v17992_v52  ;;  %v14531_v52 = vld [vmem:[%s21209_s8 + $0x6c] ss:$16 sps:$4 sm:$0xff]  }
 0x5ce   :  { %5232 = vmatpush1.bf16.msra.mxu1 %v14520_v61  ;;  %5263 = vmatprep.mubr.bf16.mxu1 %v21264_v29 }
 0x5cf   :  { %5233 = vmatprep.subr.bf16.mxu1 %v14525_v18 }
 0x5d2   :  { %5234 = vmatpush1.bf16.msra.mxu1 %v14523_v22 }
 0x5d3   :  { %5235 = vmatprep.subr.bf16.mxu1 %v14528_v36 }
 0x5d6   :  { %5236 = vmatpush1.bf16.msra.mxu1 %v14526_v44 }
 0x5d7   :  { %5237 = vmatprep.subr.bf16.mxu1 %v14531_v52  ;;  %v14586_v52 = vld [vmem:[%s21203_s2 + $0xc0] ss:$16 sps:$4 sm:$0xff]  }
 0x5da   :  { %5238 = vmatpush1.bf16.msra.mxu1 %v14529_v2 }
 0x5db   :  { %5239 = vmatprep.subr.bf16.mxu1 %v14534_v13  ;;  %v14591_v13 = vld [vmem:[%s21203_s2 + $0xe4] ss:$16 sps:$4 sm:$0xff]  }
 0x5de   :  { %5240 = vmatpush1.bf16.msra.mxu1 %v14532_v48  ;;  %v14589_v48 = vld [vmem:[%s21203_s2 + $0xe0] ss:$16 sps:$4 sm:$0xff]  }
 0x5df   :  { %5241 = vmatprep.subr.bf16.mxu1 %v14537_v20  ;;  %v14594_v20 = vld [vmem:[%s21206_s5 + $0x4] ss:$16 sps:$4 sm:$0xff]  }
 0x5e2   :  { %5242 = vmatpush1.bf16.msra.mxu1 %v14535_v12 }
 0x5e3   :  { %5243 = vmatprep.subr.bf16.mxu1 %v14540_v32 }
 0x5e6   :  { %5244 = vmatpush1.bf16.msra.mxu1 %v14538_v8 }
 0x5e7   :  { %5245 = vmatprep.subr.bf16.mxu1 %v14543_v17 }
 0x5ea   :  { %5246 = vmatpush1.bf16.msra.mxu1 %v14541_v38 }
 0x5eb   :  { %5473 = vmatprep.subr.bf16.mxu1 %v14546_v39 }
 0x5ed   :  { %5264 = vmatmul.mubr.bf16.vlgmr.msra.gmra.mrb[88].mxu1 %v18172_v11  ;;  %v14555_v11 = vld [vmem:[%s21208_s7 + $0x6c] ss:$16 sps:$4 sm:$0xff]  }
 0x5ee   :  { %5474 = vmatpush1.bf16.msra.mxu1 %v14544_v15  ;;  %5505 = vmatprep.mubr.bf16.mxu1 %v21264_v29 }
 0x5ef   :  { %5475 = vmatprep.subr.bf16.mxu1 %v14549_v53 }
 0x5f2   :  { %5476 = vmatpush1.bf16.msra.mxu1 %v14547_v49 }
 0x5f3   :  { %5477 = vmatprep.subr.bf16.mxu1 %v14552_v51 }
 0x5f6   :  { %5478 = vmatpush1.bf16.msra.mxu1 %v14550_v5  ;;  %v4381_v5 = vmul.f32 0.5, %v18359_v26 }
 0x5f7   :  { %5479 = vmatprep.subr.bf16.mxu1 %v14555_v11  ;;  %v4377_v11 = vmul.f32 0.5, %v18353_v31 }
 0x5f8   :  { %15690 = vtanh.f32 %v4381_v5 }
 0x5f9   :  { %15692 = vtanh.f32 %v4377_v11  ;;  %v14597_v11 = vld [vmem:[%s21206_s5 + $0x24] ss:$16 sps:$4 sm:$0xff]  }
 0x5fa   :  { %5480 = vmatpush1.bf16.msra.mxu1 %v14553_v56 }
 0x5fb   :  { %5481 = vmatprep.subr.bf16.mxu1 %v14558_v33 }
 0x5fe   :  { %5482 = vmatpush1.bf16.msra.mxu1 %v14556_v40  ;;  %v21282_v40 = vld [vmem:[#allocation15_spill] sm:$0xff] }
 0x5ff   :  { %5483 = vmatprep.subr.bf16.mxu1 %v14561_v10 }
 0x600   :  { %v4654_v50 = vpop.f32.mrb[80].mxu0 }
 0x601   :  { %v4656_v46 = vpop.f32.mrb[81].mxu0 }
 0x602   :  { %5484 = vmatpush1.bf16.msra.mxu1 %v14559_v60  ;;  %v4658_v43 = vpop.f32.mrb[82].mxu0 }
 0x603   :  { %v4659_v34 = vpop.f32.mrb[83].mxu0  ;;  %5485 = vmatprep.subr.bf16.mxu1 %v14564_v58  ;;  %v21283_v43 = vld [vmem:[#allocation17_spill] sm:$0xff] }
 0x606   :  { %5486 = vmatpush1.bf16.msra.mxu1 %v14562_v54 }
 0x607   :  { %5487 = vmatprep.subr.bf16.mxu1 %v14567_v63  ;;  %v14640_v63 = vld [vmem:[%s21211_s10] ss:$8 sps:$4 sm:$0xff]  }
 0x60a   :  { %5488 = vmatpush1.bf16.msra.mxu1 %v14565_v55  ;;  %v15691_v55 = vpop.eup %15690 }
 0x60b   :  { %5873 = vmatprep.subr.bf16.mxu1 %v14570_v16 }
 0x60d   :  { %5506 = vmatmul.mubr.bf16.vlgmr.msra.gmra.mrb[92].mxu1 %v18057_v14  ;;  %v14579_v14 = vld [vmem:[%s21203_s2 + $0x64] ss:$16 sps:$4 sm:$0xff]  }
 0x60e   :  { %5874 = vmatpush1.bf16.msra.mxu1 %v14568_v37  ;;  %5905 = vmatprep.mubr.bf16.mxu1 %v21264_v29 }
 0x60f   :  { %5875 = vmatprep.subr.bf16.mxu1 %v14573_v41  ;;  %v15693_v41 = vpop.eup %15692 }
 0x612   :  { %5876 = vmatpush1.bf16.msra.mxu1 %v14571_v19  ;;  %v14648_v19 = vld [vmem:[%s21211_s10 + $0x14] ss:$8 sps:$4 sm:$0xff]  }
 0x613   :  { %5877 = vmatprep.subr.bf16.mxu1 %v14576_v3  ;;  %v4383_v3 = vadd.f32 1.0, %v15691_v55  ;;  %v14609_v55 = vld [vmem:[%s21206_s5 + $0xa4] ss:$16 sps:$4 sm:$0xff]  }
 0x616   :  { %5878 = vmatpush1.bf16.msra.mxu1 %v14574_v7 }
 0x617   :  { %5879 = vmatprep.subr.bf16.mxu1 %v14579_v14  ;;  %v14646_v14 = vld [vmem:[%s21211_s10 + $0x10] ss:$8 sps:$4 sm:$0xff]  }
 0x61a   :  { %5880 = vmatpush1.bf16.msra.mxu1 %v14577_v27  ;;  %v4379_v27 = vadd.f32 1.0, %v15693_v41  ;;  %v14612_v41 = vld [vmem:[%s21206_s5 + $0xc4] ss:$16 sps:$4 sm:$0xff]  }
 0x61b   :  { %5881 = vmatprep.subr.bf16.mxu1 %v14582_v25  ;;  %v14654_v25 = vld [vmem:[%s21211_s10 + $0x24] ss:$8 sps:$4 sm:$0xff]  }
 0x61e   :  { %5882 = vmatpush1.bf16.msra.mxu1 %v14580_v4  ;;  %v4384_v4 = vmul.f32 0.5, %v4383_v3  ;;  %v14610_v3 = vld [vmem:[%s21206_s5 + $0xc0] ss:$16 sps:$4 sm:$0xff]  }
 0x61f   :  { %5883 = vmatprep.subr.bf16.mxu1 %v14585_v1  ;;  %v14652_v1 = vld [vmem:[%s21211_s10 + $0x20] ss:$8 sps:$4 sm:$0xff]  }
 0x620   :  { %v4896_v61 = vpop.f32.mrb[84].mxu0 }
 0x621   :  { %v18511_v18 = vadd.f32 %v4896_v61, %v4654_v50  ;;  %v4898_v22 = vpop.f32.mrb[85].mxu0  ;;  %v14660_v61 = vld [vmem:[%s21211_s10 + $0x34] ss:$8 sps:$4 sm:$0xff]  }
 0x622   :  { %v18513_v36 = vadd.f32 %v4898_v22, %v4656_v46  ;;  %v4900_v44 = vpop.f32.mrb[86].mxu0  ;;  %5884 = vmatpush1.bf16.msra.mxu1 %v14583_v28  ;;  %v14642_v46 = vld [vmem:[%s21211_s10 + $0x4] ss:$8 sps:$4 sm:$0xff]   ;;  %v4380_v28 = vmul.f32 0.5, %v4379_v27  ;;  %v4390_v22 = vmul.f32 %v4384_v4, %v17962_v42  ;;  %v14613_v27 = vld [vmem:[%s21206_s5 + $0xe0] ss:$16 sps:$4 sm:$0xff]  }
 0x623   :  { %v4901_v2 = vpop.f32.mrb[87].mxu0  ;;  %5885 = vmatprep.subr.bf16.mxu1 %v14588_v6  ;;  %5633 = vmatprep.subr.bf16.mxu0 %v14642_v46  ;;  %v14600_v46 = vld [vmem:[%s21206_s5 + $0x44] ss:$16 sps:$4 sm:$0xff]  }
 0x624   :  { %5634 = vmatpush1.bf16.msra.mxu0 %v14640_v63  ;;  %v14604_v63 = vld [vmem:[%s21206_s5 + $0x80] ss:$16 sps:$4 sm:$0xff]  }
 0x625   :  { %5635 = vmatprep.subr.bf16.mxu0 %v14648_v19  ;;  %v4944_v19 = vadd.f32 %v18511_v18, %v21276_v45  ;;  %v14618_v18 = vld [vmem:[%s21205_s4 + $0x4] ss:$16 sps:$4 sm:$0xff]  }
 0x626   :  { %5886 = vmatpush1.bf16.msra.mxu1 %v14586_v52  ;;  %v14658_v52 = vld [vmem:[%s21211_s10 + $0x30] ss:$8 sps:$4 sm:$0xff]  }
 0x627   :  { %5887 = vmatprep.subr.bf16.mxu1 %v14591_v13  ;;  %v14666_v13 = vld [vmem:[%s21211_s10 + $0x44] ss:$8 sps:$4 sm:$0xff]  }
 0x628   :  { %5636 = vmatpush1.bf16.msra.mxu0 %v14646_v14  ;;  %v14615_v14 = vld [vmem:[%s21206_s5 + $0xe4] ss:$16 sps:$4 sm:$0xff]  }
 0x629   :  { %5637 = vmatprep.subr.bf16.mxu0 %v14654_v25 }
 0x62a   :  { %5888 = vmatpush1.bf16.msra.mxu1 %v14589_v48  ;;  %v14664_v48 = vld [vmem:[%s21211_s10 + $0x40] ss:$8 sps:$4 sm:$0xff]  }
 0x62b   :  { %6202 = vmatprep.subr.bf16.mxu1 %v14594_v20  ;;  %v14670_v20 = vld [vmem:[%s21211_s10 + $0x50] ss:$8 sps:$4 sm:$0xff]  }
 0x62c   :  { %5638 = vmatpush1.bf16.msra.mxu0 %v14652_v1 }
 0x62d   :  { %5639 = vmatprep.subr.bf16.mxu0 %v14660_v61 }
 0x630   :  { %5640 = vmatpush1.bf16.msra.mxu0 %v14658_v52 }
 0x631   :  { %5641 = vmatprep.subr.bf16.mxu0 %v14666_v13 }
 0x634   :  { %5642 = vmatpush1.bf16.msra.mxu0 %v14664_v48 }
 0x640   :  { %v4085_v12 = vpop.f32.mrb[72].mxu1  ;;  %v5224_v32 = vpop.f32.mrb[88].mxu0 }
 0x641   :  { %v4086_v8 = vadd.f32 %v4085_v12, %v17922_v47  ;;  %v4087_v17 = vpop.f32.mrb[73].mxu1  ;;  %v5226_v38 = vpop.f32.mrb[89].mxu0  ;;  %v14672_v12 = vld [vmem:[%s21211_s10 + $0x54] ss:$8 sps:$4 sm:$0xff]  }
 0x642   :  { %v4088_v39 = vadd.f32 %v4087_v17, %v17925_v0  ;;  %v4089_v15 = vpop.f32.mrb[74].mxu1  ;;  %v5228_v53 = vpop.f32.mrb[90].mxu0  ;;  %5643 = vmatprep.subr.bf16.mxu0 %v14672_v12  ;;  %v14678_v17 = vld [vmem:[%s21211_s10 + $0x64] ss:$8 sps:$4 sm:$0xff]  }
 0x643   :  { %4092 = vst [vmem:[#allocation3 + $0x10] sm:$0xff] %v4086_v8  ;;  %v4090_v49 = vpop.f32.mrb[75].mxu1  ;;  %v5229_v51 = vpop.f32.mrb[91].mxu0  ;;  %5644 = vmatpush1.bf16.msra.mxu0 %v14670_v20  ;;  %v14676_v8 = vld [vmem:[%s21211_s10 + $0x60] ss:$8 sps:$4 sm:$0xff]  }
 0x644   :  { %4093 = vst [vmem:[#allocation3 + $0x18] sm:$0xff] %v4088_v39  ;;  %5645 = vmatprep.subr.bf16.mxu0 %v14678_v17  ;;  %v14682_v15 = vld [vmem:[%s21211_s10 + $0x70] ss:$8 sps:$4 sm:$0xff]   ;;  %v14684_v53 = vld [vmem:[%s21211_s10 + $0x74] ss:$8 sps:$4 sm:$0xff]  }
 0x645   :  { %v14592_v51 = vld [vmem:[%s21206_s5] ss:$16 sps:$4 sm:$0xff]  }
 0x647   :  { %5646 = vmatpush1.bf16.msra.mxu0 %v14676_v8 }
 0x648   :  { %5647 = vmatprep.subr.bf16.mxu0 %v14684_v53 }
 0x64b   :  { %5648 = vmatpush1.bf16.msra.mxu0 %v14682_v15 }
 0x660   :  { %v4366_v56 = vpop.f32.mrb[76].mxu1  ;;  %v5466_v33 = vpop.f32.mrb[92].mxu0 }
 0x661   :  { %v4375_v10 = vadd.f32 %v4366_v56, %v21282_v40  ;;  %v18532_v60 = vadd.f32 %v5466_v33, %v5224_v32  ;;  %v4368_v58 = vpop.f32.mrb[77].mxu1  ;;  %v5468_v50 = vpop.f32.mrb[93].mxu0  ;;  %v14690_v33 = vld [vmem:[%s21203_s2 + $0xc] ss:$16 sps:$4 sm:$0xff]  }
 0x662   :  { %v4376_v54 = vadd.f32 %v4368_v58, %v21283_v43  ;;  %v18538_v34 = vadd.f32 %v5468_v50, %v5226_v38  ;;  %v4370_v26 = vpop.f32.mrb[78].mxu1  ;;  %v5470_v31 = vpop.f32.mrb[94].mxu0  ;;  %v14595_v58 = vld [vmem:[%s21206_s5 + $0x20] ss:$16 sps:$4 sm:$0xff]   ;;  %5914 = vmatprep.subr.bf16.mxu0 %v14690_v33 }
 0x663   :  { %15694 = vtanh.f32 %v4375_v10  ;;  %v4371_v16 = vpop.f32.mrb[79].mxu1  ;;  %v5471_v37 = vpop.f32.mrb[95].mxu0  ;;  %v14598_v43 = vld [vmem:[%s21206_s5 + $0x40] ss:$16 sps:$4 sm:$0xff]   ;;  %v14606_v31 = vld [vmem:[%s21206_s5 + $0x84] ss:$16 sps:$4 sm:$0xff]  }
 0x664   :  { %v4386_v7 = vmul.f32 0.5, %v4376_v54  ;;  %v14603_v54 = vld [vmem:[%s21206_s5 + $0x64] ss:$16 sps:$4 sm:$0xff]   ;;  %v14601_v26 = vld [vmem:[%s21206_s5 + $0x60] ss:$16 sps:$4 sm:$0xff]   ;;  %v4945_v37 = vadd.f32 %v18513_v36, %v16932_v9  ;;  %v4948_v36 = vmul.f32 0.5, %v4944_v19  ;;  %v5514_v19 = vadd.f32 %v18532_v60, %v17541_v35 }
 0x665   :  { %v14607_v16 = vld [vmem:[%s21206_s5 + $0xa0] ss:$16 sps:$4 sm:$0xff]  }
 0x666   :  { %15696 = vtanh.f32 %v4386_v7  ;;  %v4952_v7 = vmul.f32 0.5, %v4945_v37  ;;  %v14616_v33 = vld [vmem:[%s21205_s4] ss:$16 sps:$4 sm:$0xff]   ;;  %v5515_v37 = vadd.f32 %v18538_v34, %v17547_v30  ;;  %v5518_v34 = vmul.f32 0.5, %v5514_v19 }
 0x667   :  { %v14637_v60 = vld [vmem:[%s21205_s4 + $0xe0] ss:$16 sps:$4 sm:$0xff]  }
 0x668   :  { %v14691_v19 = vld [vmem:[%s21208_s7] ss:$16 sps:$4 sm:$0xff]  }
 0x66d   :  { %v15695_v6 = vpop.eup %15694 }
 0x66e   :  { %v4391_v44 = vmul.f32 %v15695_v6, %v4380_v28 }
 0x670   :  { %v18562_v2 = vadd.f32 %v4391_v44, %v4390_v22  ;;  %v15697_v42 = vpop.eup %15696 }
 0x671   :  { %v4388_v32 = vadd.f32 1.0, %v15697_v42 }
 0x672   :  { %15698 = vtanh.f32 %v18562_v2 }
 0x673   :  { %v4389_v38 = vmul.f32 0.5, %v4388_v32  ;;  %15700 = vtanh.f32 %v4952_v7  ;;  %v5522_v7 = vmul.f32 0.5, %v5515_v37 }
 0x674   :  { %15702 = vtanh.f32 %v4948_v36  ;;  %v14639_v36 = vld [vmem:[%s21205_s4 + $0xe4] ss:$16 sps:$4 sm:$0xff]  }
 0x67c   :  { %v15699_v39 = vpop.eup %15698 }
 0x67d   :  { %v4394_v49 = vmul.f32 %v15699_v39, %v4389_v38  ;;  %v15701_v52 = vpop.eup %15700 }
 0x67e   :  { %v15703_v13 = vpop.eup %15702  ;;  %v4954_v48 = vadd.f32 1.0, %v15701_v52 }
 0x67f   :  { %v18592_v5 = vpack.c.bf16 %v4394_v49, %v4394_v49  ;;  %v4950_v20 = vadd.f32 1.0, %v15703_v13  ;;  %v14649_v13 = vld [vmem:[%s21209_s8 + $0x20] ss:$16 sps:$4 sm:$0xff]  }
 0x680   :  { %v4695_v56 = vpop.f32.mrb[80].mxu1  ;;  %v4955_v12 = vmul.f32 0.5, %v4954_v48 }
 0x681   :  { %v4697_v40 = vpop.f32.mrb[81].mxu1  ;;  %5906 = vmatmul.mubr.bf16.vlgmr.msra.gmra.mrb[96].mxu1 %v18592_v5  ;;  %v4951_v32 = vmul.f32 0.5, %v4950_v20 }
 0x682   :  { %v4699_v10 = vpop.f32.mrb[82].mxu1  ;;  %6203 = vmatpush1.bf16.msra.mxu1 %v14592_v51  ;;  %6234 = vmatprep.mubr.bf16.mxu1 %v21264_v29  ;;  %v4961_v17 = vmul.f32 %v4955_v12, %v18051_v23  ;;  %v14621_v23 = vld [vmem:[%s21205_s4 + $0x24] ss:$16 sps:$4 sm:$0xff]  }
 0x683   :  { %v4700_v50 = vpop.f32.mrb[83].mxu1  ;;  %6204 = vmatprep.subr.bf16.mxu1 %v14597_v11 }
 0x686   :  { %6205 = vmatpush1.bf16.msra.mxu1 %v14595_v58 }
 0x687   :  { %6206 = vmatprep.subr.bf16.mxu1 %v14600_v46  ;;  %v14619_v46 = vld [vmem:[%s21205_s4 + $0x20] ss:$16 sps:$4 sm:$0xff]  }
 0x68a   :  { %6207 = vmatpush1.bf16.msra.mxu1 %v14598_v43  ;;  %v14624_v43 = vld [vmem:[%s21205_s4 + $0x44] ss:$16 sps:$4 sm:$0xff]  }
 0x68b   :  { %6208 = vmatprep.subr.bf16.mxu1 %v14603_v54  ;;  %v14622_v54 = vld [vmem:[%s21205_s4 + $0x40] ss:$16 sps:$4 sm:$0xff]  }
 0x68e   :  { %6209 = vmatpush1.bf16.msra.mxu1 %v14601_v26  ;;  %v14627_v26 = vld [vmem:[%s21205_s4 + $0x64] ss:$16 sps:$4 sm:$0xff]  }
 0x68f   :  { %6210 = vmatprep.subr.bf16.mxu1 %v14606_v31  ;;  %v14625_v31 = vld [vmem:[%s21205_s4 + $0x60] ss:$16 sps:$4 sm:$0xff]  }
 0x692   :  { %6211 = vmatpush1.bf16.msra.mxu1 %v14604_v63  ;;  %v14630_v63 = vld [vmem:[%s21205_s4 + $0x84] ss:$16 sps:$4 sm:$0xff]  }
 0x693   :  { %6212 = vmatprep.subr.bf16.mxu1 %v14609_v55  ;;  %v14628_v55 = vld [vmem:[%s21205_s4 + $0x80] ss:$16 sps:$4 sm:$0xff]  }
 0x696   :  { %6213 = vmatpush1.bf16.msra.mxu1 %v14607_v16  ;;  %v14633_v16 = vld [vmem:[%s21205_s4 + $0xa4] ss:$16 sps:$4 sm:$0xff]  }
 0x697   :  { %6214 = vmatprep.subr.bf16.mxu1 %v14612_v41  ;;  %v14631_v41 = vld [vmem:[%s21205_s4 + $0xa0] ss:$16 sps:$4 sm:$0xff]  }
 0x69a   :  { %6215 = vmatpush1.bf16.msra.mxu1 %v14610_v3  ;;  %v14636_v3 = vld [vmem:[%s21205_s4 + $0xc4] ss:$16 sps:$4 sm:$0xff]  }
 0x69b   :  { %6216 = vmatprep.subr.bf16.mxu1 %v14615_v14  ;;  %v14634_v14 = vld [vmem:[%s21205_s4 + $0xc0] ss:$16 sps:$4 sm:$0xff]  }
 0x69e   :  { %6217 = vmatpush1.bf16.msra.mxu1 %v14613_v27  ;;  %v14645_v27 = vld [vmem:[%s21209_s8 + $0x4] ss:$16 sps:$4 sm:$0xff]  }
 0x69f   :  { %6444 = vmatprep.subr.bf16.mxu1 %v14618_v18 }
 0x6a0   :  { %v4937_v25 = vpop.f32.mrb[84].mxu1 }
 0x6a1   :  { %v4938_v4 = vadd.f32 %v4937_v25, %v4695_v56  ;;  %v4939_v1 = vpop.f32.mrb[85].mxu1  ;;  %v14643_v25 = vld [vmem:[%s21209_s8] ss:$16 sps:$4 sm:$0xff]  }
 0x6a2   :  { %v4940_v28 = vadd.f32 %v4939_v1, %v4697_v40  ;;  %v4941_v6 = vpop.f32.mrb[86].mxu1 }
 0x6a3   :  { %v4946_v61 = vadd.f32 %v4938_v4, %v21277_v59  ;;  %v4942_v22 = vpop.f32.mrb[87].mxu1 }
 0x6a4   :  { %v4947_v44 = vadd.f32 %v4940_v28, %v21278_v21  ;;  %v14651_v28 = vld [vmem:[%s21209_s8 + $0x24] ss:$16 sps:$4 sm:$0xff]  }
 0x6a5   :  { %15704 = vtanh.f32 %v4946_v61 }
 0x6a6   :  { %v4957_v42 = vmul.f32 0.5, %v4947_v44 }
 0x6a8   :  { %15706 = vtanh.f32 %v4957_v42  ;;  %v14657_v42 = vld [vmem:[%s21209_s8 + $0x44] ss:$16 sps:$4 sm:$0xff]  }
 0x6af   :  { %v15705_v8 = vpop.eup %15704 }
 0x6b0   :  { %v4962_v38 = vmul.f32 %v15705_v8, %v4951_v32  ;;  %v14655_v8 = vld [vmem:[%s21209_s8 + $0x40] ss:$16 sps:$4 sm:$0xff]  }
 0x6b2   :  { %v18651_v39 = vadd.f32 %v4962_v38, %v4961_v17  ;;  %v15707_v15 = vpop.eup %15706  ;;  %v14663_v17 = vld [vmem:[%s21209_s8 + $0x64] ss:$16 sps:$4 sm:$0xff]  }
 0x6b3   :  { %v4959_v53 = vadd.f32 1.0, %v15707_v15 }
 0x6b4   :  { %15708 = vtanh.f32 %v18651_v39 }
 0x6b5   :  { %v4960_v49 = vmul.f32 0.5, %v4959_v53  ;;  %15710 = vtanh.f32 %v5522_v7  ;;  %v14661_v53 = vld [vmem:[%s21209_s8 + $0x60] ss:$16 sps:$4 sm:$0xff]   ;;  %v14696_v7 = vld [vmem:[%s21203_s2 + $0x2c] ss:$16 sps:$4 sm:$0xff]  }
 0x6b6   :  { %15712 = vtanh.f32 %v5518_v34  ;;  %v14694_v34 = vld [vmem:[%s21203_s2 + $0x28] ss:$16 sps:$4 sm:$0xff]  }
 0x6be   :  { %v15709_v51 = vpop.eup %15708 }
 0x6bf   :  { %v4965_v11 = vmul.f32 %v15709_v51, %v4960_v49  ;;  %v15711_v48 = vpop.eup %15710  ;;  %v14669_v49 = vld [vmem:[%s21209_s8 + $0x84] ss:$16 sps:$4 sm:$0xff]  }
 0x6c0   :  { %v5265_v56 = vpop.f32.mrb[88].mxu1  ;;  %v15713_v20 = vpop.eup %15712  ;;  %v5524_v12 = vadd.f32 1.0, %v15711_v48  ;;  %v14723_v48 = vld [vmem:[%s21208_s7 + $0xa4] ss:$16 sps:$4 sm:$0xff]  }
 0x6c1   :  { %v5267_v40 = vpop.f32.mrb[89].mxu1  ;;  %v18657_v10 = vpack.c.bf16 %v4965_v11, %v4965_v11  ;;  %v5520_v38 = vadd.f32 1.0, %v15713_v20  ;;  %v14721_v20 = vld [vmem:[%s21208_s7 + $0xa0] ss:$16 sps:$4 sm:$0xff]  }
 0x6c2   :  { %v5269_v58 = vpop.f32.mrb[90].mxu1  ;;  %v5525_v15 = vmul.f32 0.5, %v5524_v12  ;;  %v14726_v12 = vld [vmem:[%s21203_s2 + $0xcc] ss:$16 sps:$4 sm:$0xff]  }
 0x6c3   :  { %v5270_v50 = vpop.f32.mrb[91].mxu1  ;;  %6235 = vmatmul.mubr.bf16.vlgmr.msra.gmra.mrb[100].mxu1 %v18657_v10  ;;  %v5521_v51 = vmul.f32 0.5, %v5520_v38  ;;  %v14732_v38 = vld [vmem:[%s21203_s2 + $0xec] ss:$16 sps:$4 sm:$0xff]  }
 0x6c4   :  { %6445 = vmatpush1.bf16.msra.mxu1 %v14616_v33  ;;  %6476 = vmatprep.mubr.bf16.mxu1 %v21264_v29  ;;  %v14681_v50 = vld [vmem:[%s21209_s8 + $0xc4] ss:$16 sps:$4 sm:$0xff]  }
 0x6c5   :  { %6446 = vmatprep.subr.bf16.mxu1 %v14621_v23  ;;  %v14675_v23 = vld [vmem:[%s21209_s8 + $0xa4] ss:$16 sps:$4 sm:$0xff]  }
 0x6c8   :  { %6447 = vmatpush1.bf16.msra.mxu1 %v14619_v46 }
 0x6c9   :  { %6448 = vmatprep.subr.bf16.mxu1 %v14624_v43  ;;  %v14679_v43 = vld [vmem:[%s21209_s8 + $0xc0] ss:$16 sps:$4 sm:$0xff]  }
 0x6cc   :  { %6449 = vmatpush1.bf16.msra.mxu1 %v14622_v54 }
 0x6cd   :  { %6450 = vmatprep.subr.bf16.mxu1 %v14627_v26  ;;  %v14687_v26 = vld [vmem:[%s21209_s8 + $0xe4] ss:$16 sps:$4 sm:$0xff]  }
 0x6d0   :  { %6451 = vmatpush1.bf16.msra.mxu1 %v14625_v31  ;;  %v14685_v31 = vld [vmem:[%s21209_s8 + $0xe0] ss:$16 sps:$4 sm:$0xff]  }
 0x6d1   :  { %6452 = vmatprep.subr.bf16.mxu1 %v14630_v63 }
 0x6d4   :  { %6453 = vmatpush1.bf16.msra.mxu1 %v14628_v55  ;;  %v14693_v55 = vld [vmem:[%s21208_s7 + $0x4] ss:$16 sps:$4 sm:$0xff]  }
 0x6d5   :  { %6454 = vmatprep.subr.bf16.mxu1 %v14633_v16 }
 0x6d8   :  { %6455 = vmatpush1.bf16.msra.mxu1 %v14631_v41  ;;  %v14688_v41 = vld [vmem:[%s21203_s2 + $0x8] ss:$16 sps:$4 sm:$0xff]  }
 0x6d9   :  { %6456 = vmatprep.subr.bf16.mxu1 %v14636_v3 }
 0x6dc   :  { %6457 = vmatpush1.bf16.msra.mxu1 %v14634_v14  ;;  %v14699_v14 = vld [vmem:[%s21208_s7 + $0x24] ss:$16 sps:$4 sm:$0xff]  }
 0x6dd   :  { %6458 = vmatprep.subr.bf16.mxu1 %v14639_v36  ;;  %v14697_v36 = vld [vmem:[%s21208_s7 + $0x20] ss:$16 sps:$4 sm:$0xff]  }
 0x6e0   :  { %6459 = vmatpush1.bf16.msra.mxu1 %v14637_v60  ;;  %v5507_v18 = vpop.f32.mrb[92].mxu1  ;;  %v14702_v60 = vld [vmem:[%s21203_s2 + $0x4c] ss:$16 sps:$4 sm:$0xff]  }
 0x6e1   :  { %v5508_v4 = vadd.f32 %v5507_v18, %v5265_v56  ;;  %v5509_v1 = vpop.f32.mrb[93].mxu1  ;;  %6772 = vmatprep.subr.bf16.mxu1 %v14645_v27  ;;  %v5531_v56 = vmul.f32 %v5525_v15, %v18145_v62  ;;  %v14673_v62 = vld [vmem:[%s21209_s8 + $0xa0] ss:$16 sps:$4 sm:$0xff]   ;;  %v14705_v27 = vld [vmem:[%s21208_s7 + $0x44] ss:$16 sps:$4 sm:$0xff]  }
 0x6e2   :  { %v5510_v6 = vadd.f32 %v5509_v1, %v5267_v40  ;;  %v5511_v61 = vpop.f32.mrb[94].mxu1  ;;  %v14667_v40 = vld [vmem:[%s21209_s8 + $0x80] ss:$16 sps:$4 sm:$0xff]   ;;  %v14700_v18 = vld [vmem:[%s21203_s2 + $0x48] ss:$16 sps:$4 sm:$0xff]  }
 0x6e3   :  { %v5516_v22 = vadd.f32 %v5508_v4, %v17554_v24  ;;  %6477 = vmatmul.mubr.bf16.vlgmr.msra.gmra.mrb[104].mxu1 %v18592_v5  ;;  %v5512_v44 = vpop.f32.mrb[95].mxu1  ;;  %v14708_v4 = vld [vmem:[%s21203_s2 + $0x6c] ss:$16 sps:$4 sm:$0xff]   ;;  %v14711_v1 = vld [vmem:[%s21208_s7 + $0x64] ss:$16 sps:$4 sm:$0xff]  }
 0x6e4   :  { %v5517_v52 = vadd.f32 %v5510_v6, %v17562_v57  ;;  %6773 = vmatpush1.bf16.msra.mxu1 %v14643_v25  ;;  %6804 = vmatprep.mubr.bf16.mxu1 %v21264_v29  ;;  %v14703_v25 = vld [vmem:[%s21208_s7 + $0x40] ss:$16 sps:$4 sm:$0xff]   ;;  %v14714_v61 = vld [vmem:[%s21203_s2 + $0x8c] ss:$16 sps:$4 sm:$0xff]   ;;  %v14712_v44 = vld [vmem:[%s21203_s2 + $0x88] ss:$16 sps:$4 sm:$0xff]  }
 0x6e5   :  { %15714 = vtanh.f32 %v5516_v22  ;;  %6774 = vmatprep.subr.bf16.mxu1 %v14651_v28  ;;  %v14706_v28 = vld [vmem:[%s21203_s2 + $0x68] ss:$16 sps:$4 sm:$0xff]   ;;  %v14709_v6 = vld [vmem:[%s21208_s7 + $0x60] ss:$16 sps:$4 sm:$0xff]   ;;  %v14717_v22 = vld [vmem:[%s21208_s7 + $0x84] ss:$16 sps:$4 sm:$0xff]  }
 0x6e6   :  { %v5527_v32 = vmul.f32 0.5, %v5517_v52  ;;  %v14715_v52 = vld [vmem:[%s21208_s7 + $0x80] ss:$16 sps:$4 sm:$0xff]   ;;  %v14735_v15 = vld [vmem:[%s21208_s7 + $0xe4] ss:$16 sps:$4 sm:$0xff]  }
 0x6e8   :  { %6775 = vmatpush1.bf16.msra.mxu1 %v14649_v13  ;;  %15716 = vtanh.f32 %v5527_v32  ;;  %v14720_v13 = vld [vmem:[%s21203_s2 + $0xac] ss:$16 sps:$4 sm:$0xff]   ;;  %v14729_v32 = vld [vmem:[%s21208_s7 + $0xc4] ss:$16 sps:$4 sm:$0xff]  }
 0x6e9   :  { %6776 = vmatprep.subr.bf16.mxu1 %v14657_v42  ;;  %v14718_v42 = vld [vmem:[%s21203_s2 + $0xa8] ss:$16 sps:$4 sm:$0xff]  }
 0x6ec   :  { %6777 = vmatpush1.bf16.msra.mxu1 %v14655_v8  ;;  %v14724_v8 = vld [vmem:[%s21203_s2 + $0xc8] ss:$16 sps:$4 sm:$0xff]  }
 0x6ed   :  { %6778 = vmatprep.subr.bf16.mxu1 %v14663_v17  ;;  %v14727_v17 = vld [vmem:[%s21208_s7 + $0xc0] ss:$16 sps:$4 sm:$0xff]  }
 0x6ef   :  { %v15715_v11 = vpop.eup %15714 }
 0x6f0   :  { %v5532_v33 = vmul.f32 %v15715_v11, %v5521_v51  ;;  %6779 = vmatpush1.bf16.msra.mxu1 %v14661_v53  ;;  %v14730_v53 = vld [vmem:[%s21203_s2 + $0xe8] ss:$16 sps:$4 sm:$0xff]   ;;  %v14738_v51 = vld [vmem:[%s21206_s5 + $0xc] ss:$16 sps:$4 sm:$0xff]  }
 0x6f1   :  { %6780 = vmatprep.subr.bf16.mxu1 %v14669_v49  ;;  %v14733_v49 = vld [vmem:[%s21208_s7 + $0xe0] ss:$16 sps:$4 sm:$0xff]   ;;  %v14736_v11 = vld [vmem:[%s21206_s5 + $0x8] ss:$16 sps:$4 sm:$0xff]  }
 0x6f2   :  { %v18745_v58 = vadd.f32 %v5532_v33, %v5531_v56  ;;  %v15717_v46 = vpop.eup %15716  ;;  %v14741_v56 = vld [vmem:[%s21206_s5 + $0x2c] ss:$16 sps:$4 sm:$0xff]   ;;  %v14739_v33 = vld [vmem:[%s21206_s5 + $0x28] ss:$16 sps:$4 sm:$0xff]  }
 0x6f3   :  { %v5529_v54 = vadd.f32 1.0, %v15717_v46  ;;  %v14750_v46 = vld [vmem:[%s21206_s5 + $0x8c] ss:$16 sps:$4 sm:$0xff]  }
 0x6f4   :  { %15718 = vtanh.f32 %v18745_v58  ;;  %6781 = vmatpush1.bf16.msra.mxu1 %v14667_v40  ;;  %v14744_v40 = vld [vmem:[%s21206_s5 + $0x4c] ss:$16 sps:$4 sm:$0xff]  }
 0x6f5   :  { %6782 = vmatprep.subr.bf16.mxu1 %v14675_v23  ;;  %v5530_v63 = vmul.f32 0.5, %v5529_v54  ;;  %v14742_v23 = vld [vmem:[%s21206_s5 + $0x48] ss:$16 sps:$4 sm:$0xff]   ;;  %v14753_v54 = vld [vmem:[%s21206_s5 + $0xac] ss:$16 sps:$4 sm:$0xff]  }
 0x6f8   :  { %6783 = vmatpush1.bf16.msra.mxu1 %v14673_v62  ;;  %v14747_v62 = vld [vmem:[%s21206_s5 + $0x6c] ss:$16 sps:$4 sm:$0xff]  }
 0x6f9   :  { %6784 = vmatprep.subr.bf16.mxu1 %v14681_v50  ;;  %v14745_v50 = vld [vmem:[%s21206_s5 + $0x68] ss:$16 sps:$4 sm:$0xff]  }
 0x6fc   :  { %6785 = vmatpush1.bf16.msra.mxu1 %v14679_v43  ;;  %v14748_v43 = vld [vmem:[%s21206_s5 + $0x88] ss:$16 sps:$4 sm:$0xff]  }
 0x6fd   :  { %6786 = vmatprep.subr.bf16.mxu1 %v14687_v26  ;;  %v14751_v26 = vld [vmem:[%s21206_s5 + $0xa8] ss:$16 sps:$4 sm:$0xff]  }
 0x6fe   :  { %v15719_v16 = vpop.eup %15718 }
 0x6ff   :  { %v5535_v37 = vmul.f32 %v15719_v16, %v5530_v63  ;;  %v14754_v63 = vld [vmem:[%s21206_s5 + $0xc8] ss:$16 sps:$4 sm:$0xff]  }
 0x700   :  { %6787 = vmatpush1.bf16.msra.mxu1 %v14685_v31  ;;  %v14756_v31 = vld [vmem:[%s21206_s5 + $0xcc] ss:$16 sps:$4 sm:$0xff]   ;;  %v14757_v16 = vld [vmem:[%s21206_s5 + $0xe8] ss:$16 sps:$4 sm:$0xff]  }
 0x701   :  { %7014 = vmatprep.subr.bf16.mxu1 %v14693_v55  ;;  %v18772_v3 = vpack.c.bf16 %v5535_v37, %v5535_v37  ;;  %v14759_v55 = vld [vmem:[%s21206_s5 + $0xec] ss:$16 sps:$4 sm:$0xff]  }
 0x702   :  { %v14762_v37 = vld [vmem:[%s21205_s4 + $0xc] ss:$16 sps:$4 sm:$0xff]  }
 0x703   :  { %5666 = vmatmul.mubr.bf16.vlgmr.msra.gmra.mrb[96].mxu0 %v18772_v3  ;;  %6805 = vmatmul.mubr.bf16.vlgmr.msra.gmra.mrb[108].mxu1 %v18772_v3 }
 0x704   :  { %5915 = vmatpush1.bf16.msra.mxu0 %v14688_v41  ;;  %7015 = vmatpush1.bf16.msra.mxu1 %v14691_v19  ;;  %v14760_v41 = vld [vmem:[%s21205_s4 + $0x8] ss:$16 sps:$4 sm:$0xff]   ;;  %v14765_v19 = vld [vmem:[%s21205_s4 + $0x2c] ss:$16 sps:$4 sm:$0xff]  }
 0x705   :  { %5916 = vmatprep.subr.bf16.mxu0 %v14696_v7  ;;  %7016 = vmatprep.subr.bf16.mxu1 %v14699_v14  ;;  %v14763_v7 = vld [vmem:[%s21205_s4 + $0x28] ss:$16 sps:$4 sm:$0xff]   ;;  %v14768_v14 = vld [vmem:[%s21205_s4 + $0x4c] ss:$16 sps:$4 sm:$0xff]  }
 0x706   :  { %5946 = vmatprep.mubr.bf16.mxu0 %v21264_v29  ;;  %7046 = vmatprep.mubr.bf16.mxu1 %v21264_v29 }
 0x708   :  { %5917 = vmatpush1.bf16.msra.mxu0 %v14694_v34  ;;  %7017 = vmatpush1.bf16.msra.mxu1 %v14697_v36  ;;  %v14766_v34 = vld [vmem:[%s21205_s4 + $0x48] ss:$16 sps:$4 sm:$0xff]   ;;  %v14771_v36 = vld [vmem:[%s21205_s4 + $0x6c] ss:$16 sps:$4 sm:$0xff]  }
 0x709   :  { %5918 = vmatprep.subr.bf16.mxu0 %v14702_v60  ;;  %7018 = vmatprep.subr.bf16.mxu1 %v14705_v27  ;;  %v14769_v60 = vld [vmem:[%s21205_s4 + $0x68] ss:$16 sps:$4 sm:$0xff]   ;;  %v14774_v27 = vld [vmem:[%s21205_s4 + $0x8c] ss:$16 sps:$4 sm:$0xff]  }
 0x70c   :  { %5919 = vmatpush1.bf16.msra.mxu0 %v14700_v18  ;;  %7019 = vmatpush1.bf16.msra.mxu1 %v14703_v25  ;;  %v14772_v18 = vld [vmem:[%s21205_s4 + $0x88] ss:$16 sps:$4 sm:$0xff]   ;;  %v14777_v25 = vld [vmem:[%s21205_s4 + $0xac] ss:$16 sps:$4 sm:$0xff]  }
 0x70d   :  { %5920 = vmatprep.subr.bf16.mxu0 %v14708_v4  ;;  %7020 = vmatprep.subr.bf16.mxu1 %v14711_v1  ;;  %v14775_v1 = vld [vmem:[%s21205_s4 + $0xa8] ss:$16 sps:$4 sm:$0xff]  }
 0x710   :  { %5921 = vmatpush1.bf16.msra.mxu0 %v14706_v28  ;;  %7021 = vmatpush1.bf16.msra.mxu1 %v14709_v6  ;;  %v21284_v28 = vld [vmem:[#allocation18_spill] sm:$0xff] }
 0x711   :  { %5922 = vmatprep.subr.bf16.mxu0 %v14714_v61  ;;  %7022 = vmatprep.subr.bf16.mxu1 %v14717_v22  ;;  %v14780_v22 = vld [vmem:[%s21205_s4 + $0xcc] ss:$16 sps:$4 sm:$0xff]  }
 0x714   :  { %5923 = vmatpush1.bf16.msra.mxu0 %v14712_v44  ;;  %7023 = vmatpush1.bf16.msra.mxu1 %v14715_v52  ;;  %v21285_v44 = vld [vmem:[#allocation20_spill] sm:$0xff] }
 0x715   :  { %5924 = vmatprep.subr.bf16.mxu0 %v14720_v13  ;;  %7024 = vmatprep.subr.bf16.mxu1 %v14723_v48 }
 0x718   :  { %5925 = vmatpush1.bf16.msra.mxu0 %v14718_v42  ;;  %7025 = vmatpush1.bf16.msra.mxu1 %v14721_v20  ;;  %v14778_v42 = vld [vmem:[%s21205_s4 + $0xc8] ss:$16 sps:$4 sm:$0xff]   ;;  %v14783_v20 = vld [vmem:[%s21205_s4 + $0xec] ss:$16 sps:$4 sm:$0xff]  }
 0x719   :  { %5926 = vmatprep.subr.bf16.mxu0 %v14726_v12  ;;  %7026 = vmatprep.subr.bf16.mxu1 %v14729_v32  ;;  %v14781_v12 = vld [vmem:[%s21205_s4 + $0xe8] ss:$16 sps:$4 sm:$0xff]   ;;  %v14786_v32 = vld [vmem:[%s21209_s8 + $0xc] ss:$16 sps:$4 sm:$0xff]  }
 0x71c   :  { %5927 = vmatpush1.bf16.msra.mxu0 %v14724_v8  ;;  %7027 = vmatpush1.bf16.msra.mxu1 %v14727_v17  ;;  %v14784_v8 = vld [vmem:[%s21209_s8 + $0x8] ss:$16 sps:$4 sm:$0xff]   ;;  %v14789_v17 = vld [vmem:[%s21209_s8 + $0x2c] ss:$16 sps:$4 sm:$0xff]  }
 0x71d   :  { %5928 = vmatprep.subr.bf16.mxu0 %v14732_v38  ;;  %7028 = vmatprep.subr.bf16.mxu1 %v14735_v15  ;;  %v14787_v38 = vld [vmem:[%s21209_s8 + $0x28] ss:$16 sps:$4 sm:$0xff]   ;;  %v14792_v15 = vld [vmem:[%s21209_s8 + $0x4c] ss:$16 sps:$4 sm:$0xff]  }
 0x720   :  { %5929 = vmatpush1.bf16.msra.mxu0 %v14730_v53  ;;  %7029 = vmatpush1.bf16.msra.mxu1 %v14733_v49  ;;  %v14790_v53 = vld [vmem:[%s21209_s8 + $0x48] ss:$16 sps:$4 sm:$0xff]  }
 0x721   :  { %6243 = vmatprep.subr.bf16.mxu0 %v14738_v51  ;;  %v14793_v49 = vld [vmem:[%s21209_s8 + $0x68] ss:$16 sps:$4 sm:$0xff]   ;;  %v14798_v51 = vld [vmem:[%s21209_s8 + $0x8c] ss:$16 sps:$4 sm:$0xff]  }
 0x723   :  { %5947 = vmatmul.mubr.bf16.vlgmr.msra.gmra.mrb[100].mxu0 %v18592_v5  ;;  %7047 = vmatmul.mubr.bf16.vlgmr.msra.gmra.mrb[112].mxu1 %v18657_v10 }
 0x724   :  { %6244 = vmatpush1.bf16.msra.mxu0 %v14736_v11  ;;  %6275 = vmatprep.mubr.bf16.mxu0 %v21264_v29  ;;  %v14796_v11 = vld [vmem:[%s21209_s8 + $0x88] ss:$16 sps:$4 sm:$0xff]  }
 0x725   :  { %6245 = vmatprep.subr.bf16.mxu0 %v14741_v56  ;;  %7247 = vmatprep.mubr.bf16.mxu1 %v21264_v29  ;;  %v14801_v56 = vld [vmem:[%s21209_s8 + $0xac] ss:$16 sps:$4 sm:$0xff]  }
 0x728   :  { %6246 = vmatpush1.bf16.msra.mxu0 %v14739_v33  ;;  %v14799_v33 = vld [vmem:[%s21209_s8 + $0xa8] ss:$16 sps:$4 sm:$0xff]  }
 0x729   :  { %6247 = vmatprep.subr.bf16.mxu0 %v14744_v40  ;;  %v14804_v40 = vld [vmem:[%s21209_s8 + $0xcc] ss:$16 sps:$4 sm:$0xff]  }
 0x72c   :  { %6248 = vmatpush1.bf16.msra.mxu0 %v14742_v23  ;;  %v14802_v23 = vld [vmem:[%s21209_s8 + $0xc8] ss:$16 sps:$4 sm:$0xff]  }
 0x72d   :  { %6249 = vmatprep.subr.bf16.mxu0 %v14747_v62  ;;  %v14807_v62 = vld [vmem:[%s21209_s8 + $0xec] ss:$16 sps:$4 sm:$0xff]  }
 0x730   :  { %6250 = vmatpush1.bf16.msra.mxu0 %v14745_v50  ;;  %v14805_v50 = vld [vmem:[%s21209_s8 + $0xe8] ss:$16 sps:$4 sm:$0xff]  }
 0x731   :  { %6251 = vmatprep.subr.bf16.mxu0 %v14750_v46  ;;  %v14810_v46 = vld [vmem:[%s21208_s7 + $0xc] ss:$16 sps:$4 sm:$0xff]  }
 0x734   :  { %6252 = vmatpush1.bf16.msra.mxu0 %v14748_v43  ;;  %v14808_v43 = vld [vmem:[%s21208_s7 + $0x8] ss:$16 sps:$4 sm:$0xff]  }
 0x735   :  { %6253 = vmatprep.subr.bf16.mxu0 %v14753_v54  ;;  %v14813_v54 = vld [vmem:[%s21208_s7 + $0x2c] ss:$16 sps:$4 sm:$0xff]  }
 0x738   :  { %6254 = vmatpush1.bf16.msra.mxu0 %v14751_v26  ;;  %v14811_v26 = vld [vmem:[%s21208_s7 + $0x28] ss:$16 sps:$4 sm:$0xff]  }
 0x739   :  { %6255 = vmatprep.subr.bf16.mxu0 %v14756_v31  ;;  %v14816_v31 = vld [vmem:[%s21208_s7 + $0x4c] ss:$16 sps:$4 sm:$0xff]  }
 0x73c   :  { %6256 = vmatpush1.bf16.msra.mxu0 %v14754_v63  ;;  %v14814_v63 = vld [vmem:[%s21208_s7 + $0x48] ss:$16 sps:$4 sm:$0xff]  }
 0x73d   :  { %6257 = vmatprep.subr.bf16.mxu0 %v14759_v55  ;;  %v14817_v55 = vld [vmem:[%s21208_s7 + $0x68] ss:$16 sps:$4 sm:$0xff]  }
 0x740   :  { %6258 = vmatpush1.bf16.msra.mxu0 %v14757_v16  ;;  %v14822_v16 = vld [vmem:[%s21208_s7 + $0x8c] ss:$16 sps:$4 sm:$0xff]  }
 0x741   :  { %6485 = vmatprep.subr.bf16.mxu0 %v14762_v37  ;;  %v14820_v37 = vld [vmem:[%s21208_s7 + $0x88] ss:$16 sps:$4 sm:$0xff]  }
 0x743   :  { %6276 = vmatmul.mubr.bf16.vlgmr.msra.gmra.mrb[104].mxu0 %v18657_v10 }
 0x744   :  { %6486 = vmatpush1.bf16.msra.mxu0 %v14760_v41  ;;  %6517 = vmatprep.mubr.bf16.mxu0 %v21264_v29  ;;  %v14825_v41 = vld [vmem:[%s21208_s7 + $0xac] ss:$16 sps:$4 sm:$0xff]  }
 0x745   :  { %6487 = vmatprep.subr.bf16.mxu0 %v14765_v19  ;;  %v14823_v19 = vld [vmem:[%s21208_s7 + $0xa8] ss:$16 sps:$4 sm:$0xff]  }
 0x748   :  { %6488 = vmatpush1.bf16.msra.mxu0 %v14763_v7  ;;  %v14828_v7 = vld [vmem:[%s21208_s7 + $0xcc] ss:$16 sps:$4 sm:$0xff]  }
 0x749   :  { %6489 = vmatprep.subr.bf16.mxu0 %v14768_v14 }
 0x74c   :  { %6490 = vmatpush1.bf16.msra.mxu0 %v14766_v34 }
 0x74d   :  { %6491 = vmatprep.subr.bf16.mxu0 %v14771_v36 }
 0x750   :  { %6492 = vmatpush1.bf16.msra.mxu0 %v14769_v60  ;;  %v14826_v60 = vld [vmem:[%s21208_s7 + $0xc8] ss:$16 sps:$4 sm:$0xff]  }
 0x751   :  { %6493 = vmatprep.subr.bf16.mxu0 %v14774_v27 }
 0x754   :  { %6494 = vmatpush1.bf16.msra.mxu0 %v14772_v18  ;;  %v5907_v4 = vpop.f32.mrb[96].mxu1  ;;  %v14831_v18 = vld [vmem:[%s21208_s7 + $0xec] ss:$16 sps:$4 sm:$0xff]  }
 0x755   :  { %v18953_v6 = vadd.f32 %v5907_v4, %v21284_v28  ;;  %v5909_v61 = vpop.f32.mrb[97].mxu1  ;;  %6495 = vmatprep.subr.bf16.mxu0 %v14777_v25  ;;  %v14829_v25 = vld [vmem:[%s21208_s7 + $0xe8] ss:$16 sps:$4 sm:$0xff]   ;;  %v14834_v4 = vld [vmem:[%s21203_s2 + $0x4] ss:$16 sps:$4 sm:$0xff]  }
 0x756   :  { %v18959_v52 = vadd.f32 %v5909_v61, %v21285_v44  ;;  %v5911_v13 = vpop.f32.mrb[98].mxu1  ;;  %v14837_v28 = vld [vmem:[%s21203_s2 + $0x24] ss:$16 sps:$4 sm:$0xff]   ;;  %v14835_v61 = vld [vmem:[%s21203_s2 + $0x20] ss:$16 sps:$4 sm:$0xff]  }
 0x757   :  { %v5912_v48 = vpop.f32.mrb[99].mxu1  ;;  %v14838_v44 = vld [vmem:[%s21203_s2 + $0x40] ss:$16 sps:$4 sm:$0xff]  }
 0x758   :  { %6496 = vmatpush1.bf16.msra.mxu0 %v14775_v1  ;;  %v14832_v1 = vld [vmem:[%s21203_s2] ss:$16 sps:$4 sm:$0xff]   ;;  %v14846_v48 = vld [vmem:[%s21203_s2 + $0x84] ss:$16 sps:$4 sm:$0xff]  }
 0x759   :  { %6497 = vmatprep.subr.bf16.mxu0 %v14780_v22  ;;  %v14840_v22 = vld [vmem:[%s21203_s2 + $0x44] ss:$16 sps:$4 sm:$0xff]   ;;  %v14841_v13 = vld [vmem:[%s21203_s2 + $0x60] ss:$16 sps:$4 sm:$0xff]  }
 0x75c   :  { %6498 = vmatpush1.bf16.msra.mxu0 %v14778_v42  ;;  %v14844_v42 = vld [vmem:[%s21203_s2 + $0x80] ss:$16 sps:$4 sm:$0xff]  }
 0x75d   :  { %6499 = vmatprep.subr.bf16.mxu0 %v14783_v20  ;;  %v14849_v20 = vld [vmem:[%s21203_s2 + $0xa4] ss:$16 sps:$4 sm:$0xff]  }
 0x760   :  { %6500 = vmatpush1.bf16.msra.mxu0 %v14781_v12  ;;  %v14847_v12 = vld [vmem:[%s21203_s2 + $0xa0] ss:$16 sps:$4 sm:$0xff]  }
 0x761   :  { %6813 = vmatprep.subr.bf16.mxu0 %v14786_v32  ;;  %v14852_v32 = vld [vmem:[%s21203_s2 + $0xc4] ss:$16 sps:$4 sm:$0xff]  }
 0x763   :  { %6518 = vmatmul.mubr.bf16.vlgmr.msra.gmra.mrb[108].mxu0 %v18592_v5  ;;  %v14795_v5 = vld [vmem:[%s21209_s8 + $0x6c] ss:$16 sps:$4 sm:$0xff]  }
 0x764   :  { %6814 = vmatpush1.bf16.msra.mxu0 %v14784_v8  ;;  %6845 = vmatprep.mubr.bf16.mxu0 %v21264_v29 }
 0x765   :  { %6815 = vmatprep.subr.bf16.mxu0 %v14789_v17 }
 0x768   :  { %6816 = vmatpush1.bf16.msra.mxu0 %v14787_v38 }
 0x769   :  { %6817 = vmatprep.subr.bf16.mxu0 %v14792_v15 }
 0x76c   :  { %6818 = vmatpush1.bf16.msra.mxu0 %v14790_v53 }
 0x76d   :  { %6819 = vmatprep.subr.bf16.mxu0 %v14795_v5  ;;  %v14850_v5 = vld [vmem:[%s21203_s2 + $0xc0] ss:$16 sps:$4 sm:$0xff]  }
 0x770   :  { %6820 = vmatpush1.bf16.msra.mxu0 %v14793_v49 }
 0x771   :  { %6821 = vmatprep.subr.bf16.mxu0 %v14798_v51  ;;  %v14855_v51 = vld [vmem:[%s21203_s2 + $0xe4] ss:$16 sps:$4 sm:$0xff]  }
 0x774   :  { %6822 = vmatpush1.bf16.msra.mxu0 %v14796_v11  ;;  %v14853_v11 = vld [vmem:[%s21203_s2 + $0xe0] ss:$16 sps:$4 sm:$0xff]  }
 0x775   :  { %6823 = vmatprep.subr.bf16.mxu0 %v14801_v56  ;;  %v14858_v56 = vld [vmem:[%s21206_s5 + $0x4] ss:$16 sps:$4 sm:$0xff]  }
 0x778   :  { %6824 = vmatpush1.bf16.msra.mxu0 %v14799_v33 }
 0x779   :  { %6825 = vmatprep.subr.bf16.mxu0 %v14804_v40 }
 0x77c   :  { %6826 = vmatpush1.bf16.msra.mxu0 %v14802_v23 }
 0x77d   :  { %6827 = vmatprep.subr.bf16.mxu0 %v14807_v62 }
 0x780   :  { %6828 = vmatpush1.bf16.msra.mxu0 %v14805_v50 }
 0x781   :  { %7055 = vmatprep.subr.bf16.mxu0 %v14810_v46 }
 0x783   :  { %6846 = vmatmul.mubr.bf16.vlgmr.msra.gmra.mrb[112].mxu0 %v18772_v3  ;;  %v14819_v3 = vld [vmem:[%s21208_s7 + $0x6c] ss:$16 sps:$4 sm:$0xff]  }
 0x784   :  { %7056 = vmatpush1.bf16.msra.mxu0 %v14808_v43  ;;  %7087 = vmatprep.mubr.bf16.mxu0 %v21264_v29 }
 0x785   :  { %7057 = vmatprep.subr.bf16.mxu0 %v14813_v54 }
 0x788   :  { %7058 = vmatpush1.bf16.msra.mxu0 %v14811_v26 }
 0x789   :  { %7059 = vmatprep.subr.bf16.mxu0 %v14816_v31 }
 0x78c   :  { %7060 = vmatpush1.bf16.msra.mxu0 %v14814_v63  ;;  %v5963_v63 = vmul.f32 0.5, %v18959_v52 }
 0x78d   :  { %7061 = vmatprep.subr.bf16.mxu0 %v14819_v3  ;;  %v5959_v3 = vmul.f32 0.5, %v18953_v6 }
 0x78e   :  { %15720 = vtanh.f32 %v5963_v63 }
 0x78f   :  { %15722 = vtanh.f32 %v5959_v3  ;;  %v14861_v3 = vld [vmem:[%s21206_s5 + $0x24] ss:$16 sps:$4 sm:$0xff]  }
 0x790   :  { %7062 = vmatpush1.bf16.msra.mxu0 %v14817_v55 }
 0x791   :  { %7063 = vmatprep.subr.bf16.mxu0 %v14822_v16 }
 0x794   :  { %7064 = vmatpush1.bf16.msra.mxu0 %v14820_v37  ;;  %v21286_v37 = vld [vmem:[#allocation19_spill] sm:$0xff] }
 0x795   :  { %7065 = vmatprep.subr.bf16.mxu0 %v14825_v41 }
 0x796   :  { %v6236_v14 = vpop.f32.mrb[100].mxu1 }
 0x797   :  { %v6238_v34 = vpop.f32.mrb[101].mxu1 }
 0x798   :  { %7066 = vmatpush1.bf16.msra.mxu0 %v14823_v19  ;;  %v6240_v36 = vpop.f32.mrb[102].mxu1 }
 0x799   :  { %v6241_v27 = vpop.f32.mrb[103].mxu1  ;;  %7067 = vmatprep.subr.bf16.mxu0 %v14828_v7  ;;  %v21287_v36 = vld [vmem:[#allocation21_spill] sm:$0xff] }
 0x79c   :  { %7068 = vmatpush1.bf16.msra.mxu0 %v14826_v60 }
 0x79d   :  { %7069 = vmatprep.subr.bf16.mxu0 %v14831_v18  ;;  %v14904_v18 = vld [vmem:[%s21211_s10] ss:$8 sps:$4 sm:$0xff]  }
 0x7a0   :  { %7070 = vmatpush1.bf16.msra.mxu0 %v14829_v25  ;;  %v15721_v25 = vpop.eup %15720 }
 0x7a1   :  { %7455 = vmatprep.subr.bf16.mxu0 %v14834_v4 }
 0x7a3   :  { %7088 = vmatmul.mubr.bf16.vlgmr.msra.gmra.mrb[116].mxu0 %v18657_v10  ;;  %v14843_v10 = vld [vmem:[%s21203_s2 + $0x64] ss:$16 sps:$4 sm:$0xff]  }
 0x7a4   :  { %7456 = vmatpush1.bf16.msra.mxu0 %v14832_v1  ;;  %7487 = vmatprep.mubr.bf16.mxu0 %v21264_v29 }
 0x7a5   :  { %7457 = vmatprep.subr.bf16.mxu0 %v14837_v28  ;;  %v15723_v28 = vpop.eup %15722 }
 0x7a8   :  { %7458 = vmatpush1.bf16.msra.mxu0 %v14835_v61  ;;  %v14912_v61 = vld [vmem:[%s21211_s10 + $0x14] ss:$8 sps:$4 sm:$0xff]  }
 0x7a9   :  { %7459 = vmatprep.subr.bf16.mxu0 %v14840_v22  ;;  %v5965_v22 = vadd.f32 1.0, %v15721_v25  ;;  %v14873_v25 = vld [vmem:[%s21206_s5 + $0xa4] ss:$16 sps:$4 sm:$0xff]  }
 0x7ac   :  { %7460 = vmatpush1.bf16.msra.mxu0 %v14838_v44 }
 0x7ad   :  { %7461 = vmatprep.subr.bf16.mxu0 %v14843_v10  ;;  %v14910_v10 = vld [vmem:[%s21211_s10 + $0x10] ss:$8 sps:$4 sm:$0xff]  }
 0x7b0   :  { %7462 = vmatpush1.bf16.msra.mxu0 %v14841_v13  ;;  %v5961_v13 = vadd.f32 1.0, %v15723_v28  ;;  %v14876_v28 = vld [vmem:[%s21206_s5 + $0xc4] ss:$16 sps:$4 sm:$0xff]  }
 0x7b1   :  { %7463 = vmatprep.subr.bf16.mxu0 %v14846_v48  ;;  %v14918_v48 = vld [vmem:[%s21211_s10 + $0x24] ss:$8 sps:$4 sm:$0xff]  }
 0x7b4   :  { %7464 = vmatpush1.bf16.msra.mxu0 %v14844_v42  ;;  %v5966_v42 = vmul.f32 0.5, %v5965_v22  ;;  %v14874_v22 = vld [vmem:[%s21206_s5 + $0xc0] ss:$16 sps:$4 sm:$0xff]  }
 0x7b5   :  { %7465 = vmatprep.subr.bf16.mxu0 %v14849_v20  ;;  %v14916_v20 = vld [vmem:[%s21211_s10 + $0x20] ss:$8 sps:$4 sm:$0xff]  }
 0x7b6   :  { %v6478_v8 = vpop.f32.mrb[104].mxu1 }
 0x7b7   :  { %v19111_v17 = vadd.f32 %v6478_v8, %v6236_v14  ;;  %v6480_v38 = vpop.f32.mrb[105].mxu1  ;;  %v14924_v8 = vld [vmem:[%s21211_s10 + $0x34] ss:$8 sps:$4 sm:$0xff]  }
 0x7b8   :  { %v19113_v15 = vadd.f32 %v6480_v38, %v6238_v34  ;;  %v6482_v53 = vpop.f32.mrb[106].mxu1  ;;  %7466 = vmatpush1.bf16.msra.mxu0 %v14847_v12  ;;  %v14906_v34 = vld [vmem:[%s21211_s10 + $0x4] ss:$8 sps:$4 sm:$0xff]   ;;  %v5962_v12 = vmul.f32 0.5, %v5961_v13  ;;  %v5972_v38 = vmul.f32 %v5966_v42, %v18562_v2  ;;  %v14877_v13 = vld [vmem:[%s21206_s5 + $0xe0] ss:$16 sps:$4 sm:$0xff]  }
 0x7b9   :  { %v6483_v49 = vpop.f32.mrb[107].mxu1  ;;  %7467 = vmatprep.subr.bf16.mxu0 %v14852_v32  ;;  %7215 = vmatprep.subr.bf16.mxu1 %v14906_v34  ;;  %v14864_v34 = vld [vmem:[%s21206_s5 + $0x44] ss:$16 sps:$4 sm:$0xff]  }
 0x7ba   :  { %7216 = vmatpush1.bf16.msra.mxu1 %v14904_v18  ;;  %v14868_v18 = vld [vmem:[%s21206_s5 + $0x80] ss:$16 sps:$4 sm:$0xff]  }
 0x7bb   :  { %7217 = vmatprep.subr.bf16.mxu1 %v14912_v61  ;;  %v6526_v61 = vadd.f32 %v19111_v17, %v21276_v45  ;;  %v14882_v17 = vld [vmem:[%s21205_s4 + $0x4] ss:$16 sps:$4 sm:$0xff]  }
 0x7bc   :  { %7468 = vmatpush1.bf16.msra.mxu0 %v14850_v5  ;;  %v14922_v5 = vld [vmem:[%s21211_s10 + $0x30] ss:$8 sps:$4 sm:$0xff]  }
 0x7bd   :  { %7469 = vmatprep.subr.bf16.mxu0 %v14855_v51  ;;  %v14930_v51 = vld [vmem:[%s21211_s10 + $0x44] ss:$8 sps:$4 sm:$0xff]  }
 0x7be   :  { %7218 = vmatpush1.bf16.msra.mxu1 %v14910_v10  ;;  %v14879_v10 = vld [vmem:[%s21206_s5 + $0xe4] ss:$16 sps:$4 sm:$0xff]  }
 0x7bf   :  { %7219 = vmatprep.subr.bf16.mxu1 %v14918_v48 }
 0x7c0   :  { %7470 = vmatpush1.bf16.msra.mxu0 %v14853_v11  ;;  %v14928_v11 = vld [vmem:[%s21211_s10 + $0x40] ss:$8 sps:$4 sm:$0xff]  }
 0x7c1   :  { %7784 = vmatprep.subr.bf16.mxu0 %v14858_v56  ;;  %v14934_v56 = vld [vmem:[%s21211_s10 + $0x50] ss:$8 sps:$4 sm:$0xff]  }
 0x7c2   :  { %7220 = vmatpush1.bf16.msra.mxu1 %v14916_v20 }
 0x7c3   :  { %7221 = vmatprep.subr.bf16.mxu1 %v14924_v8 }
 0x7c6   :  { %7222 = vmatpush1.bf16.msra.mxu1 %v14922_v5 }
 0x7c7   :  { %7223 = vmatprep.subr.bf16.mxu1 %v14930_v51 }
 0x7ca   :  { %7224 = vmatpush1.bf16.msra.mxu1 %v14928_v11 }
 0x7d6   :  { %v5667_v33 = vpop.f32.mrb[96].mxu0  ;;  %v6806_v40 = vpop.f32.mrb[108].mxu1 }
 0x7d7   :  { %v5668_v23 = vadd.f32 %v5667_v33, %v17922_v47  ;;  %v5669_v62 = vpop.f32.mrb[97].mxu0  ;;  %v6808_v50 = vpop.f32.mrb[109].mxu1  ;;  %v14936_v33 = vld [vmem:[%s21211_s10 + $0x54] ss:$8 sps:$4 sm:$0xff]  }
 0x7d8   :  { %v5670_v46 = vadd.f32 %v5669_v62, %v17925_v0  ;;  %v5671_v43 = vpop.f32.mrb[98].mxu0  ;;  %v6810_v54 = vpop.f32.mrb[110].mxu1  ;;  %7225 = vmatprep.subr.bf16.mxu1 %v14936_v33  ;;  %v14942_v62 = vld [vmem:[%s21211_s10 + $0x64] ss:$8 sps:$4 sm:$0xff]  }
 0x7d9   :  { %5674 = vst [vmem:[#allocation3 + $0x20] sm:$0xff] %v5668_v23  ;;  %v5672_v26 = vpop.f32.mrb[99].mxu0  ;;  %v6811_v31 = vpop.f32.mrb[111].mxu1  ;;  %7226 = vmatpush1.bf16.msra.mxu1 %v14934_v56  ;;  %v14940_v23 = vld [vmem:[%s21211_s10 + $0x60] ss:$8 sps:$4 sm:$0xff]  }
 0x7da   :  { %5675 = vst [vmem:[#allocation3 + $0x28] sm:$0xff] %v5670_v46  ;;  %7227 = vmatprep.subr.bf16.mxu1 %v14942_v62  ;;  %v14946_v43 = vld [vmem:[%s21211_s10 + $0x70] ss:$8 sps:$4 sm:$0xff]   ;;  %v14948_v54 = vld [vmem:[%s21211_s10 + $0x74] ss:$8 sps:$4 sm:$0xff]  }
 0x7db   :  { %v14856_v31 = vld [vmem:[%s21206_s5] ss:$16 sps:$4 sm:$0xff]  }
 0x7dd   :  { %7228 = vmatpush1.bf16.msra.mxu1 %v14940_v23 }
 0x7de   :  { %7229 = vmatprep.subr.bf16.mxu1 %v14948_v54 }
 0x7e1   :  { %7230 = vmatpush1.bf16.msra.mxu1 %v14946_v43 }
 0x7f6   :  { %v5948_v55 = vpop.f32.mrb[100].mxu0  ;;  %v7048_v16 = vpop.f32.mrb[112].mxu1 }
 0x7f7   :  { %v5957_v41 = vadd.f32 %v5948_v55, %v21286_v37  ;;  %v19132_v19 = vadd.f32 %v7048_v16, %v6806_v40  ;;  %v5950_v7 = vpop.f32.mrb[101].mxu0  ;;  %v7050_v14 = vpop.f32.mrb[113].mxu1  ;;  %v14954_v16 = vld [vmem:[%s21203_s2 + $0xc] ss:$16 sps:$4 sm:$0xff]  }
 0x7f8   :  { %v5958_v60 = vadd.f32 %v5950_v7, %v21287_v36  ;;  %v19138_v27 = vadd.f32 %v7050_v14, %v6808_v50  ;;  %v5952_v52 = vpop.f32.mrb[102].mxu0  ;;  %v7052_v6 = vpop.f32.mrb[114].mxu1  ;;  %v14859_v7 = vld [vmem:[%s21206_s5 + $0x20] ss:$16 sps:$4 sm:$0xff]   ;;  %7496 = vmatprep.subr.bf16.mxu1 %v14954_v16 }
 0x7f9   :  { %15724 = vtanh.f32 %v5957_v41  ;;  %v5953_v4 = vpop.f32.mrb[103].mxu0  ;;  %v7053_v1 = vpop.f32.mrb[115].mxu1  ;;  %v14862_v36 = vld [vmem:[%s21206_s5 + $0x40] ss:$16 sps:$4 sm:$0xff]   ;;  %v14870_v6 = vld [vmem:[%s21206_s5 + $0x84] ss:$16 sps:$4 sm:$0xff]  }
 0x7fa   :  { %v5968_v44 = vmul.f32 0.5, %v5958_v60  ;;  %v14867_v60 = vld [vmem:[%s21206_s5 + $0x64] ss:$16 sps:$4 sm:$0xff]   ;;  %v14865_v52 = vld [vmem:[%s21206_s5 + $0x60] ss:$16 sps:$4 sm:$0xff]   ;;  %v6527_v1 = vadd.f32 %v19113_v15, %v16932_v9  ;;  %v6530_v15 = vmul.f32 0.5, %v6526_v61  ;;  %v7096_v61 = vadd.f32 %v19132_v19, %v17541_v35 }
 0x7fb   :  { %v14871_v4 = vld [vmem:[%s21206_s5 + $0xa0] ss:$16 sps:$4 sm:$0xff]  }
 0x7fc   :  { %15726 = vtanh.f32 %v5968_v44  ;;  %v6534_v44 = vmul.f32 0.5, %v6527_v1  ;;  %v14880_v16 = vld [vmem:[%s21205_s4] ss:$16 sps:$4 sm:$0xff]   ;;  %v7097_v1 = vadd.f32 %v19138_v27, %v17547_v30  ;;  %v7100_v27 = vmul.f32 0.5, %v7096_v61 }
 0x7fd   :  { %v14901_v19 = vld [vmem:[%s21205_s4 + $0xe0] ss:$16 sps:$4 sm:$0xff]  }
 0x7fe   :  { %v14955_v61 = vld [vmem:[%s21208_s7] ss:$16 sps:$4 sm:$0xff]  }
 0x803   :  { %v15725_v32 = vpop.eup %15724 }
 0x804   :  { %v5973_v53 = vmul.f32 %v15725_v32, %v5962_v12 }
 0x806   :  { %v19162_v49 = vadd.f32 %v5973_v53, %v5972_v38  ;;  %v15727_v2 = vpop.eup %15726 }
 0x807   :  { %v5970_v40 = vadd.f32 1.0, %v15727_v2 }
 0x808   :  { %15728 = vtanh.f32 %v19162_v49 }
 0x809   :  { %v5971_v50 = vmul.f32 0.5, %v5970_v40  ;;  %15730 = vtanh.f32 %v6534_v44  ;;  %v7104_v44 = vmul.f32 0.5, %v7097_v1 }
 0x80a   :  { %15732 = vtanh.f32 %v6530_v15  ;;  %v14903_v15 = vld [vmem:[%s21205_s4 + $0xe4] ss:$16 sps:$4 sm:$0xff]  }
 0x812   :  { %v15729_v46 = vpop.eup %15728 }
 0x813   :  { %v5976_v26 = vmul.f32 %v15729_v46, %v5971_v50  ;;  %v15731_v5 = vpop.eup %15730 }
 0x814   :  { %v15733_v51 = vpop.eup %15732  ;;  %v6536_v11 = vadd.f32 1.0, %v15731_v5 }
 0x815   :  { %v19192_v63 = vpack.c.bf16 %v5976_v26, %v5976_v26  ;;  %v6532_v56 = vadd.f32 1.0, %v15733_v51  ;;  %v14913_v51 = vld [vmem:[%s21209_s8 + $0x20] ss:$16 sps:$4 sm:$0xff]  }
 0x816   :  { %v6277_v55 = vpop.f32.mrb[104].mxu0  ;;  %v6537_v33 = vmul.f32 0.5, %v6536_v11 }
 0x817   :  { %v6279_v37 = vpop.f32.mrb[105].mxu0  ;;  %7488 = vmatmul.mubr.bf16.vlgmr.msra.gmra.mrb[120].mxu0 %v19192_v63  ;;  %v6533_v40 = vmul.f32 0.5, %v6532_v56 }
 0x818   :  { %v6281_v41 = vpop.f32.mrb[106].mxu0  ;;  %7785 = vmatpush1.bf16.msra.mxu0 %v14856_v31  ;;  %7816 = vmatprep.mubr.bf16.mxu0 %v21264_v29  ;;  %v6543_v62 = vmul.f32 %v6537_v33, %v18651_v39  ;;  %v14885_v39 = vld [vmem:[%s21205_s4 + $0x24] ss:$16 sps:$4 sm:$0xff]  }
 0x819   :  { %v6282_v14 = vpop.f32.mrb[107].mxu0  ;;  %7786 = vmatprep.subr.bf16.mxu0 %v14861_v3 }
 0x81c   :  { %7787 = vmatpush1.bf16.msra.mxu0 %v14859_v7 }
 0x81d   :  { %7788 = vmatprep.subr.bf16.mxu0 %v14864_v34  ;;  %v14883_v34 = vld [vmem:[%s21205_s4 + $0x20] ss:$16 sps:$4 sm:$0xff]  }
 0x820   :  { %7789 = vmatpush1.bf16.msra.mxu0 %v14862_v36  ;;  %v14888_v36 = vld [vmem:[%s21205_s4 + $0x44] ss:$16 sps:$4 sm:$0xff]  }
 0x821   :  { %7790 = vmatprep.subr.bf16.mxu0 %v14867_v60  ;;  %v14886_v60 = vld [vmem:[%s21205_s4 + $0x40] ss:$16 sps:$4 sm:$0xff]  }
 0x824   :  { %7791 = vmatpush1.bf16.msra.mxu0 %v14865_v52  ;;  %v14891_v52 = vld [vmem:[%s21205_s4 + $0x64] ss:$16 sps:$4 sm:$0xff]  }
 0x825   :  { %7792 = vmatprep.subr.bf16.mxu0 %v14870_v6  ;;  %v14889_v6 = vld [vmem:[%s21205_s4 + $0x60] ss:$16 sps:$4 sm:$0xff]  }
 0x828   :  { %7793 = vmatpush1.bf16.msra.mxu0 %v14868_v18  ;;  %v14894_v18 = vld [vmem:[%s21205_s4 + $0x84] ss:$16 sps:$4 sm:$0xff]  }
 0x829   :  { %7794 = vmatprep.subr.bf16.mxu0 %v14873_v25  ;;  %v14892_v25 = vld [vmem:[%s21205_s4 + $0x80] ss:$16 sps:$4 sm:$0xff]  }
 0x82c   :  { %7795 = vmatpush1.bf16.msra.mxu0 %v14871_v4  ;;  %v14897_v4 = vld [vmem:[%s21205_s4 + $0xa4] ss:$16 sps:$4 sm:$0xff]  }
 0x82d   :  { %7796 = vmatprep.subr.bf16.mxu0 %v14876_v28  ;;  %v14895_v28 = vld [vmem:[%s21205_s4 + $0xa0] ss:$16 sps:$4 sm:$0xff]  }
 0x830   :  { %7797 = vmatpush1.bf16.msra.mxu0 %v14874_v22  ;;  %v14900_v22 = vld [vmem:[%s21205_s4 + $0xc4] ss:$16 sps:$4 sm:$0xff]  }
 0x831   :  { %7798 = vmatprep.subr.bf16.mxu0 %v14879_v10  ;;  %v14898_v10 = vld [vmem:[%s21205_s4 + $0xc0] ss:$16 sps:$4 sm:$0xff]  }
 0x834   :  { %7799 = vmatpush1.bf16.msra.mxu0 %v14877_v13  ;;  %v14909_v13 = vld [vmem:[%s21209_s8 + $0x4] ss:$16 sps:$4 sm:$0xff]  }
 0x835   :  { %8026 = vmatprep.subr.bf16.mxu0 %v14882_v17 }
 0x836   :  { %v6519_v48 = vpop.f32.mrb[108].mxu0 }
 0x837   :  { %v6520_v42 = vadd.f32 %v6519_v48, %v6277_v55  ;;  %v6521_v20 = vpop.f32.mrb[109].mxu0  ;;  %v14907_v48 = vld [vmem:[%s21209_s8] ss:$16 sps:$4 sm:$0xff]  }
 0x838   :  { %v6522_v12 = vadd.f32 %v6521_v20, %v6279_v37  ;;  %v6523_v32 = vpop.f32.mrb[110].mxu0 }
 0x839   :  { %v6528_v8 = vadd.f32 %v6520_v42, %v21277_v59  ;;  %v6524_v38 = vpop.f32.mrb[111].mxu0 }
 0x83a   :  { %v6529_v53 = vadd.f32 %v6522_v12, %v21278_v21  ;;  %v14915_v12 = vld [vmem:[%s21209_s8 + $0x24] ss:$16 sps:$4 sm:$0xff]  }
 0x83b   :  { %15734 = vtanh.f32 %v6528_v8 }
 0x83c   :  { %v6539_v2 = vmul.f32 0.5, %v6529_v53 }
 0x83e   :  { %15736 = vtanh.f32 %v6539_v2  ;;  %v14921_v2 = vld [vmem:[%s21209_s8 + $0x44] ss:$16 sps:$4 sm:$0xff]  }
 0x845   :  { %v15735_v23 = vpop.eup %15734 }
 0x846   :  { %v6544_v50 = vmul.f32 %v15735_v23, %v6533_v40  ;;  %v14919_v23 = vld [vmem:[%s21209_s8 + $0x40] ss:$16 sps:$4 sm:$0xff]  }
 0x848   :  { %v19251_v46 = vadd.f32 %v6544_v50, %v6543_v62  ;;  %v15737_v43 = vpop.eup %15736  ;;  %v14927_v62 = vld [vmem:[%s21209_s8 + $0x64] ss:$16 sps:$4 sm:$0xff]  }
 0x849   :  { %v6541_v54 = vadd.f32 1.0, %v15737_v43 }
 0x84a   :  { %15738 = vtanh.f32 %v19251_v46 }
 0x84b   :  { %v6542_v26 = vmul.f32 0.5, %v6541_v54  ;;  %15740 = vtanh.f32 %v7104_v44  ;;  %v14925_v54 = vld [vmem:[%s21209_s8 + $0x60] ss:$16 sps:$4 sm:$0xff]   ;;  %v14960_v44 = vld [vmem:[%s21203_s2 + $0x2c] ss:$16 sps:$4 sm:$0xff]  }
 0x84c   :  { %15742 = vtanh.f32 %v7100_v27  ;;  %v14958_v27 = vld [vmem:[%s21203_s2 + $0x28] ss:$16 sps:$4 sm:$0xff]  }
 0x854   :  { %v15739_v31 = vpop.eup %15738 }
 0x855   :  { %v6547_v3 = vmul.f32 %v15739_v31, %v6542_v26  ;;  %v15741_v11 = vpop.eup %15740  ;;  %v14933_v26 = vld [vmem:[%s21209_s8 + $0x84] ss:$16 sps:$4 sm:$0xff]  }
 0x856   :  { %v6847_v55 = vpop.f32.mrb[112].mxu0  ;;  %v15743_v56 = vpop.eup %15742  ;;  %v7106_v33 = vadd.f32 1.0, %v15741_v11  ;;  %v14987_v11 = vld [vmem:[%s21208_s7 + $0xa4] ss:$16 sps:$4 sm:$0xff]  }
 0x857   :  { %v6849_v37 = vpop.f32.mrb[113].mxu0  ;;  %v19257_v41 = vpack.c.bf16 %v6547_v3, %v6547_v3  ;;  %v7102_v50 = vadd.f32 1.0, %v15743_v56  ;;  %v14985_v56 = vld [vmem:[%s21208_s7 + $0xa0] ss:$16 sps:$4 sm:$0xff]  }
 0x858   :  { %v6851_v7 = vpop.f32.mrb[114].mxu0  ;;  %v7107_v43 = vmul.f32 0.5, %v7106_v33  ;;  %v14990_v33 = vld [vmem:[%s21203_s2 + $0xcc] ss:$16 sps:$4 sm:$0xff]  }
 0x859   :  { %v6852_v14 = vpop.f32.mrb[115].mxu0  ;;  %7817 = vmatmul.mubr.bf16.vlgmr.msra.gmra.mrb[124].mxu0 %v19257_v41  ;;  %v7103_v31 = vmul.f32 0.5, %v7102_v50  ;;  %v14996_v50 = vld [vmem:[%s21203_s2 + $0xec] ss:$16 sps:$4 sm:$0xff]  }
 0x85a   :  { %8027 = vmatpush1.bf16.msra.mxu0 %v14880_v16  ;;  %8058 = vmatprep.mubr.bf16.mxu0 %v21264_v29  ;;  %v14945_v14 = vld [vmem:[%s21209_s8 + $0xc4] ss:$16 sps:$4 sm:$0xff]  }
 0x85b   :  { %8028 = vmatprep.subr.bf16.mxu0 %v14885_v39  ;;  %v14939_v39 = vld [vmem:[%s21209_s8 + $0xa4] ss:$16 sps:$4 sm:$0xff]  }
 0x85e   :  { %8029 = vmatpush1.bf16.msra.mxu0 %v14883_v34 }
 0x85f   :  { %8030 = vmatprep.subr.bf16.mxu0 %v14888_v36  ;;  %v14943_v36 = vld [vmem:[%s21209_s8 + $0xc0] ss:$16 sps:$4 sm:$0xff]  }
 0x862   :  { %8031 = vmatpush1.bf16.msra.mxu0 %v14886_v60 }
 0x863   :  { %8032 = vmatprep.subr.bf16.mxu0 %v14891_v52  ;;  %v14951_v52 = vld [vmem:[%s21209_s8 + $0xe4] ss:$16 sps:$4 sm:$0xff]  }
 0x866   :  { %8033 = vmatpush1.bf16.msra.mxu0 %v14889_v6  ;;  %v14949_v6 = vld [vmem:[%s21209_s8 + $0xe0] ss:$16 sps:$4 sm:$0xff]  }
 0x867   :  { %8034 = vmatprep.subr.bf16.mxu0 %v14894_v18 }
 0x86a   :  { %8035 = vmatpush1.bf16.msra.mxu0 %v14892_v25  ;;  %v14957_v25 = vld [vmem:[%s21208_s7 + $0x4] ss:$16 sps:$4 sm:$0xff]  }
 0x86b   :  { %8036 = vmatprep.subr.bf16.mxu0 %v14897_v4 }
 0x86e   :  { %8037 = vmatpush1.bf16.msra.mxu0 %v14895_v28  ;;  %v14952_v28 = vld [vmem:[%s21203_s2 + $0x8] ss:$16 sps:$4 sm:$0xff]  }
 0x86f   :  { %8038 = vmatprep.subr.bf16.mxu0 %v14900_v22 }
 0x872   :  { %8039 = vmatpush1.bf16.msra.mxu0 %v14898_v10  ;;  %v14963_v10 = vld [vmem:[%s21208_s7 + $0x24] ss:$16 sps:$4 sm:$0xff]  }
 0x873   :  { %8040 = vmatprep.subr.bf16.mxu0 %v14903_v15  ;;  %v14961_v15 = vld [vmem:[%s21208_s7 + $0x20] ss:$16 sps:$4 sm:$0xff]  }
 0x876   :  { %8041 = vmatpush1.bf16.msra.mxu0 %v14901_v19  ;;  %v7089_v17 = vpop.f32.mrb[116].mxu0  ;;  %v14966_v19 = vld [vmem:[%s21203_s2 + $0x4c] ss:$16 sps:$4 sm:$0xff]  }
 0x877   :  { %v7090_v42 = vadd.f32 %v7089_v17, %v6847_v55  ;;  %v7091_v20 = vpop.f32.mrb[117].mxu0  ;;  %8354 = vmatprep.subr.bf16.mxu0 %v14909_v13  ;;  %v7113_v55 = vmul.f32 %v7107_v43, %v18745_v58  ;;  %v14937_v58 = vld [vmem:[%s21209_s8 + $0xa0] ss:$16 sps:$4 sm:$0xff]   ;;  %v14969_v13 = vld [vmem:[%s21208_s7 + $0x44] ss:$16 sps:$4 sm:$0xff]  }
 0x878   :  { %v7092_v32 = vadd.f32 %v7091_v20, %v6849_v37  ;;  %v7093_v8 = vpop.f32.mrb[118].mxu0  ;;  %v14931_v37 = vld [vmem:[%s21209_s8 + $0x80] ss:$16 sps:$4 sm:$0xff]   ;;  %v14964_v17 = vld [vmem:[%s21203_s2 + $0x48] ss:$16 sps:$4 sm:$0xff]  }
 0x879   :  { %v7098_v38 = vadd.f32 %v7090_v42, %v17554_v24  ;;  %8059 = vmatmul.mubr.bf16.vlgmr.msra.gmra.mrb[128].mxu0 %v19192_v63  ;;  %v7094_v53 = vpop.f32.mrb[119].mxu0  ;;  %v14972_v42 = vld [vmem:[%s21203_s2 + $0x6c] ss:$16 sps:$4 sm:$0xff]   ;;  %v14975_v20 = vld [vmem:[%s21208_s7 + $0x64] ss:$16 sps:$4 sm:$0xff]  }
 0x87a   :  { %v7099_v5 = vadd.f32 %v7092_v32, %v17562_v57  ;;  %8355 = vmatpush1.bf16.msra.mxu0 %v14907_v48  ;;  %8386 = vmatprep.mubr.bf16.mxu0 %v21264_v29  ;;  %v14967_v48 = vld [vmem:[%s21208_s7 + $0x40] ss:$16 sps:$4 sm:$0xff]   ;;  %v14978_v8 = vld [vmem:[%s21203_s2 + $0x8c] ss:$16 sps:$4 sm:$0xff]   ;;  %v14976_v53 = vld [vmem:[%s21203_s2 + $0x88] ss:$16 sps:$4 sm:$0xff]  }
 0x87b   :  { %15744 = vtanh.f32 %v7098_v38  ;;  %8356 = vmatprep.subr.bf16.mxu0 %v14915_v12  ;;  %v14970_v12 = vld [vmem:[%s21203_s2 + $0x68] ss:$16 sps:$4 sm:$0xff]   ;;  %v14973_v32 = vld [vmem:[%s21208_s7 + $0x60] ss:$16 sps:$4 sm:$0xff]   ;;  %v14981_v38 = vld [vmem:[%s21208_s7 + $0x84] ss:$16 sps:$4 sm:$0xff]  }
 0x87c   :  { %v7109_v40 = vmul.f32 0.5, %v7099_v5  ;;  %v14979_v5 = vld [vmem:[%s21208_s7 + $0x80] ss:$16 sps:$4 sm:$0xff]   ;;  %v14999_v43 = vld [vmem:[%s21208_s7 + $0xe4] ss:$16 sps:$4 sm:$0xff]  }
 0x87e   :  { %8357 = vmatpush1.bf16.msra.mxu0 %v14913_v51  ;;  %15746 = vtanh.f32 %v7109_v40  ;;  %v14984_v51 = vld [vmem:[%s21203_s2 + $0xac] ss:$16 sps:$4 sm:$0xff]   ;;  %v14993_v40 = vld [vmem:[%s21208_s7 + $0xc4] ss:$16 sps:$4 sm:$0xff]  }
 0x87f   :  { %8358 = vmatprep.subr.bf16.mxu0 %v14921_v2  ;;  %v14982_v2 = vld [vmem:[%s21203_s2 + $0xa8] ss:$16 sps:$4 sm:$0xff]  }
 0x882   :  { %8359 = vmatpush1.bf16.msra.mxu0 %v14919_v23  ;;  %v14988_v23 = vld [vmem:[%s21203_s2 + $0xc8] ss:$16 sps:$4 sm:$0xff]  }
 0x883   :  { %8360 = vmatprep.subr.bf16.mxu0 %v14927_v62  ;;  %v14991_v62 = vld [vmem:[%s21208_s7 + $0xc0] ss:$16 sps:$4 sm:$0xff]  }
 0x885   :  { %v15745_v3 = vpop.eup %15744 }
 0x886   :  { %v7114_v16 = vmul.f32 %v15745_v3, %v7103_v31  ;;  %8361 = vmatpush1.bf16.msra.mxu0 %v14925_v54  ;;  %v14994_v54 = vld [vmem:[%s21203_s2 + $0xe8] ss:$16 sps:$4 sm:$0xff]   ;;  %v15002_v31 = vld [vmem:[%s21206_s5 + $0xc] ss:$16 sps:$4 sm:$0xff]  }
 0x887   :  { %8362 = vmatprep.subr.bf16.mxu0 %v14933_v26  ;;  %v14997_v26 = vld [vmem:[%s21208_s7 + $0xe0] ss:$16 sps:$4 sm:$0xff]   ;;  %v15000_v3 = vld [vmem:[%s21206_s5 + $0x8] ss:$16 sps:$4 sm:$0xff]  }
 0x888   :  { %v19345_v7 = vadd.f32 %v7114_v16, %v7113_v55  ;;  %v15747_v34 = vpop.eup %15746  ;;  %v15005_v55 = vld [vmem:[%s21206_s5 + $0x2c] ss:$16 sps:$4 sm:$0xff]   ;;  %v15003_v16 = vld [vmem:[%s21206_s5 + $0x28] ss:$16 sps:$4 sm:$0xff]  }
 0x889   :  { %v7111_v60 = vadd.f32 1.0, %v15747_v34  ;;  %v15014_v34 = vld [vmem:[%s21206_s5 + $0x8c] ss:$16 sps:$4 sm:$0xff]  }
 0x88a   :  { %15748 = vtanh.f32 %v19345_v7  ;;  %8363 = vmatpush1.bf16.msra.mxu0 %v14931_v37  ;;  %v15008_v37 = vld [vmem:[%s21206_s5 + $0x4c] ss:$16 sps:$4 sm:$0xff]  }
 0x88b   :  { %8364 = vmatprep.subr.bf16.mxu0 %v14939_v39  ;;  %v7112_v18 = vmul.f32 0.5, %v7111_v60  ;;  %v15006_v39 = vld [vmem:[%s21206_s5 + $0x48] ss:$16 sps:$4 sm:$0xff]   ;;  %v15017_v60 = vld [vmem:[%s21206_s5 + $0xac] ss:$16 sps:$4 sm:$0xff]  }
 0x88e   :  { %8365 = vmatpush1.bf16.msra.mxu0 %v14937_v58  ;;  %v15011_v58 = vld [vmem:[%s21206_s5 + $0x6c] ss:$16 sps:$4 sm:$0xff]  }
 0x88f   :  { %8366 = vmatprep.subr.bf16.mxu0 %v14945_v14  ;;  %v15009_v14 = vld [vmem:[%s21206_s5 + $0x68] ss:$16 sps:$4 sm:$0xff]  }
 0x892   :  { %8367 = vmatpush1.bf16.msra.mxu0 %v14943_v36  ;;  %v15012_v36 = vld [vmem:[%s21206_s5 + $0x88] ss:$16 sps:$4 sm:$0xff]  }
 0x893   :  { %8368 = vmatprep.subr.bf16.mxu0 %v14951_v52  ;;  %v15015_v52 = vld [vmem:[%s21206_s5 + $0xa8] ss:$16 sps:$4 sm:$0xff]  }
 0x894   :  { %v15749_v4 = vpop.eup %15748 }
 0x895   :  { %v7117_v1 = vmul.f32 %v15749_v4, %v7112_v18  ;;  %v15018_v18 = vld [vmem:[%s21206_s5 + $0xc8] ss:$16 sps:$4 sm:$0xff]  }
 0x896   :  { %8369 = vmatpush1.bf16.msra.mxu0 %v14949_v6  ;;  %v15020_v6 = vld [vmem:[%s21206_s5 + $0xcc] ss:$16 sps:$4 sm:$0xff]   ;;  %v15021_v4 = vld [vmem:[%s21206_s5 + $0xe8] ss:$16 sps:$4 sm:$0xff]  }
 0x897   :  { %8596 = vmatprep.subr.bf16.mxu0 %v14957_v25  ;;  %v19372_v22 = vpack.c.bf16 %v7117_v1, %v7117_v1  ;;  %v15023_v25 = vld [vmem:[%s21206_s5 + $0xec] ss:$16 sps:$4 sm:$0xff]  }
 0x898   :  { %v15026_v1 = vld [vmem:[%s21205_s4 + $0xc] ss:$16 sps:$4 sm:$0xff]  }
 0x899   :  { %7248 = vmatmul.mubr.bf16.vlgmr.msra.gmra.mrb[116].mxu1 %v19372_v22  ;;  %8387 = vmatmul.mubr.bf16.vlgmr.msra.gmra.mrb[132].mxu0 %v19372_v22 }
 0x89a   :  { %7497 = vmatpush1.bf16.msra.mxu1 %v14952_v28  ;;  %8597 = vmatpush1.bf16.msra.mxu0 %v14955_v61  ;;  %v15024_v28 = vld [vmem:[%s21205_s4 + $0x8] ss:$16 sps:$4 sm:$0xff]   ;;  %v15029_v61 = vld [vmem:[%s21205_s4 + $0x2c] ss:$16 sps:$4 sm:$0xff]  }
 0x89b   :  { %7498 = vmatprep.subr.bf16.mxu1 %v14960_v44  ;;  %8598 = vmatprep.subr.bf16.mxu0 %v14963_v10  ;;  %v15027_v44 = vld [vmem:[%s21205_s4 + $0x28] ss:$16 sps:$4 sm:$0xff]   ;;  %v15032_v10 = vld [vmem:[%s21205_s4 + $0x4c] ss:$16 sps:$4 sm:$0xff]  }
 0x89c   :  { %7528 = vmatprep.mubr.bf16.mxu1 %v21264_v29  ;;  %8628 = vmatprep.mubr.bf16.mxu0 %v21264_v29 }
 0x89e   :  { %7499 = vmatpush1.bf16.msra.mxu1 %v14958_v27  ;;  %8599 = vmatpush1.bf16.msra.mxu0 %v14961_v15  ;;  %v15030_v27 = vld [vmem:[%s21205_s4 + $0x48] ss:$16 sps:$4 sm:$0xff]   ;;  %v15035_v15 = vld [vmem:[%s21205_s4 + $0x6c] ss:$16 sps:$4 sm:$0xff]  }
 0x89f   :  { %7500 = vmatprep.subr.bf16.mxu1 %v14966_v19  ;;  %8600 = vmatprep.subr.bf16.mxu0 %v14969_v13  ;;  %v15033_v19 = vld [vmem:[%s21205_s4 + $0x68] ss:$16 sps:$4 sm:$0xff]   ;;  %v15038_v13 = vld [vmem:[%s21205_s4 + $0x8c] ss:$16 sps:$4 sm:$0xff]  }
 0x8a2   :  { %7501 = vmatpush1.bf16.msra.mxu1 %v14964_v17  ;;  %8601 = vmatpush1.bf16.msra.mxu0 %v14967_v48  ;;  %v15036_v17 = vld [vmem:[%s21205_s4 + $0x88] ss:$16 sps:$4 sm:$0xff]   ;;  %v15041_v48 = vld [vmem:[%s21205_s4 + $0xac] ss:$16 sps:$4 sm:$0xff]  }
 0x8a3   :  { %7502 = vmatprep.subr.bf16.mxu1 %v14972_v42  ;;  %8602 = vmatprep.subr.bf16.mxu0 %v14975_v20  ;;  %v15039_v20 = vld [vmem:[%s21205_s4 + $0xa8] ss:$16 sps:$4 sm:$0xff]  }
 0x8a6   :  { %7503 = vmatpush1.bf16.msra.mxu1 %v14970_v12  ;;  %8603 = vmatpush1.bf16.msra.mxu0 %v14973_v32  ;;  %v21288_v12 = vld [vmem:[#allocation22_spill] sm:$0xff] }
 0x8a7   :  { %7504 = vmatprep.subr.bf16.mxu1 %v14978_v8  ;;  %8604 = vmatprep.subr.bf16.mxu0 %v14981_v38  ;;  %v15044_v38 = vld [vmem:[%s21205_s4 + $0xcc] ss:$16 sps:$4 sm:$0xff]  }
 0x8aa   :  { %7505 = vmatpush1.bf16.msra.mxu1 %v14976_v53  ;;  %8605 = vmatpush1.bf16.msra.mxu0 %v14979_v5  ;;  %v21289_v53 = vld [vmem:[#allocation24_spill] sm:$0xff] }
 0x8ab   :  { %7506 = vmatprep.subr.bf16.mxu1 %v14984_v51  ;;  %8606 = vmatprep.subr.bf16.mxu0 %v14987_v11 }
 0x8ae   :  { %7507 = vmatpush1.bf16.msra.mxu1 %v14982_v2  ;;  %8607 = vmatpush1.bf16.msra.mxu0 %v14985_v56  ;;  %v15042_v2 = vld [vmem:[%s21205_s4 + $0xc8] ss:$16 sps:$4 sm:$0xff]   ;;  %v15047_v56 = vld [vmem:[%s21205_s4 + $0xec] ss:$16 sps:$4 sm:$0xff]  }
 0x8af   :  { %7508 = vmatprep.subr.bf16.mxu1 %v14990_v33  ;;  %8608 = vmatprep.subr.bf16.mxu0 %v14993_v40  ;;  %v15045_v33 = vld [vmem:[%s21205_s4 + $0xe8] ss:$16 sps:$4 sm:$0xff]   ;;  %v15050_v40 = vld [vmem:[%s21209_s8 + $0xc] ss:$16 sps:$4 sm:$0xff]  }
 0x8b2   :  { %7509 = vmatpush1.bf16.msra.mxu1 %v14988_v23  ;;  %8609 = vmatpush1.bf16.msra.mxu0 %v14991_v62  ;;  %v15048_v23 = vld [vmem:[%s21209_s8 + $0x8] ss:$16 sps:$4 sm:$0xff]   ;;  %v15053_v62 = vld [vmem:[%s21209_s8 + $0x2c] ss:$16 sps:$4 sm:$0xff]  }
 0x8b3   :  { %7510 = vmatprep.subr.bf16.mxu1 %v14996_v50  ;;  %8610 = vmatprep.subr.bf16.mxu0 %v14999_v43  ;;  %v15051_v50 = vld [vmem:[%s21209_s8 + $0x28] ss:$16 sps:$4 sm:$0xff]   ;;  %v15056_v43 = vld [vmem:[%s21209_s8 + $0x4c] ss:$16 sps:$4 sm:$0xff]  }
 0x8b6   :  { %7511 = vmatpush1.bf16.msra.mxu1 %v14994_v54  ;;  %8611 = vmatpush1.bf16.msra.mxu0 %v14997_v26  ;;  %v15054_v54 = vld [vmem:[%s21209_s8 + $0x48] ss:$16 sps:$4 sm:$0xff]  }
 0x8b7   :  { %7825 = vmatprep.subr.bf16.mxu1 %v15002_v31  ;;  %v15057_v26 = vld [vmem:[%s21209_s8 + $0x68] ss:$16 sps:$4 sm:$0xff]   ;;  %v15062_v31 = vld [vmem:[%s21209_s8 + $0x8c] ss:$16 sps:$4 sm:$0xff]  }
 0x8b9   :  { %7529 = vmatmul.mubr.bf16.vlgmr.msra.gmra.mrb[120].mxu1 %v19192_v63  ;;  %8629 = vmatmul.mubr.bf16.vlgmr.msra.gmra.mrb[136].mxu0 %v19257_v41 }
 0x8ba   :  { %7826 = vmatpush1.bf16.msra.mxu1 %v15000_v3  ;;  %7857 = vmatprep.mubr.bf16.mxu1 %v21264_v29  ;;  %v15060_v3 = vld [vmem:[%s21209_s8 + $0x88] ss:$16 sps:$4 sm:$0xff]  }
 0x8bb   :  { %7827 = vmatprep.subr.bf16.mxu1 %v15005_v55  ;;  %8829 = vmatprep.mubr.bf16.mxu0 %v21264_v29  ;;  %v15065_v55 = vld [vmem:[%s21209_s8 + $0xac] ss:$16 sps:$4 sm:$0xff]  }
 0x8be   :  { %7828 = vmatpush1.bf16.msra.mxu1 %v15003_v16  ;;  %v15063_v16 = vld [vmem:[%s21209_s8 + $0xa8] ss:$16 sps:$4 sm:$0xff]  }
 0x8bf   :  { %7829 = vmatprep.subr.bf16.mxu1 %v15008_v37  ;;  %v15068_v37 = vld [vmem:[%s21209_s8 + $0xcc] ss:$16 sps:$4 sm:$0xff]  }
 0x8c2   :  { %7830 = vmatpush1.bf16.msra.mxu1 %v15006_v39  ;;  %v15066_v39 = vld [vmem:[%s21209_s8 + $0xc8] ss:$16 sps:$4 sm:$0xff]  }
 0x8c3   :  { %7831 = vmatprep.subr.bf16.mxu1 %v15011_v58  ;;  %v15071_v58 = vld [vmem:[%s21209_s8 + $0xec] ss:$16 sps:$4 sm:$0xff]  }
 0x8c6   :  { %7832 = vmatpush1.bf16.msra.mxu1 %v15009_v14  ;;  %v15069_v14 = vld [vmem:[%s21209_s8 + $0xe8] ss:$16 sps:$4 sm:$0xff]  }
 0x8c7   :  { %7833 = vmatprep.subr.bf16.mxu1 %v15014_v34  ;;  %v15074_v34 = vld [vmem:[%s21208_s7 + $0xc] ss:$16 sps:$4 sm:$0xff]  }
 0x8ca   :  { %7834 = vmatpush1.bf16.msra.mxu1 %v15012_v36  ;;  %v15072_v36 = vld [vmem:[%s21208_s7 + $0x8] ss:$16 sps:$4 sm:$0xff]  }
 0x8cb   :  { %7835 = vmatprep.subr.bf16.mxu1 %v15017_v60  ;;  %v15077_v60 = vld [vmem:[%s21208_s7 + $0x2c] ss:$16 sps:$4 sm:$0xff]  }
 0x8ce   :  { %7836 = vmatpush1.bf16.msra.mxu1 %v15015_v52  ;;  %v15075_v52 = vld [vmem:[%s21208_s7 + $0x28] ss:$16 sps:$4 sm:$0xff]  }
 0x8cf   :  { %7837 = vmatprep.subr.bf16.mxu1 %v15020_v6  ;;  %v15080_v6 = vld [vmem:[%s21208_s7 + $0x4c] ss:$16 sps:$4 sm:$0xff]  }
 0x8d2   :  { %7838 = vmatpush1.bf16.msra.mxu1 %v15018_v18  ;;  %v15078_v18 = vld [vmem:[%s21208_s7 + $0x48] ss:$16 sps:$4 sm:$0xff]  }
 0x8d3   :  { %7839 = vmatprep.subr.bf16.mxu1 %v15023_v25  ;;  %v15081_v25 = vld [vmem:[%s21208_s7 + $0x68] ss:$16 sps:$4 sm:$0xff]  }
 0x8d6   :  { %7840 = vmatpush1.bf16.msra.mxu1 %v15021_v4  ;;  %v15086_v4 = vld [vmem:[%s21208_s7 + $0x8c] ss:$16 sps:$4 sm:$0xff]  }
 0x8d7   :  { %8067 = vmatprep.subr.bf16.mxu1 %v15026_v1  ;;  %v15084_v1 = vld [vmem:[%s21208_s7 + $0x88] ss:$16 sps:$4 sm:$0xff]  }
 0x8d9   :  { %7858 = vmatmul.mubr.bf16.vlgmr.msra.gmra.mrb[124].mxu1 %v19257_v41 }
 0x8da   :  { %8068 = vmatpush1.bf16.msra.mxu1 %v15024_v28  ;;  %8099 = vmatprep.mubr.bf16.mxu1 %v21264_v29  ;;  %v15089_v28 = vld [vmem:[%s21208_s7 + $0xac] ss:$16 sps:$4 sm:$0xff]  }
 0x8db   :  { %8069 = vmatprep.subr.bf16.mxu1 %v15029_v61  ;;  %v15087_v61 = vld [vmem:[%s21208_s7 + $0xa8] ss:$16 sps:$4 sm:$0xff]  }
 0x8de   :  { %8070 = vmatpush1.bf16.msra.mxu1 %v15027_v44  ;;  %v15092_v44 = vld [vmem:[%s21208_s7 + $0xcc] ss:$16 sps:$4 sm:$0xff]  }
 0x8df   :  { %8071 = vmatprep.subr.bf16.mxu1 %v15032_v10 }
 0x8e2   :  { %8072 = vmatpush1.bf16.msra.mxu1 %v15030_v27 }
 0x8e3   :  { %8073 = vmatprep.subr.bf16.mxu1 %v15035_v15 }
 0x8e6   :  { %8074 = vmatpush1.bf16.msra.mxu1 %v15033_v19  ;;  %v15090_v19 = vld [vmem:[%s21208_s7 + $0xc8] ss:$16 sps:$4 sm:$0xff]  }
 0x8e7   :  { %8075 = vmatprep.subr.bf16.mxu1 %v15038_v13 }
 0x8ea   :  { %8076 = vmatpush1.bf16.msra.mxu1 %v15036_v17  ;;  %v7489_v42 = vpop.f32.mrb[120].mxu0  ;;  %v15095_v17 = vld [vmem:[%s21208_s7 + $0xec] ss:$16 sps:$4 sm:$0xff]  }
 0x8eb   :  { %v19553_v32 = vadd.f32 %v7489_v42, %v21288_v12  ;;  %v7491_v8 = vpop.f32.mrb[121].mxu0  ;;  %8077 = vmatprep.subr.bf16.mxu1 %v15041_v48  ;;  %v15093_v48 = vld [vmem:[%s21208_s7 + $0xe8] ss:$16 sps:$4 sm:$0xff]   ;;  %v15098_v42 = vld [vmem:[%s21203_s2 + $0x4] ss:$16 sps:$4 sm:$0xff]  }
 0x8ec   :  { %v19559_v5 = vadd.f32 %v7491_v8, %v21289_v53  ;;  %v7493_v51 = vpop.f32.mrb[122].mxu0  ;;  %v15101_v12 = vld [vmem:[%s21203_s2 + $0x24] ss:$16 sps:$4 sm:$0xff]   ;;  %v15099_v8 = vld [vmem:[%s21203_s2 + $0x20] ss:$16 sps:$4 sm:$0xff]  }
 0x8ed   :  { %v7494_v11 = vpop.f32.mrb[123].mxu0  ;;  %v15102_v53 = vld [vmem:[%s21203_s2 + $0x40] ss:$16 sps:$4 sm:$0xff]  }
 0x8ee   :  { %8078 = vmatpush1.bf16.msra.mxu1 %v15039_v20  ;;  %v15096_v20 = vld [vmem:[%s21203_s2] ss:$16 sps:$4 sm:$0xff]   ;;  %v15110_v11 = vld [vmem:[%s21203_s2 + $0x84] ss:$16 sps:$4 sm:$0xff]  }
 0x8ef   :  { %8079 = vmatprep.subr.bf16.mxu1 %v15044_v38  ;;  %v15104_v38 = vld [vmem:[%s21203_s2 + $0x44] ss:$16 sps:$4 sm:$0xff]   ;;  %v15105_v51 = vld [vmem:[%s21203_s2 + $0x60] ss:$16 sps:$4 sm:$0xff]  }
 0x8f2   :  { %8080 = vmatpush1.bf16.msra.mxu1 %v15042_v2  ;;  %v15108_v2 = vld [vmem:[%s21203_s2 + $0x80] ss:$16 sps:$4 sm:$0xff]  }
 0x8f3   :  { %8081 = vmatprep.subr.bf16.mxu1 %v15047_v56  ;;  %v15113_v56 = vld [vmem:[%s21203_s2 + $0xa4] ss:$16 sps:$4 sm:$0xff]  }
 0x8f6   :  { %8082 = vmatpush1.bf16.msra.mxu1 %v15045_v33  ;;  %v15111_v33 = vld [vmem:[%s21203_s2 + $0xa0] ss:$16 sps:$4 sm:$0xff]  }
 0x8f7   :  { %8395 = vmatprep.subr.bf16.mxu1 %v15050_v40  ;;  %v15116_v40 = vld [vmem:[%s21203_s2 + $0xc4] ss:$16 sps:$4 sm:$0xff]  }
 0x8f9   :  { %8100 = vmatmul.mubr.bf16.vlgmr.msra.gmra.mrb[128].mxu1 %v19192_v63  ;;  %v15059_v63 = vld [vmem:[%s21209_s8 + $0x6c] ss:$16 sps:$4 sm:$0xff]  }
 0x8fa   :  { %8396 = vmatpush1.bf16.msra.mxu1 %v15048_v23  ;;  %8427 = vmatprep.mubr.bf16.mxu1 %v21264_v29 }
 0x8fb   :  { %8397 = vmatprep.subr.bf16.mxu1 %v15053_v62 }
 0x8fe   :  { %8398 = vmatpush1.bf16.msra.mxu1 %v15051_v50 }
 0x8ff   :  { %8399 = vmatprep.subr.bf16.mxu1 %v15056_v43 }
 0x902   :  { %8400 = vmatpush1.bf16.msra.mxu1 %v15054_v54 }
 0x903   :  { %8401 = vmatprep.subr.bf16.mxu1 %v15059_v63  ;;  %v15114_v63 = vld [vmem:[%s21203_s2 + $0xc0] ss:$16 sps:$4 sm:$0xff]  }
 0x906   :  { %8402 = vmatpush1.bf16.msra.mxu1 %v15057_v26 }
 0x907   :  { %8403 = vmatprep.subr.bf16.mxu1 %v15062_v31  ;;  %v15119_v31 = vld [vmem:[%s21203_s2 + $0xe4] ss:$16 sps:$4 sm:$0xff]  }
 0x90a   :  { %8404 = vmatpush1.bf16.msra.mxu1 %v15060_v3  ;;  %v15117_v3 = vld [vmem:[%s21203_s2 + $0xe0] ss:$16 sps:$4 sm:$0xff]  }
 0x90b   :  { %8405 = vmatprep.subr.bf16.mxu1 %v15065_v55  ;;  %v15122_v55 = vld [vmem:[%s21206_s5 + $0x4] ss:$16 sps:$4 sm:$0xff]  }
 0x90e   :  { %8406 = vmatpush1.bf16.msra.mxu1 %v15063_v16 }
 0x90f   :  { %8407 = vmatprep.subr.bf16.mxu1 %v15068_v37 }
 0x912   :  { %8408 = vmatpush1.bf16.msra.mxu1 %v15066_v39 }
 0x913   :  { %8409 = vmatprep.subr.bf16.mxu1 %v15071_v58 }
 0x916   :  { %8410 = vmatpush1.bf16.msra.mxu1 %v15069_v14 }
 0x917   :  { %8637 = vmatprep.subr.bf16.mxu1 %v15074_v34 }
 0x919   :  { %8428 = vmatmul.mubr.bf16.vlgmr.msra.gmra.mrb[132].mxu1 %v19372_v22  ;;  %v15083_v22 = vld [vmem:[%s21208_s7 + $0x6c] ss:$16 sps:$4 sm:$0xff]  }
 0x91a   :  { %8638 = vmatpush1.bf16.msra.mxu1 %v15072_v36  ;;  %8669 = vmatprep.mubr.bf16.mxu1 %v21264_v29 }
 0x91b   :  { %8639 = vmatprep.subr.bf16.mxu1 %v15077_v60 }
 0x91e   :  { %8640 = vmatpush1.bf16.msra.mxu1 %v15075_v52 }
 0x91f   :  { %8641 = vmatprep.subr.bf16.mxu1 %v15080_v6 }
 0x922   :  { %8642 = vmatpush1.bf16.msra.mxu1 %v15078_v18  ;;  %v7545_v18 = vmul.f32 0.5, %v19559_v5 }
 0x923   :  { %8643 = vmatprep.subr.bf16.mxu1 %v15083_v22  ;;  %v7541_v22 = vmul.f32 0.5, %v19553_v32 }
 0x924   :  { %15750 = vtanh.f32 %v7545_v18 }
 0x925   :  { %15752 = vtanh.f32 %v7541_v22  ;;  %v15125_v22 = vld [vmem:[%s21206_s5 + $0x24] ss:$16 sps:$4 sm:$0xff]  }
 0x926   :  { %8644 = vmatpush1.bf16.msra.mxu1 %v15081_v25 }
 0x927   :  { %8645 = vmatprep.subr.bf16.mxu1 %v15086_v4 }
 0x92a   :  { %8646 = vmatpush1.bf16.msra.mxu1 %v15084_v1  ;;  %v21290_v1 = vld [vmem:[#allocation23_spill] sm:$0xff] }
 0x92b   :  { %8647 = vmatprep.subr.bf16.mxu1 %v15089_v28 }
 0x92c   :  { %v7818_v10 = vpop.f32.mrb[124].mxu0 }
 0x92d   :  { %v7820_v27 = vpop.f32.mrb[125].mxu0 }
 0x92e   :  { %8648 = vmatpush1.bf16.msra.mxu1 %v15087_v61  ;;  %v7822_v15 = vpop.f32.mrb[126].mxu0 }
 0x92f   :  { %v7823_v13 = vpop.f32.mrb[127].mxu0  ;;  %8649 = vmatprep.subr.bf16.mxu1 %v15092_v44  ;;  %v21291_v15 = vld [vmem:[#allocation25_spill] sm:$0xff] }
 0x932   :  { %8650 = vmatpush1.bf16.msra.mxu1 %v15090_v19 }
 0x933   :  { %8651 = vmatprep.subr.bf16.mxu1 %v15095_v17  ;;  %v15168_v17 = vld [vmem:[%s21211_s10] ss:$8 sps:$4 sm:$0xff]  }
 0x936   :  { %8652 = vmatpush1.bf16.msra.mxu1 %v15093_v48  ;;  %v15751_v48 = vpop.eup %15750 }
 0x937   :  { %9037 = vmatprep.subr.bf16.mxu1 %v15098_v42 }
 0x939   :  { %8670 = vmatmul.mubr.bf16.vlgmr.msra.gmra.mrb[136].mxu1 %v19257_v41  ;;  %v15107_v41 = vld [vmem:[%s21203_s2 + $0x64] ss:$16 sps:$4 sm:$0xff]  }
 0x93a   :  { %9038 = vmatpush1.bf16.msra.mxu1 %v15096_v20  ;;  %9069 = vmatprep.mubr.bf16.mxu1 %v21264_v29 }
 0x93b   :  { %9039 = vmatprep.subr.bf16.mxu1 %v15101_v12  ;;  %v15753_v12 = vpop.eup %15752 }
 0x93e   :  { %9040 = vmatpush1.bf16.msra.mxu1 %v15099_v8  ;;  %v15176_v8 = vld [vmem:[%s21211_s10 + $0x14] ss:$8 sps:$4 sm:$0xff]  }
 0x93f   :  { %9041 = vmatprep.subr.bf16.mxu1 %v15104_v38  ;;  %v7547_v38 = vadd.f32 1.0, %v15751_v48  ;;  %v15137_v48 = vld [vmem:[%s21206_s5 + $0xa4] ss:$16 sps:$4 sm:$0xff]  }
 0x942   :  { %9042 = vmatpush1.bf16.msra.mxu1 %v15102_v53 }
 0x943   :  { %9043 = vmatprep.subr.bf16.mxu1 %v15107_v41  ;;  %v15174_v41 = vld [vmem:[%s21211_s10 + $0x10] ss:$8 sps:$4 sm:$0xff]  }
 0x946   :  { %9044 = vmatpush1.bf16.msra.mxu1 %v15105_v51  ;;  %v7543_v51 = vadd.f32 1.0, %v15753_v12  ;;  %v15140_v12 = vld [vmem:[%s21206_s5 + $0xc4] ss:$16 sps:$4 sm:$0xff]  }
 0x947   :  { %9045 = vmatprep.subr.bf16.mxu1 %v15110_v11  ;;  %v15182_v11 = vld [vmem:[%s21211_s10 + $0x24] ss:$8 sps:$4 sm:$0xff]  }
 0x94a   :  { %9046 = vmatpush1.bf16.msra.mxu1 %v15108_v2  ;;  %v7548_v2 = vmul.f32 0.5, %v7547_v38  ;;  %v15138_v38 = vld [vmem:[%s21206_s5 + $0xc0] ss:$16 sps:$4 sm:$0xff]  }
 0x94b   :  { %9047 = vmatprep.subr.bf16.mxu1 %v15113_v56  ;;  %v15180_v56 = vld [vmem:[%s21211_s10 + $0x20] ss:$8 sps:$4 sm:$0xff]  }
 0x94c   :  { %v8060_v23 = vpop.f32.mrb[128].mxu0 }
 0x94d   :  { %v19711_v62 = vadd.f32 %v8060_v23, %v7818_v10  ;;  %v8062_v50 = vpop.f32.mrb[129].mxu0  ;;  %v15188_v23 = vld [vmem:[%s21211_s10 + $0x34] ss:$8 sps:$4 sm:$0xff]  }
 0x94e   :  { %v19713_v43 = vadd.f32 %v8062_v50, %v7820_v27  ;;  %v8064_v54 = vpop.f32.mrb[130].mxu0  ;;  %9048 = vmatpush1.bf16.msra.mxu1 %v15111_v33  ;;  %v15170_v27 = vld [vmem:[%s21211_s10 + $0x4] ss:$8 sps:$4 sm:$0xff]   ;;  %v7544_v33 = vmul.f32 0.5, %v7543_v51  ;;  %v7554_v50 = vmul.f32 %v7548_v2, %v19162_v49  ;;  %v15141_v51 = vld [vmem:[%s21206_s5 + $0xe0] ss:$16 sps:$4 sm:$0xff]  }
 0x94f   :  { %v8065_v26 = vpop.f32.mrb[131].mxu0  ;;  %9049 = vmatprep.subr.bf16.mxu1 %v15116_v40  ;;  %8797 = vmatprep.subr.bf16.mxu0 %v15170_v27  ;;  %v15128_v27 = vld [vmem:[%s21206_s5 + $0x44] ss:$16 sps:$4 sm:$0xff]  }
 0x950   :  { %8798 = vmatpush1.bf16.msra.mxu0 %v15168_v17  ;;  %v15132_v17 = vld [vmem:[%s21206_s5 + $0x80] ss:$16 sps:$4 sm:$0xff]  }
 0x951   :  { %8799 = vmatprep.subr.bf16.mxu0 %v15176_v8  ;;  %v8108_v8 = vadd.f32 %v19711_v62, %v21276_v45  ;;  %v15146_v62 = vld [vmem:[%s21205_s4 + $0x4] ss:$16 sps:$4 sm:$0xff]  }
 0x952   :  { %9050 = vmatpush1.bf16.msra.mxu1 %v15114_v63  ;;  %v15186_v63 = vld [vmem:[%s21211_s10 + $0x30] ss:$8 sps:$4 sm:$0xff]  }
 0x953   :  { %9051 = vmatprep.subr.bf16.mxu1 %v15119_v31  ;;  %v15194_v31 = vld [vmem:[%s21211_s10 + $0x44] ss:$8 sps:$4 sm:$0xff]  }
 0x954   :  { %8800 = vmatpush1.bf16.msra.mxu0 %v15174_v41  ;;  %v15143_v41 = vld [vmem:[%s21206_s5 + $0xe4] ss:$16 sps:$4 sm:$0xff]  }
 0x955   :  { %8801 = vmatprep.subr.bf16.mxu0 %v15182_v11 }
 0x956   :  { %9052 = vmatpush1.bf16.msra.mxu1 %v15117_v3  ;;  %v15192_v3 = vld [vmem:[%s21211_s10 + $0x40] ss:$8 sps:$4 sm:$0xff]  }
 0x957   :  { %9366 = vmatprep.subr.bf16.mxu1 %v15122_v55  ;;  %v15198_v55 = vld [vmem:[%s21211_s10 + $0x50] ss:$8 sps:$4 sm:$0xff]  }
 0x958   :  { %8802 = vmatpush1.bf16.msra.mxu0 %v15180_v56 }
 0x959   :  { %8803 = vmatprep.subr.bf16.mxu0 %v15188_v23 }
 0x95c   :  { %8804 = vmatpush1.bf16.msra.mxu0 %v15186_v63 }
 0x95d   :  { %8805 = vmatprep.subr.bf16.mxu0 %v15194_v31 }
 0x960   :  { %8806 = vmatpush1.bf16.msra.mxu0 %v15192_v3 }
 0x96c   :  { %v7249_v16 = vpop.f32.mrb[116].mxu1  ;;  %v8388_v37 = vpop.f32.mrb[132].mxu0 }
 0x96d   :  { %v7250_v39 = vadd.f32 %v7249_v16, %v17922_v47  ;;  %v7251_v58 = vpop.f32.mrb[117].mxu1  ;;  %v8390_v14 = vpop.f32.mrb[133].mxu0  ;;  %v15200_v16 = vld [vmem:[%s21211_s10 + $0x54] ss:$8 sps:$4 sm:$0xff]  }
 0x96e   :  { %v7252_v34 = vadd.f32 %v7251_v58, %v17925_v0  ;;  %v7253_v36 = vpop.f32.mrb[118].mxu1  ;;  %v8392_v60 = vpop.f32.mrb[134].mxu0  ;;  %8807 = vmatprep.subr.bf16.mxu0 %v15200_v16  ;;  %v15206_v58 = vld [vmem:[%s21211_s10 + $0x64] ss:$8 sps:$4 sm:$0xff]  }
 0x96f   :  { %7256 = vst [vmem:[#allocation3 + $0x30] sm:$0xff] %v7250_v39  ;;  %v7254_v52 = vpop.f32.mrb[119].mxu1  ;;  %v8393_v6 = vpop.f32.mrb[135].mxu0  ;;  %8808 = vmatpush1.bf16.msra.mxu0 %v15198_v55  ;;  %v15204_v39 = vld [vmem:[%s21211_s10 + $0x60] ss:$8 sps:$4 sm:$0xff]  }
 0x970   :  { %7257 = vst [vmem:[#allocation3 + $0x38] sm:$0xff] %v7252_v34  ;;  %8809 = vmatprep.subr.bf16.mxu0 %v15206_v58  ;;  %v15210_v36 = vld [vmem:[%s21211_s10 + $0x70] ss:$8 sps:$4 sm:$0xff]   ;;  %v15212_v60 = vld [vmem:[%s21211_s10 + $0x74] ss:$8 sps:$4 sm:$0xff]  }
 0x971   :  { %v15120_v6 = vld [vmem:[%s21206_s5] ss:$16 sps:$4 sm:$0xff]  }
 0x973   :  { %8810 = vmatpush1.bf16.msra.mxu0 %v15204_v39 }
 0x974   :  { %8811 = vmatprep.subr.bf16.mxu0 %v15212_v60 }
 0x977   :  { %8812 = vmatpush1.bf16.msra.mxu0 %v15210_v36 }
 0x98c   :  { %v7530_v25 = vpop.f32.mrb[120].mxu1  ;;  %v8630_v4 = vpop.f32.mrb[136].mxu0 }
 0x98d   :  { %v7539_v28 = vadd.f32 %v7530_v25, %v21290_v1  ;;  %v19732_v61 = vadd.f32 %v8630_v4, %v8388_v37  ;;  %v7532_v44 = vpop.f32.mrb[121].mxu1  ;;  %v8632_v10 = vpop.f32.mrb[137].mxu0  ;;  %v15218_v4 = vld [vmem:[%s21203_s2 + $0xc] ss:$16 sps:$4 sm:$0xff]  }
 0x98e   :  { %v7540_v19 = vadd.f32 %v7532_v44, %v21291_v15  ;;  %v19738_v13 = vadd.f32 %v8632_v10, %v8390_v14  ;;  %v7534_v5 = vpop.f32.mrb[122].mxu1  ;;  %v8634_v32 = vpop.f32.mrb[138].mxu0  ;;  %v15123_v44 = vld [vmem:[%s21206_s5 + $0x20] ss:$16 sps:$4 sm:$0xff]   ;;  %9078 = vmatprep.subr.bf16.mxu0 %v15218_v4 }
 0x98f   :  { %15754 = vtanh.f32 %v7539_v28  ;;  %v7535_v42 = vpop.f32.mrb[123].mxu1  ;;  %v8635_v20 = vpop.f32.mrb[139].mxu0  ;;  %v15126_v15 = vld [vmem:[%s21206_s5 + $0x40] ss:$16 sps:$4 sm:$0xff]   ;;  %v15134_v32 = vld [vmem:[%s21206_s5 + $0x84] ss:$16 sps:$4 sm:$0xff]  }
 0x990   :  { %v7550_v53 = vmul.f32 0.5, %v7540_v19  ;;  %v15131_v19 = vld [vmem:[%s21206_s5 + $0x64] ss:$16 sps:$4 sm:$0xff]   ;;  %v15129_v5 = vld [vmem:[%s21206_s5 + $0x60] ss:$16 sps:$4 sm:$0xff]   ;;  %v8109_v20 = vadd.f32 %v19713_v43, %v16932_v9  ;;  %v8112_v43 = vmul.f32 0.5, %v8108_v8  ;;  %v8678_v8 = vadd.f32 %v19732_v61, %v17541_v35 }
 0x991   :  { %v15135_v42 = vld [vmem:[%s21206_s5 + $0xa0] ss:$16 sps:$4 sm:$0xff]  }
 0x992   :  { %15756 = vtanh.f32 %v7550_v53  ;;  %v8116_v53 = vmul.f32 0.5, %v8109_v20  ;;  %v15144_v4 = vld [vmem:[%s21205_s4] ss:$16 sps:$4 sm:$0xff]   ;;  %v8679_v20 = vadd.f32 %v19738_v13, %v17547_v30  ;;  %v8682_v13 = vmul.f32 0.5, %v8678_v8 }
 0x993   :  { %v15165_v61 = vld [vmem:[%s21205_s4 + $0xe0] ss:$16 sps:$4 sm:$0xff]  }
 0x994   :  { %v15219_v8 = vld [vmem:[%s21208_s7] ss:$16 sps:$4 sm:$0xff]  }
 0x999   :  { %v15755_v40 = vpop.eup %15754 }
 0x99a   :  { %v7555_v54 = vmul.f32 %v15755_v40, %v7544_v33 }
 0x99c   :  { %v19762_v26 = vadd.f32 %v7555_v54, %v7554_v50  ;;  %v15757_v49 = vpop.eup %15756 }
 0x99d   :  { %v7552_v37 = vadd.f32 1.0, %v15757_v49 }
 0x99e   :  { %15758 = vtanh.f32 %v19762_v26 }
 0x99f   :  { %v7553_v14 = vmul.f32 0.5, %v7552_v37  ;;  %15760 = vtanh.f32 %v8116_v53  ;;  %v8686_v53 = vmul.f32 0.5, %v8679_v20 }
 0x9a0   :  { %15762 = vtanh.f32 %v8112_v43  ;;  %v15167_v43 = vld [vmem:[%s21205_s4 + $0xe4] ss:$16 sps:$4 sm:$0xff]  }
 0x9a8   :  { %v15759_v34 = vpop.eup %15758 }
 0x9a9   :  { %v7558_v52 = vmul.f32 %v15759_v34, %v7553_v14  ;;  %v15761_v63 = vpop.eup %15760 }
 0x9aa   :  { %v15763_v31 = vpop.eup %15762  ;;  %v8118_v3 = vadd.f32 1.0, %v15761_v63 }
 0x9ab   :  { %v19792_v18 = vpack.c.bf16 %v7558_v52, %v7558_v52  ;;  %v8114_v55 = vadd.f32 1.0, %v15763_v31  ;;  %v15177_v31 = vld [vmem:[%s21209_s8 + $0x20] ss:$16 sps:$4 sm:$0xff]  }
 0x9ac   :  { %v7859_v25 = vpop.f32.mrb[124].mxu1  ;;  %v8119_v16 = vmul.f32 0.5, %v8118_v3 }
 0x9ad   :  { %v7861_v1 = vpop.f32.mrb[125].mxu1  ;;  %9070 = vmatmul.mubr.bf16.vlgmr.msra.gmra.mrb[140].mxu1 %v19792_v18  ;;  %v8115_v37 = vmul.f32 0.5, %v8114_v55 }
 0x9ae   :  { %v7863_v28 = vpop.f32.mrb[126].mxu1  ;;  %9367 = vmatpush1.bf16.msra.mxu1 %v15120_v6  ;;  %9398 = vmatprep.mubr.bf16.mxu1 %v21264_v29  ;;  %v8125_v58 = vmul.f32 %v8119_v16, %v19251_v46  ;;  %v15149_v46 = vld [vmem:[%s21205_s4 + $0x24] ss:$16 sps:$4 sm:$0xff]  }
 0x9af   :  { %v7864_v10 = vpop.f32.mrb[127].mxu1  ;;  %9368 = vmatprep.subr.bf16.mxu1 %v15125_v22 }
 0x9b2   :  { %9369 = vmatpush1.bf16.msra.mxu1 %v15123_v44 }
 0x9b3   :  { %9370 = vmatprep.subr.bf16.mxu1 %v15128_v27  ;;  %v15147_v27 = vld [vmem:[%s21205_s4 + $0x20] ss:$16 sps:$4 sm:$0xff]  }
 0x9b6   :  { %9371 = vmatpush1.bf16.msra.mxu1 %v15126_v15  ;;  %v15152_v15 = vld [vmem:[%s21205_s4 + $0x44] ss:$16 sps:$4 sm:$0xff]  }
 0x9b7   :  { %9372 = vmatprep.subr.bf16.mxu1 %v15131_v19  ;;  %v15150_v19 = vld [vmem:[%s21205_s4 + $0x40] ss:$16 sps:$4 sm:$0xff]  }
 0x9ba   :  { %9373 = vmatpush1.bf16.msra.mxu1 %v15129_v5  ;;  %v15155_v5 = vld [vmem:[%s21205_s4 + $0x64] ss:$16 sps:$4 sm:$0xff]  }
 0x9bb   :  { %9374 = vmatprep.subr.bf16.mxu1 %v15134_v32  ;;  %v15153_v32 = vld [vmem:[%s21205_s4 + $0x60] ss:$16 sps:$4 sm:$0xff]  }
 0x9be   :  { %9375 = vmatpush1.bf16.msra.mxu1 %v15132_v17  ;;  %v15158_v17 = vld [vmem:[%s21205_s4 + $0x84] ss:$16 sps:$4 sm:$0xff]  }
 0x9bf   :  { %9376 = vmatprep.subr.bf16.mxu1 %v15137_v48  ;;  %v15156_v48 = vld [vmem:[%s21205_s4 + $0x80] ss:$16 sps:$4 sm:$0xff]  }
 0x9c2   :  { %9377 = vmatpush1.bf16.msra.mxu1 %v15135_v42  ;;  %v15161_v42 = vld [vmem:[%s21205_s4 + $0xa4] ss:$16 sps:$4 sm:$0xff]  }
 0x9c3   :  { %9378 = vmatprep.subr.bf16.mxu1 %v15140_v12  ;;  %v15159_v12 = vld [vmem:[%s21205_s4 + $0xa0] ss:$16 sps:$4 sm:$0xff]  }
 0x9c6   :  { %9379 = vmatpush1.bf16.msra.mxu1 %v15138_v38  ;;  %v15164_v38 = vld [vmem:[%s21205_s4 + $0xc4] ss:$16 sps:$4 sm:$0xff]  }
 0x9c7   :  { %9380 = vmatprep.subr.bf16.mxu1 %v15143_v41  ;;  %v15162_v41 = vld [vmem:[%s21205_s4 + $0xc0] ss:$16 sps:$4 sm:$0xff]  }
 0x9ca   :  { %9381 = vmatpush1.bf16.msra.mxu1 %v15141_v51  ;;  %v15173_v51 = vld [vmem:[%s21209_s8 + $0x4] ss:$16 sps:$4 sm:$0xff]  }
 0x9cb   :  { %9608 = vmatprep.subr.bf16.mxu1 %v15146_v62 }
 0x9cc   :  { %v8101_v11 = vpop.f32.mrb[128].mxu1 }
 0x9cd   :  { %v8102_v2 = vadd.f32 %v8101_v11, %v7859_v25  ;;  %v8103_v56 = vpop.f32.mrb[129].mxu1  ;;  %v15171_v11 = vld [vmem:[%s21209_s8] ss:$16 sps:$4 sm:$0xff]  }
 0x9ce   :  { %v8104_v33 = vadd.f32 %v8103_v56, %v7861_v1  ;;  %v8105_v40 = vpop.f32.mrb[130].mxu1 }
 0x9cf   :  { %v8110_v23 = vadd.f32 %v8102_v2, %v21277_v59  ;;  %v8106_v50 = vpop.f32.mrb[131].mxu1 }
 0x9d0   :  { %v8111_v54 = vadd.f32 %v8104_v33, %v21278_v21  ;;  %v15179_v33 = vld [vmem:[%s21209_s8 + $0x24] ss:$16 sps:$4 sm:$0xff]  }
 0x9d1   :  { %15764 = vtanh.f32 %v8110_v23 }
 0x9d2   :  { %v8121_v49 = vmul.f32 0.5, %v8111_v54 }
 0x9d4   :  { %15766 = vtanh.f32 %v8121_v49  ;;  %v15185_v49 = vld [vmem:[%s21209_s8 + $0x44] ss:$16 sps:$4 sm:$0xff]  }
 0x9db   :  { %v15765_v39 = vpop.eup %15764 }
 0x9dc   :  { %v8126_v14 = vmul.f32 %v15765_v39, %v8115_v37  ;;  %v15183_v39 = vld [vmem:[%s21209_s8 + $0x40] ss:$16 sps:$4 sm:$0xff]  }
 0x9de   :  { %v19851_v34 = vadd.f32 %v8126_v14, %v8125_v58  ;;  %v15767_v36 = vpop.eup %15766  ;;  %v15191_v58 = vld [vmem:[%s21209_s8 + $0x64] ss:$16 sps:$4 sm:$0xff]  }
 0x9df   :  { %v8123_v60 = vadd.f32 1.0, %v15767_v36 }
 0x9e0   :  { %15768 = vtanh.f32 %v19851_v34 }
 0x9e1   :  { %v8124_v52 = vmul.f32 0.5, %v8123_v60  ;;  %15770 = vtanh.f32 %v8686_v53  ;;  %v15189_v60 = vld [vmem:[%s21209_s8 + $0x60] ss:$16 sps:$4 sm:$0xff]   ;;  %v15224_v53 = vld [vmem:[%s21203_s2 + $0x2c] ss:$16 sps:$4 sm:$0xff]  }
 0x9e2   :  { %15772 = vtanh.f32 %v8682_v13  ;;  %v15222_v13 = vld [vmem:[%s21203_s2 + $0x28] ss:$16 sps:$4 sm:$0xff]  }
 0x9ea   :  { %v15769_v6 = vpop.eup %15768 }
 0x9eb   :  { %v8129_v22 = vmul.f32 %v15769_v6, %v8124_v52  ;;  %v15771_v3 = vpop.eup %15770  ;;  %v15197_v52 = vld [vmem:[%s21209_s8 + $0x84] ss:$16 sps:$4 sm:$0xff]  }
 0x9ec   :  { %v8429_v25 = vpop.f32.mrb[132].mxu1  ;;  %v15773_v55 = vpop.eup %15772  ;;  %v8688_v16 = vadd.f32 1.0, %v15771_v3  ;;  %v15251_v3 = vld [vmem:[%s21208_s7 + $0xa4] ss:$16 sps:$4 sm:$0xff]  }
 0x9ed   :  { %v8431_v1 = vpop.f32.mrb[133].mxu1  ;;  %v19857_v28 = vpack.c.bf16 %v8129_v22, %v8129_v22  ;;  %v8684_v14 = vadd.f32 1.0, %v15773_v55  ;;  %v15249_v55 = vld [vmem:[%s21208_s7 + $0xa0] ss:$16 sps:$4 sm:$0xff]  }
 0x9ee   :  { %v8433_v44 = vpop.f32.mrb[134].mxu1  ;;  %v8689_v36 = vmul.f32 0.5, %v8688_v16  ;;  %v15254_v16 = vld [vmem:[%s21203_s2 + $0xcc] ss:$16 sps:$4 sm:$0xff]  }
 0x9ef   :  { %v8434_v10 = vpop.f32.mrb[135].mxu1  ;;  %9399 = vmatmul.mubr.bf16.vlgmr.msra.gmra.mrb[144].mxu1 %v19857_v28  ;;  %v8685_v6 = vmul.f32 0.5, %v8684_v14  ;;  %v15260_v14 = vld [vmem:[%s21203_s2 + $0xec] ss:$16 sps:$4 sm:$0xff]  }
 0x9f0   :  { %9609 = vmatpush1.bf16.msra.mxu1 %v15144_v4  ;;  %9640 = vmatprep.mubr.bf16.mxu1 %v21264_v29  ;;  %v15209_v10 = vld [vmem:[%s21209_s8 + $0xc4] ss:$16 sps:$4 sm:$0xff]  }
 0x9f1   :  { %9610 = vmatprep.subr.bf16.mxu1 %v15149_v46  ;;  %v15203_v46 = vld [vmem:[%s21209_s8 + $0xa4] ss:$16 sps:$4 sm:$0xff]  }
 0x9f4   :  { %9611 = vmatpush1.bf16.msra.mxu1 %v15147_v27 }
 0x9f5   :  { %9612 = vmatprep.subr.bf16.mxu1 %v15152_v15  ;;  %v15207_v15 = vld [vmem:[%s21209_s8 + $0xc0] ss:$16 sps:$4 sm:$0xff]  }
 0x9f8   :  { %9613 = vmatpush1.bf16.msra.mxu1 %v15150_v19 }
 0x9f9   :  { %9614 = vmatprep.subr.bf16.mxu1 %v15155_v5  ;;  %v15215_v5 = vld [vmem:[%s21209_s8 + $0xe4] ss:$16 sps:$4 sm:$0xff]  }
 0x9fc   :  { %9615 = vmatpush1.bf16.msra.mxu1 %v15153_v32  ;;  %v15213_v32 = vld [vmem:[%s21209_s8 + $0xe0] ss:$16 sps:$4 sm:$0xff]  }
 0x9fd   :  { %9616 = vmatprep.subr.bf16.mxu1 %v15158_v17 }
 0xa00   :  { %9617 = vmatpush1.bf16.msra.mxu1 %v15156_v48  ;;  %v15221_v48 = vld [vmem:[%s21208_s7 + $0x4] ss:$16 sps:$4 sm:$0xff]  }
 0xa01   :  { %9618 = vmatprep.subr.bf16.mxu1 %v15161_v42 }
 0xa04   :  { %9619 = vmatpush1.bf16.msra.mxu1 %v15159_v12  ;;  %v15216_v12 = vld [vmem:[%s21203_s2 + $0x8] ss:$16 sps:$4 sm:$0xff]  }
 0xa05   :  { %9620 = vmatprep.subr.bf16.mxu1 %v15164_v38 }
 0xa08   :  { %9621 = vmatpush1.bf16.msra.mxu1 %v15162_v41  ;;  %v15227_v41 = vld [vmem:[%s21208_s7 + $0x24] ss:$16 sps:$4 sm:$0xff]  }
 0xa09   :  { %9622 = vmatprep.subr.bf16.mxu1 %v15167_v43  ;;  %v15225_v43 = vld [vmem:[%s21208_s7 + $0x20] ss:$16 sps:$4 sm:$0xff]  }
 0xa0c   :  { %9623 = vmatpush1.bf16.msra.mxu1 %v15165_v61  ;;  %v8671_v62 = vpop.f32.mrb[136].mxu1  ;;  %v15230_v61 = vld [vmem:[%s21203_s2 + $0x4c] ss:$16 sps:$4 sm:$0xff]  }
 0xa0d   :  { %v8672_v2 = vadd.f32 %v8671_v62, %v8429_v25  ;;  %v8673_v56 = vpop.f32.mrb[137].mxu1  ;;  %9936 = vmatprep.subr.bf16.mxu1 %v15173_v51  ;;  %v8695_v25 = vmul.f32 %v8689_v36, %v19345_v7  ;;  %v15201_v7 = vld [vmem:[%s21209_s8 + $0xa0] ss:$16 sps:$4 sm:$0xff]   ;;  %v15233_v51 = vld [vmem:[%s21208_s7 + $0x44] ss:$16 sps:$4 sm:$0xff]  }
 0xa0e   :  { %v8674_v40 = vadd.f32 %v8673_v56, %v8431_v1  ;;  %v8675_v23 = vpop.f32.mrb[138].mxu1  ;;  %v15195_v1 = vld [vmem:[%s21209_s8 + $0x80] ss:$16 sps:$4 sm:$0xff]   ;;  %v15228_v62 = vld [vmem:[%s21203_s2 + $0x48] ss:$16 sps:$4 sm:$0xff]  }
 0xa0f   :  { %v8680_v50 = vadd.f32 %v8672_v2, %v17554_v24  ;;  %9641 = vmatmul.mubr.bf16.vlgmr.msra.gmra.mrb[148].mxu1 %v19792_v18  ;;  %v8676_v54 = vpop.f32.mrb[139].mxu1  ;;  %v15236_v2 = vld [vmem:[%s21203_s2 + $0x6c] ss:$16 sps:$4 sm:$0xff]   ;;  %v15239_v56 = vld [vmem:[%s21208_s7 + $0x64] ss:$16 sps:$4 sm:$0xff]  }
 0xa10   :  { %v8681_v63 = vadd.f32 %v8674_v40, %v17562_v57  ;;  %9937 = vmatpush1.bf16.msra.mxu1 %v15171_v11  ;;  %9968 = vmatprep.mubr.bf16.mxu1 %v21264_v29  ;;  %v15231_v11 = vld [vmem:[%s21208_s7 + $0x40] ss:$16 sps:$4 sm:$0xff]   ;;  %v15242_v23 = vld [vmem:[%s21203_s2 + $0x8c] ss:$16 sps:$4 sm:$0xff]   ;;  %v15240_v54 = vld [vmem:[%s21203_s2 + $0x88] ss:$16 sps:$4 sm:$0xff]  }
 0xa11   :  { %15774 = vtanh.f32 %v8680_v50  ;;  %9938 = vmatprep.subr.bf16.mxu1 %v15179_v33  ;;  %v15234_v33 = vld [vmem:[%s21203_s2 + $0x68] ss:$16 sps:$4 sm:$0xff]   ;;  %v15237_v40 = vld [vmem:[%s21208_s7 + $0x60] ss:$16 sps:$4 sm:$0xff]   ;;  %v15245_v50 = vld [vmem:[%s21208_s7 + $0x84] ss:$16 sps:$4 sm:$0xff]  }
 0xa12   :  { %v8691_v37 = vmul.f32 0.5, %v8681_v63  ;;  %v15243_v63 = vld [vmem:[%s21208_s7 + $0x80] ss:$16 sps:$4 sm:$0xff]   ;;  %v15263_v36 = vld [vmem:[%s21208_s7 + $0xe4] ss:$16 sps:$4 sm:$0xff]  }
 0xa14   :  { %9939 = vmatpush1.bf16.msra.mxu1 %v15177_v31  ;;  %15776 = vtanh.f32 %v8691_v37  ;;  %v15248_v31 = vld [vmem:[%s21203_s2 + $0xac] ss:$16 sps:$4 sm:$0xff]   ;;  %v15257_v37 = vld [vmem:[%s21208_s7 + $0xc4] ss:$16 sps:$4 sm:$0xff]  }
 0xa15   :  { %9940 = vmatprep.subr.bf16.mxu1 %v15185_v49  ;;  %v15246_v49 = vld [vmem:[%s21203_s2 + $0xa8] ss:$16 sps:$4 sm:$0xff]  }
 0xa18   :  { %9941 = vmatpush1.bf16.msra.mxu1 %v15183_v39  ;;  %v15252_v39 = vld [vmem:[%s21203_s2 + $0xc8] ss:$16 sps:$4 sm:$0xff]  }
 0xa19   :  { %9942 = vmatprep.subr.bf16.mxu1 %v15191_v58  ;;  %v15255_v58 = vld [vmem:[%s21208_s7 + $0xc0] ss:$16 sps:$4 sm:$0xff]  }
 0xa1b   :  { %v15775_v22 = vpop.eup %15774 }
 0xa1c   :  { %v8696_v4 = vmul.f32 %v15775_v22, %v8685_v6  ;;  %9943 = vmatpush1.bf16.msra.mxu1 %v15189_v60  ;;  %v15258_v60 = vld [vmem:[%s21203_s2 + $0xe8] ss:$16 sps:$4 sm:$0xff]   ;;  %v15266_v6 = vld [vmem:[%s21206_s5 + $0xc] ss:$16 sps:$4 sm:$0xff]  }
 0xa1d   :  { %9944 = vmatprep.subr.bf16.mxu1 %v15197_v52  ;;  %v15261_v52 = vld [vmem:[%s21208_s7 + $0xe0] ss:$16 sps:$4 sm:$0xff]   ;;  %v15264_v22 = vld [vmem:[%s21206_s5 + $0x8] ss:$16 sps:$4 sm:$0xff]  }
 0xa1e   :  { %v19945_v44 = vadd.f32 %v8696_v4, %v8695_v25  ;;  %v15777_v27 = vpop.eup %15776  ;;  %v15269_v25 = vld [vmem:[%s21206_s5 + $0x2c] ss:$16 sps:$4 sm:$0xff]   ;;  %v15267_v4 = vld [vmem:[%s21206_s5 + $0x28] ss:$16 sps:$4 sm:$0xff]  }
 0xa1f   :  { %v8693_v19 = vadd.f32 1.0, %v15777_v27  ;;  %v15278_v27 = vld [vmem:[%s21206_s5 + $0x8c] ss:$16 sps:$4 sm:$0xff]  }
 0xa20   :  { %15778 = vtanh.f32 %v19945_v44  ;;  %9945 = vmatpush1.bf16.msra.mxu1 %v15195_v1  ;;  %v15272_v1 = vld [vmem:[%s21206_s5 + $0x4c] ss:$16 sps:$4 sm:$0xff]  }
 0xa21   :  { %9946 = vmatprep.subr.bf16.mxu1 %v15203_v46  ;;  %v8694_v17 = vmul.f32 0.5, %v8693_v19  ;;  %v15270_v46 = vld [vmem:[%s21206_s5 + $0x48] ss:$16 sps:$4 sm:$0xff]   ;;  %v15281_v19 = vld [vmem:[%s21206_s5 + $0xac] ss:$16 sps:$4 sm:$0xff]  }
 0xa24   :  { %9947 = vmatpush1.bf16.msra.mxu1 %v15201_v7  ;;  %v15275_v7 = vld [vmem:[%s21206_s5 + $0x6c] ss:$16 sps:$4 sm:$0xff]  }
 0xa25   :  { %9948 = vmatprep.subr.bf16.mxu1 %v15209_v10  ;;  %v15273_v10 = vld [vmem:[%s21206_s5 + $0x68] ss:$16 sps:$4 sm:$0xff]  }
 0xa28   :  { %9949 = vmatpush1.bf16.msra.mxu1 %v15207_v15  ;;  %v15276_v15 = vld [vmem:[%s21206_s5 + $0x88] ss:$16 sps:$4 sm:$0xff]  }
 0xa29   :  { %9950 = vmatprep.subr.bf16.mxu1 %v15215_v5  ;;  %v15279_v5 = vld [vmem:[%s21206_s5 + $0xa8] ss:$16 sps:$4 sm:$0xff]  }
 0xa2a   :  { %v15779_v42 = vpop.eup %15778 }
 0xa2b   :  { %v8699_v20 = vmul.f32 %v15779_v42, %v8694_v17  ;;  %v15282_v17 = vld [vmem:[%s21206_s5 + $0xc8] ss:$16 sps:$4 sm:$0xff]  }
 0xa2c   :  { %9951 = vmatpush1.bf16.msra.mxu1 %v15213_v32  ;;  %v15284_v32 = vld [vmem:[%s21206_s5 + $0xcc] ss:$16 sps:$4 sm:$0xff]   ;;  %v15285_v42 = vld [vmem:[%s21206_s5 + $0xe8] ss:$16 sps:$4 sm:$0xff]  }
 0xa2d   :  { %10178 = vmatprep.subr.bf16.mxu1 %v15221_v48  ;;  %v19972_v38 = vpack.c.bf16 %v8699_v20, %v8699_v20  ;;  %v15287_v48 = vld [vmem:[%s21206_s5 + $0xec] ss:$16 sps:$4 sm:$0xff]  }
 0xa2e   :  { %v15290_v20 = vld [vmem:[%s21205_s4 + $0xc] ss:$16 sps:$4 sm:$0xff]  }
 0xa2f   :  { %8830 = vmatmul.mubr.bf16.vlgmr.msra.gmra.mrb[140].mxu0 %v19972_v38  ;;  %9969 = vmatmul.mubr.bf16.vlgmr.msra.gmra.mrb[152].mxu1 %v19972_v38 }
 0xa30   :  { %9079 = vmatpush1.bf16.msra.mxu0 %v15216_v12  ;;  %10179 = vmatpush1.bf16.msra.mxu1 %v15219_v8  ;;  %v15288_v12 = vld [vmem:[%s21205_s4 + $0x8] ss:$16 sps:$4 sm:$0xff]   ;;  %v15293_v8 = vld [vmem:[%s21205_s4 + $0x2c] ss:$16 sps:$4 sm:$0xff]  }
 0xa31   :  { %9080 = vmatprep.subr.bf16.mxu0 %v15224_v53  ;;  %10180 = vmatprep.subr.bf16.mxu1 %v15227_v41  ;;  %v15291_v53 = vld [vmem:[%s21205_s4 + $0x28] ss:$16 sps:$4 sm:$0xff]   ;;  %v15296_v41 = vld [vmem:[%s21205_s4 + $0x4c] ss:$16 sps:$4 sm:$0xff]  }
 0xa32   :  { %9110 = vmatprep.mubr.bf16.mxu0 %v21264_v29  ;;  %10210 = vmatprep.mubr.bf16.mxu1 %v21264_v29 }
 0xa34   :  { %9081 = vmatpush1.bf16.msra.mxu0 %v15222_v13  ;;  %10181 = vmatpush1.bf16.msra.mxu1 %v15225_v43  ;;  %v15294_v13 = vld [vmem:[%s21205_s4 + $0x48] ss:$16 sps:$4 sm:$0xff]   ;;  %v15299_v43 = vld [vmem:[%s21205_s4 + $0x6c] ss:$16 sps:$4 sm:$0xff]  }
 0xa35   :  { %9082 = vmatprep.subr.bf16.mxu0 %v15230_v61  ;;  %10182 = vmatprep.subr.bf16.mxu1 %v15233_v51  ;;  %v15297_v61 = vld [vmem:[%s21205_s4 + $0x68] ss:$16 sps:$4 sm:$0xff]   ;;  %v15302_v51 = vld [vmem:[%s21205_s4 + $0x8c] ss:$16 sps:$4 sm:$0xff]  }
 0xa38   :  { %9083 = vmatpush1.bf16.msra.mxu0 %v15228_v62  ;;  %10183 = vmatpush1.bf16.msra.mxu1 %v15231_v11  ;;  %v15300_v62 = vld [vmem:[%s21205_s4 + $0x88] ss:$16 sps:$4 sm:$0xff]   ;;  %v15305_v11 = vld [vmem:[%s21205_s4 + $0xac] ss:$16 sps:$4 sm:$0xff]  }
 0xa39   :  { %9084 = vmatprep.subr.bf16.mxu0 %v15236_v2  ;;  %10184 = vmatprep.subr.bf16.mxu1 %v15239_v56  ;;  %v15303_v56 = vld [vmem:[%s21205_s4 + $0xa8] ss:$16 sps:$4 sm:$0xff]  }
 0xa3c   :  { %9085 = vmatpush1.bf16.msra.mxu0 %v15234_v33  ;;  %10185 = vmatpush1.bf16.msra.mxu1 %v15237_v40  ;;  %v21292_v33 = vld [vmem:[#allocation26_spill] sm:$0xff] }
 0xa3d   :  { %9086 = vmatprep.subr.bf16.mxu0 %v15242_v23  ;;  %10186 = vmatprep.subr.bf16.mxu1 %v15245_v50  ;;  %v15308_v50 = vld [vmem:[%s21205_s4 + $0xcc] ss:$16 sps:$4 sm:$0xff]  }
 0xa40   :  { %9087 = vmatpush1.bf16.msra.mxu0 %v15240_v54  ;;  %10187 = vmatpush1.bf16.msra.mxu1 %v15243_v63  ;;  %v21293_v54 = vld [vmem:[#allocation28_spill] sm:$0xff] }
 0xa41   :  { %9088 = vmatprep.subr.bf16.mxu0 %v15248_v31  ;;  %10188 = vmatprep.subr.bf16.mxu1 %v15251_v3 }
 0xa44   :  { %9089 = vmatpush1.bf16.msra.mxu0 %v15246_v49  ;;  %10189 = vmatpush1.bf16.msra.mxu1 %v15249_v55  ;;  %v15306_v49 = vld [vmem:[%s21205_s4 + $0xc8] ss:$16 sps:$4 sm:$0xff]   ;;  %v15311_v55 = vld [vmem:[%s21205_s4 + $0xec] ss:$16 sps:$4 sm:$0xff]  }
 0xa45   :  { %9090 = vmatprep.subr.bf16.mxu0 %v15254_v16  ;;  %10190 = vmatprep.subr.bf16.mxu1 %v15257_v37  ;;  %v15309_v16 = vld [vmem:[%s21205_s4 + $0xe8] ss:$16 sps:$4 sm:$0xff]   ;;  %v15314_v37 = vld [vmem:[%s21209_s8 + $0xc] ss:$16 sps:$4 sm:$0xff]  }
 0xa48   :  { %9091 = vmatpush1.bf16.msra.mxu0 %v15252_v39  ;;  %10191 = vmatpush1.bf16.msra.mxu1 %v15255_v58  ;;  %v15312_v39 = vld [vmem:[%s21209_s8 + $0x8] ss:$16 sps:$4 sm:$0xff]   ;;  %v15317_v58 = vld [vmem:[%s21209_s8 + $0x2c] ss:$16 sps:$4 sm:$0xff]  }
 0xa49   :  { %9092 = vmatprep.subr.bf16.mxu0 %v15260_v14  ;;  %10192 = vmatprep.subr.bf16.mxu1 %v15263_v36  ;;  %v15315_v14 = vld [vmem:[%s21209_s8 + $0x28] ss:$16 sps:$4 sm:$0xff]   ;;  %v15320_v36 = vld [vmem:[%s21209_s8 + $0x4c] ss:$16 sps:$4 sm:$0xff]  }
 0xa4c   :  { %9093 = vmatpush1.bf16.msra.mxu0 %v15258_v60  ;;  %10193 = vmatpush1.bf16.msra.mxu1 %v15261_v52  ;;  %v15318_v60 = vld [vmem:[%s21209_s8 + $0x48] ss:$16 sps:$4 sm:$0xff]  }
 0xa4d   :  { %9407 = vmatprep.subr.bf16.mxu0 %v15266_v6  ;;  %v15321_v52 = vld [vmem:[%s21209_s8 + $0x68] ss:$16 sps:$4 sm:$0xff]   ;;  %v15326_v6 = vld [vmem:[%s21209_s8 + $0x8c] ss:$16 sps:$4 sm:$0xff]  }
 0xa4f   :  { %9111 = vmatmul.mubr.bf16.vlgmr.msra.gmra.mrb[144].mxu0 %v19792_v18  ;;  %10211 = vmatmul.mubr.bf16.vlgmr.msra.gmra.mrb[156].mxu1 %v19857_v28 }
 0xa50   :  { %9408 = vmatpush1.bf16.msra.mxu0 %v15264_v22  ;;  %9439 = vmatprep.mubr.bf16.mxu0 %v21264_v29  ;;  %v15324_v22 = vld [vmem:[%s21209_s8 + $0x88] ss:$16 sps:$4 sm:$0xff]  }
 0xa51   :  { %9409 = vmatprep.subr.bf16.mxu0 %v15269_v25  ;;  %10411 = vmatprep.mubr.bf16.mxu1 %v21264_v29  ;;  %v15329_v25 = vld [vmem:[%s21209_s8 + $0xac] ss:$16 sps:$4 sm:$0xff]  }
 0xa54   :  { %9410 = vmatpush1.bf16.msra.mxu0 %v15267_v4  ;;  %v15327_v4 = vld [vmem:[%s21209_s8 + $0xa8] ss:$16 sps:$4 sm:$0xff]  }
 0xa55   :  { %9411 = vmatprep.subr.bf16.mxu0 %v15272_v1  ;;  %v15332_v1 = vld [vmem:[%s21209_s8 + $0xcc] ss:$16 sps:$4 sm:$0xff]  }
 0xa58   :  { %9412 = vmatpush1.bf16.msra.mxu0 %v15270_v46  ;;  %v15330_v46 = vld [vmem:[%s21209_s8 + $0xc8] ss:$16 sps:$4 sm:$0xff]  }
 0xa59   :  { %9413 = vmatprep.subr.bf16.mxu0 %v15275_v7  ;;  %v15335_v7 = vld [vmem:[%s21209_s8 + $0xec] ss:$16 sps:$4 sm:$0xff]  }
 0xa5c   :  { %9414 = vmatpush1.bf16.msra.mxu0 %v15273_v10  ;;  %v15333_v10 = vld [vmem:[%s21209_s8 + $0xe8] ss:$16 sps:$4 sm:$0xff]  }
 0xa5d   :  { %9415 = vmatprep.subr.bf16.mxu0 %v15278_v27  ;;  %v15338_v27 = vld [vmem:[%s21208_s7 + $0xc] ss:$16 sps:$4 sm:$0xff]  }
 0xa60   :  { %9416 = vmatpush1.bf16.msra.mxu0 %v15276_v15  ;;  %v15336_v15 = vld [vmem:[%s21208_s7 + $0x8] ss:$16 sps:$4 sm:$0xff]  }
 0xa61   :  { %9417 = vmatprep.subr.bf16.mxu0 %v15281_v19  ;;  %v15341_v19 = vld [vmem:[%s21208_s7 + $0x2c] ss:$16 sps:$4 sm:$0xff]  }
 0xa64   :  { %9418 = vmatpush1.bf16.msra.mxu0 %v15279_v5  ;;  %v15339_v5 = vld [vmem:[%s21208_s7 + $0x28] ss:$16 sps:$4 sm:$0xff]  }
 0xa65   :  { %9419 = vmatprep.subr.bf16.mxu0 %v15284_v32  ;;  %v15344_v32 = vld [vmem:[%s21208_s7 + $0x4c] ss:$16 sps:$4 sm:$0xff]  }
 0xa68   :  { %9420 = vmatpush1.bf16.msra.mxu0 %v15282_v17  ;;  %v15342_v17 = vld [vmem:[%s21208_s7 + $0x48] ss:$16 sps:$4 sm:$0xff]  }
 0xa69   :  { %9421 = vmatprep.subr.bf16.mxu0 %v15287_v48  ;;  %v15345_v48 = vld [vmem:[%s21208_s7 + $0x68] ss:$16 sps:$4 sm:$0xff]  }
 0xa6c   :  { %9422 = vmatpush1.bf16.msra.mxu0 %v15285_v42  ;;  %v15350_v42 = vld [vmem:[%s21208_s7 + $0x8c] ss:$16 sps:$4 sm:$0xff]  }
 0xa6d   :  { %9649 = vmatprep.subr.bf16.mxu0 %v15290_v20  ;;  %v15348_v20 = vld [vmem:[%s21208_s7 + $0x88] ss:$16 sps:$4 sm:$0xff]  }
 0xa6f   :  { %9440 = vmatmul.mubr.bf16.vlgmr.msra.gmra.mrb[148].mxu0 %v19857_v28 }
 0xa70   :  { %9650 = vmatpush1.bf16.msra.mxu0 %v15288_v12  ;;  %9681 = vmatprep.mubr.bf16.mxu0 %v21264_v29  ;;  %v15353_v12 = vld [vmem:[%s21208_s7 + $0xac] ss:$16 sps:$4 sm:$0xff]  }
 0xa71   :  { %9651 = vmatprep.subr.bf16.mxu0 %v15293_v8  ;;  %v15351_v8 = vld [vmem:[%s21208_s7 + $0xa8] ss:$16 sps:$4 sm:$0xff]  }
 0xa74   :  { %9652 = vmatpush1.bf16.msra.mxu0 %v15291_v53  ;;  %v15356_v53 = vld [vmem:[%s21208_s7 + $0xcc] ss:$16 sps:$4 sm:$0xff]  }
 0xa75   :  { %9653 = vmatprep.subr.bf16.mxu0 %v15296_v41 }
 0xa78   :  { %9654 = vmatpush1.bf16.msra.mxu0 %v15294_v13 }
 0xa79   :  { %9655 = vmatprep.subr.bf16.mxu0 %v15299_v43 }
 0xa7c   :  { %9656 = vmatpush1.bf16.msra.mxu0 %v15297_v61  ;;  %v15354_v61 = vld [vmem:[%s21208_s7 + $0xc8] ss:$16 sps:$4 sm:$0xff]  }
 0xa7d   :  { %9657 = vmatprep.subr.bf16.mxu0 %v15302_v51 }
 0xa80   :  { %9658 = vmatpush1.bf16.msra.mxu0 %v15300_v62  ;;  %v9071_v2 = vpop.f32.mrb[140].mxu1  ;;  %v15359_v62 = vld [vmem:[%s21208_s7 + $0xec] ss:$16 sps:$4 sm:$0xff]  }
 0xa81   :  { %v20153_v40 = vadd.f32 %v9071_v2, %v21292_v33  ;;  %v9073_v23 = vpop.f32.mrb[141].mxu1  ;;  %9659 = vmatprep.subr.bf16.mxu0 %v15305_v11  ;;  %v15357_v11 = vld [vmem:[%s21208_s7 + $0xe8] ss:$16 sps:$4 sm:$0xff]  }
 0xa82   :  { %v20159_v63 = vadd.f32 %v9073_v23, %v21293_v54  ;;  %v9075_v31 = vpop.f32.mrb[142].mxu1 }
 0xa83   :  { %v9076_v3 = vpop.f32.mrb[143].mxu1 }
 0xa84   :  { %9660 = vmatpush1.bf16.msra.mxu0 %v15303_v56  ;;  %v15362_v56 = vld [vmem:[%s21206_s5 + $0x4] ss:$16 sps:$4 sm:$0xff]  }
 0xa85   :  { %9661 = vmatprep.subr.bf16.mxu0 %v15308_v50  ;;  %v15360_v50 = vld [vmem:[%s21206_s5] ss:$16 sps:$4 sm:$0xff]  }
 0xa88   :  { %9662 = vmatpush1.bf16.msra.mxu0 %v15306_v49  ;;  %v15363_v49 = vld [vmem:[%s21206_s5 + $0x20] ss:$16 sps:$4 sm:$0xff]  }
 0xa89   :  { %9663 = vmatprep.subr.bf16.mxu0 %v15311_v55  ;;  %v15368_v55 = vld [vmem:[%s21206_s5 + $0x44] ss:$16 sps:$4 sm:$0xff]  }
 0xa8c   :  { %9664 = vmatpush1.bf16.msra.mxu0 %v15309_v16  ;;  %v15366_v16 = vld [vmem:[%s21206_s5 + $0x40] ss:$16 sps:$4 sm:$0xff]  }
 0xa8d   :  { %9977 = vmatprep.subr.bf16.mxu0 %v15314_v37  ;;  %v15371_v37 = vld [vmem:[%s21206_s5 + $0x64] ss:$16 sps:$4 sm:$0xff]  }
 0xa8f   :  { %9682 = vmatmul.mubr.bf16.vlgmr.msra.gmra.mrb[152].mxu0 %v19792_v18  ;;  %v15323_v18 = vld [vmem:[%s21209_s8 + $0x6c] ss:$16 sps:$4 sm:$0xff]  }
 0xa90   :  { %9978 = vmatpush1.bf16.msra.mxu0 %v15312_v39  ;;  %10009 = vmatprep.mubr.bf16.mxu0 %v21264_v29  ;;  %v15369_v39 = vld [vmem:[%s21206_s5 + $0x60] ss:$16 sps:$4 sm:$0xff]  }
 0xa91   :  { %9979 = vmatprep.subr.bf16.mxu0 %v15317_v58  ;;  %v15374_v58 = vld [vmem:[%s21206_s5 + $0x84] ss:$16 sps:$4 sm:$0xff]  }
 0xa94   :  { %9980 = vmatpush1.bf16.msra.mxu0 %v15315_v14  ;;  %v15372_v14 = vld [vmem:[%s21206_s5 + $0x80] ss:$16 sps:$4 sm:$0xff]  }
 0xa95   :  { %9981 = vmatprep.subr.bf16.mxu0 %v15320_v36  ;;  %v15377_v36 = vld [vmem:[%s21206_s5 + $0xa4] ss:$16 sps:$4 sm:$0xff]  }
 0xa98   :  { %9982 = vmatpush1.bf16.msra.mxu0 %v15318_v60  ;;  %v15375_v60 = vld [vmem:[%s21206_s5 + $0xa0] ss:$16 sps:$4 sm:$0xff]  }
 0xa99   :  { %9983 = vmatprep.subr.bf16.mxu0 %v15323_v18  ;;  %v15380_v18 = vld [vmem:[%s21206_s5 + $0xc4] ss:$16 sps:$4 sm:$0xff]  }
 0xa9c   :  { %9984 = vmatpush1.bf16.msra.mxu0 %v15321_v52  ;;  %v15378_v52 = vld [vmem:[%s21206_s5 + $0xc0] ss:$16 sps:$4 sm:$0xff]  }
 0xa9d   :  { %9985 = vmatprep.subr.bf16.mxu0 %v15326_v6  ;;  %v15383_v6 = vld [vmem:[%s21206_s5 + $0xe4] ss:$16 sps:$4 sm:$0xff]  }
 0xaa0   :  { %9986 = vmatpush1.bf16.msra.mxu0 %v15324_v22  ;;  %v15381_v22 = vld [vmem:[%s21206_s5 + $0xe0] ss:$16 sps:$4 sm:$0xff]  }
 0xaa1   :  { %9987 = vmatprep.subr.bf16.mxu0 %v15329_v25 }
 0xaa4   :  { %9988 = vmatpush1.bf16.msra.mxu0 %v15327_v4 }
 0xaa5   :  { %9989 = vmatprep.subr.bf16.mxu0 %v15332_v1  ;;  %v15386_v1 = vld [vmem:[%s21205_s4 + $0x4] ss:$16 sps:$4 sm:$0xff]  }
 0xaa8   :  { %9990 = vmatpush1.bf16.msra.mxu0 %v15330_v46 }
 0xaa9   :  { %9991 = vmatprep.subr.bf16.mxu0 %v15335_v7 }
 0xaac   :  { %9992 = vmatpush1.bf16.msra.mxu0 %v15333_v10 }
 0xaad   :  { %10219 = vmatprep.subr.bf16.mxu0 %v15338_v27 }
 0xaaf   :  { %10010 = vmatmul.mubr.bf16.vlgmr.msra.gmra.mrb[156].mxu0 %v19972_v38  ;;  %v15347_v38 = vld [vmem:[%s21208_s7 + $0x6c] ss:$16 sps:$4 sm:$0xff]  }
 0xab0   :  { %10220 = vmatpush1.bf16.msra.mxu0 %v15336_v15  ;;  %10251 = vmatprep.mubr.bf16.mxu0 %v21264_v29 }
 0xab1   :  { %10221 = vmatprep.subr.bf16.mxu0 %v15341_v19 }
 0xab4   :  { %10222 = vmatpush1.bf16.msra.mxu0 %v15339_v5 }
 0xab5   :  { %10223 = vmatprep.subr.bf16.mxu0 %v15344_v32 }
 0xab8   :  { %10224 = vmatpush1.bf16.msra.mxu0 %v15342_v17  ;;  %v9127_v17 = vmul.f32 0.5, %v20159_v63 }
 0xab9   :  { %10225 = vmatprep.subr.bf16.mxu0 %v15347_v38  ;;  %v9123_v38 = vmul.f32 0.5, %v20153_v40 }
 0xaba   :  { %15780 = vtanh.f32 %v9127_v17  ;;  %v15458_v17 = vld [vmem:[%s21206_s5 + $0xc] ss:$16 sps:$4 sm:$0xff]  }
 0xabb   :  { %15782 = vtanh.f32 %v9123_v38 }
 0xabc   :  { %10226 = vmatpush1.bf16.msra.mxu0 %v15345_v48 }
 0xabd   :  { %10227 = vmatprep.subr.bf16.mxu0 %v15350_v42 }
 0xac0   :  { %10228 = vmatpush1.bf16.msra.mxu0 %v15348_v20  ;;  %v21294_v20 = vld [vmem:[#allocation27_spill] sm:$0xff] }
 0xac1   :  { %10229 = vmatprep.subr.bf16.mxu0 %v15353_v12 }
 0xac2   :  { %v9400_v41 = vpop.f32.mrb[144].mxu1 }
 0xac3   :  { %v9402_v13 = vpop.f32.mrb[145].mxu1 }
 0xac4   :  { %10230 = vmatpush1.bf16.msra.mxu0 %v15351_v8  ;;  %v9404_v43 = vpop.f32.mrb[146].mxu1 }
 0xac5   :  { %v9405_v51 = vpop.f32.mrb[147].mxu1  ;;  %10231 = vmatprep.subr.bf16.mxu0 %v15356_v53  ;;  %v21295_v43 = vld [vmem:[#allocation29_spill] sm:$0xff] }
 0xac8   :  { %10232 = vmatpush1.bf16.msra.mxu0 %v15354_v61 }
 0xac9   :  { %10233 = vmatprep.subr.bf16.mxu0 %v15359_v62  ;;  %v20345_v62 = vld [vmem:[%s21211_s10] ss:$8 sps:$4 sm:$0xff]  }
 0xacc   :  { %10234 = vmatpush1.bf16.msra.mxu0 %v15357_v11  ;;  %v15781_v11 = vpop.eup %15780 }
 0xacd   :  { %10648 = vmatprep.subr.bf16.mxu0 %v15362_v56 }
 0xacf   :  { %10252 = vmatmul.mubr.bf16.vlgmr.msra.gmra.mrb[160].mxu0 %v19857_v28  ;;  %v15365_v28 = vld [vmem:[%s21206_s5 + $0x24] ss:$16 sps:$4 sm:$0xff]  }
 0xad0   :  { %10680 = vmatprep.mubr.bf16.mxu0 %v21264_v29  ;;  %10649 = vmatpush1.bf16.msra.mxu0 %v15360_v50  ;;  %v20352_v50 = vld [vmem:[%s21211_s10 + $0x14] ss:$8 sps:$4 sm:$0xff]  }
 0xad1   :  { %10650 = vmatprep.subr.bf16.mxu0 %v15365_v28  ;;  %v20357_v28 = vld [vmem:[%s21211_s10 + $0x10] ss:$8 sps:$4 sm:$0xff]  }
 0xad4   :  { %10651 = vmatpush1.bf16.msra.mxu0 %v15363_v49 }
 0xad5   :  { %10652 = vmatprep.subr.bf16.mxu0 %v15368_v55  ;;  %v20364_v55 = vld [vmem:[%s21211_s10 + $0x24] ss:$8 sps:$4 sm:$0xff]  }
 0xad8   :  { %10653 = vmatpush1.bf16.msra.mxu0 %v15366_v16 }
 0xad9   :  { %10654 = vmatprep.subr.bf16.mxu0 %v15371_v37  ;;  %v20369_v37 = vld [vmem:[%s21211_s10 + $0x20] ss:$8 sps:$4 sm:$0xff]  }
 0xadc   :  { %10655 = vmatpush1.bf16.msra.mxu0 %v15369_v39 }
 0xadd   :  { %10656 = vmatprep.subr.bf16.mxu0 %v15374_v58 }
 0xae0   :  { %10657 = vmatpush1.bf16.msra.mxu0 %v15372_v14  ;;  %v20376_v14 = vld [vmem:[%s21211_s10 + $0x34] ss:$8 sps:$4 sm:$0xff]  }
 0xae1   :  { %10658 = vmatprep.subr.bf16.mxu0 %v15377_v36 }
 0xae2   :  { %v9642_v2 = vpop.f32.mrb[148].mxu1 }
 0xae3   :  { %v20275_v33 = vadd.f32 %v9642_v2, %v9400_v41  ;;  %v9644_v23 = vpop.f32.mrb[149].mxu1 }
 0xae4   :  { %v20280_v54 = vadd.f32 %v9644_v23, %v9402_v13  ;;  %v9646_v31 = vpop.f32.mrb[150].mxu1  ;;  %10659 = vmatpush1.bf16.msra.mxu0 %v15375_v60  ;;  %v20337_v13 = vld [vmem:[%s21211_s10 + $0x4] ss:$8 sps:$4 sm:$0xff]   ;;  %v15783_v23 = vpop.eup %15782 }
 0xae5   :  { %v9647_v3 = vpop.f32.mrb[151].mxu1  ;;  %10660 = vmatprep.subr.bf16.mxu0 %v15380_v18  ;;  %10379 = vmatprep.subr.bf16.mxu1 %v20337_v13  ;;  %v9129_v31 = vadd.f32 1.0, %v15781_v11  ;;  %v9125_v49 = vadd.f32 1.0, %v15783_v23  ;;  %v20382_v18 = vld [vmem:[%s21211_s10 + $0x30] ss:$8 sps:$4 sm:$0xff]  }
 0xae6   :  { %10380 = vmatpush1.bf16.msra.mxu1 %v20345_v62 }
 0xae7   :  { %10381 = vmatprep.subr.bf16.mxu1 %v20352_v50  ;;  %v9130_v16 = vmul.f32 0.5, %v9129_v31  ;;  %v9126_v39 = vmul.f32 0.5, %v9125_v49 }
 0xae8   :  { %10661 = vmatpush1.bf16.msra.mxu0 %v15378_v52 }
 0xae9   :  { %10662 = vmatprep.subr.bf16.mxu0 %v15383_v6  ;;  %v9136_v36 = vmul.f32 %v9130_v16, %v19762_v26  ;;  %v20389_v6 = vld [vmem:[%s21211_s10 + $0x44] ss:$8 sps:$4 sm:$0xff]   ;;  %v20394_v26 = vld [vmem:[%s21211_s10 + $0x40] ss:$8 sps:$4 sm:$0xff]  }
 0xaea   :  { %10382 = vmatpush1.bf16.msra.mxu1 %v20357_v28 }
 0xaeb   :  { %10383 = vmatprep.subr.bf16.mxu1 %v20364_v55 }
 0xaec   :  { %10663 = vmatpush1.bf16.msra.mxu0 %v15381_v22 }
 0xaed   :  { %10890 = vmatprep.subr.bf16.mxu0 %v15386_v1 }
 0xaee   :  { %10384 = vmatpush1.bf16.msra.mxu1 %v20369_v37 }
 0xaef   :  { %10385 = vmatprep.subr.bf16.mxu1 %v20376_v14 }
 0xaf2   :  { %10386 = vmatpush1.bf16.msra.mxu1 %v20382_v18 }
 0xaf3   :  { %10387 = vmatprep.subr.bf16.mxu1 %v20389_v6 }
 0xaf6   :  { %10388 = vmatpush1.bf16.msra.mxu1 %v20394_v26 }
 0xb02   :  { %v8831_v25 = vpop.f32.mrb[140].mxu0  ;;  %v9970_v4 = vpop.f32.mrb[152].mxu1 }
 0xb03   :  { %v8832_v46 = vadd.f32 %v8831_v25, %v17922_v47  ;;  %v8833_v7 = vpop.f32.mrb[141].mxu0  ;;  %v9972_v10 = vpop.f32.mrb[153].mxu1  ;;  %v20401_v25 = vld [vmem:[%s21211_s10 + $0x50] ss:$8 sps:$4 sm:$0xff]  }
 0xb04   :  { %v8834_v27 = vadd.f32 %v8833_v7, %v17925_v0  ;;  %v8835_v15 = vpop.f32.mrb[142].mxu0  ;;  %v9974_v19 = vpop.f32.mrb[154].mxu1  ;;  %v20418_v7 = vld [vmem:[%s21211_s10 + $0x64] ss:$8 sps:$4 sm:$0xff]  }
 0xb05   :  { %8838 = vst [vmem:[#allocation3 + $0x40] sm:$0xff] %v8832_v46  ;;  %v8836_v5 = vpop.f32.mrb[143].mxu0  ;;  %v9975_v32 = vpop.f32.mrb[155].mxu1  ;;  %v20413_v46 = vld [vmem:[%s21211_s10 + $0x60] ss:$8 sps:$4 sm:$0xff]  }
 0xb06   :  { %8839 = vst [vmem:[#allocation3 + $0x48] sm:$0xff] %v8834_v27  ;;  %v20425_v15 = vld [vmem:[%s21211_s10 + $0x70] ss:$8 sps:$4 sm:$0xff]   ;;  %v20430_v19 = vld [vmem:[%s21211_s10 + $0x74] ss:$8 sps:$4 sm:$0xff]  }
 0xb22   :  { %v9112_v48 = vpop.f32.mrb[144].mxu0  ;;  %v10212_v42 = vpop.f32.mrb[156].mxu1 }
 0xb23   :  { %v9121_v12 = vadd.f32 %v9112_v48, %v21294_v20  ;;  %v20332_v8 = vadd.f32 %v10212_v42, %v9970_v4  ;;  %v9114_v53 = vpop.f32.mrb[145].mxu0  ;;  %v10214_v41 = vpop.f32.mrb[157].mxu1  ;;  %v20406_v4 = vld [vmem:[%s21211_s10 + $0x54] ss:$8 sps:$4 sm:$0xff]   ;;  %v9691_v20 = vadd.f32 %v20280_v54, %v16932_v9 }
 0xb24   :  { %v9122_v61 = vadd.f32 %v9114_v53, %v21295_v43  ;;  %v20340_v63 = vadd.f32 %v10214_v41, %v9972_v10  ;;  %v9116_v40 = vpop.f32.mrb[146].mxu0  ;;  %v10216_v51 = vpop.f32.mrb[158].mxu1  ;;  %10389 = vmatprep.subr.bf16.mxu1 %v20406_v4 }
 0xb25   :  { %15784 = vtanh.f32 %v9121_v12  ;;  %v9117_v2 = vpop.f32.mrb[147].mxu0  ;;  %v10217_v56 = vpop.f32.mrb[159].mxu1  ;;  %10390 = vmatpush1.bf16.msra.mxu1 %v20401_v25  ;;  %v9690_v12 = vadd.f32 %v20275_v33, %v21276_v45  ;;  %v9698_v53 = vmul.f32 0.5, %v9691_v20 }
 0xb26   :  { %v9132_v3 = vmul.f32 0.5, %v9122_v61  ;;  %10391 = vmatprep.subr.bf16.mxu1 %v20418_v7 }
 0xb27   :  { %v9694_v41 = vmul.f32 0.5, %v9690_v12 }
 0xb28   :  { %15786 = vtanh.f32 %v9132_v3 }
 0xb29   :  { %10392 = vmatpush1.bf16.msra.mxu1 %v20413_v46 }
 0xb2a   :  { %10393 = vmatprep.subr.bf16.mxu1 %v20430_v19 }
 0xb2d   :  { %10394 = vmatpush1.bf16.msra.mxu1 %v20425_v15 }
 0xb2e   :  { %10689 = vmatprep.subr.bf16.mxu1 %v15458_v17 }
 0xb2f   :  { %v15785_v58 = vpop.eup %15784 }
 0xb30   :  { %v9137_v60 = vmul.f32 %v15785_v58, %v9126_v39 }
 0xb32   :  { %v9138_v52 = vadd.f32 %v9137_v60, %v9136_v36  ;;  %v15787_v22 = vpop.eup %15786 }
 0xb33   :  { %v9134_v1 = vadd.f32 1.0, %v15787_v22 }
 0xb34   :  { %15788 = vtanh.f32 %v9138_v52  ;;  %12420 = vst [vmem:[#allocation7] sm:$0xff] %v9138_v52 }
 0xb35   :  { %v9135_v10 = vmul.f32 0.5, %v9134_v1  ;;  %15790 = vtanh.f32 %v9698_v53  ;;  %v15387_v53 = vld [vmem:[%s21205_s4 + $0x20] ss:$16 sps:$4 sm:$0xff]  }
 0xb36   :  { %15792 = vtanh.f32 %v9694_v41  ;;  %v15392_v41 = vld [vmem:[%s21205_s4 + $0x44] ss:$16 sps:$4 sm:$0xff]  }
 0xb3e   :  { %v15789_v27 = vpop.eup %15788 }
 0xb3f   :  { %v20432_v5 = vmul.f32 %v15789_v27, %v9135_v10  ;;  %v15791_v31 = vpop.eup %15790 }
 0xb40   :  { %v15793_v54 = vpop.eup %15792  ;;  %v9700_v3 = vadd.f32 1.0, %v15791_v31  ;;  %v10260_v31 = vadd.f32 %v20332_v8, %v17541_v35  ;;  %v15405_v8 = vld [vmem:[%s21205_s4 + $0xe0] ss:$16 sps:$4 sm:$0xff]  }
 0xb41   :  { %12415 = vst [vmem:[#allocation5] sm:$0xff] %v20432_v5  ;;  %v9696_v33 = vadd.f32 1.0, %v15793_v54  ;;  %v15404_v54 = vld [vmem:[%s21205_s4 + $0xc4] ss:$16 sps:$4 sm:$0xff]  }
 0xb42   :  { %v9441_v32 = vpop.f32.mrb[148].mxu0  ;;  %v9701_v16 = vmul.f32 0.5, %v9700_v3 }
 0xb43   :  { %v9443_v38 = vpop.f32.mrb[149].mxu0  ;;  %v9697_v39 = vmul.f32 0.5, %v9696_v33  ;;  %v15407_v33 = vld [vmem:[%s21205_s4 + $0xe4] ss:$16 sps:$4 sm:$0xff]  }
 0xb44   :  { %v9445_v48 = vpop.f32.mrb[150].mxu0  ;;  %v9707_v36 = vmul.f32 %v9701_v16, %v19851_v34  ;;  %v15389_v34 = vld [vmem:[%s21205_s4 + $0x24] ss:$16 sps:$4 sm:$0xff]  }
 0xb45   :  { %v9446_v42 = vpop.f32.mrb[151].mxu0  ;;  %v20506_v16 = vld [vmem:[%s21209_s8 + $0x4] ss:$16 sps:$4 sm:$0xff]  }
 0xb62   :  { %v9683_v43 = vpop.f32.mrb[152].mxu0 }
 0xb63   :  { %v9684_v61 = vadd.f32 %v9683_v43, %v9441_v32  ;;  %v9685_v40 = vpop.f32.mrb[153].mxu0  ;;  %v15390_v43 = vld [vmem:[%s21205_s4 + $0x40] ss:$16 sps:$4 sm:$0xff]  }
 0xb64   :  { %v9686_v51 = vadd.f32 %v9685_v40, %v9443_v38  ;;  %v9687_v11 = vpop.f32.mrb[154].mxu0  ;;  %v15384_v38 = vld [vmem:[%s21205_s4] ss:$16 sps:$4 sm:$0xff]  }
 0xb65   :  { %v9692_v2 = vadd.f32 %v9684_v61, %v21277_v59  ;;  %v9688_v56 = vpop.f32.mrb[155].mxu0  ;;  %v15395_v61 = vld [vmem:[%s21205_s4 + $0x64] ss:$16 sps:$4 sm:$0xff]   ;;  %v15393_v40 = vld [vmem:[%s21205_s4 + $0x60] ss:$16 sps:$4 sm:$0xff]  }
 0xb66   :  { %v9693_v23 = vadd.f32 %v9686_v51, %v21278_v21  ;;  %v15398_v51 = vld [vmem:[%s21205_s4 + $0x84] ss:$16 sps:$4 sm:$0xff]   ;;  %v15396_v11 = vld [vmem:[%s21205_s4 + $0x80] ss:$16 sps:$4 sm:$0xff]   ;;  %v10261_v56 = vadd.f32 %v20340_v63, %v17547_v30  ;;  %v10264_v63 = vmul.f32 0.5, %v10260_v31 }
 0xb67   :  { %15794 = vtanh.f32 %v9692_v2  ;;  %v15401_v2 = vld [vmem:[%s21205_s4 + $0xa4] ss:$16 sps:$4 sm:$0xff]  }
 0xb68   :  { %v9703_v49 = vmul.f32 0.5, %v9693_v23  ;;  %v15399_v23 = vld [vmem:[%s21205_s4 + $0xa0] ss:$16 sps:$4 sm:$0xff]   ;;  %v10268_v3 = vmul.f32 0.5, %v10261_v56 }
 0xb6a   :  { %15796 = vtanh.f32 %v9703_v49  ;;  %v15402_v49 = vld [vmem:[%s21205_s4 + $0xc0] ss:$16 sps:$4 sm:$0xff]  }
 0xb71   :  { %v15795_v58 = vpop.eup %15794 }
 0xb72   :  { %v9708_v60 = vmul.f32 %v15795_v58, %v9697_v39  ;;  %v20511_v58 = vld [vmem:[%s21209_s8] ss:$16 sps:$4 sm:$0xff]  }
 0xb74   :  { %v20447_v52 = vadd.f32 %v9708_v60, %v9707_v36  ;;  %v15797_v22 = vpop.eup %15796 }
 0xb75   :  { %v9705_v1 = vadd.f32 1.0, %v15797_v22  ;;  %v20515_v22 = vpack.c.bf16 %v20432_v5, %v20432_v5  ;;  %v20530_v5 = vld [vmem:[%s21209_s8 + $0x20] ss:$16 sps:$4 sm:$0xff]  }
 0xb76   :  { %15798 = vtanh.f32 %v20447_v52 }
 0xb77   :  { %v9706_v10 = vmul.f32 0.5, %v9705_v1  ;;  %15800 = vtanh.f32 %v10268_v3  ;;  %v20521_v1 = vld [vmem:[%s21209_s8 + $0x24] ss:$16 sps:$4 sm:$0xff]  }
 0xb78   :  { %15802 = vtanh.f32 %v10264_v63  ;;  %v20574_v3 = vld [vmem:[%s21209_s8 + $0xa4] ss:$16 sps:$4 sm:$0xff]  }
 0xb79   :  { %v20589_v63 = vld [vmem:[%s21209_s8 + $0xc4] ss:$16 sps:$4 sm:$0xff]  }
 0xb80   :  { %v15799_v27 = vpop.eup %15798 }
 0xb81   :  { %v9711_v32 = vmul.f32 %v15799_v27, %v9706_v10 }
 0xb82   :  { %v10011_v17 = vpop.f32.mrb[156].mxu0 }
 0xb83   :  { %v10013_v48 = vpop.f32.mrb[157].mxu0  ;;  %v20453_v42 = vpack.c.bf16 %v9711_v32, %v9711_v32 }
 0xb84   :  { %v10015_v20 = vpop.f32.mrb[158].mxu0 }
 0xb85   :  { %v10016_v12 = vpop.f32.mrb[159].mxu0  ;;  %10681 = vmatmul.mubr.bf16.vlgmr.msra.gmra.mrb[164].mxu0 %v20453_v42 }
 0xb86   :  { %10891 = vmatpush1.bf16.msra.mxu0 %v15384_v38  ;;  %10922 = vmatprep.mubr.bf16.mxu0 %v21264_v29 }
 0xb87   :  { %10892 = vmatprep.subr.bf16.mxu0 %v15389_v34  ;;  %v15801_v34 = vpop.eup %15800 }
 0xb88   :  { %v15803_v20 = vpop.eup %15802  ;;  %v10270_v12 = vadd.f32 1.0, %v15801_v34  ;;  %v20622_v34 = vld [vmem:[%s21208_s7] ss:$16 sps:$4 sm:$0xff]  }
 0xb8a   :  { %10893 = vmatpush1.bf16.msra.mxu0 %v15387_v53 }
 0xb8b   :  { %10894 = vmatprep.subr.bf16.mxu0 %v15392_v41  ;;  %v20543_v41 = vld [vmem:[%s21209_s8 + $0x40] ss:$16 sps:$4 sm:$0xff]  }
 0xb8e   :  { %10895 = vmatpush1.bf16.msra.mxu0 %v15390_v43  ;;  %v20549_v43 = vld [vmem:[%s21209_s8 + $0x64] ss:$16 sps:$4 sm:$0xff]  }
 0xb8f   :  { %10896 = vmatprep.subr.bf16.mxu0 %v15395_v61  ;;  %v10266_v61 = vadd.f32 1.0, %v15803_v20 }
 0xb92   :  { %10897 = vmatpush1.bf16.msra.mxu0 %v15393_v40  ;;  %v10271_v40 = vmul.f32 0.5, %v10270_v12  ;;  %v15464_v12 = vld [vmem:[%s21206_s5 + $0x2c] ss:$16 sps:$4 sm:$0xff]  }
 0xb93   :  { %10898 = vmatprep.subr.bf16.mxu0 %v15398_v51  ;;  %v20555_v51 = vld [vmem:[%s21209_s8 + $0x60] ss:$16 sps:$4 sm:$0xff]  }
 0xb96   :  { %10899 = vmatpush1.bf16.msra.mxu0 %v15396_v11  ;;  %v20561_v11 = vld [vmem:[%s21209_s8 + $0x84] ss:$16 sps:$4 sm:$0xff]  }
 0xb97   :  { %10900 = vmatprep.subr.bf16.mxu0 %v15401_v2  ;;  %v10267_v2 = vmul.f32 0.5, %v10266_v61  ;;  %v15462_v61 = vld [vmem:[%s21206_s5 + $0x28] ss:$16 sps:$4 sm:$0xff]  }
 0xb9a   :  { %10901 = vmatpush1.bf16.msra.mxu0 %v15399_v23  ;;  %v10277_v23 = vmul.f32 %v10271_v40, %v19945_v44  ;;  %v20583_v44 = vld [vmem:[%s21209_s8 + $0xa0] ss:$16 sps:$4 sm:$0xff]  }
 0xb9b   :  { %10902 = vmatprep.subr.bf16.mxu0 %v15404_v54  ;;  %v20568_v54 = vld [vmem:[%s21209_s8 + $0x80] ss:$16 sps:$4 sm:$0xff]  }
 0xb9c   :  { %v20644_v40 = vld [vmem:[%s21208_s7 + $0x20] ss:$16 sps:$4 sm:$0xff]  }
 0xb9e   :  { %10903 = vmatpush1.bf16.msra.mxu0 %v15402_v49 }
 0xb9f   :  { %10904 = vmatprep.subr.bf16.mxu0 %v15407_v33 }
 0xba2   :  { %10905 = vmatpush1.bf16.msra.mxu0 %v15405_v8  ;;  %v10253_v39 = vpop.f32.mrb[160].mxu0  ;;  %v20595_v8 = vld [vmem:[%s21209_s8 + $0xc0] ss:$16 sps:$4 sm:$0xff]  }
 0xba3   :  { %v10254_v36 = vadd.f32 %v10253_v39, %v10011_v17  ;;  %v10255_v60 = vpop.f32.mrb[161].mxu0  ;;  %11218 = vmatprep.subr.bf16.mxu0 %v20506_v16 }
 0xba4   :  { %v10256_v10 = vadd.f32 %v10255_v60, %v10013_v48  ;;  %v10257_v27 = vpop.f32.mrb[162].mxu0  ;;  %v20537_v48 = vld [vmem:[%s21209_s8 + $0x44] ss:$16 sps:$4 sm:$0xff]   ;;  %v20607_v60 = vld [vmem:[%s21209_s8 + $0xe0] ss:$16 sps:$4 sm:$0xff]  }
 0xba5   :  { %v10262_v32 = vadd.f32 %v10254_v36, %v17554_v24  ;;  %10923 = vmatmul.mubr.bf16.vlgmr.msra.gmra.mrb[168].mxu0 %v20515_v22  ;;  %v10258_v38 = vpop.f32.mrb[163].mxu0  ;;  %v20601_v36 = vld [vmem:[%s21209_s8 + $0xe4] ss:$16 sps:$4 sm:$0xff]  }
 0xba6   :  { %v10263_v17 = vadd.f32 %v10256_v10, %v17562_v57  ;;  %11219 = vmatpush1.bf16.msra.mxu0 %v20511_v58  ;;  %11250 = vmatprep.mubr.bf16.mxu0 %v21264_v29  ;;  %v20613_v27 = vld [vmem:[%s21208_s7 + $0x4] ss:$16 sps:$4 sm:$0xff]  }
 0xba7   :  { %15804 = vtanh.f32 %v10262_v32  ;;  %11220 = vmatprep.subr.bf16.mxu0 %v20521_v1 }
 0xba8   :  { %v10273_v53 = vmul.f32 0.5, %v10263_v17  ;;  %v15456_v17 = vld [vmem:[%s21206_s5 + $0x8] ss:$16 sps:$4 sm:$0xff]  }
 0xbaa   :  { %11221 = vmatpush1.bf16.msra.mxu0 %v20530_v5  ;;  %15806 = vtanh.f32 %v10273_v53  ;;  %v20633_v53 = vld [vmem:[%s21208_s7 + $0x24] ss:$16 sps:$4 sm:$0xff]  }
 0xbab   :  { %11222 = vmatprep.subr.bf16.mxu0 %v20537_v48 }
 0xbae   :  { %11223 = vmatpush1.bf16.msra.mxu0 %v20543_v41 }
 0xbaf   :  { %11224 = vmatprep.subr.bf16.mxu0 %v20549_v43 }
 0xbb1   :  { %v15805_v56 = vpop.eup %15804 }
 0xbb2   :  { %v10278_v31 = vmul.f32 %v15805_v56, %v10267_v2  ;;  %11225 = vmatpush1.bf16.msra.mxu0 %v20555_v51  ;;  %v15470_v2 = vld [vmem:[%s21206_s5 + $0x4c] ss:$16 sps:$4 sm:$0xff]   ;;  %v20653_v56 = vld [vmem:[%s21208_s7 + $0x44] ss:$16 sps:$4 sm:$0xff]  }
 0xbb3   :  { %11226 = vmatprep.subr.bf16.mxu0 %v20561_v11 }
 0xbb4   :  { %v20576_v49 = vadd.f32 %v10278_v31, %v10277_v23  ;;  %v15807_v33 = vpop.eup %15806  ;;  %v15468_v23 = vld [vmem:[%s21206_s5 + $0x48] ss:$16 sps:$4 sm:$0xff]   ;;  %v20664_v31 = vld [vmem:[%s21208_s7 + $0x40] ss:$16 sps:$4 sm:$0xff]  }
 0xbb5   :  { %v10275_v39 = vadd.f32 1.0, %v15807_v33  ;;  %v15476_v33 = vld [vmem:[%s21206_s5 + $0x6c] ss:$16 sps:$4 sm:$0xff]  }
 0xbb6   :  { %15808 = vtanh.f32 %v20576_v49  ;;  %11227 = vmatpush1.bf16.msra.mxu0 %v20568_v54 }
 0xbb7   :  { %11228 = vmatprep.subr.bf16.mxu0 %v20574_v3  ;;  %v10276_v10 = vmul.f32 0.5, %v10275_v39  ;;  %v20673_v39 = vld [vmem:[%s21208_s7 + $0x64] ss:$16 sps:$4 sm:$0xff]  }
 0xbba   :  { %11229 = vmatpush1.bf16.msra.mxu0 %v20583_v44 }
 0xbbb   :  { %11230 = vmatprep.subr.bf16.mxu0 %v20589_v63 }
 0xbbe   :  { %11231 = vmatpush1.bf16.msra.mxu0 %v20595_v8 }
 0xbbf   :  { %11232 = vmatprep.subr.bf16.mxu0 %v20601_v36 }
 0xbc0   :  { %v15809_v32 = vpop.eup %15808 }
 0xbc1   :  { %v10281_v38 = vmul.f32 %v15809_v32, %v10276_v10  ;;  %v15474_v10 = vld [vmem:[%s21206_s5 + $0x68] ss:$16 sps:$4 sm:$0xff]   ;;  %v20682_v32 = vld [vmem:[%s21208_s7 + $0x60] ss:$16 sps:$4 sm:$0xff]  }
 0xbc2   :  { %11233 = vmatpush1.bf16.msra.mxu0 %v20607_v60 }
 0xbc3   :  { %11460 = vmatprep.subr.bf16.mxu0 %v20613_v27  ;;  %v20625_v20 = vpack.c.bf16 %v10281_v38, %v10281_v38  ;;  %v15482_v38 = vld [vmem:[%s21206_s5 + $0x8c] ss:$16 sps:$4 sm:$0xff]  }
 0xbc5   :  { %10412 = vmatmul.mubr.bf16.vlgmr.msra.gmra.mrb[160].mxu1 %v20625_v20  ;;  %11251 = vmatmul.mubr.bf16.vlgmr.msra.gmra.mrb[172].mxu0 %v20625_v20 }
 0xbc6   :  { %10690 = vmatpush1.bf16.msra.mxu1 %v15456_v17  ;;  %11461 = vmatpush1.bf16.msra.mxu0 %v20622_v34  ;;  %v20691_v17 = vld [vmem:[%s21208_s7 + $0x84] ss:$16 sps:$4 sm:$0xff]  }
 0xbc7   :  { %10691 = vmatprep.subr.bf16.mxu1 %v15464_v12  ;;  %11462 = vmatprep.subr.bf16.mxu0 %v20633_v53  ;;  %v15480_v12 = vld [vmem:[%s21206_s5 + $0x88] ss:$16 sps:$4 sm:$0xff]  }
 0xbc8   :  { %10721 = vmatprep.mubr.bf16.mxu1 %v21264_v29  ;;  %11492 = vmatprep.mubr.bf16.mxu0 %v21264_v29 }
 0xbca   :  { %10692 = vmatpush1.bf16.msra.mxu1 %v15462_v61  ;;  %11463 = vmatpush1.bf16.msra.mxu0 %v20644_v40  ;;  %v20700_v61 = vld [vmem:[%s21208_s7 + $0x80] ss:$16 sps:$4 sm:$0xff]  }
 0xbcb   :  { %10693 = vmatprep.subr.bf16.mxu1 %v15470_v2  ;;  %11464 = vmatprep.subr.bf16.mxu0 %v20653_v56  ;;  %21296 = vst [vmem:[#allocation12_spill] sm:$0xff] %v20700_v61  ;;  %v15488_v2 = vld [vmem:[%s21206_s5 + $0xac] ss:$16 sps:$4 sm:$0xff]  }
 0xbce   :  { %10694 = vmatpush1.bf16.msra.mxu1 %v15468_v23  ;;  %11465 = vmatpush1.bf16.msra.mxu0 %v20664_v31  ;;  %v20709_v23 = vld [vmem:[%s21208_s7 + $0xa4] ss:$16 sps:$4 sm:$0xff]  }
 0xbcf   :  { %10695 = vmatprep.subr.bf16.mxu1 %v15476_v33  ;;  %11466 = vmatprep.subr.bf16.mxu0 %v20673_v39  ;;  %21297 = vst [vmem:[#allocation11_spill] sm:$0xff] %v20709_v23  ;;  %v15486_v33 = vld [vmem:[%s21206_s5 + $0xa8] ss:$16 sps:$4 sm:$0xff]  }
 0xbd2   :  { %10696 = vmatpush1.bf16.msra.mxu1 %v15474_v10  ;;  %11467 = vmatpush1.bf16.msra.mxu0 %v20682_v32  ;;  %v20718_v10 = vld [vmem:[%s21208_s7 + $0xa0] ss:$16 sps:$4 sm:$0xff]  }
 0xbd3   :  { %10697 = vmatprep.subr.bf16.mxu1 %v15482_v38  ;;  %11468 = vmatprep.subr.bf16.mxu0 %v20691_v17  ;;  %21298 = vst [vmem:[#allocation13_spill] sm:$0xff] %v20718_v10  ;;  %v15494_v38 = vld [vmem:[%s21206_s5 + $0xcc] ss:$16 sps:$4 sm:$0xff]  }
 0xbd6   :  { %10698 = vmatpush1.bf16.msra.mxu1 %v15480_v12  ;;  %11469 = vmatpush1.bf16.msra.mxu0 %v20700_v61  ;;  %v20727_v12 = vld [vmem:[%s21208_s7 + $0xc4] ss:$16 sps:$4 sm:$0xff]   ;;  %v15492_v61 = vld [vmem:[%s21206_s5 + $0xc8] ss:$16 sps:$4 sm:$0xff]  }
 0xbd7   :  { %10699 = vmatprep.subr.bf16.mxu1 %v15488_v2  ;;  %11470 = vmatprep.subr.bf16.mxu0 %v20709_v23  ;;  %21299 = vst [vmem:[#allocation33_spill] sm:$0xff] %v20727_v12  ;;  %v20736_v2 = vld [vmem:[%s21208_s7 + $0xc0] ss:$16 sps:$4 sm:$0xff]   ;;  %v15500_v23 = vld [vmem:[%s21206_s5 + $0xec] ss:$16 sps:$4 sm:$0xff]  }
 0xbd8   :  { %21300 = vst [vmem:[#allocation30_spill] sm:$0xff] %v20736_v2 }
 0xbda   :  { %10700 = vmatpush1.bf16.msra.mxu1 %v15486_v33  ;;  %11471 = vmatpush1.bf16.msra.mxu0 %v20718_v10  ;;  %v20745_v33 = vld [vmem:[%s21208_s7 + $0xe4] ss:$16 sps:$4 sm:$0xff]   ;;  %v15498_v10 = vld [vmem:[%s21206_s5 + $0xe8] ss:$16 sps:$4 sm:$0xff]  }
 0xbdb   :  { %10701 = vmatprep.subr.bf16.mxu1 %v15494_v38  ;;  %11472 = vmatprep.subr.bf16.mxu0 %v20727_v12  ;;  %v20754_v38 = vld [vmem:[%s21208_s7 + $0xe0] ss:$16 sps:$4 sm:$0xff]   ;;  %v15506_v12 = vld [vmem:[%s21205_s4 + $0xc] ss:$16 sps:$4 sm:$0xff]  }
 0xbde   :  { %10702 = vmatpush1.bf16.msra.mxu1 %v15492_v61  ;;  %11473 = vmatpush1.bf16.msra.mxu0 %v20736_v2  ;;  %v15504_v61 = vld [vmem:[%s21205_s4 + $0x8] ss:$16 sps:$4 sm:$0xff]   ;;  %v15509_v2 = vld [vmem:[%s21205_s4 + $0x2c] ss:$16 sps:$4 sm:$0xff]  }
 0xbdf   :  { %10703 = vmatprep.subr.bf16.mxu1 %v15500_v23  ;;  %11474 = vmatprep.subr.bf16.mxu0 %v20745_v33  ;;  %v15507_v23 = vld [vmem:[%s21205_s4 + $0x28] ss:$16 sps:$4 sm:$0xff]  }
 0xbe2   :  { %10704 = vmatpush1.bf16.msra.mxu1 %v15498_v10  ;;  %11475 = vmatpush1.bf16.msra.mxu0 %v20754_v38  ;;  %v15512_v10 = vld [vmem:[%s21205_s4 + $0x4c] ss:$16 sps:$4 sm:$0xff]  }
 0xbe3   :  { %10931 = vmatprep.subr.bf16.mxu1 %v15506_v12  ;;  %11661 = vmatprep.subr.bf16.mxu0 %v20337_v13  ;;  %v15510_v13 = vld [vmem:[%s21205_s4 + $0x48] ss:$16 sps:$4 sm:$0xff]   ;;  %v15515_v12 = vld [vmem:[%s21205_s4 + $0x6c] ss:$16 sps:$4 sm:$0xff]  }
 0xbe5   :  { %10722 = vmatmul.mubr.bf16.vlgmr.msra.gmra.mrb[164].mxu1 %v20453_v42  ;;  %11493 = vmatmul.mubr.bf16.vlgmr.msra.gmra.mrb[176].mxu0 %v20453_v42 }
 0xbe6   :  { %10932 = vmatpush1.bf16.msra.mxu1 %v15504_v61  ;;  %10963 = vmatprep.mubr.bf16.mxu1 %v21264_v29  ;;  %v20875_v61 = vld [vmem:[%s21209_s8 + $0x8c] ss:$16 sps:$4 sm:$0xff]  }
 0xbe7   :  { %10933 = vmatprep.subr.bf16.mxu1 %v15509_v2  ;;  %11662 = vmatpush1.bf16.msra.mxu0 %v20345_v62  ;;  %v15513_v62 = vld [vmem:[%s21205_s4 + $0x68] ss:$16 sps:$4 sm:$0xff]  }
 0xbe8   :  { %11663 = vmatprep.subr.bf16.mxu0 %v20352_v50  ;;  %11693 = vmatprep.mubr.bf16.mxu0 %v21264_v29  ;;  %v15518_v50 = vld [vmem:[%s21205_s4 + $0x8c] ss:$16 sps:$4 sm:$0xff]   ;;  %v20869_v2 = vld [vmem:[%s21209_s8 + $0x68] ss:$16 sps:$4 sm:$0xff]  }
 0xbea   :  { %10934 = vmatpush1.bf16.msra.mxu1 %v15507_v23  ;;  %v20881_v23 = vld [vmem:[%s21209_s8 + $0x88] ss:$16 sps:$4 sm:$0xff]  }
 0xbeb   :  { %10935 = vmatprep.subr.bf16.mxu1 %v15512_v10  ;;  %11664 = vmatpush1.bf16.msra.mxu0 %v20357_v28  ;;  %v15516_v28 = vld [vmem:[%s21205_s4 + $0x88] ss:$16 sps:$4 sm:$0xff]   ;;  %v20887_v10 = vld [vmem:[%s21209_s8 + $0xac] ss:$16 sps:$4 sm:$0xff]  }
 0xbec   :  { %11665 = vmatprep.subr.bf16.mxu0 %v20364_v55  ;;  %v15521_v55 = vld [vmem:[%s21205_s4 + $0xac] ss:$16 sps:$4 sm:$0xff]  }
 0xbee   :  { %10936 = vmatpush1.bf16.msra.mxu1 %v15510_v13  ;;  %v20893_v13 = vld [vmem:[%s21209_s8 + $0xa8] ss:$16 sps:$4 sm:$0xff]  }
 0xbef   :  { %10937 = vmatprep.subr.bf16.mxu1 %v15515_v12  ;;  %11666 = vmatpush1.bf16.msra.mxu0 %v20369_v37  ;;  %v15519_v37 = vld [vmem:[%s21205_s4 + $0xa8] ss:$16 sps:$4 sm:$0xff]   ;;  %v20899_v12 = vld [vmem:[%s21209_s8 + $0xcc] ss:$16 sps:$4 sm:$0xff]  }
 0xbf0   :  { %11667 = vmatprep.subr.bf16.mxu0 %v20376_v14  ;;  %v15524_v14 = vld [vmem:[%s21205_s4 + $0xcc] ss:$16 sps:$4 sm:$0xff]  }
 0xbf2   :  { %10938 = vmatpush1.bf16.msra.mxu1 %v15513_v62  ;;  %v20905_v62 = vld [vmem:[%s21209_s8 + $0xc8] ss:$16 sps:$4 sm:$0xff]  }
 0xbf3   :  { %10939 = vmatprep.subr.bf16.mxu1 %v15518_v50  ;;  %11668 = vmatpush1.bf16.msra.mxu0 %v20382_v18  ;;  %v15522_v18 = vld [vmem:[%s21205_s4 + $0xc8] ss:$16 sps:$4 sm:$0xff]   ;;  %v20911_v50 = vld [vmem:[%s21209_s8 + $0xec] ss:$16 sps:$4 sm:$0xff]  }
 0xbf4   :  { %11669 = vmatprep.subr.bf16.mxu0 %v20389_v6  ;;  %v15527_v6 = vld [vmem:[%s21205_s4 + $0xec] ss:$16 sps:$4 sm:$0xff]  }
 0xbf6   :  { %10940 = vmatpush1.bf16.msra.mxu1 %v15516_v28  ;;  %v20917_v28 = vld [vmem:[%s21209_s8 + $0xe8] ss:$16 sps:$4 sm:$0xff]  }
 0xbf7   :  { %10941 = vmatprep.subr.bf16.mxu1 %v15521_v55  ;;  %11670 = vmatpush1.bf16.msra.mxu0 %v20394_v26  ;;  %v15525_v26 = vld [vmem:[%s21205_s4 + $0xe8] ss:$16 sps:$4 sm:$0xff]   ;;  %v20923_v55 = vld [vmem:[%s21208_s7 + $0xc] ss:$16 sps:$4 sm:$0xff]  }
 0xbf8   :  { %11671 = vmatprep.subr.bf16.mxu0 %v20406_v4  ;;  %v15530_v4 = vld [vmem:[%s21209_s8 + $0xc] ss:$16 sps:$4 sm:$0xff]  }
 0xbfa   :  { %10942 = vmatpush1.bf16.msra.mxu1 %v15519_v37  ;;  %v20929_v37 = vld [vmem:[%s21208_s7 + $0x8] ss:$16 sps:$4 sm:$0xff]  }
 0xbfb   :  { %10943 = vmatprep.subr.bf16.mxu1 %v15524_v14  ;;  %11672 = vmatpush1.bf16.msra.mxu0 %v20401_v25  ;;  %v20831_v25 = vld [vmem:[%s21209_s8 + $0x8] ss:$16 sps:$4 sm:$0xff]   ;;  %v20935_v14 = vld [vmem:[%s21208_s7 + $0x2c] ss:$16 sps:$4 sm:$0xff]  }
 0xbfc   :  { %11673 = vmatprep.subr.bf16.mxu0 %v20418_v7  ;;  %v20836_v7 = vld [vmem:[%s21209_s8 + $0x2c] ss:$16 sps:$4 sm:$0xff]  }
 0xbfe   :  { %10944 = vmatpush1.bf16.msra.mxu1 %v15522_v18  ;;  %v20942_v18 = vld [vmem:[%s21208_s7 + $0x28] ss:$16 sps:$4 sm:$0xff]  }
 0xbff   :  { %10945 = vmatprep.subr.bf16.mxu1 %v15527_v6  ;;  %11674 = vmatpush1.bf16.msra.mxu0 %v20413_v46  ;;  %v20844_v46 = vld [vmem:[%s21209_s8 + $0x28] ss:$16 sps:$4 sm:$0xff]   ;;  %21301 = vst [vmem:[#allocation31_spill] sm:$0xff] %v20942_v18  ;;  %v20949_v6 = vld [vmem:[%s21208_s7 + $0x4c] ss:$16 sps:$4 sm:$0xff]  }
 0xc00   :  { %11675 = vmatprep.subr.bf16.mxu0 %v20430_v19  ;;  %v20851_v19 = vld [vmem:[%s21209_s8 + $0x4c] ss:$16 sps:$4 sm:$0xff]   ;;  %21302 = vst [vmem:[#allocation32_spill] sm:$0xff] %v20949_v6 }
 0xc02   :  { %10946 = vmatpush1.bf16.msra.mxu1 %v15525_v26  ;;  %v20961_v26 = vld [vmem:[%s21208_s7 + $0x6c] ss:$16 sps:$4 sm:$0xff]  }
 0xc03   :  { %11259 = vmatprep.subr.bf16.mxu1 %v15530_v4  ;;  %11676 = vmatpush1.bf16.msra.mxu0 %v20425_v15  ;;  %v20857_v15 = vld [vmem:[%s21209_s8 + $0x48] ss:$16 sps:$4 sm:$0xff]   ;;  %21304 = vst [vmem:[#allocation14_spill] sm:$0xff] %v20961_v26 }
 0xc04   :  { %11970 = vmatprep.subr.bf16.mxu0 %v15530_v4  ;;  %v20967_v4 = vld [vmem:[%s21208_s7 + $0x68] ss:$16 sps:$4 sm:$0xff]  }
 0xc05   :  { %10964 = vmatmul.mubr.bf16.vlgmr.msra.gmra.mrb[168].mxu1 %v20515_v22  ;;  %v20863_v22 = vld [vmem:[%s21209_s8 + $0x6c] ss:$16 sps:$4 sm:$0xff]   ;;  %21305 = vst [vmem:[#allocation16_spill] sm:$0xff] %v20967_v4 }
 0xc06   :  { %11260 = vmatpush1.bf16.msra.mxu1 %v20831_v25  ;;  %11291 = vmatprep.mubr.bf16.mxu1 %v21264_v29 }
 0xc07   :  { %11261 = vmatprep.subr.bf16.mxu1 %v20836_v7 }
 0xc0a   :  { %11262 = vmatpush1.bf16.msra.mxu1 %v20844_v46 }
 0xc0b   :  { %11263 = vmatprep.subr.bf16.mxu1 %v20851_v19 }
 0xc0e   :  { %11264 = vmatpush1.bf16.msra.mxu1 %v20857_v15 }
 0xc0f   :  { %11265 = vmatprep.subr.bf16.mxu1 %v20863_v22 }
 0xc12   :  { %11266 = vmatpush1.bf16.msra.mxu1 %v20869_v2 }
 0xc13   :  { %11267 = vmatprep.subr.bf16.mxu1 %v20875_v61 }
 0xc16   :  { %11268 = vmatpush1.bf16.msra.mxu1 %v20881_v23 }
 0xc17   :  { %11269 = vmatprep.subr.bf16.mxu1 %v20887_v10 }
 0xc1a   :  { %11270 = vmatpush1.bf16.msra.mxu1 %v20893_v13 }
 0xc1b   :  { %11271 = vmatprep.subr.bf16.mxu1 %v20899_v12 }
 0xc1e   :  { %11272 = vmatpush1.bf16.msra.mxu1 %v20905_v62 }
 0xc1f   :  { %11273 = vmatprep.subr.bf16.mxu1 %v20911_v50 }
 0xc22   :  { %11274 = vmatpush1.bf16.msra.mxu1 %v20917_v28 }
 0xc23   :  { %11501 = vmatprep.subr.bf16.mxu1 %v20923_v55 }
 0xc25   :  { %11292 = vmatmul.mubr.bf16.vlgmr.msra.gmra.mrb[172].mxu1 %v20625_v20  ;;  %v20955_v20 = vld [vmem:[%s21208_s7 + $0x48] ss:$16 sps:$4 sm:$0xff]  }
 0xc26   :  { %11502 = vmatpush1.bf16.msra.mxu1 %v20929_v37  ;;  %11533 = vmatprep.mubr.bf16.mxu1 %v21264_v29  ;;  %21303 = vst [vmem:[#allocation34_spill] sm:$0xff] %v20955_v20 }
 0xc27   :  { %11503 = vmatprep.subr.bf16.mxu1 %v20935_v14 }
 0xc2a   :  { %11504 = vmatpush1.bf16.msra.mxu1 %v20942_v18  ;;  %v20973_v18 = vld [vmem:[%s21208_s7 + $0x8c] ss:$16 sps:$4 sm:$0xff]  }
 0xc2b   :  { %11505 = vmatprep.subr.bf16.mxu1 %v20949_v6  ;;  %21306 = vst [vmem:[#allocation15_spill] sm:$0xff] %v20973_v18  ;;  %v20979_v6 = vld [vmem:[%s21208_s7 + $0x88] ss:$16 sps:$4 sm:$0xff]  }
 0xc2c   :  { %21307 = vst [vmem:[#allocation17_spill] sm:$0xff] %v20979_v6 }
 0xc2e   :  { %11506 = vmatpush1.bf16.msra.mxu1 %v20955_v20  ;;  %v20985_v20 = vld [vmem:[%s21208_s7 + $0xac] ss:$16 sps:$4 sm:$0xff]  }
 0xc2f   :  { %11507 = vmatprep.subr.bf16.mxu1 %v20961_v26  ;;  %21308 = vst [vmem:[#allocation18_spill] sm:$0xff] %v20985_v20  ;;  %v20991_v26 = vld [vmem:[%s21208_s7 + $0xa8] ss:$16 sps:$4 sm:$0xff]  }
 0xc32   :  { %11508 = vmatpush1.bf16.msra.mxu1 %v20967_v4  ;;  %v20997_v4 = vld [vmem:[%s21208_s7 + $0xcc] ss:$16 sps:$4 sm:$0xff]  }
 0xc33   :  { %11509 = vmatprep.subr.bf16.mxu1 %v20973_v18  ;;  %v21003_v18 = vld [vmem:[%s21208_s7 + $0xc8] ss:$16 sps:$4 sm:$0xff]  }
 0xc34   :  { %21309 = vst [vmem:[#allocation20_spill] sm:$0xff] %v21003_v18 }
 0xc36   :  { %11510 = vmatpush1.bf16.msra.mxu1 %v20979_v6  ;;  %v21009_v6 = vld [vmem:[%s21208_s7 + $0xec] ss:$16 sps:$4 sm:$0xff]  }
 0xc37   :  { %11511 = vmatprep.subr.bf16.mxu1 %v20985_v20  ;;  %21310 = vst [vmem:[#allocation19_spill] sm:$0xff] %v21009_v6  ;;  %v21015_v20 = vld [vmem:[%s21208_s7 + $0xe8] ss:$16 sps:$4 sm:$0xff]  }
 0xc38   :  { %21311 = vst [vmem:[#allocation21_spill] sm:$0xff] %v21015_v20 }
 0xc3a   :  { %11512 = vmatpush1.bf16.msra.mxu1 %v20991_v26 }
 0xc3b   :  { %11513 = vmatprep.subr.bf16.mxu1 %v20997_v4 }
 0xc3e   :  { %11514 = vmatpush1.bf16.msra.mxu1 %v21003_v18 }
 0xc3f   :  { %11515 = vmatprep.subr.bf16.mxu1 %v21009_v6 }
 0xc42   :  { %11516 = vmatpush1.bf16.msra.mxu1 %v21015_v20 }
 0xc43   :  { %11929 = vmatprep.subr.bf16.mxu1 %v20506_v16 }
 0xc45   :  { %11534 = vmatmul.mubr.bf16.vlgmr.msra.gmra.mrb[176].mxu1 %v20453_v42 }
 0xc46   :  { %11930 = vmatpush1.bf16.msra.mxu1 %v20511_v58  ;;  %11961 = vmatprep.mubr.bf16.mxu1 %v21264_v29 }
 0xc47   :  { %11931 = vmatprep.subr.bf16.mxu1 %v20521_v1 }
 0xc4a   :  { %11932 = vmatpush1.bf16.msra.mxu1 %v20530_v5 }
 0xc4b   :  { %11933 = vmatprep.subr.bf16.mxu1 %v20537_v48 }
 0xc4e   :  { %11934 = vmatpush1.bf16.msra.mxu1 %v20543_v41 }
 0xc4f   :  { %11935 = vmatprep.subr.bf16.mxu1 %v20549_v43 }
 0xc52   :  { %11936 = vmatpush1.bf16.msra.mxu1 %v20555_v51 }
 0xc53   :  { %11937 = vmatprep.subr.bf16.mxu1 %v20561_v11 }
 0xc56   :  { %11938 = vmatpush1.bf16.msra.mxu1 %v20568_v54 }
 0xc57   :  { %11939 = vmatprep.subr.bf16.mxu1 %v20574_v3 }
 0xc58   :  { %v10682_v42 = vpop.f32.mrb[164].mxu0 }
 0xc59   :  { %v10684_v16 = vpop.f32.mrb[165].mxu0 }
 0xc5a   :  { %v10686_v58 = vpop.f32.mrb[166].mxu0  ;;  %11940 = vmatpush1.bf16.msra.mxu1 %v20583_v44 }
 0xc5b   :  { %v10687_v1 = vpop.f32.mrb[167].mxu0  ;;  %11941 = vmatprep.subr.bf16.mxu1 %v20589_v63 }
 0xc5e   :  { %11942 = vmatpush1.bf16.msra.mxu1 %v20595_v8 }
 0xc5f   :  { %11943 = vmatprep.subr.bf16.mxu1 %v20601_v36 }
 0xc62   :  { %11944 = vmatpush1.bf16.msra.mxu1 %v20607_v60 }
 0xc63   :  { %12171 = vmatprep.subr.bf16.mxu1 %v20613_v27 }
 0xc78   :  { %v10924_v5 = vpop.f32.mrb[168].mxu0 }
 0xc79   :  { %v10925_v48 = vadd.f32 %v10924_v5, %v10682_v42  ;;  %v10926_v41 = vpop.f32.mrb[169].mxu0 }
 0xc7a   :  { %v10927_v43 = vadd.f32 %v10926_v41, %v10684_v16  ;;  %v10928_v51 = vpop.f32.mrb[170].mxu0 }
 0xc7b   :  { %v10929_v11 = vpop.f32.mrb[171].mxu0 }
 0xc98   :  { %v10413_v54 = vpop.f32.mrb[160].mxu1  ;;  %v11252_v3 = vpop.f32.mrb[172].mxu0 }
 0xc99   :  { %v10414_v44 = vadd.f32 %v10413_v54, %v17922_v47  ;;  %v10415_v58 = vpop.f32.mrb[161].mxu1  ;;  %v11254_v63 = vpop.f32.mrb[173].mxu0  ;;  %v10973_v47 = vadd.f32 %v10927_v43, %v16932_v9 }
 0xc9a   :  { %v10416_v8 = vadd.f32 %v10415_v58, %v17925_v0  ;;  %v10417_v1 = vpop.f32.mrb[162].mxu1  ;;  %v11256_v36 = vpop.f32.mrb[174].mxu0  ;;  %v10972_v58 = vadd.f32 %v10925_v48, %v21276_v45 }
 0xc9b   :  { %10420 = vst [vmem:[#allocation3 + $0x50] sm:$0xff] %v10414_v44  ;;  %v10418_v60 = vpop.f32.mrb[163].mxu1  ;;  %v11257_v20 = vpop.f32.mrb[175].mxu0  ;;  %v10980_v1 = vmul.f32 0.5, %v10973_v47 }
 0xc9c   :  { %10421 = vst [vmem:[#allocation3 + $0x58] sm:$0xff] %v10416_v8  ;;  %v10976_v36 = vmul.f32 0.5, %v10972_v58 }
 0xc9d   :  { %15810 = vtanh.f32 %v10980_v1 }
 0xc9e   :  { %15812 = vtanh.f32 %v10976_v36 }
 0xcb8   :  { %v10723_v27 = vpop.f32.mrb[164].mxu1  ;;  %v11494_v42 = vpop.f32.mrb[176].mxu0 }
 0xcb9   :  { %v11495_v5 = vadd.f32 %v11494_v42, %v11252_v3  ;;  %v10725_v16 = vpop.f32.mrb[165].mxu1  ;;  %v11496_v41 = vpop.f32.mrb[177].mxu0 }
 0xcba   :  { %v11497_v51 = vadd.f32 %v11496_v41, %v11254_v63  ;;  %v10727_v11 = vpop.f32.mrb[166].mxu1  ;;  %v11498_v6 = vpop.f32.mrb[178].mxu0 }
 0xcbb   :  { %v10728_v18 = vpop.f32.mrb[167].mxu1  ;;  %v11499_v54 = vpop.f32.mrb[179].mxu0 }
 0xcbc   :  { %v15811_v18 = vpop.eup %15810 }
 0xcbd   :  { %v15813_v41 = vpop.eup %15812  ;;  %v10982_v9 = vadd.f32 1.0, %v15811_v18 }
 0xcbe   :  { %v10978_v45 = vadd.f32 1.0, %v15813_v41 }
 0xcbf   :  { %v10983_v47 = vmul.f32 0.5, %v10982_v9 }
 0xcc0   :  { %v10979_v48 = vmul.f32 0.5, %v10978_v45 }
 0xcd8   :  { %v10965_v20 = vpop.f32.mrb[168].mxu1 }
 0xcd9   :  { %v10966_v44 = vadd.f32 %v10965_v20, %v10723_v27  ;;  %v10967_v8 = vpop.f32.mrb[169].mxu1  ;;  %v10989_v27 = vmul.f32 %v10983_v47, %v20447_v52  ;;  %v11542_v52 = vadd.f32 %v11495_v5, %v17541_v35 }
 0xcda   :  { %v10968_v60 = vadd.f32 %v10967_v8, %v10725_v16  ;;  %v10969_v3 = vpop.f32.mrb[170].mxu1 }
 0xcdb   :  { %v10974_v42 = vadd.f32 %v10966_v44, %v21277_v59  ;;  %v10970_v63 = vpop.f32.mrb[171].mxu1  ;;  %v11543_v3 = vadd.f32 %v11497_v51, %v17547_v30 }
 0xcdc   :  { %v10975_v6 = vadd.f32 %v10968_v60, %v21278_v21  ;;  %v11546_v63 = vmul.f32 0.5, %v11542_v52 }
 0xcdd   :  { %15814 = vtanh.f32 %v10974_v42  ;;  %v11550_v42 = vmul.f32 0.5, %v11543_v3 }
 0xcde   :  { %v10985_v43 = vmul.f32 0.5, %v10975_v6 }
 0xce0   :  { %15816 = vtanh.f32 %v10985_v43 }
 0xce7   :  { %v15815_v11 = vpop.eup %15814 }
 0xce8   :  { %v10990_v54 = vmul.f32 %v15815_v11, %v10979_v48 }
 0xcea   :  { %v10991_v16 = vadd.f32 %v10990_v54, %v10989_v27  ;;  %v15817_v59 = vpop.eup %15816 }
 0xceb   :  { %v10987_v58 = vadd.f32 1.0, %v15817_v59 }
 0xcec   :  { %15818 = vtanh.f32 %v10991_v16  ;;  %12422 = vst [vmem:[#allocation7 + $0x8] sm:$0xff] %v10991_v16 }
 0xced   :  { %v10988_v1 = vmul.f32 0.5, %v10987_v58  ;;  %15820 = vtanh.f32 %v11550_v42 }
 0xcee   :  { %15822 = vtanh.f32 %v11546_v63 }
 0xcf6   :  { %v15819_v21 = vpop.eup %15818 }
 0xcf7   :  { %v21045_v36 = vmul.f32 %v15819_v21, %v10988_v1  ;;  %v15821_v11 = vpop.eup %15820 }
 0xcf8   :  { %v11293_v20 = vpop.f32.mrb[172].mxu1  ;;  %v15823_v27 = vpop.eup %15822  ;;  %v11552_v51 = vadd.f32 1.0, %v15821_v11 }
 0xcf9   :  { %12417 = vst [vmem:[#allocation5 + $0x8] sm:$0xff] %v21045_v36  ;;  %v11295_v44 = vpop.f32.mrb[173].mxu1  ;;  %v11548_v5 = vadd.f32 1.0, %v15823_v27 }
 0xcfa   :  { %v11297_v8 = vpop.f32.mrb[174].mxu1  ;;  %v11553_v16 = vmul.f32 0.5, %v11552_v51 }
 0xcfb   :  { %v11298_v60 = vpop.f32.mrb[175].mxu1  ;;  %v11549_v59 = vmul.f32 0.5, %v11548_v5 }
 0xcfc   :  { %v11559_v1 = vmul.f32 %v11553_v16, %v20576_v49  ;;  %v21312_v49 = vld [vmem:[#allocation12_spill] sm:$0xff] }
 0xd18   :  { %v11535_v6 = vpop.f32.mrb[176].mxu1 }
 0xd19   :  { %v11536_v18 = vadd.f32 %v11535_v6, %v11293_v20  ;;  %v11537_v41 = vpop.f32.mrb[177].mxu1 }
 0xd1a   :  { %v11538_v9 = vadd.f32 %v11537_v41, %v11295_v44  ;;  %v11539_v43 = vpop.f32.mrb[178].mxu1 }
 0xd1b   :  { %v11544_v45 = vadd.f32 %v11536_v18, %v17554_v24  ;;  %v11540_v47 = vpop.f32.mrb[179].mxu1  ;;  %v21328_v18 = vld [vmem:[#allocation10_spill] sm:$0xff] }
 0xd1c   :  { %v11545_v48 = vadd.f32 %v11538_v9, %v17562_v57 }
 0xd1d   :  { %15824 = vtanh.f32 %v11544_v45 }
 0xd1e   :  { %v11555_v54 = vmul.f32 0.5, %v11545_v48 }
 0xd20   :  { %15826 = vtanh.f32 %v11555_v54 }
 0xd27   :  { %v15825_v58 = vpop.eup %15824 }
 0xd28   :  { %v11560_v21 = vmul.f32 %v15825_v58, %v11549_v59 }
 0xd2a   :  { %v21053_v20 = vadd.f32 %v11560_v21, %v11559_v1  ;;  %v15827_v44 = vpop.eup %15826 }
 0xd2b   :  { %v11557_v8 = vadd.f32 1.0, %v15827_v44 }
 0xd2c   :  { %15828 = vtanh.f32 %v21053_v20 }
 0xd2d   :  { %v11558_v60 = vmul.f32 0.5, %v11557_v8 }
 0xd36   :  { %v15829_v3 = vpop.eup %15828 }
 0xd37   :  { %v11563_v52 = vmul.f32 %v15829_v3, %v11558_v60 }
 0xd39   :  { %v11564_v42 = vpack.c.bf16 %v11563_v52, %v11563_v52 }
 0xd3b   :  { %11694 = vmatmul.mubr.bf16.vlgmr.msra.gmra.mrb[180].mxu0 %v11564_v42  ;;  %11962 = vmatmul.mubr.bf16.vlgmr.msra.gmra.mrb[180].mxu1 %v11564_v42 }
 0xd3c   :  { %11971 = vmatpush1.bf16.msra.mxu0 %v20831_v25  ;;  %12172 = vmatpush1.bf16.msra.mxu1 %v20622_v34  ;;  %v21313_v34 = vld [vmem:[#allocation11_spill] sm:$0xff] }
 0xd3d   :  { %11972 = vmatprep.subr.bf16.mxu0 %v20836_v7  ;;  %12173 = vmatprep.subr.bf16.mxu1 %v20633_v53  ;;  %v21314_v53 = vld [vmem:[#allocation13_spill] sm:$0xff]  ;;  %v21322_v25 = vld [vmem:[#allocation15_spill] sm:$0xff] }
 0xd3e   :  { %12002 = vmatprep.mubr.bf16.mxu0 %v21264_v29  ;;  %12203 = vmatprep.mubr.bf16.mxu1 %v21264_v29  ;;  %v21323_v7 = vld [vmem:[#allocation17_spill] sm:$0xff] }
 0xd40   :  { %11973 = vmatpush1.bf16.msra.mxu0 %v20844_v46  ;;  %12174 = vmatpush1.bf16.msra.mxu1 %v20644_v40  ;;  %v21315_v40 = vld [vmem:[#allocation33_spill] sm:$0xff]  ;;  %v21324_v46 = vld [vmem:[#allocation18_spill] sm:$0xff] }
 0xd41   :  { %11974 = vmatprep.subr.bf16.mxu0 %v20851_v19  ;;  %12175 = vmatprep.subr.bf16.mxu1 %v20653_v56  ;;  %v21316_v56 = vld [vmem:[#allocation30_spill] sm:$0xff]  ;;  %v21326_v19 = vld [vmem:[#allocation19_spill] sm:$0xff] }
 0xd44   :  { %11975 = vmatpush1.bf16.msra.mxu0 %v20857_v15  ;;  %12176 = vmatpush1.bf16.msra.mxu1 %v20664_v31  ;;  %v11704_v31 = vpack.c.bf16 %v21045_v36, %v21045_v36  ;;  %v21327_v15 = vld [vmem:[#allocation21_spill] sm:$0xff]  ;;  %v15597_v36 = vld [vmem:[%s21211_s10 + $0x70] ss:$8 sps:$4 sm:$0xff]  }
 0xd45   :  { %11976 = vmatprep.subr.bf16.mxu0 %v20863_v22  ;;  %12177 = vmatprep.subr.bf16.mxu1 %v20673_v39  ;;  %v21317_v39 = vld [vmem:[#allocation31_spill] sm:$0xff]  ;;  %v15578_v22 = vld [vmem:[%s21211_s10 + $0x4] ss:$8 sps:$4 sm:$0xff]  }
 0xd48   :  { %11977 = vmatpush1.bf16.msra.mxu0 %v20869_v2  ;;  %12178 = vmatpush1.bf16.msra.mxu1 %v20682_v32  ;;  %v21318_v32 = vld [vmem:[#allocation32_spill] sm:$0xff] }
 0xd49   :  { %11978 = vmatprep.subr.bf16.mxu0 %v20875_v61  ;;  %12179 = vmatprep.subr.bf16.mxu1 %v20691_v17  ;;  %v21319_v17 = vld [vmem:[#allocation34_spill] sm:$0xff]  ;;  %v15576_v2 = vld [vmem:[%s21211_s10] ss:$8 sps:$4 sm:$0xff]  }
 0xd4a   :  { %v15581_v61 = vld [vmem:[%s21211_s10 + $0x14] ss:$8 sps:$4 sm:$0xff]  }
 0xd4c   :  { %11979 = vmatpush1.bf16.msra.mxu0 %v20881_v23  ;;  %12180 = vmatpush1.bf16.msra.mxu1 %v21312_v49  ;;  %v15579_v23 = vld [vmem:[%s21211_s10 + $0x10] ss:$8 sps:$4 sm:$0xff]  }
 0xd4d   :  { %11980 = vmatprep.subr.bf16.mxu0 %v20887_v10  ;;  %12181 = vmatprep.subr.bf16.mxu1 %v21313_v34  ;;  %v15584_v10 = vld [vmem:[%s21211_s10 + $0x24] ss:$8 sps:$4 sm:$0xff]  }
 0xd50   :  { %11981 = vmatpush1.bf16.msra.mxu0 %v20893_v13  ;;  %12182 = vmatpush1.bf16.msra.mxu1 %v21314_v53  ;;  %v15582_v13 = vld [vmem:[%s21211_s10 + $0x20] ss:$8 sps:$4 sm:$0xff]  }
 0xd51   :  { %11982 = vmatprep.subr.bf16.mxu0 %v20899_v12  ;;  %12183 = vmatprep.subr.bf16.mxu1 %v21315_v40  ;;  %v15587_v12 = vld [vmem:[%s21211_s10 + $0x34] ss:$8 sps:$4 sm:$0xff]  }
 0xd54   :  { %11983 = vmatpush1.bf16.msra.mxu0 %v20905_v62  ;;  %12184 = vmatpush1.bf16.msra.mxu1 %v21316_v56  ;;  %v15585_v62 = vld [vmem:[%s21211_s10 + $0x30] ss:$8 sps:$4 sm:$0xff]  }
 0xd55   :  { %11984 = vmatprep.subr.bf16.mxu0 %v20911_v50  ;;  %12185 = vmatprep.subr.bf16.mxu1 %v20745_v33  ;;  %v21320_v33 = vld [vmem:[#allocation14_spill] sm:$0xff]  ;;  %v15590_v50 = vld [vmem:[%s21211_s10 + $0x44] ss:$8 sps:$4 sm:$0xff]  }
 0xd58   :  { %11985 = vmatpush1.bf16.msra.mxu0 %v20917_v28  ;;  %12186 = vmatpush1.bf16.msra.mxu1 %v20754_v38  ;;  %v21321_v38 = vld [vmem:[#allocation16_spill] sm:$0xff] }
 0xd59   :  { %12212 = vmatprep.subr.bf16.mxu0 %v20923_v55  ;;  %12372 = vmatprep.subr.bf16.mxu1 %v15578_v22  ;;  %v15588_v28 = vld [vmem:[%s21211_s10 + $0x40] ss:$8 sps:$4 sm:$0xff]   ;;  %v15593_v55 = vld [vmem:[%s21211_s10 + $0x54] ss:$8 sps:$4 sm:$0xff]  }
 0xd5b   :  { %12003 = vmatmul.mubr.bf16.vlgmr.msra.gmra.mrb[184].mxu0 %v11564_v42  ;;  %12204 = vmatmul.mubr.bf16.vlgmr.msra.gmra.mrb[184].mxu1 %v11704_v31 }
 0xd5c   :  { %12213 = vmatpush1.bf16.msra.mxu0 %v20929_v37  ;;  %12244 = vmatprep.mubr.bf16.mxu0 %v21264_v29  ;;  %v15591_v37 = vld [vmem:[%s21211_s10 + $0x50] ss:$8 sps:$4 sm:$0xff]  }
 0xd5d   :  { %12214 = vmatprep.subr.bf16.mxu0 %v20935_v14  ;;  %12404 = vmatprep.mubr.bf16.mxu1 %v21264_v29  ;;  %v21325_v29 = vld [vmem:[#allocation20_spill] sm:$0xff] }
 0xd5e   :  { %12373 = vmatpush1.bf16.msra.mxu1 %v15576_v2  ;;  %v15596_v14 = vld [vmem:[%s21211_s10 + $0x64] ss:$8 sps:$4 sm:$0xff]  }
 0xd5f   :  { %12374 = vmatprep.subr.bf16.mxu1 %v15581_v61 }
 0xd60   :  { %12215 = vmatpush1.bf16.msra.mxu0 %v21317_v39 }
 0xd61   :  { %12216 = vmatprep.subr.bf16.mxu0 %v21318_v32 }
 0xd62   :  { %12375 = vmatpush1.bf16.msra.mxu1 %v15579_v23 }
 0xd63   :  { %12376 = vmatprep.subr.bf16.mxu1 %v15584_v10 }
 0xd64   :  { %12217 = vmatpush1.bf16.msra.mxu0 %v21319_v17 }
 0xd65   :  { %12218 = vmatprep.subr.bf16.mxu0 %v21320_v33 }
 0xd66   :  { %12377 = vmatpush1.bf16.msra.mxu1 %v15582_v13 }
 0xd67   :  { %12378 = vmatprep.subr.bf16.mxu1 %v15587_v12 }
 0xd68   :  { %12219 = vmatpush1.bf16.msra.mxu0 %v21321_v38 }
 0xd69   :  { %12220 = vmatprep.subr.bf16.mxu0 %v21322_v25 }
 0xd6a   :  { %12379 = vmatpush1.bf16.msra.mxu1 %v15585_v62 }
 0xd6b   :  { %12380 = vmatprep.subr.bf16.mxu1 %v15590_v50 }
 0xd6c   :  { %12221 = vmatpush1.bf16.msra.mxu0 %v21323_v7 }
 0xd6d   :  { %12222 = vmatprep.subr.bf16.mxu0 %v21324_v46 }
 0xd6e   :  { %12381 = vmatpush1.bf16.msra.mxu1 %v15588_v28 }
 0xd6f   :  { %12382 = vmatprep.subr.bf16.mxu1 %v15593_v55 }
 0xd70   :  { %12223 = vmatpush1.bf16.msra.mxu0 %v20991_v26  ;;  %v15594_v26 = vld [vmem:[%s21211_s10 + $0x60] ss:$8 sps:$4 sm:$0xff]  }
 0xd71   :  { %12224 = vmatprep.subr.bf16.mxu0 %v20997_v4  ;;  %v15599_v4 = vld [vmem:[%s21211_s10 + $0x74] ss:$8 sps:$4 sm:$0xff]   ;;  %s15985_s10 = smov [#allocation5]  }
 0xd72   :  { %12383 = vmatpush1.bf16.msra.mxu1 %v15591_v37  ;;  %s12442_s3 = sshll.u32 %s15985_s10, 4  ;;  %s12443_s3 = int_to_ptr.vmem [resolvable:$true] %s12442_s3 }
 0xd73   :  { %12384 = vmatprep.subr.bf16.mxu1 %v15596_v14  ;;  %s15914_s21 = scalar_lea.vmem %s12443_s3, 384  ;;  %p15919_p1 = scmp.lt.s32.totalorder %s12443_s3, %s12443_s3 }
 0xd74   :  { %12225 = vmatpush1.bf16.msra.mxu0 %v21325_v29  ;;  %p15915_p0 = scmp.ne.s32.totalorder %s12443_s3, %s15914_s21  ;;  %p15920_p2 = scmp.lt.s32.totalorder %s15914_s21, %s15914_s21 }
 0xd75   :  { %12226 = vmatprep.subr.bf16.mxu0 %v21326_v19 }
 0xd76   :  { %12385 = vmatpush1.bf16.msra.mxu1 %v15594_v26  ;;  %p15921_p3 = por %p15920_p2, %p15919_p1 }
 0xd77   :  { %12386 = vmatprep.subr.bf16.mxu1 %v15599_v4 }
 0xd78   :  { %12227 = vmatpush1.bf16.msra.mxu0 %v21327_v15  ;;  %p15922_p4 = pnand %p15921_p3, %p15915_p0 }
 0xd7a   :  { %12387 = vmatpush1.bf16.msra.mxu1 %v15597_v36 }
 0xd7b   :  { %12245 = vmatmul.mubr.bf16.vlgmr.msra.gmra.mrb[188].mxu0 %v11704_v31 }
 0xe0e   :  { %v11695_v63 = vpop.f32.mrb[180].mxu0  ;;  %v11963_v6 = vpop.f32.mrb[180].mxu1 }
 0xe0f   :  { %v11696_v41 = vadd.f32 %v11695_v63, %v21328_v18  ;;  %v11697_v9 = vpop.f32.mrb[181].mxu0  ;;  %v11965_v43 = vpop.f32.mrb[181].mxu1 }
 0xe10   :  { %v11698_v45 = vadd.f32 %v11697_v9, %v17925_v0  ;;  %v11699_v47 = vpop.f32.mrb[182].mxu0  ;;  %v11967_v48 = vpop.f32.mrb[182].mxu1 }
 0xe11   :  { %11702 = vst [vmem:[#allocation3 + $0x60] sm:$0xff] %v11696_v41  ;;  %v11700_v11 = vpop.f32.mrb[183].mxu0  ;;  %v11968_v27 = vpop.f32.mrb[183].mxu1 }
 0xe12   :  { %11703 = vst [vmem:[#allocation3 + $0x68] sm:$0xff] %v11698_v45 }
 0xe2e   :  { %v12004_v51 = vpop.f32.mrb[184].mxu0  ;;  %v12205_v54 = vpop.f32.mrb[184].mxu1 }
 0xe2f   :  { %v12206_v5 = vadd.f32 %v12205_v54, %v11963_v6  ;;  %v12006_v16 = vpop.f32.mrb[185].mxu0  ;;  %v12207_v59 = vpop.f32.mrb[185].mxu1 }
 0xe30   :  { %v12208_v58 = vadd.f32 %v12207_v59, %v11965_v43  ;;  %v12008_v1 = vpop.f32.mrb[186].mxu0  ;;  %v12209_v21 = vpop.f32.mrb[186].mxu1 }
 0xe31   :  { %v12009_v44 = vpop.f32.mrb[187].mxu0  ;;  %v12210_v8 = vpop.f32.mrb[187].mxu1  ;;  %v12253_v3 = vadd.f32 %v12206_v5, %v17541_v35 }
 0xe32   :  { %v12254_v60 = vadd.f32 %v12208_v58, %v17547_v30 }
 0xe33   :  { %v12257_v42 = vmul.f32 0.5, %v12253_v3 }
 0xe34   :  { %v12261_v52 = vmul.f32 0.5, %v12254_v60 }
 0xe36   :  { %15830 = vtanh.f32 %v12261_v52 }
 0xe37   :  { %15832 = vtanh.f32 %v12257_v42 }
 0xe40   :  { %v15831_v17 = vpop.eup %15830 }
 0xe41   :  { %v15833_v33 = vpop.eup %15832  ;;  %v12263_v30 = vadd.f32 1.0, %v15831_v17 }
 0xe42   :  { %v12259_v35 = vadd.f32 1.0, %v15833_v33 }
 0xe43   :  { %v12264_v25 = vmul.f32 0.5, %v12263_v30 }
 0xe44   :  { %v12260_v7 = vmul.f32 0.5, %v12259_v35 }
 0xe45   :  { %v12270_v29 = vmul.f32 %v12264_v25, %v21053_v20 }
 0xe4e   :  { %v12246_v49 = vpop.f32.mrb[188].mxu0 }
 0xe4f   :  { %v12247_v34 = vadd.f32 %v12246_v49, %v12004_v51  ;;  %v12248_v53 = vpop.f32.mrb[189].mxu0 }
 0xe50   :  { %v12249_v40 = vadd.f32 %v12248_v53, %v12006_v16  ;;  %v12250_v56 = vpop.f32.mrb[190].mxu0 }
 0xe51   :  { %v12255_v31 = vadd.f32 %v12247_v34, %v17554_v24  ;;  %v12251_v39 = vpop.f32.mrb[191].mxu0 }
 0xe52   :  { %v12256_v32 = vadd.f32 %v12249_v40, %v17562_v57 }
 0xe53   :  { %15834 = vtanh.f32 %v12255_v31 }
 0xe54   :  { %v12266_v38 = vmul.f32 0.5, %v12256_v32 }
 0xe56   :  { %15836 = vtanh.f32 %v12266_v38 }
 0xe5d   :  { %v15835_v46 = vpop.eup %15834 }
 0xe5e   :  { %v12271_v19 = vmul.f32 %v15835_v46, %v12260_v7 }
 0xe60   :  { %v12272_v15 = vadd.f32 %v12271_v19, %v12270_v29  ;;  %v15837_v24 = vpop.eup %15836 }
 0xe61   :  { %v12268_v22 = vadd.f32 1.0, %v15837_v24 }
 0xe62   :  { %15838 = vtanh.f32 %v12272_v15  ;;  %12424 = vst [vmem:[#allocation7 + $0x10] sm:$0xff] %v12272_v15 }
 0xe63   :  { %v12269_v2 = vmul.f32 0.5, %v12268_v22 }
 0xe6c   :  { %v15839_v57 = vpop.eup %15838 }
 0xe6d   :  { %v12274_v61 = vmul.f32 %v15839_v57, %v12269_v2 }
 0xe6f   :  { %12419 = vst [vmem:[#allocation5 + $0x10] sm:$0xff] %v12274_v61  ;;  %v12275_v23 = vpack.c.bf16 %v12274_v61, %v12274_v61 }
 0xe71   :  { %12405 = vmatmul.mubr.bf16.vlgmr.msra.gmra.mrb[188].mxu1 %v12275_v23 }
 0xe72   :  { %15925 = shalt.err (!%p15922_p4)
}
 0xe73   :  { %s15926_s23 = scalar_lea.hbm %s21214_s13, 384 }
 0xe74   :  { %p15927_p5 = scmp.ne.s32.totalorder %s21214_s13, %s15926_s23  ;;  %p15930_p6 = scmp.lt.u32.totalorder %s15926_s23, %s21214_s13 }
 0xe76   :  { %p15932_p7 = pnand %p15930_p6, %p15927_p5 }
 0xe78   :  { %15935 = shalt.err (!%p15932_p7)
}
 0xe79   :  { %s15986_s27 = smov 128   ;;  %s15987_s2 = smov 8  }
 0xe7a   :  { %12448 = dma.vmem_to_hbm [thread:$0]  %s12443_s3, 384, %s21214_s13, [#allocation6], %s15986_s27, %s15986_s27, %s15987_s2  }
 0xe7b   :  { %s15988_s11 = smov [#allocation7]  }
 0xe7c   :  { %s12454_s29 = sshll.u32 %s15988_s11, 4  ;;  %s12455_s29 = int_to_ptr.vmem [resolvable:$true] %s12454_s29 }
 0xe7d   :  { %s15936_s4 = scalar_lea.vmem %s12455_s29, 384  ;;  %p15941_p9 = scmp.lt.s32.totalorder %s12455_s29, %s12455_s29 }
 0xe7e   :  { %p15937_p8 = scmp.ne.s32.totalorder %s12455_s29, %s15936_s4  ;;  %p15942_p10 = scmp.lt.s32.totalorder %s15936_s4, %s15936_s4 }
 0xe80   :  { %p15943_p11 = por %p15942_p10, %p15941_p9 }
 0xe82   :  { %p15944_p12 = pnand %p15943_p11, %p15937_p8 }
 0xe84   :  { %15947 = shalt.err (!%p15944_p12)
}
 0xe85   :  { %s15948_s16 = scalar_lea.hbm %s21215_s14, 384 }
 0xe86   :  { %p15949_p13 = scmp.ne.s32.totalorder %s21215_s14, %s15948_s16  ;;  %p15952_p0 = scmp.lt.u32.totalorder %s15948_s16, %s21215_s14 }
 0xe88   :  { %p15954_p1 = pnand %p15952_p0, %p15949_p13 }
 0xe8a   :  { %15957 = shalt.err (!%p15954_p1)
}
 0xe8b   :  { %12460 = dma.vmem_to_hbm [thread:$0]  %s12455_s29, 384, %s21215_s14, [#allocation6], %s15986_s27, %s15986_s27, %s15987_s2  }
 0xe8c   :  { %s15989_s19 = smov [#allocation3]  }
 0xe8d   :  { %s12430_s1 = sshll.u32 %s15989_s19, 4  ;;  %s12431_s1 = int_to_ptr.vmem [resolvable:$true] %s12430_s1 }
 0xe8e   :  { %s15958_s20 = scalar_lea.vmem %s12431_s1, 2048  ;;  %p15963_p3 = scmp.lt.s32.totalorder %s12431_s1, %s12431_s1 }
 0xe8f   :  { %p15959_p2 = scmp.ne.s32.totalorder %s12431_s1, %s15958_s20  ;;  %p15964_p4 = scmp.lt.s32.totalorder %s15958_s20, %s15958_s20 }
 0xe91   :  { %p15965_p5 = por %p15964_p4, %p15963_p3 }
 0xe93   :  { %p15966_p6 = pnand %p15965_p5, %p15959_p2 }
 0xf44   :  { %v12406_v20 = vpop.f32.mrb[188].mxu1 }
 0xf45   :  { %v12407_v10 = vadd.f32 %v12406_v20, %v21328_v18  ;;  %v12408_v13 = vpop.f32.mrb[189].mxu1 }
 0xf46   :  { %v12409_v12 = vadd.f32 %v12408_v13, %v17925_v0  ;;  %v12410_v62 = vpop.f32.mrb[190].mxu1 }
 0xf47   :  { %12413 = vst [vmem:[#allocation3 + $0x70] sm:$0xff] %v12407_v10  ;;  %v12411_v50 = vpop.f32.mrb[191].mxu1 }
 0xf48   :  { %12414 = vst [vmem:[#allocation3 + $0x78] sm:$0xff] %v12409_v12 }
 0xf49   :  { %15969 = shalt.err (!%p15966_p6)
}
 0xf4a   :  { %s15970_s3 = scalar_lea.hbm %s21213_s12, 2048 }
 0xf4b   :  { %p15971_p7 = scmp.ne.s32.totalorder %s21213_s12, %s15970_s3  ;;  %p15974_p8 = scmp.lt.u32.totalorder %s15970_s3, %s21213_s12 }
 0xf4d   :  { %p15976_p9 = pnand %p15974_p8, %p15971_p7 }
 0xf4f   :  { %15979 = shalt.err (!%p15976_p9)
}
 0xf50   :  { %s15990_s5 = smov 256   ;;  %s15991_s24 = smov 16  }
 0xf51   :  { %12436 = dma.vmem_to_hbm [thread:$0]  %s12431_s1, 2048, %s21213_s12, [#allocation4], %s15990_s5, %s15990_s5, %s15991_s24  }
 0xf52   :  { %15980 = dma.done.wait [#allocation4], 2048  }
 0xf53   :  { %15981 = vsyncadd [#allocation4], 4294965248 }
 0xf54   :  { %15982 = dma.done.wait [#allocation6], 768  }
 0xf55   :  { %15983 = vsyncadd [#allocation6], 4294966528 }
 0xf56   :  { %12470 = vsyncpa [#allocation4], 1 }
 0xf57   :  { %12471 = vsyncpa [#allocation6], 1 }

</bundles_post_ra>
